<compile_context>
chip_gen: v6e
topology: v6e:2x2x1
jax: 0.10.0
libtpu: 0.0.40
codegen_flags: <defaults>
</compile_context>

<pallas_src>
import math
from functools import partial

import jax
import jax.numpy as jnp
from jax import lax
from jax.experimental import pallas as pl
from jax.experimental.pallas import tpu as pltpu

BN_EPS = 1e-5


# -----------------------------------------------------------------------------
# in-kernel helpers
# -----------------------------------------------------------------------------
def _tap_gather(bc, lout, lin, stride, d):
    """One-hot (bc*lout, bc*lin) f32 matrix G.

    Row m = b*lout + i selects input row b*lin + (stride*i + d); rows whose tap
    falls into the zero padding (outside the batch segment) are all-zero, which
    reproduces conv zero padding / post-ReLU max-pool padding exactly.
    Requires lin == stride * lout (holds for every k=3,p=1 conv and the pool here).
    """
    assert lin == stride * lout
    M, N = bc * lout, bc * lin
    m = lax.broadcasted_iota(jnp.int32, (M, N), 0)
    n = lax.broadcasted_iota(jnp.int32, (M, N), 1)
    i = m % lout                      # position inside the batch segment
    tgt = stride * i + d              # tap position inside the segment
    hit = (n == stride * m + d) & (tgt >= 0) & (tgt < lin)
    return jnp.where(hit, 1.0, 0.0)


def _gather_rows(bc, lout, lin, stride, d, h):
    """Rows h[b, stride*i + d] for all (b, i); zeros where the tap is padding."""
    g = _tap_gather(bc, lout, lin, stride, d)
    return jnp.dot(g, h, preferred_element_type=jnp.float32)


def _conv3(h, w_folded, bc, lin, stride):
    """Conv1d(k=3, p=1, stride) over row-folded activations.

    h: (bc*lin, cin) f32.  w_folded: (3*cin, cout) bf16, tap-major rows.
    Returns ((bc*lout, cout) f32, lout).  Single folded-K MXU matmul: the three
    shifted windows are concatenated along the lane axis.
    """
    lout = (lin - 1) // stride + 1
    taps = []
    for d in (-1, 0, 1):
        if stride == 1 and d == 0:
            taps.append(h)
        else:
            taps.append(_gather_rows(bc, lout, lin, stride, d, h))
    x3 = jnp.concatenate(taps, axis=1).astype(jnp.bfloat16)       # (M, 3*cin)
    out = jnp.dot(x3, w_folded, preferred_element_type=jnp.float32)
    return out, lout


# -----------------------------------------------------------------------------
# fused network kernel: stem + blocks + head, one invocation per batch chunk
# -----------------------------------------------------------------------------
def _make_resnet_kernel(bc, l1, plan):
    assert l1 % 2 == 0
    lpool = l1 // 2                    # MaxPool1d(3, 2, 1) output length

    def kernel(*refs):
        it = iter(refs)
        xcol_ref = next(it)
        cw_ref, cs_ref, cb_ref = next(it), next(it), next(it)
        blk_refs = []
        for spec in plan:
            names = ["w1", "s1", "b1", "w2", "s2", "b2"]
            if spec["has_down"]:
                names += ["wd", "sd", "bd"]
            blk_refs.append({k: next(it) for k in names})
        fcw_ref, fcb_ref = next(it), next(it)
        o_ref = next(it)

        # --- stem: conv1(k=7, s=2, p=3) as im2col matmul + folded BN + ReLU ---
        a = jnp.dot(xcol_ref[...].astype(jnp.bfloat16), cw_ref[...],
                    preferred_element_type=jnp.float32)            # (bc*l1, 64)
        h = jnp.maximum(a * cs_ref[...] + cb_ref[...], 0.0)

        # --- MaxPool1d(3, 2, 1): zero padding is exact post-ReLU (h >= 0) ---
        p = _gather_rows(bc, lpool, l1, 2, -1, h)
        p = jnp.maximum(p, _gather_rows(bc, lpool, l1, 2, 0, h))
        p = jnp.maximum(p, _gather_rows(bc, lpool, l1, 2, 1, h))
        h, lin = p, lpool

        # --- BasicBlocks: conv3+BN+ReLU, [1x1 downsample+BN], conv3+BN+add+ReLU ---
        for spec, r in zip(plan, blk_refs):
            stride = spec["stride"]
            a1, lmid = _conv3(h, r["w1"][...], bc, lin, stride)
            h1 = jnp.maximum(a1 * r["s1"][...] + r["b1"][...], 0.0)
            if spec["has_down"]:             # strided 1x1 conv + BN on block input
                xs = h if stride == 1 else _gather_rows(bc, lmid, lin, stride, 0, h)
                ident = (jnp.dot(xs.astype(jnp.bfloat16), r["wd"][...],
                                 preferred_element_type=jnp.float32)
                         * r["sd"][...] + r["bd"][...])
            else:
                ident = h
            a2, _ = _conv3(h1, r["w2"][...], bc, lmid, 1)
            h = jnp.maximum(a2 * r["s2"][...] + r["b2"][...] + ident, 0.0)
            lin = lmid

        # --- AdaptiveAvgPool1d(1) + Linear (fused head) ---
        rr = lax.broadcasted_iota(jnp.int32, (bc, bc * lin), 0)
        cc = lax.broadcasted_iota(jnp.int32, (bc, bc * lin), 1)
        pool = jnp.where((cc >= rr * lin) & (cc < (rr + 1) * lin), 1.0 / lin, 0.0)
        pooled = jnp.dot(pool, h, preferred_element_type=jnp.float32)  # (bc, 512)
        logits = (jnp.dot(pooled, fcw_ref[...], preferred_element_type=jnp.float32)
                  + fcb_ref[...])
        o_ref[...] = logits.astype(o_ref.dtype)

    return kernel


# -----------------------------------------------------------------------------
# forward pass wrapper (single pallas_call)
# -----------------------------------------------------------------------------
def resnet1d_forward(plan, params, x, *, batch_chunks=1):
    """x: (B, L) float32 — the PyTorch module's forward does x.unsqueeze(1)."""
    B, L = x.shape
    assert B % batch_chunks == 0
    bc = B // batch_chunks
    num_classes = params["fc_b"].shape[1]
    l1 = (L - 1) // 2 + 1                              # conv1 output length

    # Stem im2col (pure layout, plain XLA): xcol[b, i, k] = xpad[b, 2*i + k].
    xpad = jnp.pad(x.astype(jnp.float32), ((0, 0), (3, 3)))
    xcol = jnp.stack([xpad[:, k:k + 2 * l1 - 1:2] for k in range(7)], axis=-1)
    xcol = jnp.concatenate([xcol, jnp.zeros((B, l1, 1), jnp.float32)], axis=-1)
    xcol = xcol.reshape(B * l1, 8)                     # taps padded 7 -> 8

    # flat argument list (weights are grid-invariant full blocks)
    args = [xcol, params["conv1_w"], params["bn1_s"], params["bn1_b"]]
    for spec, blk in zip(plan, params["blocks"]):
        args += [blk["w1"], blk["s1"], blk["b1"], blk["w2"], blk["s2"], blk["b2"]]
        if spec["has_down"]:
            args += [blk["wd"], blk["sd"], blk["bd"]]
    args += [params["fc_w"], params["fc_b"]]

    def const_spec(a):
        nd = a.ndim
        return pl.BlockSpec(a.shape, lambda g, nd=nd: (0,) * nd)

    in_specs = [pl.BlockSpec((bc * l1, 8), lambda g: (g, 0))]
    in_specs += [const_spec(a) for a in args[1:]]

    # rough advisory cost estimate
    lin, cin = l1 // 2, 64
    flops = 2 * B * l1 * 8 * 64 + 3 * 2 * (B * lin) * (B * l1) * 64
    for spec in plan:
        planes, s = spec["planes"], spec["stride"]
        lout = (lin - 1) // s + 1
        flops += 2 * (B * lout) * (3 * cin) * planes
        flops += 2 * (B * lout) * (3 * planes) * planes
        if spec["has_down"]:
            flops += 2 * (B * lout) * cin * planes
        lin, cin = lout, planes
    flops += 2 * B * cin * num_classes
    bytes_accessed = xcol.size * 4 + B * num_classes * 4 + sum(
        int(a.size) * a.dtype.itemsize for a in args[1:])

    return pl.pallas_call(
        _make_resnet_kernel(bc, l1, plan),
        grid=(batch_chunks,),
        in_specs=in_specs,
        out_specs=pl.BlockSpec((bc, num_classes), lambda g: (g, 0)),
        out_shape=jax.ShapeDtypeStruct((B, num_classes), jnp.float32),
        compiler_params=pltpu.CompilerParams(
            dimension_semantics=("parallel",),
            vmem_limit_bytes=32 * 1024 * 1024),
        cost_estimate=pl.CostEstimate(flops=int(flops), transcendentals=0,
                                      bytes_accessed=int(bytes_accessed)),
    )(*args)


# -----------------------------------------------------------------------------
# deterministic synthetic parameters (inference BN folded, conv weights pre-folded
# to (3*Cin, Cout) bf16; FC kept f32 — it is negligible)
# -----------------------------------------------------------------------------
def _init_conv(key, cout, cin, k, pad_k_rows=None):
    std = math.sqrt(2.0 / (cin * k))
    w = jax.random.normal(key, (cout, cin, k), jnp.float32) * std   # torch (Cout,Cin,K)
    w = jnp.transpose(w, (2, 1, 0)).reshape(k * cin, cout)          # (K*Cin, Cout)
    if pad_k_rows is not None and pad_k_rows > k * cin:
        w = jnp.concatenate(
            [w, jnp.zeros((pad_k_rows - k * cin, cout), w.dtype)], axis=0)
    return w.astype(jnp.bfloat16)


def _init_bn(key, c):
    k1, k2, k3, k4 = jax.random.split(key, 4)
    gamma = 1.0 + 0.1 * jax.random.normal(k1, (c,), jnp.float32)
    beta = 0.1 * jax.random.normal(k2, (c,), jnp.float32)
    mean = 0.1 * jax.random.normal(k3, (c,), jnp.float32)
    var = 1.0 + 0.1 * jax.random.uniform(k4, (c,), jnp.float32)
    scale = gamma / jnp.sqrt(var + BN_EPS)
    bias = beta - mean * scale
    return scale.reshape(1, c), bias.reshape(1, c)                  # (1, C) f32


def make_plan(layers):
    plan, in_planes = [], 64
    cfg = [(64, layers[0], 1), (128, layers[1], 2),
           (256, layers[2], 2), (512, layers[3], 2)]
    for planes, nblocks, stride in cfg:
        for bi in range(nblocks):
            s = stride if bi == 0 else 1
            plan.append({"in_planes": in_planes, "planes": planes, "stride": s,
                         "has_down": (s != 1) or (in_planes != planes)})
            in_planes = planes
    return plan


def build_params(key, plan, in_channels=1, num_classes=4):
    keys = iter(jax.random.split(key, 8 * len(plan) + 8))
    nk = lambda: next(keys)
    params = {"conv1_w": _init_conv(nk(), 64, in_channels, 7, pad_k_rows=8)}
    params["bn1_s"], params["bn1_b"] = _init_bn(nk(), 64)
    blocks = []
    for spec in plan:
        cin, planes = spec["in_planes"], spec["planes"]
        blk = {"w1": _init_conv(nk(), planes, cin, 3)}
        blk["s1"], blk["b1"] = _init_bn(nk(), planes)
        blk["w2"] = _init_conv(nk(), planes, planes, 3)
        blk["s2"], blk["b2"] = _init_bn(nk(), planes)
        if spec["has_down"]:
            blk["wd"] = _init_conv(nk(), planes, cin, 1)
            blk["sd"], blk["bd"] = _init_bn(nk(), planes)
        blocks.append(blk)
    params["blocks"] = blocks
    fin = 512
    params["fc_w"] = jnp.transpose(
        jax.random.normal(nk(), (num_classes, fin), jnp.float32) / math.sqrt(fin))
    params["fc_b"] = (0.01 * jax.random.normal(nk(), (num_classes,),
                                               jnp.float32)).reshape(1, num_classes)
    return params


if __name__ == "__main__":
    key = jax.random.PRNGKey(0)
    k_params, k_x = jax.random.split(key)

    # Small ResNet1D: layers=[1,1,1,1], in_channels=1, num_classes=4.
    layers = [1, 1, 1, 1]
    plan = make_plan(layers)
    params = build_params(k_params, plan, in_channels=1, num_classes=4)

    B, L = 2, 64
    x = jax.random.normal(k_x, (B, L), jnp.float32)

    # batch_chunks=1: fully fused, batch folded into matmul rows.  On v7x with a
    # larger batch, pass batch_chunks>=2 so the "parallel" grid axis uses both TCs.
    fwd = jax.jit(partial(resnet1d_forward, plan))
    out = jax.block_until_ready(fwd(params, x))

    assert out.shape == (B, 4), out.shape
    assert bool(jnp.all(jnp.isfinite(out)))
    print("KERNEL_OK")
</pallas_src>

<mosaic_0001>
module attributes {stable_mosaic.version = 11 : i64} {
  func.func @kernel(%arg0: i32, %arg1: memref<64x8xf32, #tpu.memory_space<vmem>>, %arg2: memref<8x64xbf16, #tpu.memory_space<vmem>>, %arg3: memref<1x64xf32, #tpu.memory_space<vmem>>, %arg4: memref<1x64xf32, #tpu.memory_space<vmem>>, %arg5: memref<192x64xbf16, #tpu.memory_space<vmem>>, %arg6: memref<1x64xf32, #tpu.memory_space<vmem>>, %arg7: memref<1x64xf32, #tpu.memory_space<vmem>>, %arg8: memref<192x64xbf16, #tpu.memory_space<vmem>>, %arg9: memref<1x64xf32, #tpu.memory_space<vmem>>, %arg10: memref<1x64xf32, #tpu.memory_space<vmem>>, %arg11: memref<192x128xbf16, #tpu.memory_space<vmem>>, %arg12: memref<1x128xf32, #tpu.memory_space<vmem>>, %arg13: memref<1x128xf32, #tpu.memory_space<vmem>>, %arg14: memref<384x128xbf16, #tpu.memory_space<vmem>>, %arg15: memref<1x128xf32, #tpu.memory_space<vmem>>, %arg16: memref<1x128xf32, #tpu.memory_space<vmem>>, %arg17: memref<64x128xbf16, #tpu.memory_space<vmem>>, %arg18: memref<1x128xf32, #tpu.memory_space<vmem>>, %arg19: memref<1x128xf32, #tpu.memory_space<vmem>>, %arg20: memref<384x256xbf16, #tpu.memory_space<vmem>>, %arg21: memref<1x256xf32, #tpu.memory_space<vmem>>, %arg22: memref<1x256xf32, #tpu.memory_space<vmem>>, %arg23: memref<768x256xbf16, #tpu.memory_space<vmem>>, %arg24: memref<1x256xf32, #tpu.memory_space<vmem>>, %arg25: memref<1x256xf32, #tpu.memory_space<vmem>>, %arg26: memref<128x256xbf16, #tpu.memory_space<vmem>>, %arg27: memref<1x256xf32, #tpu.memory_space<vmem>>, %arg28: memref<1x256xf32, #tpu.memory_space<vmem>>, %arg29: memref<768x512xbf16, #tpu.memory_space<vmem>>, %arg30: memref<1x512xf32, #tpu.memory_space<vmem>>, %arg31: memref<1x512xf32, #tpu.memory_space<vmem>>, %arg32: memref<1536x512xbf16, #tpu.memory_space<vmem>>, %arg33: memref<1x512xf32, #tpu.memory_space<vmem>>, %arg34: memref<1x512xf32, #tpu.memory_space<vmem>>, %arg35: memref<256x512xbf16, #tpu.memory_space<vmem>>, %arg36: memref<1x512xf32, #tpu.memory_space<vmem>>, %arg37: memref<1x512xf32, #tpu.memory_space<vmem>>, %arg38: memref<512x4xf32, #tpu.memory_space<vmem>>, %arg39: memref<1x4xf32, #tpu.memory_space<vmem>>, %arg40: memref<2x4xf32, #tpu.memory_space<vmem>>) attributes {dimension_semantics = [#tpu.dimension_semantics<parallel>], iteration_bounds = array<i64: 1>, scalar_prefetch = 0 : i64, scratch_operands = 0 : i64, tpu.core_type = #tpu.core_type<tc>, window_params = [{transform_indices = @transform_0, window_bounds = array<i64: 64, 8>}, {pipeline_mode = #tpu.pipeline_mode<synchronous>, transform_indices = @transform_1, window_bounds = array<i64: 8, 64>}, {pipeline_mode = #tpu.pipeline_mode<synchronous>, transform_indices = @transform_2, window_bounds = array<i64: 1, 64>}, {pipeline_mode = #tpu.pipeline_mode<synchronous>, transform_indices = @transform_3, window_bounds = array<i64: 1, 64>}, {pipeline_mode = #tpu.pipeline_mode<synchronous>, transform_indices = @transform_4, window_bounds = array<i64: 192, 64>}, {pipeline_mode = #tpu.pipeline_mode<synchronous>, transform_indices = @transform_5, window_bounds = array<i64: 1, 64>}, {pipeline_mode = #tpu.pipeline_mode<synchronous>, transform_indices = @transform_6, window_bounds = array<i64: 1, 64>}, {pipeline_mode = #tpu.pipeline_mode<synchronous>, transform_indices = @transform_7, window_bounds = array<i64: 192, 64>}, {pipeline_mode = #tpu.pipeline_mode<synchronous>, transform_indices = @transform_8, window_bounds = array<i64: 1, 64>}, {pipeline_mode = #tpu.pipeline_mode<synchronous>, transform_indices = @transform_9, window_bounds = array<i64: 1, 64>}, {pipeline_mode = #tpu.pipeline_mode<synchronous>, transform_indices = @transform_10, window_bounds = array<i64: 192, 128>}, {pipeline_mode = #tpu.pipeline_mode<synchronous>, transform_indices = @transform_11, window_bounds = array<i64: 1, 128>}, {pipeline_mode = #tpu.pipeline_mode<synchronous>, transform_indices = @transform_12, window_bounds = array<i64: 1, 128>}, {pipeline_mode = #tpu.pipeline_mode<synchronous>, transform_indices = @transform_13, window_bounds = array<i64: 384, 128>}, {pipeline_mode = #tpu.pipeline_mode<synchronous>, transform_indices = @transform_14, window_bounds = array<i64: 1, 128>}, {pipeline_mode = #tpu.pipeline_mode<synchronous>, transform_indices = @transform_15, window_bounds = array<i64: 1, 128>}, {pipeline_mode = #tpu.pipeline_mode<synchronous>, transform_indices = @transform_16, window_bounds = array<i64: 64, 128>}, {pipeline_mode = #tpu.pipeline_mode<synchronous>, transform_indices = @transform_17, window_bounds = array<i64: 1, 128>}, {pipeline_mode = #tpu.pipeline_mode<synchronous>, transform_indices = @transform_18, window_bounds = array<i64: 1, 128>}, {pipeline_mode = #tpu.pipeline_mode<synchronous>, transform_indices = @transform_19, window_bounds = array<i64: 384, 256>}, {pipeline_mode = #tpu.pipeline_mode<synchronous>, transform_indices = @transform_20, window_bounds = array<i64: 1, 256>}, {pipeline_mode = #tpu.pipeline_mode<synchronous>, transform_indices = @transform_21, window_bounds = array<i64: 1, 256>}, {pipeline_mode = #tpu.pipeline_mode<synchronous>, transform_indices = @transform_22, window_bounds = array<i64: 768, 256>}, {pipeline_mode = #tpu.pipeline_mode<synchronous>, transform_indices = @transform_23, window_bounds = array<i64: 1, 256>}, {pipeline_mode = #tpu.pipeline_mode<synchronous>, transform_indices = @transform_24, window_bounds = array<i64: 1, 256>}, {pipeline_mode = #tpu.pipeline_mode<synchronous>, transform_indices = @transform_25, window_bounds = array<i64: 128, 256>}, {pipeline_mode = #tpu.pipeline_mode<synchronous>, transform_indices = @transform_26, window_bounds = array<i64: 1, 256>}, {pipeline_mode = #tpu.pipeline_mode<synchronous>, transform_indices = @transform_27, window_bounds = array<i64: 1, 256>}, {pipeline_mode = #tpu.pipeline_mode<synchronous>, transform_indices = @transform_28, window_bounds = array<i64: 768, 512>}, {pipeline_mode = #tpu.pipeline_mode<synchronous>, transform_indices = @transform_29, window_bounds = array<i64: 1, 512>}, {pipeline_mode = #tpu.pipeline_mode<synchronous>, transform_indices = @transform_30, window_bounds = array<i64: 1, 512>}, {pipeline_mode = #tpu.pipeline_mode<synchronous>, transform_indices = @transform_31, window_bounds = array<i64: 1536, 512>}, {pipeline_mode = #tpu.pipeline_mode<synchronous>, transform_indices = @transform_32, window_bounds = array<i64: 1, 512>}, {pipeline_mode = #tpu.pipeline_mode<synchronous>, transform_indices = @transform_33, window_bounds = array<i64: 1, 512>}, {pipeline_mode = #tpu.pipeline_mode<synchronous>, transform_indices = @transform_34, window_bounds = array<i64: 256, 512>}, {pipeline_mode = #tpu.pipeline_mode<synchronous>, transform_indices = @transform_35, window_bounds = array<i64: 1, 512>}, {pipeline_mode = #tpu.pipeline_mode<synchronous>, transform_indices = @transform_36, window_bounds = array<i64: 1, 512>}, {pipeline_mode = #tpu.pipeline_mode<synchronous>, transform_indices = @transform_37, window_bounds = array<i64: 512, 4>}, {pipeline_mode = #tpu.pipeline_mode<synchronous>, transform_indices = @transform_38, window_bounds = array<i64: 1, 4>}, {transform_indices = @transform_39, window_bounds = array<i64: 2, 4>}]} {
    %c0 = arith.constant 0 : index
    %c0_0 = arith.constant 0 : index
    %0 = vector.load %arg1[%c0, %c0_0] : memref<64x8xf32, #tpu.memory_space<vmem>>, vector<64x8xf32>
    %1 = arith.truncf %0 : vector<64x8xf32> to vector<64x8xbf16>
    %c0_1 = arith.constant 0 : index
    %c0_2 = arith.constant 0 : index
    %2 = vector.load %arg2[%c0_1, %c0_2] : memref<8x64xbf16, #tpu.memory_space<vmem>>, vector<8x64xbf16>
    %cst = arith.constant dense<0.000000e+00> : vector<64x64xf32>
    %3 = tpu.matmul %1, %2, %cst {dimension_numbers = #tpu.dot_dimension_numbers<[1], [0], [0], [1], [0, 0, 1, 1], [], []>} : vector<64x8xbf16>, vector<8x64xbf16>, vector<64x64xf32> -> vector<64x64xf32>
    %c0_3 = arith.constant 0 : index
    %c0_4 = arith.constant 0 : index
    %4 = vector.load %arg3[%c0_3, %c0_4] : memref<1x64xf32, #tpu.memory_space<vmem>>, vector<1x64xf32>
    %5 = vector.broadcast %4 : vector<1x64xf32> to vector<64x64xf32>
    %6 = arith.mulf %3, %5 : vector<64x64xf32>
    %c0_5 = arith.constant 0 : index
    %c0_6 = arith.constant 0 : index
    %7 = vector.load %arg4[%c0_5, %c0_6] : memref<1x64xf32, #tpu.memory_space<vmem>>, vector<1x64xf32>
    %8 = vector.broadcast %7 : vector<1x64xf32> to vector<64x64xf32>
    %9 = arith.addf %6, %8 : vector<64x64xf32>
    %cst_7 = arith.constant 0.000000e+00 : f32
    %10 = vector.broadcast %cst_7 : f32 to vector<64x64xf32>
    %11 = arith.maximumf %9, %10 : vector<64x64xf32>
    %12 = tpu.iota {dimensions = array<i32: 0>} : vector<32x64xi32>
    %13 = tpu.iota {dimensions = array<i32: 1>} : vector<32x64xi32>
    %c16_i32 = arith.constant 16 : i32
    %c0_i32 = arith.constant 0 : i32
    %14 = arith.cmpi eq, %c16_i32, %c0_i32 : i32
    %c1_i32 = arith.constant 1 : i32
    %15 = arith.select %14, %c1_i32, %c16_i32 : i32
    %16 = vector.broadcast %15 : i32 to vector<32x64xi32>
    %17 = arith.remsi %12, %16 : vector<32x64xi32>
    %c0_i32_8 = arith.constant 0 : i32
    %18 = vector.broadcast %c0_i32_8 : i32 to vector<32x64xi32>
    %19 = arith.cmpi ne, %17, %18 : vector<32x64xi32>
    %c0_i32_9 = arith.constant 0 : i32
    %20 = vector.broadcast %c0_i32_9 : i32 to vector<32x64xi32>
    %21 = arith.cmpi slt, %17, %20 : vector<32x64xi32>
    %c0_i32_10 = arith.constant 0 : i32
    %22 = arith.cmpi slt, %15, %c0_i32_10 : i32
    %23 = vector.broadcast %22 : i1 to vector<32x64xi1>
    %24 = vector.broadcast %23 : vector<32x64xi1> to vector<32x64xi1>
    %25 = arith.xori %21, %24 : vector<32x64xi1>
    %26 = arith.andi %25, %19 : vector<32x64xi1>
    %27 = vector.broadcast %15 : i32 to vector<32x64xi32>
    %28 = arith.addi %17, %27 : vector<32x64xi32>
    %29 = arith.select %26, %28, %17 : vector<32x64xi1>, vector<32x64xi32>
    %c2_i32 = arith.constant 2 : i32
    %30 = vector.broadcast %c2_i32 : i32 to vector<32x64xi32>
    %31 = arith.muli %30, %29 : vector<32x64xi32>
    %c-1_i32 = arith.constant -1 : i32
    %32 = vector.broadcast %c-1_i32 : i32 to vector<32x64xi32>
    %33 = arith.addi %31, %32 : vector<32x64xi32>
    %c2_i32_11 = arith.constant 2 : i32
    %34 = vector.broadcast %c2_i32_11 : i32 to vector<32x64xi32>
    %35 = arith.muli %34, %12 : vector<32x64xi32>
    %c-1_i32_12 = arith.constant -1 : i32
    %36 = vector.broadcast %c-1_i32_12 : i32 to vector<32x64xi32>
    %37 = arith.addi %35, %36 : vector<32x64xi32>
    %38 = arith.cmpi eq, %13, %37 : vector<32x64xi32>
    %c0_i32_13 = arith.constant 0 : i32
    %39 = vector.broadcast %c0_i32_13 : i32 to vector<32x64xi32>
    %40 = arith.cmpi sge, %33, %39 : vector<32x64xi32>
    %41 = arith.andi %38, %40 : vector<32x64xi1>
    %c32_i32 = arith.constant 32 : i32
    %42 = vector.broadcast %c32_i32 : i32 to vector<32x64xi32>
    %43 = arith.cmpi slt, %33, %42 : vector<32x64xi32>
    %44 = arith.andi %41, %43 : vector<32x64xi1>
    %cst_14 = arith.constant 1.000000e+00 : f32
    %cst_15 = arith.constant 0.000000e+00 : f32
    %45 = vector.broadcast %cst_14 : f32 to vector<32x64xf32>
    %46 = vector.broadcast %cst_15 : f32 to vector<32x64xf32>
    %47 = arith.select %44, %45, %46 : vector<32x64xi1>, vector<32x64xf32>
    %cst_16 = arith.constant dense<0.000000e+00> : vector<32x64xf32>
    %48 = tpu.matmul %47, %11, %cst_16 {dimension_numbers = #tpu.dot_dimension_numbers<[1], [0], [0], [1], [0, 0, 1, 1], [], []>} : vector<32x64xf32>, vector<64x64xf32>, vector<32x64xf32> -> vector<32x64xf32>
    %49 = tpu.iota {dimensions = array<i32: 0>} : vector<32x64xi32>
    %50 = tpu.iota {dimensions = array<i32: 1>} : vector<32x64xi32>
    %c16_i32_17 = arith.constant 16 : i32
    %c0_i32_18 = arith.constant 0 : i32
    %51 = arith.cmpi eq, %c16_i32_17, %c0_i32_18 : i32
    %c1_i32_19 = arith.constant 1 : i32
    %52 = arith.select %51, %c1_i32_19, %c16_i32_17 : i32
    %53 = vector.broadcast %52 : i32 to vector<32x64xi32>
    %54 = arith.remsi %49, %53 : vector<32x64xi32>
    %c0_i32_20 = arith.constant 0 : i32
    %55 = vector.broadcast %c0_i32_20 : i32 to vector<32x64xi32>
    %56 = arith.cmpi ne, %54, %55 : vector<32x64xi32>
    %c0_i32_21 = arith.constant 0 : i32
    %57 = vector.broadcast %c0_i32_21 : i32 to vector<32x64xi32>
    %58 = arith.cmpi slt, %54, %57 : vector<32x64xi32>
    %c0_i32_22 = arith.constant 0 : i32
    %59 = arith.cmpi slt, %52, %c0_i32_22 : i32
    %60 = vector.broadcast %59 : i1 to vector<32x64xi1>
    %61 = vector.broadcast %60 : vector<32x64xi1> to vector<32x64xi1>
    %62 = arith.xori %58, %61 : vector<32x64xi1>
    %63 = arith.andi %62, %56 : vector<32x64xi1>
    %64 = vector.broadcast %52 : i32 to vector<32x64xi32>
    %65 = arith.addi %54, %64 : vector<32x64xi32>
    %66 = arith.select %63, %65, %54 : vector<32x64xi1>, vector<32x64xi32>
    %c2_i32_23 = arith.constant 2 : i32
    %67 = vector.broadcast %c2_i32_23 : i32 to vector<32x64xi32>
    %68 = arith.muli %67, %66 : vector<32x64xi32>
    %c0_i32_24 = arith.constant 0 : i32
    %69 = vector.broadcast %c0_i32_24 : i32 to vector<32x64xi32>
    %70 = arith.addi %68, %69 : vector<32x64xi32>
    %c2_i32_25 = arith.constant 2 : i32
    %71 = vector.broadcast %c2_i32_25 : i32 to vector<32x64xi32>
    %72 = arith.muli %71, %49 : vector<32x64xi32>
    %c0_i32_26 = arith.constant 0 : i32
    %73 = vector.broadcast %c0_i32_26 : i32 to vector<32x64xi32>
    %74 = arith.addi %72, %73 : vector<32x64xi32>
    %75 = arith.cmpi eq, %50, %74 : vector<32x64xi32>
    %c0_i32_27 = arith.constant 0 : i32
    %76 = vector.broadcast %c0_i32_27 : i32 to vector<32x64xi32>
    %77 = arith.cmpi sge, %70, %76 : vector<32x64xi32>
    %78 = arith.andi %75, %77 : vector<32x64xi1>
    %c32_i32_28 = arith.constant 32 : i32
    %79 = vector.broadcast %c32_i32_28 : i32 to vector<32x64xi32>
    %80 = arith.cmpi slt, %70, %79 : vector<32x64xi32>
    %81 = arith.andi %78, %80 : vector<32x64xi1>
    %cst_29 = arith.constant 1.000000e+00 : f32
    %cst_30 = arith.constant 0.000000e+00 : f32
    %82 = vector.broadcast %cst_29 : f32 to vector<32x64xf32>
    %83 = vector.broadcast %cst_30 : f32 to vector<32x64xf32>
    %84 = arith.select %81, %82, %83 : vector<32x64xi1>, vector<32x64xf32>
    %cst_31 = arith.constant dense<0.000000e+00> : vector<32x64xf32>
    %85 = tpu.matmul %84, %11, %cst_31 {dimension_numbers = #tpu.dot_dimension_numbers<[1], [0], [0], [1], [0, 0, 1, 1], [], []>} : vector<32x64xf32>, vector<64x64xf32>, vector<32x64xf32> -> vector<32x64xf32>
    %86 = arith.maximumf %48, %85 : vector<32x64xf32>
    %87 = tpu.iota {dimensions = array<i32: 0>} : vector<32x64xi32>
    %88 = tpu.iota {dimensions = array<i32: 1>} : vector<32x64xi32>
    %c16_i32_32 = arith.constant 16 : i32
    %c0_i32_33 = arith.constant 0 : i32
    %89 = arith.cmpi eq, %c16_i32_32, %c0_i32_33 : i32
    %c1_i32_34 = arith.constant 1 : i32
    %90 = arith.select %89, %c1_i32_34, %c16_i32_32 : i32
    %91 = vector.broadcast %90 : i32 to vector<32x64xi32>
    %92 = arith.remsi %87, %91 : vector<32x64xi32>
    %c0_i32_35 = arith.constant 0 : i32
    %93 = vector.broadcast %c0_i32_35 : i32 to vector<32x64xi32>
    %94 = arith.cmpi ne, %92, %93 : vector<32x64xi32>
    %c0_i32_36 = arith.constant 0 : i32
    %95 = vector.broadcast %c0_i32_36 : i32 to vector<32x64xi32>
    %96 = arith.cmpi slt, %92, %95 : vector<32x64xi32>
    %c0_i32_37 = arith.constant 0 : i32
    %97 = arith.cmpi slt, %90, %c0_i32_37 : i32
    %98 = vector.broadcast %97 : i1 to vector<32x64xi1>
    %99 = vector.broadcast %98 : vector<32x64xi1> to vector<32x64xi1>
    %100 = arith.xori %96, %99 : vector<32x64xi1>
    %101 = arith.andi %100, %94 : vector<32x64xi1>
    %102 = vector.broadcast %90 : i32 to vector<32x64xi32>
    %103 = arith.addi %92, %102 : vector<32x64xi32>
    %104 = arith.select %101, %103, %92 : vector<32x64xi1>, vector<32x64xi32>
    %c2_i32_38 = arith.constant 2 : i32
    %105 = vector.broadcast %c2_i32_38 : i32 to vector<32x64xi32>
    %106 = arith.muli %105, %104 : vector<32x64xi32>
    %c1_i32_39 = arith.constant 1 : i32
    %107 = vector.broadcast %c1_i32_39 : i32 to vector<32x64xi32>
    %108 = arith.addi %106, %107 : vector<32x64xi32>
    %c2_i32_40 = arith.constant 2 : i32
    %109 = vector.broadcast %c2_i32_40 : i32 to vector<32x64xi32>
    %110 = arith.muli %109, %87 : vector<32x64xi32>
    %c1_i32_41 = arith.constant 1 : i32
    %111 = vector.broadcast %c1_i32_41 : i32 to vector<32x64xi32>
    %112 = arith.addi %110, %111 : vector<32x64xi32>
    %113 = arith.cmpi eq, %88, %112 : vector<32x64xi32>
    %c0_i32_42 = arith.constant 0 : i32
    %114 = vector.broadcast %c0_i32_42 : i32 to vector<32x64xi32>
    %115 = arith.cmpi sge, %108, %114 : vector<32x64xi32>
    %116 = arith.andi %113, %115 : vector<32x64xi1>
    %c32_i32_43 = arith.constant 32 : i32
    %117 = vector.broadcast %c32_i32_43 : i32 to vector<32x64xi32>
    %118 = arith.cmpi slt, %108, %117 : vector<32x64xi32>
    %119 = arith.andi %116, %118 : vector<32x64xi1>
    %cst_44 = arith.constant 1.000000e+00 : f32
    %cst_45 = arith.constant 0.000000e+00 : f32
    %120 = vector.broadcast %cst_44 : f32 to vector<32x64xf32>
    %121 = vector.broadcast %cst_45 : f32 to vector<32x64xf32>
    %122 = arith.select %119, %120, %121 : vector<32x64xi1>, vector<32x64xf32>
    %cst_46 = arith.constant dense<0.000000e+00> : vector<32x64xf32>
    %123 = tpu.matmul %122, %11, %cst_46 {dimension_numbers = #tpu.dot_dimension_numbers<[1], [0], [0], [1], [0, 0, 1, 1], [], []>} : vector<32x64xf32>, vector<64x64xf32>, vector<32x64xf32> -> vector<32x64xf32>
    %124 = arith.maximumf %86, %123 : vector<32x64xf32>
    %c0_47 = arith.constant 0 : index
    %c0_48 = arith.constant 0 : index
    %125 = vector.load %arg5[%c0_47, %c0_48] : memref<192x64xbf16, #tpu.memory_space<vmem>>, vector<192x64xbf16>
    %126 = tpu.iota {dimensions = array<i32: 0>} : vector<32x32xi32>
    %127 = tpu.iota {dimensions = array<i32: 1>} : vector<32x32xi32>
    %c16_i32_49 = arith.constant 16 : i32
    %c0_i32_50 = arith.constant 0 : i32
    %128 = arith.cmpi eq, %c16_i32_49, %c0_i32_50 : i32
    %c1_i32_51 = arith.constant 1 : i32
    %129 = arith.select %128, %c1_i32_51, %c16_i32_49 : i32
    %130 = vector.broadcast %129 : i32 to vector<32x32xi32>
    %131 = arith.remsi %126, %130 : vector<32x32xi32>
    %c0_i32_52 = arith.constant 0 : i32
    %132 = vector.broadcast %c0_i32_52 : i32 to vector<32x32xi32>
    %133 = arith.cmpi ne, %131, %132 : vector<32x32xi32>
    %c0_i32_53 = arith.constant 0 : i32
    %134 = vector.broadcast %c0_i32_53 : i32 to vector<32x32xi32>
    %135 = arith.cmpi slt, %131, %134 : vector<32x32xi32>
    %c0_i32_54 = arith.constant 0 : i32
    %136 = arith.cmpi slt, %129, %c0_i32_54 : i32
    %137 = vector.broadcast %136 : i1 to vector<32x32xi1>
    %138 = vector.broadcast %137 : vector<32x32xi1> to vector<32x32xi1>
    %139 = arith.xori %135, %138 : vector<32x32xi1>
    %140 = arith.andi %139, %133 : vector<32x32xi1>
    %141 = vector.broadcast %129 : i32 to vector<32x32xi32>
    %142 = arith.addi %131, %141 : vector<32x32xi32>
    %143 = arith.select %140, %142, %131 : vector<32x32xi1>, vector<32x32xi32>
    %c1_i32_55 = arith.constant 1 : i32
    %144 = vector.broadcast %c1_i32_55 : i32 to vector<32x32xi32>
    %145 = arith.muli %144, %143 : vector<32x32xi32>
    %c-1_i32_56 = arith.constant -1 : i32
    %146 = vector.broadcast %c-1_i32_56 : i32 to vector<32x32xi32>
    %147 = arith.addi %145, %146 : vector<32x32xi32>
    %c1_i32_57 = arith.constant 1 : i32
    %148 = vector.broadcast %c1_i32_57 : i32 to vector<32x32xi32>
    %149 = arith.muli %148, %126 : vector<32x32xi32>
    %c-1_i32_58 = arith.constant -1 : i32
    %150 = vector.broadcast %c-1_i32_58 : i32 to vector<32x32xi32>
    %151 = arith.addi %149, %150 : vector<32x32xi32>
    %152 = arith.cmpi eq, %127, %151 : vector<32x32xi32>
    %c0_i32_59 = arith.constant 0 : i32
    %153 = vector.broadcast %c0_i32_59 : i32 to vector<32x32xi32>
    %154 = arith.cmpi sge, %147, %153 : vector<32x32xi32>
    %155 = arith.andi %152, %154 : vector<32x32xi1>
    %c16_i32_60 = arith.constant 16 : i32
    %156 = vector.broadcast %c16_i32_60 : i32 to vector<32x32xi32>
    %157 = arith.cmpi slt, %147, %156 : vector<32x32xi32>
    %158 = arith.andi %155, %157 : vector<32x32xi1>
    %cst_61 = arith.constant 1.000000e+00 : f32
    %cst_62 = arith.constant 0.000000e+00 : f32
    %159 = vector.broadcast %cst_61 : f32 to vector<32x32xf32>
    %160 = vector.broadcast %cst_62 : f32 to vector<32x32xf32>
    %161 = arith.select %158, %159, %160 : vector<32x32xi1>, vector<32x32xf32>
    %cst_63 = arith.constant dense<0.000000e+00> : vector<32x64xf32>
    %162 = tpu.matmul %161, %124, %cst_63 {dimension_numbers = #tpu.dot_dimension_numbers<[1], [0], [0], [1], [0, 0, 1, 1], [], []>} : vector<32x32xf32>, vector<32x64xf32>, vector<32x64xf32> -> vector<32x64xf32>
    %163 = tpu.iota {dimensions = array<i32: 0>} : vector<32x32xi32>
    %164 = tpu.iota {dimensions = array<i32: 1>} : vector<32x32xi32>
    %c16_i32_64 = arith.constant 16 : i32
    %c0_i32_65 = arith.constant 0 : i32
    %165 = arith.cmpi eq, %c16_i32_64, %c0_i32_65 : i32
    %c1_i32_66 = arith.constant 1 : i32
    %166 = arith.select %165, %c1_i32_66, %c16_i32_64 : i32
    %167 = vector.broadcast %166 : i32 to vector<32x32xi32>
    %168 = arith.remsi %163, %167 : vector<32x32xi32>
    %c0_i32_67 = arith.constant 0 : i32
    %169 = vector.broadcast %c0_i32_67 : i32 to vector<32x32xi32>
    %170 = arith.cmpi ne, %168, %169 : vector<32x32xi32>
    %c0_i32_68 = arith.constant 0 : i32
    %171 = vector.broadcast %c0_i32_68 : i32 to vector<32x32xi32>
    %172 = arith.cmpi slt, %168, %171 : vector<32x32xi32>
    %c0_i32_69 = arith.constant 0 : i32
    %173 = arith.cmpi slt, %166, %c0_i32_69 : i32
    %174 = vector.broadcast %173 : i1 to vector<32x32xi1>
    %175 = vector.broadcast %174 : vector<32x32xi1> to vector<32x32xi1>
    %176 = arith.xori %172, %175 : vector<32x32xi1>
    %177 = arith.andi %176, %170 : vector<32x32xi1>
    %178 = vector.broadcast %166 : i32 to vector<32x32xi32>
    %179 = arith.addi %168, %178 : vector<32x32xi32>
    %180 = arith.select %177, %179, %168 : vector<32x32xi1>, vector<32x32xi32>
    %c1_i32_70 = arith.constant 1 : i32
    %181 = vector.broadcast %c1_i32_70 : i32 to vector<32x32xi32>
    %182 = arith.muli %181, %180 : vector<32x32xi32>
    %c1_i32_71 = arith.constant 1 : i32
    %183 = vector.broadcast %c1_i32_71 : i32 to vector<32x32xi32>
    %184 = arith.addi %182, %183 : vector<32x32xi32>
    %c1_i32_72 = arith.constant 1 : i32
    %185 = vector.broadcast %c1_i32_72 : i32 to vector<32x32xi32>
    %186 = arith.muli %185, %163 : vector<32x32xi32>
    %c1_i32_73 = arith.constant 1 : i32
    %187 = vector.broadcast %c1_i32_73 : i32 to vector<32x32xi32>
    %188 = arith.addi %186, %187 : vector<32x32xi32>
    %189 = arith.cmpi eq, %164, %188 : vector<32x32xi32>
    %c0_i32_74 = arith.constant 0 : i32
    %190 = vector.broadcast %c0_i32_74 : i32 to vector<32x32xi32>
    %191 = arith.cmpi sge, %184, %190 : vector<32x32xi32>
    %192 = arith.andi %189, %191 : vector<32x32xi1>
    %c16_i32_75 = arith.constant 16 : i32
    %193 = vector.broadcast %c16_i32_75 : i32 to vector<32x32xi32>
    %194 = arith.cmpi slt, %184, %193 : vector<32x32xi32>
    %195 = arith.andi %192, %194 : vector<32x32xi1>
    %cst_76 = arith.constant 1.000000e+00 : f32
    %cst_77 = arith.constant 0.000000e+00 : f32
    %196 = vector.broadcast %cst_76 : f32 to vector<32x32xf32>
    %197 = vector.broadcast %cst_77 : f32 to vector<32x32xf32>
    %198 = arith.select %195, %196, %197 : vector<32x32xi1>, vector<32x32xf32>
    %cst_78 = arith.constant dense<0.000000e+00> : vector<32x64xf32>
    %199 = tpu.matmul %198, %124, %cst_78 {dimension_numbers = #tpu.dot_dimension_numbers<[1], [0], [0], [1], [0, 0, 1, 1], [], []>} : vector<32x32xf32>, vector<32x64xf32>, vector<32x64xf32> -> vector<32x64xf32>
    %200 = tpu.concatenate %162, %124, %199 in 1 : vector<32x64xf32>, vector<32x64xf32>, vector<32x64xf32> -> vector<32x192xf32>
    %201 = arith.truncf %200 : vector<32x192xf32> to vector<32x192xbf16>
    %cst_79 = arith.constant dense<0.000000e+00> : vector<32x64xf32>
    %202 = tpu.matmul %201, %125, %cst_79 {dimension_numbers = #tpu.dot_dimension_numbers<[1], [0], [0], [1], [0, 0, 1, 1], [], []>} : vector<32x192xbf16>, vector<192x64xbf16>, vector<32x64xf32> -> vector<32x64xf32>
    %c0_80 = arith.constant 0 : index
    %c0_81 = arith.constant 0 : index
    %203 = vector.load %arg6[%c0_80, %c0_81] : memref<1x64xf32, #tpu.memory_space<vmem>>, vector<1x64xf32>
    %204 = vector.broadcast %203 : vector<1x64xf32> to vector<32x64xf32>
    %205 = arith.mulf %202, %204 : vector<32x64xf32>
    %c0_82 = arith.constant 0 : index
    %c0_83 = arith.constant 0 : index
    %206 = vector.load %arg7[%c0_82, %c0_83] : memref<1x64xf32, #tpu.memory_space<vmem>>, vector<1x64xf32>
    %207 = vector.broadcast %206 : vector<1x64xf32> to vector<32x64xf32>
    %208 = arith.addf %205, %207 : vector<32x64xf32>
    %cst_84 = arith.constant 0.000000e+00 : f32
    %209 = vector.broadcast %cst_84 : f32 to vector<32x64xf32>
    %210 = arith.maximumf %208, %209 : vector<32x64xf32>
    %c0_85 = arith.constant 0 : index
    %c0_86 = arith.constant 0 : index
    %211 = vector.load %arg8[%c0_85, %c0_86] : memref<192x64xbf16, #tpu.memory_space<vmem>>, vector<192x64xbf16>
    %212 = tpu.iota {dimensions = array<i32: 0>} : vector<32x32xi32>
    %213 = tpu.iota {dimensions = array<i32: 1>} : vector<32x32xi32>
    %c16_i32_87 = arith.constant 16 : i32
    %c0_i32_88 = arith.constant 0 : i32
    %214 = arith.cmpi eq, %c16_i32_87, %c0_i32_88 : i32
    %c1_i32_89 = arith.constant 1 : i32
    %215 = arith.select %214, %c1_i32_89, %c16_i32_87 : i32
    %216 = vector.broadcast %215 : i32 to vector<32x32xi32>
    %217 = arith.remsi %212, %216 : vector<32x32xi32>
    %c0_i32_90 = arith.constant 0 : i32
    %218 = vector.broadcast %c0_i32_90 : i32 to vector<32x32xi32>
    %219 = arith.cmpi ne, %217, %218 : vector<32x32xi32>
    %c0_i32_91 = arith.constant 0 : i32
    %220 = vector.broadcast %c0_i32_91 : i32 to vector<32x32xi32>
    %221 = arith.cmpi slt, %217, %220 : vector<32x32xi32>
    %c0_i32_92 = arith.constant 0 : i32
    %222 = arith.cmpi slt, %215, %c0_i32_92 : i32
    %223 = vector.broadcast %222 : i1 to vector<32x32xi1>
    %224 = vector.broadcast %223 : vector<32x32xi1> to vector<32x32xi1>
    %225 = arith.xori %221, %224 : vector<32x32xi1>
    %226 = arith.andi %225, %219 : vector<32x32xi1>
    %227 = vector.broadcast %215 : i32 to vector<32x32xi32>
    %228 = arith.addi %217, %227 : vector<32x32xi32>
    %229 = arith.select %226, %228, %217 : vector<32x32xi1>, vector<32x32xi32>
    %c1_i32_93 = arith.constant 1 : i32
    %230 = vector.broadcast %c1_i32_93 : i32 to vector<32x32xi32>
    %231 = arith.muli %230, %229 : vector<32x32xi32>
    %c-1_i32_94 = arith.constant -1 : i32
    %232 = vector.broadcast %c-1_i32_94 : i32 to vector<32x32xi32>
    %233 = arith.addi %231, %232 : vector<32x32xi32>
    %c1_i32_95 = arith.constant 1 : i32
    %234 = vector.broadcast %c1_i32_95 : i32 to vector<32x32xi32>
    %235 = arith.muli %234, %212 : vector<32x32xi32>
    %c-1_i32_96 = arith.constant -1 : i32
    %236 = vector.broadcast %c-1_i32_96 : i32 to vector<32x32xi32>
    %237 = arith.addi %235, %236 : vector<32x32xi32>
    %238 = arith.cmpi eq, %213, %237 : vector<32x32xi32>
    %c0_i32_97 = arith.constant 0 : i32
    %239 = vector.broadcast %c0_i32_97 : i32 to vector<32x32xi32>
    %240 = arith.cmpi sge, %233, %239 : vector<32x32xi32>
    %241 = arith.andi %238, %240 : vector<32x32xi1>
    %c16_i32_98 = arith.constant 16 : i32
    %242 = vector.broadcast %c16_i32_98 : i32 to vector<32x32xi32>
    %243 = arith.cmpi slt, %233, %242 : vector<32x32xi32>
    %244 = arith.andi %241, %243 : vector<32x32xi1>
    %cst_99 = arith.constant 1.000000e+00 : f32
    %cst_100 = arith.constant 0.000000e+00 : f32
    %245 = vector.broadcast %cst_99 : f32 to vector<32x32xf32>
    %246 = vector.broadcast %cst_100 : f32 to vector<32x32xf32>
    %247 = arith.select %244, %245, %246 : vector<32x32xi1>, vector<32x32xf32>
    %cst_101 = arith.constant dense<0.000000e+00> : vector<32x64xf32>
    %248 = tpu.matmul %247, %210, %cst_101 {dimension_numbers = #tpu.dot_dimension_numbers<[1], [0], [0], [1], [0, 0, 1, 1], [], []>} : vector<32x32xf32>, vector<32x64xf32>, vector<32x64xf32> -> vector<32x64xf32>
    %249 = tpu.iota {dimensions = array<i32: 0>} : vector<32x32xi32>
    %250 = tpu.iota {dimensions = array<i32: 1>} : vector<32x32xi32>
    %c16_i32_102 = arith.constant 16 : i32
    %c0_i32_103 = arith.constant 0 : i32
    %251 = arith.cmpi eq, %c16_i32_102, %c0_i32_103 : i32
    %c1_i32_104 = arith.constant 1 : i32
    %252 = arith.select %251, %c1_i32_104, %c16_i32_102 : i32
    %253 = vector.broadcast %252 : i32 to vector<32x32xi32>
    %254 = arith.remsi %249, %253 : vector<32x32xi32>
    %c0_i32_105 = arith.constant 0 : i32
    %255 = vector.broadcast %c0_i32_105 : i32 to vector<32x32xi32>
    %256 = arith.cmpi ne, %254, %255 : vector<32x32xi32>
    %c0_i32_106 = arith.constant 0 : i32
    %257 = vector.broadcast %c0_i32_106 : i32 to vector<32x32xi32>
    %258 = arith.cmpi slt, %254, %257 : vector<32x32xi32>
    %c0_i32_107 = arith.constant 0 : i32
    %259 = arith.cmpi slt, %252, %c0_i32_107 : i32
    %260 = vector.broadcast %259 : i1 to vector<32x32xi1>
    %261 = vector.broadcast %260 : vector<32x32xi1> to vector<32x32xi1>
    %262 = arith.xori %258, %261 : vector<32x32xi1>
    %263 = arith.andi %262, %256 : vector<32x32xi1>
    %264 = vector.broadcast %252 : i32 to vector<32x32xi32>
    %265 = arith.addi %254, %264 : vector<32x32xi32>
    %266 = arith.select %263, %265, %254 : vector<32x32xi1>, vector<32x32xi32>
    %c1_i32_108 = arith.constant 1 : i32
    %267 = vector.broadcast %c1_i32_108 : i32 to vector<32x32xi32>
    %268 = arith.muli %267, %266 : vector<32x32xi32>
    %c1_i32_109 = arith.constant 1 : i32
    %269 = vector.broadcast %c1_i32_109 : i32 to vector<32x32xi32>
    %270 = arith.addi %268, %269 : vector<32x32xi32>
    %c1_i32_110 = arith.constant 1 : i32
    %271 = vector.broadcast %c1_i32_110 : i32 to vector<32x32xi32>
    %272 = arith.muli %271, %249 : vector<32x32xi32>
    %c1_i32_111 = arith.constant 1 : i32
    %273 = vector.broadcast %c1_i32_111 : i32 to vector<32x32xi32>
    %274 = arith.addi %272, %273 : vector<32x32xi32>
    %275 = arith.cmpi eq, %250, %274 : vector<32x32xi32>
    %c0_i32_112 = arith.constant 0 : i32
    %276 = vector.broadcast %c0_i32_112 : i32 to vector<32x32xi32>
    %277 = arith.cmpi sge, %270, %276 : vector<32x32xi32>
    %278 = arith.andi %275, %277 : vector<32x32xi1>
    %c16_i32_113 = arith.constant 16 : i32
    %279 = vector.broadcast %c16_i32_113 : i32 to vector<32x32xi32>
    %280 = arith.cmpi slt, %270, %279 : vector<32x32xi32>
    %281 = arith.andi %278, %280 : vector<32x32xi1>
    %cst_114 = arith.constant 1.000000e+00 : f32
    %cst_115 = arith.constant 0.000000e+00 : f32
    %282 = vector.broadcast %cst_114 : f32 to vector<32x32xf32>
    %283 = vector.broadcast %cst_115 : f32 to vector<32x32xf32>
    %284 = arith.select %281, %282, %283 : vector<32x32xi1>, vector<32x32xf32>
    %cst_116 = arith.constant dense<0.000000e+00> : vector<32x64xf32>
    %285 = tpu.matmul %284, %210, %cst_116 {dimension_numbers = #tpu.dot_dimension_numbers<[1], [0], [0], [1], [0, 0, 1, 1], [], []>} : vector<32x32xf32>, vector<32x64xf32>, vector<32x64xf32> -> vector<32x64xf32>
    %286 = tpu.concatenate %248, %210, %285 in 1 : vector<32x64xf32>, vector<32x64xf32>, vector<32x64xf32> -> vector<32x192xf32>
    %287 = arith.truncf %286 : vector<32x192xf32> to vector<32x192xbf16>
    %cst_117 = arith.constant dense<0.000000e+00> : vector<32x64xf32>
    %288 = tpu.matmul %287, %211, %cst_117 {dimension_numbers = #tpu.dot_dimension_numbers<[1], [0], [0], [1], [0, 0, 1, 1], [], []>} : vector<32x192xbf16>, vector<192x64xbf16>, vector<32x64xf32> -> vector<32x64xf32>
    %c0_118 = arith.constant 0 : index
    %c0_119 = arith.constant 0 : index
    %289 = vector.load %arg9[%c0_118, %c0_119] : memref<1x64xf32, #tpu.memory_space<vmem>>, vector<1x64xf32>
    %290 = vector.broadcast %289 : vector<1x64xf32> to vector<32x64xf32>
    %291 = arith.mulf %288, %290 : vector<32x64xf32>
    %c0_120 = arith.constant 0 : index
    %c0_121 = arith.constant 0 : index
    %292 = vector.load %arg10[%c0_120, %c0_121] : memref<1x64xf32, #tpu.memory_space<vmem>>, vector<1x64xf32>
    %293 = vector.broadcast %292 : vector<1x64xf32> to vector<32x64xf32>
    %294 = arith.addf %291, %293 : vector<32x64xf32>
    %295 = arith.addf %294, %124 : vector<32x64xf32>
    %cst_122 = arith.constant 0.000000e+00 : f32
    %296 = vector.broadcast %cst_122 : f32 to vector<32x64xf32>
    %297 = arith.maximumf %295, %296 : vector<32x64xf32>
    %c0_123 = arith.constant 0 : index
    %c0_124 = arith.constant 0 : index
    %298 = vector.load %arg11[%c0_123, %c0_124] : memref<192x128xbf16, #tpu.memory_space<vmem>>, vector<192x128xbf16>
    %299 = tpu.iota {dimensions = array<i32: 0>} : vector<16x32xi32>
    %300 = tpu.iota {dimensions = array<i32: 1>} : vector<16x32xi32>
    %c8_i32 = arith.constant 8 : i32
    %c0_i32_125 = arith.constant 0 : i32
    %301 = arith.cmpi eq, %c8_i32, %c0_i32_125 : i32
    %c1_i32_126 = arith.constant 1 : i32
    %302 = arith.select %301, %c1_i32_126, %c8_i32 : i32
    %303 = vector.broadcast %302 : i32 to vector<16x32xi32>
    %304 = arith.remsi %299, %303 : vector<16x32xi32>
    %c0_i32_127 = arith.constant 0 : i32
    %305 = vector.broadcast %c0_i32_127 : i32 to vector<16x32xi32>
    %306 = arith.cmpi ne, %304, %305 : vector<16x32xi32>
    %c0_i32_128 = arith.constant 0 : i32
    %307 = vector.broadcast %c0_i32_128 : i32 to vector<16x32xi32>
    %308 = arith.cmpi slt, %304, %307 : vector<16x32xi32>
    %c0_i32_129 = arith.constant 0 : i32
    %309 = arith.cmpi slt, %302, %c0_i32_129 : i32
    %310 = vector.broadcast %309 : i1 to vector<16x32xi1>
    %311 = vector.broadcast %310 : vector<16x32xi1> to vector<16x32xi1>
    %312 = arith.xori %308, %311 : vector<16x32xi1>
    %313 = arith.andi %312, %306 : vector<16x32xi1>
    %314 = vector.broadcast %302 : i32 to vector<16x32xi32>
    %315 = arith.addi %304, %314 : vector<16x32xi32>
    %316 = arith.select %313, %315, %304 : vector<16x32xi1>, vector<16x32xi32>
    %c2_i32_130 = arith.constant 2 : i32
    %317 = vector.broadcast %c2_i32_130 : i32 to vector<16x32xi32>
    %318 = arith.muli %317, %316 : vector<16x32xi32>
    %c-1_i32_131 = arith.constant -1 : i32
    %319 = vector.broadcast %c-1_i32_131 : i32 to vector<16x32xi32>
    %320 = arith.addi %318, %319 : vector<16x32xi32>
    %c2_i32_132 = arith.constant 2 : i32
    %321 = vector.broadcast %c2_i32_132 : i32 to vector<16x32xi32>
    %322 = arith.muli %321, %299 : vector<16x32xi32>
    %c-1_i32_133 = arith.constant -1 : i32
    %323 = vector.broadcast %c-1_i32_133 : i32 to vector<16x32xi32>
    %324 = arith.addi %322, %323 : vector<16x32xi32>
    %325 = arith.cmpi eq, %300, %324 : vector<16x32xi32>
    %c0_i32_134 = arith.constant 0 : i32
    %326 = vector.broadcast %c0_i32_134 : i32 to vector<16x32xi32>
    %327 = arith.cmpi sge, %320, %326 : vector<16x32xi32>
    %328 = arith.andi %325, %327 : vector<16x32xi1>
    %c16_i32_135 = arith.constant 16 : i32
    %329 = vector.broadcast %c16_i32_135 : i32 to vector<16x32xi32>
    %330 = arith.cmpi slt, %320, %329 : vector<16x32xi32>
    %331 = arith.andi %328, %330 : vector<16x32xi1>
    %cst_136 = arith.constant 1.000000e+00 : f32
    %cst_137 = arith.constant 0.000000e+00 : f32
    %332 = vector.broadcast %cst_136 : f32 to vector<16x32xf32>
    %333 = vector.broadcast %cst_137 : f32 to vector<16x32xf32>
    %334 = arith.select %331, %332, %333 : vector<16x32xi1>, vector<16x32xf32>
    %cst_138 = arith.constant dense<0.000000e+00> : vector<16x64xf32>
    %335 = tpu.matmul %334, %297, %cst_138 {dimension_numbers = #tpu.dot_dimension_numbers<[1], [0], [0], [1], [0, 0, 1, 1], [], []>} : vector<16x32xf32>, vector<32x64xf32>, vector<16x64xf32> -> vector<16x64xf32>
    %336 = tpu.iota {dimensions = array<i32: 0>} : vector<16x32xi32>
    %337 = tpu.iota {dimensions = array<i32: 1>} : vector<16x32xi32>
    %c8_i32_139 = arith.constant 8 : i32
    %c0_i32_140 = arith.constant 0 : i32
    %338 = arith.cmpi eq, %c8_i32_139, %c0_i32_140 : i32
    %c1_i32_141 = arith.constant 1 : i32
    %339 = arith.select %338, %c1_i32_141, %c8_i32_139 : i32
    %340 = vector.broadcast %339 : i32 to vector<16x32xi32>
    %341 = arith.remsi %336, %340 : vector<16x32xi32>
    %c0_i32_142 = arith.constant 0 : i32
    %342 = vector.broadcast %c0_i32_142 : i32 to vector<16x32xi32>
    %343 = arith.cmpi ne, %341, %342 : vector<16x32xi32>
    %c0_i32_143 = arith.constant 0 : i32
    %344 = vector.broadcast %c0_i32_143 : i32 to vector<16x32xi32>
    %345 = arith.cmpi slt, %341, %344 : vector<16x32xi32>
    %c0_i32_144 = arith.constant 0 : i32
    %346 = arith.cmpi slt, %339, %c0_i32_144 : i32
    %347 = vector.broadcast %346 : i1 to vector<16x32xi1>
    %348 = vector.broadcast %347 : vector<16x32xi1> to vector<16x32xi1>
    %349 = arith.xori %345, %348 : vector<16x32xi1>
    %350 = arith.andi %349, %343 : vector<16x32xi1>
    %351 = vector.broadcast %339 : i32 to vector<16x32xi32>
    %352 = arith.addi %341, %351 : vector<16x32xi32>
    %353 = arith.select %350, %352, %341 : vector<16x32xi1>, vector<16x32xi32>
    %c2_i32_145 = arith.constant 2 : i32
    %354 = vector.broadcast %c2_i32_145 : i32 to vector<16x32xi32>
    %355 = arith.muli %354, %353 : vector<16x32xi32>
    %c0_i32_146 = arith.constant 0 : i32
    %356 = vector.broadcast %c0_i32_146 : i32 to vector<16x32xi32>
    %357 = arith.addi %355, %356 : vector<16x32xi32>
    %c2_i32_147 = arith.constant 2 : i32
    %358 = vector.broadcast %c2_i32_147 : i32 to vector<16x32xi32>
    %359 = arith.muli %358, %336 : vector<16x32xi32>
    %c0_i32_148 = arith.constant 0 : i32
    %360 = vector.broadcast %c0_i32_148 : i32 to vector<16x32xi32>
    %361 = arith.addi %359, %360 : vector<16x32xi32>
    %362 = arith.cmpi eq, %337, %361 : vector<16x32xi32>
    %c0_i32_149 = arith.constant 0 : i32
    %363 = vector.broadcast %c0_i32_149 : i32 to vector<16x32xi32>
    %364 = arith.cmpi sge, %357, %363 : vector<16x32xi32>
    %365 = arith.andi %362, %364 : vector<16x32xi1>
    %c16_i32_150 = arith.constant 16 : i32
    %366 = vector.broadcast %c16_i32_150 : i32 to vector<16x32xi32>
    %367 = arith.cmpi slt, %357, %366 : vector<16x32xi32>
    %368 = arith.andi %365, %367 : vector<16x32xi1>
    %cst_151 = arith.constant 1.000000e+00 : f32
    %cst_152 = arith.constant 0.000000e+00 : f32
    %369 = vector.broadcast %cst_151 : f32 to vector<16x32xf32>
    %370 = vector.broadcast %cst_152 : f32 to vector<16x32xf32>
    %371 = arith.select %368, %369, %370 : vector<16x32xi1>, vector<16x32xf32>
    %cst_153 = arith.constant dense<0.000000e+00> : vector<16x64xf32>
    %372 = tpu.matmul %371, %297, %cst_153 {dimension_numbers = #tpu.dot_dimension_numbers<[1], [0], [0], [1], [0, 0, 1, 1], [], []>} : vector<16x32xf32>, vector<32x64xf32>, vector<16x64xf32> -> vector<16x64xf32>
    %373 = tpu.iota {dimensions = array<i32: 0>} : vector<16x32xi32>
    %374 = tpu.iota {dimensions = array<i32: 1>} : vector<16x32xi32>
    %c8_i32_154 = arith.constant 8 : i32
    %c0_i32_155 = arith.constant 0 : i32
    %375 = arith.cmpi eq, %c8_i32_154, %c0_i32_155 : i32
    %c1_i32_156 = arith.constant 1 : i32
    %376 = arith.select %375, %c1_i32_156, %c8_i32_154 : i32
    %377 = vector.broadcast %376 : i32 to vector<16x32xi32>
    %378 = arith.remsi %373, %377 : vector<16x32xi32>
    %c0_i32_157 = arith.constant 0 : i32
    %379 = vector.broadcast %c0_i32_157 : i32 to vector<16x32xi32>
    %380 = arith.cmpi ne, %378, %379 : vector<16x32xi32>
    %c0_i32_158 = arith.constant 0 : i32
    %381 = vector.broadcast %c0_i32_158 : i32 to vector<16x32xi32>
    %382 = arith.cmpi slt, %378, %381 : vector<16x32xi32>
    %c0_i32_159 = arith.constant 0 : i32
    %383 = arith.cmpi slt, %376, %c0_i32_159 : i32
    %384 = vector.broadcast %383 : i1 to vector<16x32xi1>
    %385 = vector.broadcast %384 : vector<16x32xi1> to vector<16x32xi1>
    %386 = arith.xori %382, %385 : vector<16x32xi1>
    %387 = arith.andi %386, %380 : vector<16x32xi1>
    %388 = vector.broadcast %376 : i32 to vector<16x32xi32>
    %389 = arith.addi %378, %388 : vector<16x32xi32>
    %390 = arith.select %387, %389, %378 : vector<16x32xi1>, vector<16x32xi32>
    %c2_i32_160 = arith.constant 2 : i32
    %391 = vector.broadcast %c2_i32_160 : i32 to vector<16x32xi32>
    %392 = arith.muli %391, %390 : vector<16x32xi32>
    %c1_i32_161 = arith.constant 1 : i32
    %393 = vector.broadcast %c1_i32_161 : i32 to vector<16x32xi32>
    %394 = arith.addi %392, %393 : vector<16x32xi32>
    %c2_i32_162 = arith.constant 2 : i32
    %395 = vector.broadcast %c2_i32_162 : i32 to vector<16x32xi32>
    %396 = arith.muli %395, %373 : vector<16x32xi32>
    %c1_i32_163 = arith.constant 1 : i32
    %397 = vector.broadcast %c1_i32_163 : i32 to vector<16x32xi32>
    %398 = arith.addi %396, %397 : vector<16x32xi32>
    %399 = arith.cmpi eq, %374, %398 : vector<16x32xi32>
    %c0_i32_164 = arith.constant 0 : i32
    %400 = vector.broadcast %c0_i32_164 : i32 to vector<16x32xi32>
    %401 = arith.cmpi sge, %394, %400 : vector<16x32xi32>
    %402 = arith.andi %399, %401 : vector<16x32xi1>
    %c16_i32_165 = arith.constant 16 : i32
    %403 = vector.broadcast %c16_i32_165 : i32 to vector<16x32xi32>
    %404 = arith.cmpi slt, %394, %403 : vector<16x32xi32>
    %405 = arith.andi %402, %404 : vector<16x32xi1>
    %cst_166 = arith.constant 1.000000e+00 : f32
    %cst_167 = arith.constant 0.000000e+00 : f32
    %406 = vector.broadcast %cst_166 : f32 to vector<16x32xf32>
    %407 = vector.broadcast %cst_167 : f32 to vector<16x32xf32>
    %408 = arith.select %405, %406, %407 : vector<16x32xi1>, vector<16x32xf32>
    %cst_168 = arith.constant dense<0.000000e+00> : vector<16x64xf32>
    %409 = tpu.matmul %408, %297, %cst_168 {dimension_numbers = #tpu.dot_dimension_numbers<[1], [0], [0], [1], [0, 0, 1, 1], [], []>} : vector<16x32xf32>, vector<32x64xf32>, vector<16x64xf32> -> vector<16x64xf32>
    %410 = tpu.concatenate %335, %372, %409 in 1 : vector<16x64xf32>, vector<16x64xf32>, vector<16x64xf32> -> vector<16x192xf32>
    %411 = arith.truncf %410 : vector<16x192xf32> to vector<16x192xbf16>
    %cst_169 = arith.constant dense<0.000000e+00> : vector<16x128xf32>
    %412 = tpu.matmul %411, %298, %cst_169 {dimension_numbers = #tpu.dot_dimension_numbers<[1], [0], [0], [1], [0, 0, 1, 1], [], []>} : vector<16x192xbf16>, vector<192x128xbf16>, vector<16x128xf32> -> vector<16x128xf32>
    %c0_170 = arith.constant 0 : index
    %c0_171 = arith.constant 0 : index
    %413 = vector.load %arg12[%c0_170, %c0_171] : memref<1x128xf32, #tpu.memory_space<vmem>>, vector<1x128xf32>
    %414 = vector.broadcast %413 : vector<1x128xf32> to vector<16x128xf32>
    %415 = arith.mulf %412, %414 : vector<16x128xf32>
    %c0_172 = arith.constant 0 : index
    %c0_173 = arith.constant 0 : index
    %416 = vector.load %arg13[%c0_172, %c0_173] : memref<1x128xf32, #tpu.memory_space<vmem>>, vector<1x128xf32>
    %417 = vector.broadcast %416 : vector<1x128xf32> to vector<16x128xf32>
    %418 = arith.addf %415, %417 : vector<16x128xf32>
    %cst_174 = arith.constant 0.000000e+00 : f32
    %419 = vector.broadcast %cst_174 : f32 to vector<16x128xf32>
    %420 = arith.maximumf %418, %419 : vector<16x128xf32>
    %421 = tpu.iota {dimensions = array<i32: 0>} : vector<16x32xi32>
    %422 = tpu.iota {dimensions = array<i32: 1>} : vector<16x32xi32>
    %c8_i32_175 = arith.constant 8 : i32
    %c0_i32_176 = arith.constant 0 : i32
    %423 = arith.cmpi eq, %c8_i32_175, %c0_i32_176 : i32
    %c1_i32_177 = arith.constant 1 : i32
    %424 = arith.select %423, %c1_i32_177, %c8_i32_175 : i32
    %425 = vector.broadcast %424 : i32 to vector<16x32xi32>
    %426 = arith.remsi %421, %425 : vector<16x32xi32>
    %c0_i32_178 = arith.constant 0 : i32
    %427 = vector.broadcast %c0_i32_178 : i32 to vector<16x32xi32>
    %428 = arith.cmpi ne, %426, %427 : vector<16x32xi32>
    %c0_i32_179 = arith.constant 0 : i32
    %429 = vector.broadcast %c0_i32_179 : i32 to vector<16x32xi32>
    %430 = arith.cmpi slt, %426, %429 : vector<16x32xi32>
    %c0_i32_180 = arith.constant 0 : i32
    %431 = arith.cmpi slt, %424, %c0_i32_180 : i32
    %432 = vector.broadcast %431 : i1 to vector<16x32xi1>
    %433 = vector.broadcast %432 : vector<16x32xi1> to vector<16x32xi1>
    %434 = arith.xori %430, %433 : vector<16x32xi1>
    %435 = arith.andi %434, %428 : vector<16x32xi1>
    %436 = vector.broadcast %424 : i32 to vector<16x32xi32>
    %437 = arith.addi %426, %436 : vector<16x32xi32>
    %438 = arith.select %435, %437, %426 : vector<16x32xi1>, vector<16x32xi32>
    %c2_i32_181 = arith.constant 2 : i32
    %439 = vector.broadcast %c2_i32_181 : i32 to vector<16x32xi32>
    %440 = arith.muli %439, %438 : vector<16x32xi32>
    %c0_i32_182 = arith.constant 0 : i32
    %441 = vector.broadcast %c0_i32_182 : i32 to vector<16x32xi32>
    %442 = arith.addi %440, %441 : vector<16x32xi32>
    %c2_i32_183 = arith.constant 2 : i32
    %443 = vector.broadcast %c2_i32_183 : i32 to vector<16x32xi32>
    %444 = arith.muli %443, %421 : vector<16x32xi32>
    %c0_i32_184 = arith.constant 0 : i32
    %445 = vector.broadcast %c0_i32_184 : i32 to vector<16x32xi32>
    %446 = arith.addi %444, %445 : vector<16x32xi32>
    %447 = arith.cmpi eq, %422, %446 : vector<16x32xi32>
    %c0_i32_185 = arith.constant 0 : i32
    %448 = vector.broadcast %c0_i32_185 : i32 to vector<16x32xi32>
    %449 = arith.cmpi sge, %442, %448 : vector<16x32xi32>
    %450 = arith.andi %447, %449 : vector<16x32xi1>
    %c16_i32_186 = arith.constant 16 : i32
    %451 = vector.broadcast %c16_i32_186 : i32 to vector<16x32xi32>
    %452 = arith.cmpi slt, %442, %451 : vector<16x32xi32>
    %453 = arith.andi %450, %452 : vector<16x32xi1>
    %cst_187 = arith.constant 1.000000e+00 : f32
    %cst_188 = arith.constant 0.000000e+00 : f32
    %454 = vector.broadcast %cst_187 : f32 to vector<16x32xf32>
    %455 = vector.broadcast %cst_188 : f32 to vector<16x32xf32>
    %456 = arith.select %453, %454, %455 : vector<16x32xi1>, vector<16x32xf32>
    %cst_189 = arith.constant dense<0.000000e+00> : vector<16x64xf32>
    %457 = tpu.matmul %456, %297, %cst_189 {dimension_numbers = #tpu.dot_dimension_numbers<[1], [0], [0], [1], [0, 0, 1, 1], [], []>} : vector<16x32xf32>, vector<32x64xf32>, vector<16x64xf32> -> vector<16x64xf32>
    %458 = arith.truncf %457 : vector<16x64xf32> to vector<16x64xbf16>
    %c0_190 = arith.constant 0 : index
    %c0_191 = arith.constant 0 : index
    %459 = vector.load %arg17[%c0_190, %c0_191] : memref<64x128xbf16, #tpu.memory_space<vmem>>, vector<64x128xbf16>
    %cst_192 = arith.constant dense<0.000000e+00> : vector<16x128xf32>
    %460 = tpu.matmul %458, %459, %cst_192 {dimension_numbers = #tpu.dot_dimension_numbers<[1], [0], [0], [1], [0, 0, 1, 1], [], []>} : vector<16x64xbf16>, vector<64x128xbf16>, vector<16x128xf32> -> vector<16x128xf32>
    %c0_193 = arith.constant 0 : index
    %c0_194 = arith.constant 0 : index
    %461 = vector.load %arg18[%c0_193, %c0_194] : memref<1x128xf32, #tpu.memory_space<vmem>>, vector<1x128xf32>
    %462 = vector.broadcast %461 : vector<1x128xf32> to vector<16x128xf32>
    %463 = arith.mulf %460, %462 : vector<16x128xf32>
    %c0_195 = arith.constant 0 : index
    %c0_196 = arith.constant 0 : index
    %464 = vector.load %arg19[%c0_195, %c0_196] : memref<1x128xf32, #tpu.memory_space<vmem>>, vector<1x128xf32>
    %465 = vector.broadcast %464 : vector<1x128xf32> to vector<16x128xf32>
    %466 = arith.addf %463, %465 : vector<16x128xf32>
    %c0_197 = arith.constant 0 : index
    %c0_198 = arith.constant 0 : index
    %467 = vector.load %arg14[%c0_197, %c0_198] : memref<384x128xbf16, #tpu.memory_space<vmem>>, vector<384x128xbf16>
    %468 = tpu.iota {dimensions = array<i32: 0>} : vector<16x16xi32>
    %469 = tpu.iota {dimensions = array<i32: 1>} : vector<16x16xi32>
    %c8_i32_199 = arith.constant 8 : i32
    %c0_i32_200 = arith.constant 0 : i32
    %470 = arith.cmpi eq, %c8_i32_199, %c0_i32_200 : i32
    %c1_i32_201 = arith.constant 1 : i32
    %471 = arith.select %470, %c1_i32_201, %c8_i32_199 : i32
    %472 = vector.broadcast %471 : i32 to vector<16x16xi32>
    %473 = arith.remsi %468, %472 : vector<16x16xi32>
    %c0_i32_202 = arith.constant 0 : i32
    %474 = vector.broadcast %c0_i32_202 : i32 to vector<16x16xi32>
    %475 = arith.cmpi ne, %473, %474 : vector<16x16xi32>
    %c0_i32_203 = arith.constant 0 : i32
    %476 = vector.broadcast %c0_i32_203 : i32 to vector<16x16xi32>
    %477 = arith.cmpi slt, %473, %476 : vector<16x16xi32>
    %c0_i32_204 = arith.constant 0 : i32
    %478 = arith.cmpi slt, %471, %c0_i32_204 : i32
    %479 = vector.broadcast %478 : i1 to vector<16x16xi1>
    %480 = vector.broadcast %479 : vector<16x16xi1> to vector<16x16xi1>
    %481 = arith.xori %477, %480 : vector<16x16xi1>
    %482 = arith.andi %481, %475 : vector<16x16xi1>
    %483 = vector.broadcast %471 : i32 to vector<16x16xi32>
    %484 = arith.addi %473, %483 : vector<16x16xi32>
    %485 = arith.select %482, %484, %473 : vector<16x16xi1>, vector<16x16xi32>
    %c1_i32_205 = arith.constant 1 : i32
    %486 = vector.broadcast %c1_i32_205 : i32 to vector<16x16xi32>
    %487 = arith.muli %486, %485 : vector<16x16xi32>
    %c-1_i32_206 = arith.constant -1 : i32
    %488 = vector.broadcast %c-1_i32_206 : i32 to vector<16x16xi32>
    %489 = arith.addi %487, %488 : vector<16x16xi32>
    %c1_i32_207 = arith.constant 1 : i32
    %490 = vector.broadcast %c1_i32_207 : i32 to vector<16x16xi32>
    %491 = arith.muli %490, %468 : vector<16x16xi32>
    %c-1_i32_208 = arith.constant -1 : i32
    %492 = vector.broadcast %c-1_i32_208 : i32 to vector<16x16xi32>
    %493 = arith.addi %491, %492 : vector<16x16xi32>
    %494 = arith.cmpi eq, %469, %493 : vector<16x16xi32>
    %c0_i32_209 = arith.constant 0 : i32
    %495 = vector.broadcast %c0_i32_209 : i32 to vector<16x16xi32>
    %496 = arith.cmpi sge, %489, %495 : vector<16x16xi32>
    %497 = arith.andi %494, %496 : vector<16x16xi1>
    %c8_i32_210 = arith.constant 8 : i32
    %498 = vector.broadcast %c8_i32_210 : i32 to vector<16x16xi32>
    %499 = arith.cmpi slt, %489, %498 : vector<16x16xi32>
    %500 = arith.andi %497, %499 : vector<16x16xi1>
    %cst_211 = arith.constant 1.000000e+00 : f32
    %cst_212 = arith.constant 0.000000e+00 : f32
    %501 = vector.broadcast %cst_211 : f32 to vector<16x16xf32>
    %502 = vector.broadcast %cst_212 : f32 to vector<16x16xf32>
    %503 = arith.select %500, %501, %502 : vector<16x16xi1>, vector<16x16xf32>
    %cst_213 = arith.constant dense<0.000000e+00> : vector<16x128xf32>
    %504 = tpu.matmul %503, %420, %cst_213 {dimension_numbers = #tpu.dot_dimension_numbers<[1], [0], [0], [1], [0, 0, 1, 1], [], []>} : vector<16x16xf32>, vector<16x128xf32>, vector<16x128xf32> -> vector<16x128xf32>
    %505 = tpu.iota {dimensions = array<i32: 0>} : vector<16x16xi32>
    %506 = tpu.iota {dimensions = array<i32: 1>} : vector<16x16xi32>
    %c8_i32_214 = arith.constant 8 : i32
    %c0_i32_215 = arith.constant 0 : i32
    %507 = arith.cmpi eq, %c8_i32_214, %c0_i32_215 : i32
    %c1_i32_216 = arith.constant 1 : i32
    %508 = arith.select %507, %c1_i32_216, %c8_i32_214 : i32
    %509 = vector.broadcast %508 : i32 to vector<16x16xi32>
    %510 = arith.remsi %505, %509 : vector<16x16xi32>
    %c0_i32_217 = arith.constant 0 : i32
    %511 = vector.broadcast %c0_i32_217 : i32 to vector<16x16xi32>
    %512 = arith.cmpi ne, %510, %511 : vector<16x16xi32>
    %c0_i32_218 = arith.constant 0 : i32
    %513 = vector.broadcast %c0_i32_218 : i32 to vector<16x16xi32>
    %514 = arith.cmpi slt, %510, %513 : vector<16x16xi32>
    %c0_i32_219 = arith.constant 0 : i32
    %515 = arith.cmpi slt, %508, %c0_i32_219 : i32
    %516 = vector.broadcast %515 : i1 to vector<16x16xi1>
    %517 = vector.broadcast %516 : vector<16x16xi1> to vector<16x16xi1>
    %518 = arith.xori %514, %517 : vector<16x16xi1>
    %519 = arith.andi %518, %512 : vector<16x16xi1>
    %520 = vector.broadcast %508 : i32 to vector<16x16xi32>
    %521 = arith.addi %510, %520 : vector<16x16xi32>
    %522 = arith.select %519, %521, %510 : vector<16x16xi1>, vector<16x16xi32>
    %c1_i32_220 = arith.constant 1 : i32
    %523 = vector.broadcast %c1_i32_220 : i32 to vector<16x16xi32>
    %524 = arith.muli %523, %522 : vector<16x16xi32>
    %c1_i32_221 = arith.constant 1 : i32
    %525 = vector.broadcast %c1_i32_221 : i32 to vector<16x16xi32>
    %526 = arith.addi %524, %525 : vector<16x16xi32>
    %c1_i32_222 = arith.constant 1 : i32
    %527 = vector.broadcast %c1_i32_222 : i32 to vector<16x16xi32>
    %528 = arith.muli %527, %505 : vector<16x16xi32>
    %c1_i32_223 = arith.constant 1 : i32
    %529 = vector.broadcast %c1_i32_223 : i32 to vector<16x16xi32>
    %530 = arith.addi %528, %529 : vector<16x16xi32>
    %531 = arith.cmpi eq, %506, %530 : vector<16x16xi32>
    %c0_i32_224 = arith.constant 0 : i32
    %532 = vector.broadcast %c0_i32_224 : i32 to vector<16x16xi32>
    %533 = arith.cmpi sge, %526, %532 : vector<16x16xi32>
    %534 = arith.andi %531, %533 : vector<16x16xi1>
    %c8_i32_225 = arith.constant 8 : i32
    %535 = vector.broadcast %c8_i32_225 : i32 to vector<16x16xi32>
    %536 = arith.cmpi slt, %526, %535 : vector<16x16xi32>
    %537 = arith.andi %534, %536 : vector<16x16xi1>
    %cst_226 = arith.constant 1.000000e+00 : f32
    %cst_227 = arith.constant 0.000000e+00 : f32
    %538 = vector.broadcast %cst_226 : f32 to vector<16x16xf32>
    %539 = vector.broadcast %cst_227 : f32 to vector<16x16xf32>
    %540 = arith.select %537, %538, %539 : vector<16x16xi1>, vector<16x16xf32>
    %cst_228 = arith.constant dense<0.000000e+00> : vector<16x128xf32>
    %541 = tpu.matmul %540, %420, %cst_228 {dimension_numbers = #tpu.dot_dimension_numbers<[1], [0], [0], [1], [0, 0, 1, 1], [], []>} : vector<16x16xf32>, vector<16x128xf32>, vector<16x128xf32> -> vector<16x128xf32>
    %542 = tpu.concatenate %504, %420, %541 in 1 : vector<16x128xf32>, vector<16x128xf32>, vector<16x128xf32> -> vector<16x384xf32>
    %543 = arith.truncf %542 : vector<16x384xf32> to vector<16x384xbf16>
    %cst_229 = arith.constant dense<0.000000e+00> : vector<16x128xf32>
    %544 = tpu.matmul %543, %467, %cst_229 {dimension_numbers = #tpu.dot_dimension_numbers<[1], [0], [0], [1], [0, 0, 1, 1], [], []>} : vector<16x384xbf16>, vector<384x128xbf16>, vector<16x128xf32> -> vector<16x128xf32>
    %c0_230 = arith.constant 0 : index
    %c0_231 = arith.constant 0 : index
    %545 = vector.load %arg15[%c0_230, %c0_231] : memref<1x128xf32, #tpu.memory_space<vmem>>, vector<1x128xf32>
    %546 = vector.broadcast %545 : vector<1x128xf32> to vector<16x128xf32>
    %547 = arith.mulf %544, %546 : vector<16x128xf32>
    %c0_232 = arith.constant 0 : index
    %c0_233 = arith.constant 0 : index
    %548 = vector.load %arg16[%c0_232, %c0_233] : memref<1x128xf32, #tpu.memory_space<vmem>>, vector<1x128xf32>
    %549 = vector.broadcast %548 : vector<1x128xf32> to vector<16x128xf32>
    %550 = arith.addf %547, %549 : vector<16x128xf32>
    %551 = arith.addf %550, %466 : vector<16x128xf32>
    %cst_234 = arith.constant 0.000000e+00 : f32
    %552 = vector.broadcast %cst_234 : f32 to vector<16x128xf32>
    %553 = arith.maximumf %551, %552 : vector<16x128xf32>
    %c0_235 = arith.constant 0 : index
    %c0_236 = arith.constant 0 : index
    %554 = vector.load %arg20[%c0_235, %c0_236] : memref<384x256xbf16, #tpu.memory_space<vmem>>, vector<384x256xbf16>
    %555 = tpu.iota {dimensions = array<i32: 0>} : vector<8x16xi32>
    %556 = tpu.iota {dimensions = array<i32: 1>} : vector<8x16xi32>
    %c4_i32 = arith.constant 4 : i32
    %c0_i32_237 = arith.constant 0 : i32
    %557 = arith.cmpi eq, %c4_i32, %c0_i32_237 : i32
    %c1_i32_238 = arith.constant 1 : i32
    %558 = arith.select %557, %c1_i32_238, %c4_i32 : i32
    %559 = vector.broadcast %558 : i32 to vector<8x16xi32>
    %560 = arith.remsi %555, %559 : vector<8x16xi32>
    %c0_i32_239 = arith.constant 0 : i32
    %561 = vector.broadcast %c0_i32_239 : i32 to vector<8x16xi32>
    %562 = arith.cmpi ne, %560, %561 : vector<8x16xi32>
    %c0_i32_240 = arith.constant 0 : i32
    %563 = vector.broadcast %c0_i32_240 : i32 to vector<8x16xi32>
    %564 = arith.cmpi slt, %560, %563 : vector<8x16xi32>
    %c0_i32_241 = arith.constant 0 : i32
    %565 = arith.cmpi slt, %558, %c0_i32_241 : i32
    %566 = vector.broadcast %565 : i1 to vector<8x16xi1>
    %567 = vector.broadcast %566 : vector<8x16xi1> to vector<8x16xi1>
    %568 = arith.xori %564, %567 : vector<8x16xi1>
    %569 = arith.andi %568, %562 : vector<8x16xi1>
    %570 = vector.broadcast %558 : i32 to vector<8x16xi32>
    %571 = arith.addi %560, %570 : vector<8x16xi32>
    %572 = arith.select %569, %571, %560 : vector<8x16xi1>, vector<8x16xi32>
    %c2_i32_242 = arith.constant 2 : i32
    %573 = vector.broadcast %c2_i32_242 : i32 to vector<8x16xi32>
    %574 = arith.muli %573, %572 : vector<8x16xi32>
    %c-1_i32_243 = arith.constant -1 : i32
    %575 = vector.broadcast %c-1_i32_243 : i32 to vector<8x16xi32>
    %576 = arith.addi %574, %575 : vector<8x16xi32>
    %c2_i32_244 = arith.constant 2 : i32
    %577 = vector.broadcast %c2_i32_244 : i32 to vector<8x16xi32>
    %578 = arith.muli %577, %555 : vector<8x16xi32>
    %c-1_i32_245 = arith.constant -1 : i32
    %579 = vector.broadcast %c-1_i32_245 : i32 to vector<8x16xi32>
    %580 = arith.addi %578, %579 : vector<8x16xi32>
    %581 = arith.cmpi eq, %556, %580 : vector<8x16xi32>
    %c0_i32_246 = arith.constant 0 : i32
    %582 = vector.broadcast %c0_i32_246 : i32 to vector<8x16xi32>
    %583 = arith.cmpi sge, %576, %582 : vector<8x16xi32>
    %584 = arith.andi %581, %583 : vector<8x16xi1>
    %c8_i32_247 = arith.constant 8 : i32
    %585 = vector.broadcast %c8_i32_247 : i32 to vector<8x16xi32>
    %586 = arith.cmpi slt, %576, %585 : vector<8x16xi32>
    %587 = arith.andi %584, %586 : vector<8x16xi1>
    %cst_248 = arith.constant 1.000000e+00 : f32
    %cst_249 = arith.constant 0.000000e+00 : f32
    %588 = vector.broadcast %cst_248 : f32 to vector<8x16xf32>
    %589 = vector.broadcast %cst_249 : f32 to vector<8x16xf32>
    %590 = arith.select %587, %588, %589 : vector<8x16xi1>, vector<8x16xf32>
    %cst_250 = arith.constant dense<0.000000e+00> : vector<8x128xf32>
    %591 = tpu.matmul %590, %553, %cst_250 {dimension_numbers = #tpu.dot_dimension_numbers<[1], [0], [0], [1], [0, 0, 1, 1], [], []>} : vector<8x16xf32>, vector<16x128xf32>, vector<8x128xf32> -> vector<8x128xf32>
    %592 = tpu.iota {dimensions = array<i32: 0>} : vector<8x16xi32>
    %593 = tpu.iota {dimensions = array<i32: 1>} : vector<8x16xi32>
    %c4_i32_251 = arith.constant 4 : i32
    %c0_i32_252 = arith.constant 0 : i32
    %594 = arith.cmpi eq, %c4_i32_251, %c0_i32_252 : i32
    %c1_i32_253 = arith.constant 1 : i32
    %595 = arith.select %594, %c1_i32_253, %c4_i32_251 : i32
    %596 = vector.broadcast %595 : i32 to vector<8x16xi32>
    %597 = arith.remsi %592, %596 : vector<8x16xi32>
    %c0_i32_254 = arith.constant 0 : i32
    %598 = vector.broadcast %c0_i32_254 : i32 to vector<8x16xi32>
    %599 = arith.cmpi ne, %597, %598 : vector<8x16xi32>
    %c0_i32_255 = arith.constant 0 : i32
    %600 = vector.broadcast %c0_i32_255 : i32 to vector<8x16xi32>
    %601 = arith.cmpi slt, %597, %600 : vector<8x16xi32>
    %c0_i32_256 = arith.constant 0 : i32
    %602 = arith.cmpi slt, %595, %c0_i32_256 : i32
    %603 = vector.broadcast %602 : i1 to vector<8x16xi1>
    %604 = vector.broadcast %603 : vector<8x16xi1> to vector<8x16xi1>
    %605 = arith.xori %601, %604 : vector<8x16xi1>
    %606 = arith.andi %605, %599 : vector<8x16xi1>
    %607 = vector.broadcast %595 : i32 to vector<8x16xi32>
    %608 = arith.addi %597, %607 : vector<8x16xi32>
    %609 = arith.select %606, %608, %597 : vector<8x16xi1>, vector<8x16xi32>
    %c2_i32_257 = arith.constant 2 : i32
    %610 = vector.broadcast %c2_i32_257 : i32 to vector<8x16xi32>
    %611 = arith.muli %610, %609 : vector<8x16xi32>
    %c0_i32_258 = arith.constant 0 : i32
    %612 = vector.broadcast %c0_i32_258 : i32 to vector<8x16xi32>
    %613 = arith.addi %611, %612 : vector<8x16xi32>
    %c2_i32_259 = arith.constant 2 : i32
    %614 = vector.broadcast %c2_i32_259 : i32 to vector<8x16xi32>
    %615 = arith.muli %614, %592 : vector<8x16xi32>
    %c0_i32_260 = arith.constant 0 : i32
    %616 = vector.broadcast %c0_i32_260 : i32 to vector<8x16xi32>
    %617 = arith.addi %615, %616 : vector<8x16xi32>
    %618 = arith.cmpi eq, %593, %617 : vector<8x16xi32>
    %c0_i32_261 = arith.constant 0 : i32
    %619 = vector.broadcast %c0_i32_261 : i32 to vector<8x16xi32>
    %620 = arith.cmpi sge, %613, %619 : vector<8x16xi32>
    %621 = arith.andi %618, %620 : vector<8x16xi1>
    %c8_i32_262 = arith.constant 8 : i32
    %622 = vector.broadcast %c8_i32_262 : i32 to vector<8x16xi32>
    %623 = arith.cmpi slt, %613, %622 : vector<8x16xi32>
    %624 = arith.andi %621, %623 : vector<8x16xi1>
    %cst_263 = arith.constant 1.000000e+00 : f32
    %cst_264 = arith.constant 0.000000e+00 : f32
    %625 = vector.broadcast %cst_263 : f32 to vector<8x16xf32>
    %626 = vector.broadcast %cst_264 : f32 to vector<8x16xf32>
    %627 = arith.select %624, %625, %626 : vector<8x16xi1>, vector<8x16xf32>
    %cst_265 = arith.constant dense<0.000000e+00> : vector<8x128xf32>
    %628 = tpu.matmul %627, %553, %cst_265 {dimension_numbers = #tpu.dot_dimension_numbers<[1], [0], [0], [1], [0, 0, 1, 1], [], []>} : vector<8x16xf32>, vector<16x128xf32>, vector<8x128xf32> -> vector<8x128xf32>
    %629 = tpu.iota {dimensions = array<i32: 0>} : vector<8x16xi32>
    %630 = tpu.iota {dimensions = array<i32: 1>} : vector<8x16xi32>
    %c4_i32_266 = arith.constant 4 : i32
    %c0_i32_267 = arith.constant 0 : i32
    %631 = arith.cmpi eq, %c4_i32_266, %c0_i32_267 : i32
    %c1_i32_268 = arith.constant 1 : i32
    %632 = arith.select %631, %c1_i32_268, %c4_i32_266 : i32
    %633 = vector.broadcast %632 : i32 to vector<8x16xi32>
    %634 = arith.remsi %629, %633 : vector<8x16xi32>
    %c0_i32_269 = arith.constant 0 : i32
    %635 = vector.broadcast %c0_i32_269 : i32 to vector<8x16xi32>
    %636 = arith.cmpi ne, %634, %635 : vector<8x16xi32>
    %c0_i32_270 = arith.constant 0 : i32
    %637 = vector.broadcast %c0_i32_270 : i32 to vector<8x16xi32>
    %638 = arith.cmpi slt, %634, %637 : vector<8x16xi32>
    %c0_i32_271 = arith.constant 0 : i32
    %639 = arith.cmpi slt, %632, %c0_i32_271 : i32
    %640 = vector.broadcast %639 : i1 to vector<8x16xi1>
    %641 = vector.broadcast %640 : vector<8x16xi1> to vector<8x16xi1>
    %642 = arith.xori %638, %641 : vector<8x16xi1>
    %643 = arith.andi %642, %636 : vector<8x16xi1>
    %644 = vector.broadcast %632 : i32 to vector<8x16xi32>
    %645 = arith.addi %634, %644 : vector<8x16xi32>
    %646 = arith.select %643, %645, %634 : vector<8x16xi1>, vector<8x16xi32>
    %c2_i32_272 = arith.constant 2 : i32
    %647 = vector.broadcast %c2_i32_272 : i32 to vector<8x16xi32>
    %648 = arith.muli %647, %646 : vector<8x16xi32>
    %c1_i32_273 = arith.constant 1 : i32
    %649 = vector.broadcast %c1_i32_273 : i32 to vector<8x16xi32>
    %650 = arith.addi %648, %649 : vector<8x16xi32>
    %c2_i32_274 = arith.constant 2 : i32
    %651 = vector.broadcast %c2_i32_274 : i32 to vector<8x16xi32>
    %652 = arith.muli %651, %629 : vector<8x16xi32>
    %c1_i32_275 = arith.constant 1 : i32
    %653 = vector.broadcast %c1_i32_275 : i32 to vector<8x16xi32>
    %654 = arith.addi %652, %653 : vector<8x16xi32>
    %655 = arith.cmpi eq, %630, %654 : vector<8x16xi32>
    %c0_i32_276 = arith.constant 0 : i32
    %656 = vector.broadcast %c0_i32_276 : i32 to vector<8x16xi32>
    %657 = arith.cmpi sge, %650, %656 : vector<8x16xi32>
    %658 = arith.andi %655, %657 : vector<8x16xi1>
    %c8_i32_277 = arith.constant 8 : i32
    %659 = vector.broadcast %c8_i32_277 : i32 to vector<8x16xi32>
    %660 = arith.cmpi slt, %650, %659 : vector<8x16xi32>
    %661 = arith.andi %658, %660 : vector<8x16xi1>
    %cst_278 = arith.constant 1.000000e+00 : f32
    %cst_279 = arith.constant 0.000000e+00 : f32
    %662 = vector.broadcast %cst_278 : f32 to vector<8x16xf32>
    %663 = vector.broadcast %cst_279 : f32 to vector<8x16xf32>
    %664 = arith.select %661, %662, %663 : vector<8x16xi1>, vector<8x16xf32>
    %cst_280 = arith.constant dense<0.000000e+00> : vector<8x128xf32>
    %665 = tpu.matmul %664, %553, %cst_280 {dimension_numbers = #tpu.dot_dimension_numbers<[1], [0], [0], [1], [0, 0, 1, 1], [], []>} : vector<8x16xf32>, vector<16x128xf32>, vector<8x128xf32> -> vector<8x128xf32>
    %666 = tpu.concatenate %591, %628, %665 in 1 : vector<8x128xf32>, vector<8x128xf32>, vector<8x128xf32> -> vector<8x384xf32>
    %667 = arith.truncf %666 : vector<8x384xf32> to vector<8x384xbf16>
    %cst_281 = arith.constant dense<0.000000e+00> : vector<8x256xf32>
    %668 = tpu.matmul %667, %554, %cst_281 {dimension_numbers = #tpu.dot_dimension_numbers<[1], [0], [0], [1], [0, 0, 1, 1], [], []>} : vector<8x384xbf16>, vector<384x256xbf16>, vector<8x256xf32> -> vector<8x256xf32>
    %c0_282 = arith.constant 0 : index
    %c0_283 = arith.constant 0 : index
    %669 = vector.load %arg21[%c0_282, %c0_283] : memref<1x256xf32, #tpu.memory_space<vmem>>, vector<1x256xf32>
    %670 = vector.broadcast %669 : vector<1x256xf32> to vector<8x256xf32>
    %671 = arith.mulf %668, %670 : vector<8x256xf32>
    %c0_284 = arith.constant 0 : index
    %c0_285 = arith.constant 0 : index
    %672 = vector.load %arg22[%c0_284, %c0_285] : memref<1x256xf32, #tpu.memory_space<vmem>>, vector<1x256xf32>
    %673 = vector.broadcast %672 : vector<1x256xf32> to vector<8x256xf32>
    %674 = arith.addf %671, %673 : vector<8x256xf32>
    %cst_286 = arith.constant 0.000000e+00 : f32
    %675 = vector.broadcast %cst_286 : f32 to vector<8x256xf32>
    %676 = arith.maximumf %674, %675 : vector<8x256xf32>
    %677 = tpu.iota {dimensions = array<i32: 0>} : vector<8x16xi32>
    %678 = tpu.iota {dimensions = array<i32: 1>} : vector<8x16xi32>
    %c4_i32_287 = arith.constant 4 : i32
    %c0_i32_288 = arith.constant 0 : i32
    %679 = arith.cmpi eq, %c4_i32_287, %c0_i32_288 : i32
    %c1_i32_289 = arith.constant 1 : i32
    %680 = arith.select %679, %c1_i32_289, %c4_i32_287 : i32
    %681 = vector.broadcast %680 : i32 to vector<8x16xi32>
    %682 = arith.remsi %677, %681 : vector<8x16xi32>
    %c0_i32_290 = arith.constant 0 : i32
    %683 = vector.broadcast %c0_i32_290 : i32 to vector<8x16xi32>
    %684 = arith.cmpi ne, %682, %683 : vector<8x16xi32>
    %c0_i32_291 = arith.constant 0 : i32
    %685 = vector.broadcast %c0_i32_291 : i32 to vector<8x16xi32>
    %686 = arith.cmpi slt, %682, %685 : vector<8x16xi32>
    %c0_i32_292 = arith.constant 0 : i32
    %687 = arith.cmpi slt, %680, %c0_i32_292 : i32
    %688 = vector.broadcast %687 : i1 to vector<8x16xi1>
    %689 = vector.broadcast %688 : vector<8x16xi1> to vector<8x16xi1>
    %690 = arith.xori %686, %689 : vector<8x16xi1>
    %691 = arith.andi %690, %684 : vector<8x16xi1>
    %692 = vector.broadcast %680 : i32 to vector<8x16xi32>
    %693 = arith.addi %682, %692 : vector<8x16xi32>
    %694 = arith.select %691, %693, %682 : vector<8x16xi1>, vector<8x16xi32>
    %c2_i32_293 = arith.constant 2 : i32
    %695 = vector.broadcast %c2_i32_293 : i32 to vector<8x16xi32>
    %696 = arith.muli %695, %694 : vector<8x16xi32>
    %c0_i32_294 = arith.constant 0 : i32
    %697 = vector.broadcast %c0_i32_294 : i32 to vector<8x16xi32>
    %698 = arith.addi %696, %697 : vector<8x16xi32>
    %c2_i32_295 = arith.constant 2 : i32
    %699 = vector.broadcast %c2_i32_295 : i32 to vector<8x16xi32>
    %700 = arith.muli %699, %677 : vector<8x16xi32>
    %c0_i32_296 = arith.constant 0 : i32
    %701 = vector.broadcast %c0_i32_296 : i32 to vector<8x16xi32>
    %702 = arith.addi %700, %701 : vector<8x16xi32>
    %703 = arith.cmpi eq, %678, %702 : vector<8x16xi32>
    %c0_i32_297 = arith.constant 0 : i32
    %704 = vector.broadcast %c0_i32_297 : i32 to vector<8x16xi32>
    %705 = arith.cmpi sge, %698, %704 : vector<8x16xi32>
    %706 = arith.andi %703, %705 : vector<8x16xi1>
    %c8_i32_298 = arith.constant 8 : i32
    %707 = vector.broadcast %c8_i32_298 : i32 to vector<8x16xi32>
    %708 = arith.cmpi slt, %698, %707 : vector<8x16xi32>
    %709 = arith.andi %706, %708 : vector<8x16xi1>
    %cst_299 = arith.constant 1.000000e+00 : f32
    %cst_300 = arith.constant 0.000000e+00 : f32
    %710 = vector.broadcast %cst_299 : f32 to vector<8x16xf32>
    %711 = vector.broadcast %cst_300 : f32 to vector<8x16xf32>
    %712 = arith.select %709, %710, %711 : vector<8x16xi1>, vector<8x16xf32>
    %cst_301 = arith.constant dense<0.000000e+00> : vector<8x128xf32>
    %713 = tpu.matmul %712, %553, %cst_301 {dimension_numbers = #tpu.dot_dimension_numbers<[1], [0], [0], [1], [0, 0, 1, 1], [], []>} : vector<8x16xf32>, vector<16x128xf32>, vector<8x128xf32> -> vector<8x128xf32>
    %714 = arith.truncf %713 : vector<8x128xf32> to vector<8x128xbf16>
    %c0_302 = arith.constant 0 : index
    %c0_303 = arith.constant 0 : index
    %715 = vector.load %arg26[%c0_302, %c0_303] : memref<128x256xbf16, #tpu.memory_space<vmem>>, vector<128x256xbf16>
    %cst_304 = arith.constant dense<0.000000e+00> : vector<8x256xf32>
    %716 = tpu.matmul %714, %715, %cst_304 {dimension_numbers = #tpu.dot_dimension_numbers<[1], [0], [0], [1], [0, 0, 1, 1], [], []>} : vector<8x128xbf16>, vector<128x256xbf16>, vector<8x256xf32> -> vector<8x256xf32>
    %c0_305 = arith.constant 0 : index
    %c0_306 = arith.constant 0 : index
    %717 = vector.load %arg27[%c0_305, %c0_306] : memref<1x256xf32, #tpu.memory_space<vmem>>, vector<1x256xf32>
    %718 = vector.broadcast %717 : vector<1x256xf32> to vector<8x256xf32>
    %719 = arith.mulf %716, %718 : vector<8x256xf32>
    %c0_307 = arith.constant 0 : index
    %c0_308 = arith.constant 0 : index
    %720 = vector.load %arg28[%c0_307, %c0_308] : memref<1x256xf32, #tpu.memory_space<vmem>>, vector<1x256xf32>
    %721 = vector.broadcast %720 : vector<1x256xf32> to vector<8x256xf32>
    %722 = arith.addf %719, %721 : vector<8x256xf32>
    %c0_309 = arith.constant 0 : index
    %c0_310 = arith.constant 0 : index
    %723 = vector.load %arg23[%c0_309, %c0_310] : memref<768x256xbf16, #tpu.memory_space<vmem>>, vector<768x256xbf16>
    %724 = tpu.iota {dimensions = array<i32: 0>} : vector<8x8xi32>
    %725 = tpu.iota {dimensions = array<i32: 1>} : vector<8x8xi32>
    %c4_i32_311 = arith.constant 4 : i32
    %c0_i32_312 = arith.constant 0 : i32
    %726 = arith.cmpi eq, %c4_i32_311, %c0_i32_312 : i32
    %c1_i32_313 = arith.constant 1 : i32
    %727 = arith.select %726, %c1_i32_313, %c4_i32_311 : i32
    %728 = vector.broadcast %727 : i32 to vector<8x8xi32>
    %729 = arith.remsi %724, %728 : vector<8x8xi32>
    %c0_i32_314 = arith.constant 0 : i32
    %730 = vector.broadcast %c0_i32_314 : i32 to vector<8x8xi32>
    %731 = arith.cmpi ne, %729, %730 : vector<8x8xi32>
    %c0_i32_315 = arith.constant 0 : i32
    %732 = vector.broadcast %c0_i32_315 : i32 to vector<8x8xi32>
    %733 = arith.cmpi slt, %729, %732 : vector<8x8xi32>
    %c0_i32_316 = arith.constant 0 : i32
    %734 = arith.cmpi slt, %727, %c0_i32_316 : i32
    %735 = vector.broadcast %734 : i1 to vector<8x8xi1>
    %736 = vector.broadcast %735 : vector<8x8xi1> to vector<8x8xi1>
    %737 = arith.xori %733, %736 : vector<8x8xi1>
    %738 = arith.andi %737, %731 : vector<8x8xi1>
    %739 = vector.broadcast %727 : i32 to vector<8x8xi32>
    %740 = arith.addi %729, %739 : vector<8x8xi32>
    %741 = arith.select %738, %740, %729 : vector<8x8xi1>, vector<8x8xi32>
    %c1_i32_317 = arith.constant 1 : i32
    %742 = vector.broadcast %c1_i32_317 : i32 to vector<8x8xi32>
    %743 = arith.muli %742, %741 : vector<8x8xi32>
    %c-1_i32_318 = arith.constant -1 : i32
    %744 = vector.broadcast %c-1_i32_318 : i32 to vector<8x8xi32>
    %745 = arith.addi %743, %744 : vector<8x8xi32>
    %c1_i32_319 = arith.constant 1 : i32
    %746 = vector.broadcast %c1_i32_319 : i32 to vector<8x8xi32>
    %747 = arith.muli %746, %724 : vector<8x8xi32>
    %c-1_i32_320 = arith.constant -1 : i32
    %748 = vector.broadcast %c-1_i32_320 : i32 to vector<8x8xi32>
    %749 = arith.addi %747, %748 : vector<8x8xi32>
    %750 = arith.cmpi eq, %725, %749 : vector<8x8xi32>
    %c0_i32_321 = arith.constant 0 : i32
    %751 = vector.broadcast %c0_i32_321 : i32 to vector<8x8xi32>
    %752 = arith.cmpi sge, %745, %751 : vector<8x8xi32>
    %753 = arith.andi %750, %752 : vector<8x8xi1>
    %c4_i32_322 = arith.constant 4 : i32
    %754 = vector.broadcast %c4_i32_322 : i32 to vector<8x8xi32>
    %755 = arith.cmpi slt, %745, %754 : vector<8x8xi32>
    %756 = arith.andi %753, %755 : vector<8x8xi1>
    %cst_323 = arith.constant 1.000000e+00 : f32
    %cst_324 = arith.constant 0.000000e+00 : f32
    %757 = vector.broadcast %cst_323 : f32 to vector<8x8xf32>
    %758 = vector.broadcast %cst_324 : f32 to vector<8x8xf32>
    %759 = arith.select %756, %757, %758 : vector<8x8xi1>, vector<8x8xf32>
    %cst_325 = arith.constant dense<0.000000e+00> : vector<8x256xf32>
    %760 = tpu.matmul %759, %676, %cst_325 {dimension_numbers = #tpu.dot_dimension_numbers<[1], [0], [0], [1], [0, 0, 1, 1], [], []>} : vector<8x8xf32>, vector<8x256xf32>, vector<8x256xf32> -> vector<8x256xf32>
    %761 = tpu.iota {dimensions = array<i32: 0>} : vector<8x8xi32>
    %762 = tpu.iota {dimensions = array<i32: 1>} : vector<8x8xi32>
    %c4_i32_326 = arith.constant 4 : i32
    %c0_i32_327 = arith.constant 0 : i32
    %763 = arith.cmpi eq, %c4_i32_326, %c0_i32_327 : i32
    %c1_i32_328 = arith.constant 1 : i32
    %764 = arith.select %763, %c1_i32_328, %c4_i32_326 : i32
    %765 = vector.broadcast %764 : i32 to vector<8x8xi32>
    %766 = arith.remsi %761, %765 : vector<8x8xi32>
    %c0_i32_329 = arith.constant 0 : i32
    %767 = vector.broadcast %c0_i32_329 : i32 to vector<8x8xi32>
    %768 = arith.cmpi ne, %766, %767 : vector<8x8xi32>
    %c0_i32_330 = arith.constant 0 : i32
    %769 = vector.broadcast %c0_i32_330 : i32 to vector<8x8xi32>
    %770 = arith.cmpi slt, %766, %769 : vector<8x8xi32>
    %c0_i32_331 = arith.constant 0 : i32
    %771 = arith.cmpi slt, %764, %c0_i32_331 : i32
    %772 = vector.broadcast %771 : i1 to vector<8x8xi1>
    %773 = vector.broadcast %772 : vector<8x8xi1> to vector<8x8xi1>
    %774 = arith.xori %770, %773 : vector<8x8xi1>
    %775 = arith.andi %774, %768 : vector<8x8xi1>
    %776 = vector.broadcast %764 : i32 to vector<8x8xi32>
    %777 = arith.addi %766, %776 : vector<8x8xi32>
    %778 = arith.select %775, %777, %766 : vector<8x8xi1>, vector<8x8xi32>
    %c1_i32_332 = arith.constant 1 : i32
    %779 = vector.broadcast %c1_i32_332 : i32 to vector<8x8xi32>
    %780 = arith.muli %779, %778 : vector<8x8xi32>
    %c1_i32_333 = arith.constant 1 : i32
    %781 = vector.broadcast %c1_i32_333 : i32 to vector<8x8xi32>
    %782 = arith.addi %780, %781 : vector<8x8xi32>
    %c1_i32_334 = arith.constant 1 : i32
    %783 = vector.broadcast %c1_i32_334 : i32 to vector<8x8xi32>
    %784 = arith.muli %783, %761 : vector<8x8xi32>
    %c1_i32_335 = arith.constant 1 : i32
    %785 = vector.broadcast %c1_i32_335 : i32 to vector<8x8xi32>
    %786 = arith.addi %784, %785 : vector<8x8xi32>
    %787 = arith.cmpi eq, %762, %786 : vector<8x8xi32>
    %c0_i32_336 = arith.constant 0 : i32
    %788 = vector.broadcast %c0_i32_336 : i32 to vector<8x8xi32>
    %789 = arith.cmpi sge, %782, %788 : vector<8x8xi32>
    %790 = arith.andi %787, %789 : vector<8x8xi1>
    %c4_i32_337 = arith.constant 4 : i32
    %791 = vector.broadcast %c4_i32_337 : i32 to vector<8x8xi32>
    %792 = arith.cmpi slt, %782, %791 : vector<8x8xi32>
    %793 = arith.andi %790, %792 : vector<8x8xi1>
    %cst_338 = arith.constant 1.000000e+00 : f32
    %cst_339 = arith.constant 0.000000e+00 : f32
    %794 = vector.broadcast %cst_338 : f32 to vector<8x8xf32>
    %795 = vector.broadcast %cst_339 : f32 to vector<8x8xf32>
    %796 = arith.select %793, %794, %795 : vector<8x8xi1>, vector<8x8xf32>
    %cst_340 = arith.constant dense<0.000000e+00> : vector<8x256xf32>
    %797 = tpu.matmul %796, %676, %cst_340 {dimension_numbers = #tpu.dot_dimension_numbers<[1], [0], [0], [1], [0, 0, 1, 1], [], []>} : vector<8x8xf32>, vector<8x256xf32>, vector<8x256xf32> -> vector<8x256xf32>
    %798 = tpu.concatenate %760, %676, %797 in 1 : vector<8x256xf32>, vector<8x256xf32>, vector<8x256xf32> -> vector<8x768xf32>
    %799 = arith.truncf %798 : vector<8x768xf32> to vector<8x768xbf16>
    %cst_341 = arith.constant dense<0.000000e+00> : vector<8x256xf32>
    %800 = tpu.matmul %799, %723, %cst_341 {dimension_numbers = #tpu.dot_dimension_numbers<[1], [0], [0], [1], [0, 0, 1, 1], [], []>} : vector<8x768xbf16>, vector<768x256xbf16>, vector<8x256xf32> -> vector<8x256xf32>
    %c0_342 = arith.constant 0 : index
    %c0_343 = arith.constant 0 : index
    %801 = vector.load %arg24[%c0_342, %c0_343] : memref<1x256xf32, #tpu.memory_space<vmem>>, vector<1x256xf32>
    %802 = vector.broadcast %801 : vector<1x256xf32> to vector<8x256xf32>
    %803 = arith.mulf %800, %802 : vector<8x256xf32>
    %c0_344 = arith.constant 0 : index
    %c0_345 = arith.constant 0 : index
    %804 = vector.load %arg25[%c0_344, %c0_345] : memref<1x256xf32, #tpu.memory_space<vmem>>, vector<1x256xf32>
    %805 = vector.broadcast %804 : vector<1x256xf32> to vector<8x256xf32>
    %806 = arith.addf %803, %805 : vector<8x256xf32>
    %807 = arith.addf %806, %722 : vector<8x256xf32>
    %cst_346 = arith.constant 0.000000e+00 : f32
    %808 = vector.broadcast %cst_346 : f32 to vector<8x256xf32>
    %809 = arith.maximumf %807, %808 : vector<8x256xf32>
    %c0_347 = arith.constant 0 : index
    %c0_348 = arith.constant 0 : index
    %810 = vector.load %arg29[%c0_347, %c0_348] : memref<768x512xbf16, #tpu.memory_space<vmem>>, vector<768x512xbf16>
    %811 = tpu.iota {dimensions = array<i32: 0>} : vector<4x8xi32>
    %812 = tpu.iota {dimensions = array<i32: 1>} : vector<4x8xi32>
    %c2_i32_349 = arith.constant 2 : i32
    %c0_i32_350 = arith.constant 0 : i32
    %813 = arith.cmpi eq, %c2_i32_349, %c0_i32_350 : i32
    %c1_i32_351 = arith.constant 1 : i32
    %814 = arith.select %813, %c1_i32_351, %c2_i32_349 : i32
    %815 = vector.broadcast %814 : i32 to vector<4x8xi32>
    %816 = arith.remsi %811, %815 : vector<4x8xi32>
    %c0_i32_352 = arith.constant 0 : i32
    %817 = vector.broadcast %c0_i32_352 : i32 to vector<4x8xi32>
    %818 = arith.cmpi ne, %816, %817 : vector<4x8xi32>
    %c0_i32_353 = arith.constant 0 : i32
    %819 = vector.broadcast %c0_i32_353 : i32 to vector<4x8xi32>
    %820 = arith.cmpi slt, %816, %819 : vector<4x8xi32>
    %c0_i32_354 = arith.constant 0 : i32
    %821 = arith.cmpi slt, %814, %c0_i32_354 : i32
    %822 = vector.broadcast %821 : i1 to vector<4x8xi1>
    %823 = vector.broadcast %822 : vector<4x8xi1> to vector<4x8xi1>
    %824 = arith.xori %820, %823 : vector<4x8xi1>
    %825 = arith.andi %824, %818 : vector<4x8xi1>
    %826 = vector.broadcast %814 : i32 to vector<4x8xi32>
    %827 = arith.addi %816, %826 : vector<4x8xi32>
    %828 = arith.select %825, %827, %816 : vector<4x8xi1>, vector<4x8xi32>
    %c2_i32_355 = arith.constant 2 : i32
    %829 = vector.broadcast %c2_i32_355 : i32 to vector<4x8xi32>
    %830 = arith.muli %829, %828 : vector<4x8xi32>
    %c-1_i32_356 = arith.constant -1 : i32
    %831 = vector.broadcast %c-1_i32_356 : i32 to vector<4x8xi32>
    %832 = arith.addi %830, %831 : vector<4x8xi32>
    %c2_i32_357 = arith.constant 2 : i32
    %833 = vector.broadcast %c2_i32_357 : i32 to vector<4x8xi32>
    %834 = arith.muli %833, %811 : vector<4x8xi32>
    %c-1_i32_358 = arith.constant -1 : i32
    %835 = vector.broadcast %c-1_i32_358 : i32 to vector<4x8xi32>
    %836 = arith.addi %834, %835 : vector<4x8xi32>
    %837 = arith.cmpi eq, %812, %836 : vector<4x8xi32>
    %c0_i32_359 = arith.constant 0 : i32
    %838 = vector.broadcast %c0_i32_359 : i32 to vector<4x8xi32>
    %839 = arith.cmpi sge, %832, %838 : vector<4x8xi32>
    %840 = arith.andi %837, %839 : vector<4x8xi1>
    %c4_i32_360 = arith.constant 4 : i32
    %841 = vector.broadcast %c4_i32_360 : i32 to vector<4x8xi32>
    %842 = arith.cmpi slt, %832, %841 : vector<4x8xi32>
    %843 = arith.andi %840, %842 : vector<4x8xi1>
    %cst_361 = arith.constant 1.000000e+00 : f32
    %cst_362 = arith.constant 0.000000e+00 : f32
    %844 = vector.broadcast %cst_361 : f32 to vector<4x8xf32>
    %845 = vector.broadcast %cst_362 : f32 to vector<4x8xf32>
    %846 = arith.select %843, %844, %845 : vector<4x8xi1>, vector<4x8xf32>
    %cst_363 = arith.constant dense<0.000000e+00> : vector<4x256xf32>
    %847 = tpu.matmul %846, %809, %cst_363 {dimension_numbers = #tpu.dot_dimension_numbers<[1], [0], [0], [1], [0, 0, 1, 1], [], []>} : vector<4x8xf32>, vector<8x256xf32>, vector<4x256xf32> -> vector<4x256xf32>
    %848 = tpu.iota {dimensions = array<i32: 0>} : vector<4x8xi32>
    %849 = tpu.iota {dimensions = array<i32: 1>} : vector<4x8xi32>
    %c2_i32_364 = arith.constant 2 : i32
    %c0_i32_365 = arith.constant 0 : i32
    %850 = arith.cmpi eq, %c2_i32_364, %c0_i32_365 : i32
    %c1_i32_366 = arith.constant 1 : i32
    %851 = arith.select %850, %c1_i32_366, %c2_i32_364 : i32
    %852 = vector.broadcast %851 : i32 to vector<4x8xi32>
    %853 = arith.remsi %848, %852 : vector<4x8xi32>
    %c0_i32_367 = arith.constant 0 : i32
    %854 = vector.broadcast %c0_i32_367 : i32 to vector<4x8xi32>
    %855 = arith.cmpi ne, %853, %854 : vector<4x8xi32>
    %c0_i32_368 = arith.constant 0 : i32
    %856 = vector.broadcast %c0_i32_368 : i32 to vector<4x8xi32>
    %857 = arith.cmpi slt, %853, %856 : vector<4x8xi32>
    %c0_i32_369 = arith.constant 0 : i32
    %858 = arith.cmpi slt, %851, %c0_i32_369 : i32
    %859 = vector.broadcast %858 : i1 to vector<4x8xi1>
    %860 = vector.broadcast %859 : vector<4x8xi1> to vector<4x8xi1>
    %861 = arith.xori %857, %860 : vector<4x8xi1>
    %862 = arith.andi %861, %855 : vector<4x8xi1>
    %863 = vector.broadcast %851 : i32 to vector<4x8xi32>
    %864 = arith.addi %853, %863 : vector<4x8xi32>
    %865 = arith.select %862, %864, %853 : vector<4x8xi1>, vector<4x8xi32>
    %c2_i32_370 = arith.constant 2 : i32
    %866 = vector.broadcast %c2_i32_370 : i32 to vector<4x8xi32>
    %867 = arith.muli %866, %865 : vector<4x8xi32>
    %c0_i32_371 = arith.constant 0 : i32
    %868 = vector.broadcast %c0_i32_371 : i32 to vector<4x8xi32>
    %869 = arith.addi %867, %868 : vector<4x8xi32>
    %c2_i32_372 = arith.constant 2 : i32
    %870 = vector.broadcast %c2_i32_372 : i32 to vector<4x8xi32>
    %871 = arith.muli %870, %848 : vector<4x8xi32>
    %c0_i32_373 = arith.constant 0 : i32
    %872 = vector.broadcast %c0_i32_373 : i32 to vector<4x8xi32>
    %873 = arith.addi %871, %872 : vector<4x8xi32>
    %874 = arith.cmpi eq, %849, %873 : vector<4x8xi32>
    %c0_i32_374 = arith.constant 0 : i32
    %875 = vector.broadcast %c0_i32_374 : i32 to vector<4x8xi32>
    %876 = arith.cmpi sge, %869, %875 : vector<4x8xi32>
    %877 = arith.andi %874, %876 : vector<4x8xi1>
    %c4_i32_375 = arith.constant 4 : i32
    %878 = vector.broadcast %c4_i32_375 : i32 to vector<4x8xi32>
    %879 = arith.cmpi slt, %869, %878 : vector<4x8xi32>
    %880 = arith.andi %877, %879 : vector<4x8xi1>
    %cst_376 = arith.constant 1.000000e+00 : f32
    %cst_377 = arith.constant 0.000000e+00 : f32
    %881 = vector.broadcast %cst_376 : f32 to vector<4x8xf32>
    %882 = vector.broadcast %cst_377 : f32 to vector<4x8xf32>
    %883 = arith.select %880, %881, %882 : vector<4x8xi1>, vector<4x8xf32>
    %cst_378 = arith.constant dense<0.000000e+00> : vector<4x256xf32>
    %884 = tpu.matmul %883, %809, %cst_378 {dimension_numbers = #tpu.dot_dimension_numbers<[1], [0], [0], [1], [0, 0, 1, 1], [], []>} : vector<4x8xf32>, vector<8x256xf32>, vector<4x256xf32> -> vector<4x256xf32>
    %885 = tpu.iota {dimensions = array<i32: 0>} : vector<4x8xi32>
    %886 = tpu.iota {dimensions = array<i32: 1>} : vector<4x8xi32>
    %c2_i32_379 = arith.constant 2 : i32
    %c0_i32_380 = arith.constant 0 : i32
    %887 = arith.cmpi eq, %c2_i32_379, %c0_i32_380 : i32
    %c1_i32_381 = arith.constant 1 : i32
    %888 = arith.select %887, %c1_i32_381, %c2_i32_379 : i32
    %889 = vector.broadcast %888 : i32 to vector<4x8xi32>
    %890 = arith.remsi %885, %889 : vector<4x8xi32>
    %c0_i32_382 = arith.constant 0 : i32
    %891 = vector.broadcast %c0_i32_382 : i32 to vector<4x8xi32>
    %892 = arith.cmpi ne, %890, %891 : vector<4x8xi32>
    %c0_i32_383 = arith.constant 0 : i32
    %893 = vector.broadcast %c0_i32_383 : i32 to vector<4x8xi32>
    %894 = arith.cmpi slt, %890, %893 : vector<4x8xi32>
    %c0_i32_384 = arith.constant 0 : i32
    %895 = arith.cmpi slt, %888, %c0_i32_384 : i32
    %896 = vector.broadcast %895 : i1 to vector<4x8xi1>
    %897 = vector.broadcast %896 : vector<4x8xi1> to vector<4x8xi1>
    %898 = arith.xori %894, %897 : vector<4x8xi1>
    %899 = arith.andi %898, %892 : vector<4x8xi1>
    %900 = vector.broadcast %888 : i32 to vector<4x8xi32>
    %901 = arith.addi %890, %900 : vector<4x8xi32>
    %902 = arith.select %899, %901, %890 : vector<4x8xi1>, vector<4x8xi32>
    %c2_i32_385 = arith.constant 2 : i32
    %903 = vector.broadcast %c2_i32_385 : i32 to vector<4x8xi32>
    %904 = arith.muli %903, %902 : vector<4x8xi32>
    %c1_i32_386 = arith.constant 1 : i32
    %905 = vector.broadcast %c1_i32_386 : i32 to vector<4x8xi32>
    %906 = arith.addi %904, %905 : vector<4x8xi32>
    %c2_i32_387 = arith.constant 2 : i32
    %907 = vector.broadcast %c2_i32_387 : i32 to vector<4x8xi32>
    %908 = arith.muli %907, %885 : vector<4x8xi32>
    %c1_i32_388 = arith.constant 1 : i32
    %909 = vector.broadcast %c1_i32_388 : i32 to vector<4x8xi32>
    %910 = arith.addi %908, %909 : vector<4x8xi32>
    %911 = arith.cmpi eq, %886, %910 : vector<4x8xi32>
    %c0_i32_389 = arith.constant 0 : i32
    %912 = vector.broadcast %c0_i32_389 : i32 to vector<4x8xi32>
    %913 = arith.cmpi sge, %906, %912 : vector<4x8xi32>
    %914 = arith.andi %911, %913 : vector<4x8xi1>
    %c4_i32_390 = arith.constant 4 : i32
    %915 = vector.broadcast %c4_i32_390 : i32 to vector<4x8xi32>
    %916 = arith.cmpi slt, %906, %915 : vector<4x8xi32>
    %917 = arith.andi %914, %916 : vector<4x8xi1>
    %cst_391 = arith.constant 1.000000e+00 : f32
    %cst_392 = arith.constant 0.000000e+00 : f32
    %918 = vector.broadcast %cst_391 : f32 to vector<4x8xf32>
    %919 = vector.broadcast %cst_392 : f32 to vector<4x8xf32>
    %920 = arith.select %917, %918, %919 : vector<4x8xi1>, vector<4x8xf32>
    %cst_393 = arith.constant dense<0.000000e+00> : vector<4x256xf32>
    %921 = tpu.matmul %920, %809, %cst_393 {dimension_numbers = #tpu.dot_dimension_numbers<[1], [0], [0], [1], [0, 0, 1, 1], [], []>} : vector<4x8xf32>, vector<8x256xf32>, vector<4x256xf32> -> vector<4x256xf32>
    %922 = tpu.concatenate %847, %884, %921 in 1 : vector<4x256xf32>, vector<4x256xf32>, vector<4x256xf32> -> vector<4x768xf32>
    %923 = arith.truncf %922 : vector<4x768xf32> to vector<4x768xbf16>
    %cst_394 = arith.constant dense<0.000000e+00> : vector<4x512xf32>
    %924 = tpu.matmul %923, %810, %cst_394 {dimension_numbers = #tpu.dot_dimension_numbers<[1], [0], [0], [1], [0, 0, 1, 1], [], []>} : vector<4x768xbf16>, vector<768x512xbf16>, vector<4x512xf32> -> vector<4x512xf32>
    %c0_395 = arith.constant 0 : index
    %c0_396 = arith.constant 0 : index
    %925 = vector.load %arg30[%c0_395, %c0_396] : memref<1x512xf32, #tpu.memory_space<vmem>>, vector<1x512xf32>
    %926 = vector.broadcast %925 : vector<1x512xf32> to vector<4x512xf32>
    %927 = arith.mulf %924, %926 : vector<4x512xf32>
    %c0_397 = arith.constant 0 : index
    %c0_398 = arith.constant 0 : index
    %928 = vector.load %arg31[%c0_397, %c0_398] : memref<1x512xf32, #tpu.memory_space<vmem>>, vector<1x512xf32>
    %929 = vector.broadcast %928 : vector<1x512xf32> to vector<4x512xf32>
    %930 = arith.addf %927, %929 : vector<4x512xf32>
    %cst_399 = arith.constant 0.000000e+00 : f32
    %931 = vector.broadcast %cst_399 : f32 to vector<4x512xf32>
    %932 = arith.maximumf %930, %931 : vector<4x512xf32>
    %933 = tpu.iota {dimensions = array<i32: 0>} : vector<4x8xi32>
    %934 = tpu.iota {dimensions = array<i32: 1>} : vector<4x8xi32>
    %c2_i32_400 = arith.constant 2 : i32
    %c0_i32_401 = arith.constant 0 : i32
    %935 = arith.cmpi eq, %c2_i32_400, %c0_i32_401 : i32
    %c1_i32_402 = arith.constant 1 : i32
    %936 = arith.select %935, %c1_i32_402, %c2_i32_400 : i32
    %937 = vector.broadcast %936 : i32 to vector<4x8xi32>
    %938 = arith.remsi %933, %937 : vector<4x8xi32>
    %c0_i32_403 = arith.constant 0 : i32
    %939 = vector.broadcast %c0_i32_403 : i32 to vector<4x8xi32>
    %940 = arith.cmpi ne, %938, %939 : vector<4x8xi32>
    %c0_i32_404 = arith.constant 0 : i32
    %941 = vector.broadcast %c0_i32_404 : i32 to vector<4x8xi32>
    %942 = arith.cmpi slt, %938, %941 : vector<4x8xi32>
    %c0_i32_405 = arith.constant 0 : i32
    %943 = arith.cmpi slt, %936, %c0_i32_405 : i32
    %944 = vector.broadcast %943 : i1 to vector<4x8xi1>
    %945 = vector.broadcast %944 : vector<4x8xi1> to vector<4x8xi1>
    %946 = arith.xori %942, %945 : vector<4x8xi1>
    %947 = arith.andi %946, %940 : vector<4x8xi1>
    %948 = vector.broadcast %936 : i32 to vector<4x8xi32>
    %949 = arith.addi %938, %948 : vector<4x8xi32>
    %950 = arith.select %947, %949, %938 : vector<4x8xi1>, vector<4x8xi32>
    %c2_i32_406 = arith.constant 2 : i32
    %951 = vector.broadcast %c2_i32_406 : i32 to vector<4x8xi32>
    %952 = arith.muli %951, %950 : vector<4x8xi32>
    %c0_i32_407 = arith.constant 0 : i32
    %953 = vector.broadcast %c0_i32_407 : i32 to vector<4x8xi32>
    %954 = arith.addi %952, %953 : vector<4x8xi32>
    %c2_i32_408 = arith.constant 2 : i32
    %955 = vector.broadcast %c2_i32_408 : i32 to vector<4x8xi32>
    %956 = arith.muli %955, %933 : vector<4x8xi32>
    %c0_i32_409 = arith.constant 0 : i32
    %957 = vector.broadcast %c0_i32_409 : i32 to vector<4x8xi32>
    %958 = arith.addi %956, %957 : vector<4x8xi32>
    %959 = arith.cmpi eq, %934, %958 : vector<4x8xi32>
    %c0_i32_410 = arith.constant 0 : i32
    %960 = vector.broadcast %c0_i32_410 : i32 to vector<4x8xi32>
    %961 = arith.cmpi sge, %954, %960 : vector<4x8xi32>
    %962 = arith.andi %959, %961 : vector<4x8xi1>
    %c4_i32_411 = arith.constant 4 : i32
    %963 = vector.broadcast %c4_i32_411 : i32 to vector<4x8xi32>
    %964 = arith.cmpi slt, %954, %963 : vector<4x8xi32>
    %965 = arith.andi %962, %964 : vector<4x8xi1>
    %cst_412 = arith.constant 1.000000e+00 : f32
    %cst_413 = arith.constant 0.000000e+00 : f32
    %966 = vector.broadcast %cst_412 : f32 to vector<4x8xf32>
    %967 = vector.broadcast %cst_413 : f32 to vector<4x8xf32>
    %968 = arith.select %965, %966, %967 : vector<4x8xi1>, vector<4x8xf32>
    %cst_414 = arith.constant dense<0.000000e+00> : vector<4x256xf32>
    %969 = tpu.matmul %968, %809, %cst_414 {dimension_numbers = #tpu.dot_dimension_numbers<[1], [0], [0], [1], [0, 0, 1, 1], [], []>} : vector<4x8xf32>, vector<8x256xf32>, vector<4x256xf32> -> vector<4x256xf32>
    %970 = arith.truncf %969 : vector<4x256xf32> to vector<4x256xbf16>
    %c0_415 = arith.constant 0 : index
    %c0_416 = arith.constant 0 : index
    %971 = vector.load %arg35[%c0_415, %c0_416] : memref<256x512xbf16, #tpu.memory_space<vmem>>, vector<256x512xbf16>
    %cst_417 = arith.constant dense<0.000000e+00> : vector<4x512xf32>
    %972 = tpu.matmul %970, %971, %cst_417 {dimension_numbers = #tpu.dot_dimension_numbers<[1], [0], [0], [1], [0, 0, 1, 1], [], []>} : vector<4x256xbf16>, vector<256x512xbf16>, vector<4x512xf32> -> vector<4x512xf32>
    %c0_418 = arith.constant 0 : index
    %c0_419 = arith.constant 0 : index
    %973 = vector.load %arg36[%c0_418, %c0_419] : memref<1x512xf32, #tpu.memory_space<vmem>>, vector<1x512xf32>
    %974 = vector.broadcast %973 : vector<1x512xf32> to vector<4x512xf32>
    %975 = arith.mulf %972, %974 : vector<4x512xf32>
    %c0_420 = arith.constant 0 : index
    %c0_421 = arith.constant 0 : index
    %976 = vector.load %arg37[%c0_420, %c0_421] : memref<1x512xf32, #tpu.memory_space<vmem>>, vector<1x512xf32>
    %977 = vector.broadcast %976 : vector<1x512xf32> to vector<4x512xf32>
    %978 = arith.addf %975, %977 : vector<4x512xf32>
    %c0_422 = arith.constant 0 : index
    %c0_423 = arith.constant 0 : index
    %979 = vector.load %arg32[%c0_422, %c0_423] : memref<1536x512xbf16, #tpu.memory_space<vmem>>, vector<1536x512xbf16>
    %980 = tpu.iota {dimensions = array<i32: 0>} : vector<4x4xi32>
    %981 = tpu.iota {dimensions = array<i32: 1>} : vector<4x4xi32>
    %c2_i32_424 = arith.constant 2 : i32
    %c0_i32_425 = arith.constant 0 : i32
    %982 = arith.cmpi eq, %c2_i32_424, %c0_i32_425 : i32
    %c1_i32_426 = arith.constant 1 : i32
    %983 = arith.select %982, %c1_i32_426, %c2_i32_424 : i32
    %984 = vector.broadcast %983 : i32 to vector<4x4xi32>
    %985 = arith.remsi %980, %984 : vector<4x4xi32>
    %c0_i32_427 = arith.constant 0 : i32
    %986 = vector.broadcast %c0_i32_427 : i32 to vector<4x4xi32>
    %987 = arith.cmpi ne, %985, %986 : vector<4x4xi32>
    %c0_i32_428 = arith.constant 0 : i32
    %988 = vector.broadcast %c0_i32_428 : i32 to vector<4x4xi32>
    %989 = arith.cmpi slt, %985, %988 : vector<4x4xi32>
    %c0_i32_429 = arith.constant 0 : i32
    %990 = arith.cmpi slt, %983, %c0_i32_429 : i32
    %991 = vector.broadcast %990 : i1 to vector<4x4xi1>
    %992 = vector.broadcast %991 : vector<4x4xi1> to vector<4x4xi1>
    %993 = arith.xori %989, %992 : vector<4x4xi1>
    %994 = arith.andi %993, %987 : vector<4x4xi1>
    %995 = vector.broadcast %983 : i32 to vector<4x4xi32>
    %996 = arith.addi %985, %995 : vector<4x4xi32>
    %997 = arith.select %994, %996, %985 : vector<4x4xi1>, vector<4x4xi32>
    %c1_i32_430 = arith.constant 1 : i32
    %998 = vector.broadcast %c1_i32_430 : i32 to vector<4x4xi32>
    %999 = arith.muli %998, %997 : vector<4x4xi32>
    %c-1_i32_431 = arith.constant -1 : i32
    %1000 = vector.broadcast %c-1_i32_431 : i32 to vector<4x4xi32>
    %1001 = arith.addi %999, %1000 : vector<4x4xi32>
    %c1_i32_432 = arith.constant 1 : i32
    %1002 = vector.broadcast %c1_i32_432 : i32 to vector<4x4xi32>
    %1003 = arith.muli %1002, %980 : vector<4x4xi32>
    %c-1_i32_433 = arith.constant -1 : i32
    %1004 = vector.broadcast %c-1_i32_433 : i32 to vector<4x4xi32>
    %1005 = arith.addi %1003, %1004 : vector<4x4xi32>
    %1006 = arith.cmpi eq, %981, %1005 : vector<4x4xi32>
    %c0_i32_434 = arith.constant 0 : i32
    %1007 = vector.broadcast %c0_i32_434 : i32 to vector<4x4xi32>
    %1008 = arith.cmpi sge, %1001, %1007 : vector<4x4xi32>
    %1009 = arith.andi %1006, %1008 : vector<4x4xi1>
    %c2_i32_435 = arith.constant 2 : i32
    %1010 = vector.broadcast %c2_i32_435 : i32 to vector<4x4xi32>
    %1011 = arith.cmpi slt, %1001, %1010 : vector<4x4xi32>
    %1012 = arith.andi %1009, %1011 : vector<4x4xi1>
    %cst_436 = arith.constant 1.000000e+00 : f32
    %cst_437 = arith.constant 0.000000e+00 : f32
    %1013 = vector.broadcast %cst_436 : f32 to vector<4x4xf32>
    %1014 = vector.broadcast %cst_437 : f32 to vector<4x4xf32>
    %1015 = arith.select %1012, %1013, %1014 : vector<4x4xi1>, vector<4x4xf32>
    %cst_438 = arith.constant dense<0.000000e+00> : vector<4x512xf32>
    %1016 = tpu.matmul %1015, %932, %cst_438 {dimension_numbers = #tpu.dot_dimension_numbers<[1], [0], [0], [1], [0, 0, 1, 1], [], []>} : vector<4x4xf32>, vector<4x512xf32>, vector<4x512xf32> -> vector<4x512xf32>
    %1017 = tpu.iota {dimensions = array<i32: 0>} : vector<4x4xi32>
    %1018 = tpu.iota {dimensions = array<i32: 1>} : vector<4x4xi32>
    %c2_i32_439 = arith.constant 2 : i32
    %c0_i32_440 = arith.constant 0 : i32
    %1019 = arith.cmpi eq, %c2_i32_439, %c0_i32_440 : i32
    %c1_i32_441 = arith.constant 1 : i32
    %1020 = arith.select %1019, %c1_i32_441, %c2_i32_439 : i32
    %1021 = vector.broadcast %1020 : i32 to vector<4x4xi32>
    %1022 = arith.remsi %1017, %1021 : vector<4x4xi32>
    %c0_i32_442 = arith.constant 0 : i32
    %1023 = vector.broadcast %c0_i32_442 : i32 to vector<4x4xi32>
    %1024 = arith.cmpi ne, %1022, %1023 : vector<4x4xi32>
    %c0_i32_443 = arith.constant 0 : i32
    %1025 = vector.broadcast %c0_i32_443 : i32 to vector<4x4xi32>
    %1026 = arith.cmpi slt, %1022, %1025 : vector<4x4xi32>
    %c0_i32_444 = arith.constant 0 : i32
    %1027 = arith.cmpi slt, %1020, %c0_i32_444 : i32
    %1028 = vector.broadcast %1027 : i1 to vector<4x4xi1>
    %1029 = vector.broadcast %1028 : vector<4x4xi1> to vector<4x4xi1>
    %1030 = arith.xori %1026, %1029 : vector<4x4xi1>
    %1031 = arith.andi %1030, %1024 : vector<4x4xi1>
    %1032 = vector.broadcast %1020 : i32 to vector<4x4xi32>
    %1033 = arith.addi %1022, %1032 : vector<4x4xi32>
    %1034 = arith.select %1031, %1033, %1022 : vector<4x4xi1>, vector<4x4xi32>
    %c1_i32_445 = arith.constant 1 : i32
    %1035 = vector.broadcast %c1_i32_445 : i32 to vector<4x4xi32>
    %1036 = arith.muli %1035, %1034 : vector<4x4xi32>
    %c1_i32_446 = arith.constant 1 : i32
    %1037 = vector.broadcast %c1_i32_446 : i32 to vector<4x4xi32>
    %1038 = arith.addi %1036, %1037 : vector<4x4xi32>
    %c1_i32_447 = arith.constant 1 : i32
    %1039 = vector.broadcast %c1_i32_447 : i32 to vector<4x4xi32>
    %1040 = arith.muli %1039, %1017 : vector<4x4xi32>
    %c1_i32_448 = arith.constant 1 : i32
    %1041 = vector.broadcast %c1_i32_448 : i32 to vector<4x4xi32>
    %1042 = arith.addi %1040, %1041 : vector<4x4xi32>
    %1043 = arith.cmpi eq, %1018, %1042 : vector<4x4xi32>
    %c0_i32_449 = arith.constant 0 : i32
    %1044 = vector.broadcast %c0_i32_449 : i32 to vector<4x4xi32>
    %1045 = arith.cmpi sge, %1038, %1044 : vector<4x4xi32>
    %1046 = arith.andi %1043, %1045 : vector<4x4xi1>
    %c2_i32_450 = arith.constant 2 : i32
    %1047 = vector.broadcast %c2_i32_450 : i32 to vector<4x4xi32>
    %1048 = arith.cmpi slt, %1038, %1047 : vector<4x4xi32>
    %1049 = arith.andi %1046, %1048 : vector<4x4xi1>
    %cst_451 = arith.constant 1.000000e+00 : f32
    %cst_452 = arith.constant 0.000000e+00 : f32
    %1050 = vector.broadcast %cst_451 : f32 to vector<4x4xf32>
    %1051 = vector.broadcast %cst_452 : f32 to vector<4x4xf32>
    %1052 = arith.select %1049, %1050, %1051 : vector<4x4xi1>, vector<4x4xf32>
    %cst_453 = arith.constant dense<0.000000e+00> : vector<4x512xf32>
    %1053 = tpu.matmul %1052, %932, %cst_453 {dimension_numbers = #tpu.dot_dimension_numbers<[1], [0], [0], [1], [0, 0, 1, 1], [], []>} : vector<4x4xf32>, vector<4x512xf32>, vector<4x512xf32> -> vector<4x512xf32>
    %1054 = tpu.concatenate %1016, %932, %1053 in 1 : vector<4x512xf32>, vector<4x512xf32>, vector<4x512xf32> -> vector<4x1536xf32>
    %1055 = arith.truncf %1054 : vector<4x1536xf32> to vector<4x1536xbf16>
    %cst_454 = arith.constant dense<0.000000e+00> : vector<4x512xf32>
    %1056 = tpu.matmul %1055, %979, %cst_454 {dimension_numbers = #tpu.dot_dimension_numbers<[1], [0], [0], [1], [0, 0, 1, 1], [], []>} : vector<4x1536xbf16>, vector<1536x512xbf16>, vector<4x512xf32> -> vector<4x512xf32>
    %c0_455 = arith.constant 0 : index
    %c0_456 = arith.constant 0 : index
    %1057 = vector.load %arg33[%c0_455, %c0_456] : memref<1x512xf32, #tpu.memory_space<vmem>>, vector<1x512xf32>
    %1058 = vector.broadcast %1057 : vector<1x512xf32> to vector<4x512xf32>
    %1059 = arith.mulf %1056, %1058 : vector<4x512xf32>
    %c0_457 = arith.constant 0 : index
    %c0_458 = arith.constant 0 : index
    %1060 = vector.load %arg34[%c0_457, %c0_458] : memref<1x512xf32, #tpu.memory_space<vmem>>, vector<1x512xf32>
    %1061 = vector.broadcast %1060 : vector<1x512xf32> to vector<4x512xf32>
    %1062 = arith.addf %1059, %1061 : vector<4x512xf32>
    %1063 = arith.addf %1062, %978 : vector<4x512xf32>
    %cst_459 = arith.constant 0.000000e+00 : f32
    %1064 = vector.broadcast %cst_459 : f32 to vector<4x512xf32>
    %1065 = arith.maximumf %1063, %1064 : vector<4x512xf32>
    %1066 = tpu.iota {dimensions = array<i32: 0>} : vector<2x4xi32>
    %1067 = tpu.iota {dimensions = array<i32: 1>} : vector<2x4xi32>
    %c2_i32_460 = arith.constant 2 : i32
    %1068 = vector.broadcast %c2_i32_460 : i32 to vector<2x4xi32>
    %1069 = arith.muli %1066, %1068 : vector<2x4xi32>
    %1070 = arith.cmpi sge, %1067, %1069 : vector<2x4xi32>
    %c1_i32_461 = arith.constant 1 : i32
    %1071 = vector.broadcast %c1_i32_461 : i32 to vector<2x4xi32>
    %1072 = arith.addi %1066, %1071 : vector<2x4xi32>
    %c2_i32_462 = arith.constant 2 : i32
    %1073 = vector.broadcast %c2_i32_462 : i32 to vector<2x4xi32>
    %1074 = arith.muli %1072, %1073 : vector<2x4xi32>
    %1075 = arith.cmpi slt, %1067, %1074 : vector<2x4xi32>
    %1076 = arith.andi %1070, %1075 : vector<2x4xi1>
    %cst_463 = arith.constant 5.000000e-01 : f32
    %cst_464 = arith.constant 0.000000e+00 : f32
    %1077 = vector.broadcast %cst_463 : f32 to vector<2x4xf32>
    %1078 = vector.broadcast %cst_464 : f32 to vector<2x4xf32>
    %1079 = arith.select %1076, %1077, %1078 : vector<2x4xi1>, vector<2x4xf32>
    %cst_465 = arith.constant dense<0.000000e+00> : vector<2x512xf32>
    %1080 = tpu.matmul %1079, %1065, %cst_465 {dimension_numbers = #tpu.dot_dimension_numbers<[1], [0], [0], [1], [0, 0, 1, 1], [], []>} : vector<2x4xf32>, vector<4x512xf32>, vector<2x512xf32> -> vector<2x512xf32>
    %c0_466 = arith.constant 0 : index
    %c0_467 = arith.constant 0 : index
    %1081 = vector.load %arg38[%c0_466, %c0_467] : memref<512x4xf32, #tpu.memory_space<vmem>>, vector<512x4xf32>
    %cst_468 = arith.constant dense<0.000000e+00> : vector<2x4xf32>
    %1082 = tpu.matmul %1080, %1081, %cst_468 {dimension_numbers = #tpu.dot_dimension_numbers<[1], [0], [0], [1], [0, 0, 1, 1], [], []>} : vector<2x512xf32>, vector<512x4xf32>, vector<2x4xf32> -> vector<2x4xf32>
    %c0_469 = arith.constant 0 : index
    %c0_470 = arith.constant 0 : index
    %1083 = vector.load %arg39[%c0_469, %c0_470] : memref<1x4xf32, #tpu.memory_space<vmem>>, vector<1x4xf32>
    %1084 = vector.broadcast %1083 : vector<1x4xf32> to vector<2x4xf32>
    %1085 = arith.addf %1082, %1084 : vector<2x4xf32>
    %c0_471 = arith.constant 0 : index
    %c0_472 = arith.constant 0 : index
    %1086 = vector.load %arg40[%c0_471, %c0_472] : memref<2x4xf32, #tpu.memory_space<vmem>>, vector<2x4xf32>
    tpu.vector_store %arg40[%c0_471, %c0_472], %1085 {strides = array<i32>} : memref<2x4xf32, #tpu.memory_space<vmem>>, vector<2x4xf32>,
    return
  }
  func.func @transform_0(%arg0: i32) -> (i32, i32) {
    %c0_i32 = arith.constant 0 : i32
    %c0_i32_0 = arith.constant 0 : i32
    return %arg0, %c0_i32 : i32, i32
  }
  func.func @transform_1(%arg0: i32) -> (i32, i32) {
    %c0_i32 = arith.constant 0 : i32
    %c0_i32_0 = arith.constant 0 : i32
    %c0_i32_1 = arith.constant 0 : i32
    return %c0_i32, %c0_i32_0 : i32, i32
  }
  func.func @transform_2(%arg0: i32) -> (i32, i32) {
    %c0_i32 = arith.constant 0 : i32
    %c0_i32_0 = arith.constant 0 : i32
    %c0_i32_1 = arith.constant 0 : i32
    return %c0_i32, %c0_i32_0 : i32, i32
  }
  func.func @transform_3(%arg0: i32) -> (i32, i32) {
    %c0_i32 = arith.constant 0 : i32
    %c0_i32_0 = arith.constant 0 : i32
    %c0_i32_1 = arith.constant 0 : i32
    return %c0_i32, %c0_i32_0 : i32, i32
  }
  func.func @transform_4(%arg0: i32) -> (i32, i32) {
    %c0_i32 = arith.constant 0 : i32
    %c0_i32_0 = arith.constant 0 : i32
    %c0_i32_1 = arith.constant 0 : i32
    return %c0_i32, %c0_i32_0 : i32, i32
  }
  func.func @transform_5(%arg0: i32) -> (i32, i32) {
    %c0_i32 = arith.constant 0 : i32
    %c0_i32_0 = arith.constant 0 : i32
    %c0_i32_1 = arith.constant 0 : i32
    return %c0_i32, %c0_i32_0 : i32, i32
  }
  func.func @transform_6(%arg0: i32) -> (i32, i32) {
    %c0_i32 = arith.constant 0 : i32
    %c0_i32_0 = arith.constant 0 : i32
    %c0_i32_1 = arith.constant 0 : i32
    return %c0_i32, %c0_i32_0 : i32, i32
  }
  func.func @transform_7(%arg0: i32) -> (i32, i32) {
    %c0_i32 = arith.constant 0 : i32
    %c0_i32_0 = arith.constant 0 : i32
    %c0_i32_1 = arith.constant 0 : i32
    return %c0_i32, %c0_i32_0 : i32, i32
  }
  func.func @transform_8(%arg0: i32) -> (i32, i32) {
    %c0_i32 = arith.constant 0 : i32
    %c0_i32_0 = arith.constant 0 : i32
    %c0_i32_1 = arith.constant 0 : i32
    return %c0_i32, %c0_i32_0 : i32, i32
  }
  func.func @transform_9(%arg0: i32) -> (i32, i32) {
    %c0_i32 = arith.constant 0 : i32
    %c0_i32_0 = arith.constant 0 : i32
    %c0_i32_1 = arith.constant 0 : i32
    return %c0_i32, %c0_i32_0 : i32, i32
  }
  func.func @transform_10(%arg0: i32) -> (i32, i32) {
    %c0_i32 = arith.constant 0 : i32
    %c0_i32_0 = arith.constant 0 : i32
    %c0_i32_1 = arith.constant 0 : i32
    return %c0_i32, %c0_i32_0 : i32, i32
  }
  func.func @transform_11(%arg0: i32) -> (i32, i32) {
    %c0_i32 = arith.constant 0 : i32
    %c0_i32_0 = arith.constant 0 : i32
    %c0_i32_1 = arith.constant 0 : i32
    return %c0_i32, %c0_i32_0 : i32, i32
  }
  func.func @transform_12(%arg0: i32) -> (i32, i32) {
    %c0_i32 = arith.constant 0 : i32
    %c0_i32_0 = arith.constant 0 : i32
    %c0_i32_1 = arith.constant 0 : i32
    return %c0_i32, %c0_i32_0 : i32, i32
  }
  func.func @transform_13(%arg0: i32) -> (i32, i32) {
    %c0_i32 = arith.constant 0 : i32
    %c0_i32_0 = arith.constant 0 : i32
    %c0_i32_1 = arith.constant 0 : i32
    return %c0_i32, %c0_i32_0 : i32, i32
  }
  func.func @transform_14(%arg0: i32) -> (i32, i32) {
    %c0_i32 = arith.constant 0 : i32
    %c0_i32_0 = arith.constant 0 : i32
    %c0_i32_1 = arith.constant 0 : i32
    return %c0_i32, %c0_i32_0 : i32, i32
  }
  func.func @transform_15(%arg0: i32) -> (i32, i32) {
    %c0_i32 = arith.constant 0 : i32
    %c0_i32_0 = arith.constant 0 : i32
    %c0_i32_1 = arith.constant 0 : i32
    return %c0_i32, %c0_i32_0 : i32, i32
  }
  func.func @transform_16(%arg0: i32) -> (i32, i32) {
    %c0_i32 = arith.constant 0 : i32
    %c0_i32_0 = arith.constant 0 : i32
    %c0_i32_1 = arith.constant 0 : i32
    return %c0_i32, %c0_i32_0 : i32, i32
  }
  func.func @transform_17(%arg0: i32) -> (i32, i32) {
    %c0_i32 = arith.constant 0 : i32
    %c0_i32_0 = arith.constant 0 : i32
    %c0_i32_1 = arith.constant 0 : i32
    return %c0_i32, %c0_i32_0 : i32, i32
  }
  func.func @transform_18(%arg0: i32) -> (i32, i32) {
    %c0_i32 = arith.constant 0 : i32
    %c0_i32_0 = arith.constant 0 : i32
    %c0_i32_1 = arith.constant 0 : i32
    return %c0_i32, %c0_i32_0 : i32, i32
  }
  func.func @transform_19(%arg0: i32) -> (i32, i32) {
    %c0_i32 = arith.constant 0 : i32
    %c0_i32_0 = arith.constant 0 : i32
    %c0_i32_1 = arith.constant 0 : i32
    return %c0_i32, %c0_i32_0 : i32, i32
  }
  func.func @transform_20(%arg0: i32) -> (i32, i32) {
    %c0_i32 = arith.constant 0 : i32
    %c0_i32_0 = arith.constant 0 : i32
    %c0_i32_1 = arith.constant 0 : i32
    return %c0_i32, %c0_i32_0 : i32, i32
  }
  func.func @transform_21(%arg0: i32) -> (i32, i32) {
    %c0_i32 = arith.constant 0 : i32
    %c0_i32_0 = arith.constant 0 : i32
    %c0_i32_1 = arith.constant 0 : i32
    return %c0_i32, %c0_i32_0 : i32, i32
  }
  func.func @transform_22(%arg0: i32) -> (i32, i32) {
    %c0_i32 = arith.constant 0 : i32
    %c0_i32_0 = arith.constant 0 : i32
    %c0_i32_1 = arith.constant 0 : i32
    return %c0_i32, %c0_i32_0 : i32, i32
  }
  func.func @transform_23(%arg0: i32) -> (i32, i32) {
    %c0_i32 = arith.constant 0 : i32
    %c0_i32_0 = arith.constant 0 : i32
    %c0_i32_1 = arith.constant 0 : i32
    return %c0_i32, %c0_i32_0 : i32, i32
  }
  func.func @transform_24(%arg0: i32) -> (i32, i32) {
    %c0_i32 = arith.constant 0 : i32
    %c0_i32_0 = arith.constant 0 : i32
    %c0_i32_1 = arith.constant 0 : i32
    return %c0_i32, %c0_i32_0 : i32, i32
  }
  func.func @transform_25(%arg0: i32) -> (i32, i32) {
    %c0_i32 = arith.constant 0 : i32
    %c0_i32_0 = arith.constant 0 : i32
    %c0_i32_1 = arith.constant 0 : i32
    return %c0_i32, %c0_i32_0 : i32, i32
  }
  func.func @transform_26(%arg0: i32) -> (i32, i32) {
    %c0_i32 = arith.constant 0 : i32
    %c0_i32_0 = arith.constant 0 : i32
    %c0_i32_1 = arith.constant 0 : i32
    return %c0_i32, %c0_i32_0 : i32, i32
  }
  func.func @transform_27(%arg0: i32) -> (i32, i32) {
    %c0_i32 = arith.constant 0 : i32
    %c0_i32_0 = arith.constant 0 : i32
    %c0_i32_1 = arith.constant 0 : i32
    return %c0_i32, %c0_i32_0 : i32, i32
  }
  func.func @transform_28(%arg0: i32) -> (i32, i32) {
    %c0_i32 = arith.constant 0 : i32
    %c0_i32_0 = arith.constant 0 : i32
    %c0_i32_1 = arith.constant 0 : i32
    return %c0_i32, %c0_i32_0 : i32, i32
  }
  func.func @transform_29(%arg0: i32) -> (i32, i32) {
    %c0_i32 = arith.constant 0 : i32
    %c0_i32_0 = arith.constant 0 : i32
    %c0_i32_1 = arith.constant 0 : i32
    return %c0_i32, %c0_i32_0 : i32, i32
  }
  func.func @transform_30(%arg0: i32) -> (i32, i32) {
    %c0_i32 = arith.constant 0 : i32
    %c0_i32_0 = arith.constant 0 : i32
    %c0_i32_1 = arith.constant 0 : i32
    return %c0_i32, %c0_i32_0 : i32, i32
  }
  func.func @transform_31(%arg0: i32) -> (i32, i32) {
    %c0_i32 = arith.constant 0 : i32
    %c0_i32_0 = arith.constant 0 : i32
    %c0_i32_1 = arith.constant 0 : i32
    return %c0_i32, %c0_i32_0 : i32, i32
  }
  func.func @transform_32(%arg0: i32) -> (i32, i32) {
    %c0_i32 = arith.constant 0 : i32
    %c0_i32_0 = arith.constant 0 : i32
    %c0_i32_1 = arith.constant 0 : i32
    return %c0_i32, %c0_i32_0 : i32, i32
  }
  func.func @transform_33(%arg0: i32) -> (i32, i32) {
    %c0_i32 = arith.constant 0 : i32
    %c0_i32_0 = arith.constant 0 : i32
    %c0_i32_1 = arith.constant 0 : i32
    return %c0_i32, %c0_i32_0 : i32, i32
  }
  func.func @transform_34(%arg0: i32) -> (i32, i32) {
    %c0_i32 = arith.constant 0 : i32
    %c0_i32_0 = arith.constant 0 : i32
    %c0_i32_1 = arith.constant 0 : i32
    return %c0_i32, %c0_i32_0 : i32, i32
  }
  func.func @transform_35(%arg0: i32) -> (i32, i32) {
    %c0_i32 = arith.constant 0 : i32
    %c0_i32_0 = arith.constant 0 : i32
    %c0_i32_1 = arith.constant 0 : i32
    return %c0_i32, %c0_i32_0 : i32, i32
  }
  func.func @transform_36(%arg0: i32) -> (i32, i32) {
    %c0_i32 = arith.constant 0 : i32
    %c0_i32_0 = arith.constant 0 : i32
    %c0_i32_1 = arith.constant 0 : i32
    return %c0_i32, %c0_i32_0 : i32, i32
  }
  func.func @transform_37(%arg0: i32) -> (i32, i32) {
    %c0_i32 = arith.constant 0 : i32
    %c0_i32_0 = arith.constant 0 : i32
    %c0_i32_1 = arith.constant 0 : i32
    return %c0_i32, %c0_i32_0 : i32, i32
  }
  func.func @transform_38(%arg0: i32) -> (i32, i32) {
    %c0_i32 = arith.constant 0 : i32
    %c0_i32_0 = arith.constant 0 : i32
    %c0_i32_1 = arith.constant 0 : i32
    return %c0_i32, %c0_i32_0 : i32, i32
  }
  func.func @transform_39(%arg0: i32) -> (i32, i32) {
    %c0_i32 = arith.constant 0 : i32
    %c0_i32_0 = arith.constant 0 : i32
    return %arg0, %c0_i32 : i32, i32
  }
}

</mosaic_0001>

<bundles_post_ra>
// kernel: resnet1d_forward.1
= control target key start
LH: loop header
LB: loop body
LE: loop exit
PB: predicated region body
PF: predicated region fallthrough
CT: control target
= control target key end

     0   :  { %s14164_s6 = smov 1   ;;  %s14165_s10 = smov 2   ;;  %s15582_s0 = inlined_call_operand.smem [shape: u32[40], index: -1, kind: input, shape index: {}] }
   0x1   :  { %s14256_s5 = sld [smem:[%s15582_s0]]   ;;  %s14166_s14 = smov 3  }
   0x2   :  { %s14261_s9 = sld [smem:[%s15582_s0 + %s14164_s6]]   ;;  %s14167_s18 = smov 4  }
   0x3   :  { %s14266_s13 = sld [smem:[%s15582_s0 + %s14165_s10]]   ;;  %s14168_s22 = smov 5  }
   0x4   :  { %s14271_s17 = sld [smem:[%s15582_s0 + %s14166_s14]]   ;;  %s14169_s26 = smov 6  }
   0x5   :  { %s14276_s21 = sld [smem:[%s15582_s0 + %s14167_s18]]   ;;  %s14170_s30 = smov 7  }
   0x6   :  { %s14281_s25 = sld [smem:[%s15582_s0 + %s14168_s22]]   ;;  %s14171_s4 = smov 8  }
   0x7   :  { %15596 = sst [smem:[#allocation76_spill]] %s14256_s5  ;;  %s14172_s10 = smov 9  }
   0x8   :  { %15597 = sst [smem:[#allocation77_spill]] %s14261_s9  ;;  %s14173_s15 = smov 10  }
   0x9   :  { %s14286_s29 = sld [smem:[%s15582_s0 + %s14169_s26]]   ;;  %s14174_s20 = smov 11  }
   0xa   :  { %15598 = sst [smem:[#allocation78_spill]] %s14271_s17  ;;  %s14175_s26 = smov 12  }
   0xb   :  { %15599 = sst [smem:[#allocation79_spill]] %s14276_s21  ;;  %s14176_s1 = smov 13  }
   0xc   :  { %s14291_s3 = sld [smem:[%s15582_s0 + %s14170_s30]]   ;;  %s14177_s7 = smov 14  }
   0xd   :  { %s14296_s8 = sld [smem:[%s15582_s0 + %s14171_s4]]   ;;  %s14179_s22 = smov 16  }
   0xe   :  { %s14301_s14 = sld [smem:[%s15582_s0 + %s14172_s10]]   ;;  %s14180_s28 = smov 17  }
   0xf   :  { %15600 = sst [smem:[#allocation80_spill]] %s14286_s29 }
  0x10   :  { %s14306_s19 = sld [smem:[%s15582_s0 + %s14173_s15]]   ;;  %s14178_s15 = smov 15  }
  0x11   :  { %s14311_s24 = sld [smem:[%s15582_s0 + %s14174_s20]]  }
  0x12   :  { %15601 = sst [smem:[#allocation81_spill]] %s14291_s3 }
  0x13   :  { %s14316_s30 = sld [smem:[%s15582_s0 + %s14175_s26]]  }
  0x14   :  { %15602 = sst [smem:[#allocation82_spill]] %s14301_s14 }
  0x15   :  { %s14321_s6 = sld [smem:[%s15582_s0 + %s14176_s1]]  }
  0x16   :  { %s14326_s12 = sld [smem:[%s15582_s0 + %s14177_s7]]   ;;  %s14181_s7 = smov 18  }
  0x17   :  { %15603 = sst [smem:[#allocation83_spill]] %s14311_s24 }
  0x18   :  { %s14331_s20 = sld [smem:[%s15582_s0 + %s14178_s15]]   ;;  %s14182_s15 = smov 19  }
  0x19   :  { %s14336_s27 = sld [smem:[%s15582_s0 + %s14179_s22]]   ;;  %s14183_s22 = smov 20  }
  0x1a   :  { %s14341_s4 = sld [smem:[%s15582_s0 + %s14180_s28]]   ;;  %s14184_s28 = smov 21  }
  0x1b   :  { %15604 = sst [smem:[#allocation84_spill]] %s14321_s6 }
  0x1c   :  { %s14346_s3 = sld [smem:[%s15582_s0 + %s14181_s7]]   ;;  %s14185_s7 = smov 22  }
  0x1d   :  { %s14351_s21 = sld [smem:[%s15582_s0 + %s14182_s15]]   ;;  %s14186_s15 = smov 23  }
  0x1e   :  { %15605 = sst [smem:[#allocation85_spill]] %s14331_s20 }
  0x1f   :  { %s14356_s5 = sld [smem:[%s15582_s0 + %s14183_s22]]   ;;  %s14187_s22 = smov 24  }
  0x20   :  { %15606 = sst [smem:[#allocation86_spill]] %s14341_s4 }
  0x21   :  { %s14361_s4 = sld [smem:[%s15582_s0 + %s14184_s28]]   ;;  %s14188_s28 = smov 25  }
  0x22   :  { %s14366_s20 = sld [smem:[%s15582_s0 + %s14185_s7]]   ;;  %s14189_s7 = smov 26  }
  0x23   :  { %15607 = sst [smem:[#allocation87_spill]] %s14351_s21 }
  0x24   :  { %s14371_s21 = sld [smem:[%s15582_s0 + %s14186_s15]]   ;;  %s14190_s15 = smov 27  }
  0x25   :  { %s14376_s6 = sld [smem:[%s15582_s0 + %s14187_s22]]   ;;  %s14191_s22 = smov 28  }
  0x26   :  { %s14386_s24 = sld [smem:[%s15582_s0 + %s14189_s7]]   ;;  %s14193_s7 = smov 30  }
  0x27   :  { %15608 = sst [smem:[#allocation88_spill]] %s14361_s4 }
  0x28   :  { %s14381_s4 = sld [smem:[%s15582_s0 + %s14188_s28]]   ;;  %s14192_s28 = smov 29  }
  0x29   :  { %s14396_s14 = sld [smem:[%s15582_s0 + %s14191_s22]]   ;;  %s14195_s22 = smov 32  }
  0x2a   :  { %15609 = sst [smem:[#allocation89_spill]] %s14371_s21 }
  0x2b   :  { %s14391_s21 = sld [smem:[%s15582_s0 + %s14190_s15]]   ;;  %s14194_s15 = smov 31  }
  0x2c   :  { %s14406_s29 = sld [smem:[%s15582_s0 + %s14193_s7]]   ;;  %s14197_s7 = smov 34  }
  0x2d   :  { %s14416_s17 = sld [smem:[%s15582_s0 + %s14195_s22]]   ;;  %s14199_s22 = smov 36  }
  0x2e   :  { %15610 = sst [smem:[#allocation90_spill]] %s14381_s4 }
  0x2f   :  { %s14401_s4 = sld [smem:[%s15582_s0 + %s14192_s28]]   ;;  %s14196_s28 = smov 33  }
  0x30   :  { %s14426_s9 = sld [smem:[%s15582_s0 + %s14197_s7]]   ;;  %s14201_s7 = smov 38  }
  0x31   :  { %15611 = sst [smem:[#allocation91_spill]] %s14391_s21 }
  0x32   :  { %s14411_s21 = sld [smem:[%s15582_s0 + %s14194_s15]]   ;;  %s14198_s15 = smov 35  }
  0x33   :  { %15614 = sst [smem:[#allocation94_spill]] %s14416_s17 }
  0x34   :  { %s14436_s17 = sld [smem:[%s15582_s0 + %s14199_s22]]  }
  0x35   :  { %15612 = sst [smem:[#allocation92_spill]] %s14401_s4 }
  0x36   :  { %s14421_s4 = sld [smem:[%s15582_s0 + %s14196_s28]]   ;;  %s14200_s28 = smov 37  }
  0x37   :  { %15616 = sst [smem:[#allocation96_spill]] %s14426_s9 }
  0x38   :  { %15613 = sst [smem:[#allocation93_spill]] %s14411_s21 }
  0x39   :  { %s14431_s21 = sld [smem:[%s15582_s0 + %s14198_s15]]   ;;  %s14202_s15 = smov 39  }
  0x3a   :  { %s14446_s9 = sld [smem:[%s15582_s0 + %s14201_s7]]  }
  0x3c   :  { %15615 = sst [smem:[#allocation95_spill]] %s14421_s4 }
  0x3d   :  { %s14441_s4 = sld [smem:[%s15582_s0 + %s14200_s28]]  }
  0x3f   :  { %15617 = sst [smem:[#allocation97_spill]] %s14431_s21 }
  0x40   :  { %s14451_s21 = sld [smem:[%s15582_s0 + %s14202_s15]]  }
  0x41   :  { %84 = vsyncpa [#allocation3], 0 }
  0x42   :  { %85 = vsyncpa [#allocation6], 0 }
  0x43   :  { %86 = vsyncpa [#allocation9], 0 }
  0x44   :  { %87 = vsyncpa [#allocation12], 0 }
  0x45   :  { %88 = vsyncpa [#allocation15], 0 }
  0x46   :  { %89 = vsyncpa [#allocation18], 0 }
  0x47   :  { %90 = vsyncpa [#allocation21], 0 }
  0x48   :  { %91 = vsyncpa [#allocation24], 0 }
  0x49   :  { %92 = vsyncpa [#allocation27], 0 }
  0x4a   :  { %93 = vsyncpa [#allocation30], 0 }
  0x4b   :  { %94 = vsyncpa [#allocation33], 0 }
  0x4c   :  { %95 = vsyncpa [#allocation36], 0 }
  0x4d   :  { %96 = vsyncpa [#allocation39], 0 }
  0x4e   :  { %97 = vsyncpa [#allocation42], 0 }
  0x4f   :  { %98 = vsyncpa [#allocation45], 0 }
  0x50   :  { %99 = vsyncpa [#allocation48], 0 }
  0x51   :  { %100 = vsyncpa [#allocation51], 0 }
  0x52   :  { %101 = vsyncpa [#allocation54], 0 }
  0x53   :  { %102 = vsyncpa [#allocation4], 0  ;;  %s14203_s0 = smov [#allocation5]   ;;  %s14204_s23 = smov [#allocation8]  }
  0x54   :  { %s121_s22 = sshll.u32 %s14203_s0, 4  ;;  %s143_s26 = sshll.u32 %s14204_s23, 4  ;;  %s122_s22 = int_to_ptr.vmem [resolvable:$true] %s121_s22  ;;  %s144_s26 = int_to_ptr.vmem [resolvable:$true] %s143_s26 }
  0x55   :  { %s13414_s28 = scalar_lea.vmem %s122_s22, 16  ;;  %s13418_s1 = scalar_lea.vmem %s122_s22, 32 }
  0x56   :  { %p13415_p0 = scmp.ne.s32.totalorder %s122_s22, %s13414_s28  ;;  %p13419_p1 = scmp.lt.s32.totalorder %s122_s22, %s122_s22 }
  0x57   :  { %p13420_p2 = scmp.lt.s32.totalorder %s13418_s1, %s13414_s28 }
  0x59   :  { %p13421_p3 = por %p13420_p2, %p13419_p1 }
  0x5b   :  { %p13422_p4 = pnand %p13421_p3, %p13415_p0 }
  0x5d   :  { %13425 = shalt.err (!%p13422_p4)
}
  0x5e   :  { %124 = dma.hbm_to_vmem [thread:$0]  %s14266_s13, 16, %s122_s22, [#allocation6]  }
  0x5f   :  { %s13434_s2 = scalar_lea.vmem %s144_s26, 16  ;;  %s13438_s7 = scalar_lea.vmem %s144_s26, 32 }
  0x60   :  { %p13435_p5 = scmp.ne.s32.totalorder %s144_s26, %s13434_s2  ;;  %p13439_p6 = scmp.lt.s32.totalorder %s144_s26, %s144_s26 }
  0x61   :  { %p13440_p7 = scmp.lt.s32.totalorder %s13438_s7, %s13434_s2 }
  0x63   :  { %p13441_p8 = por %p13440_p7, %p13439_p6 }
  0x65   :  { %p13442_p9 = pnand %p13441_p8, %p13435_p5 }
  0x67   :  { %13445 = shalt.err (!%p13442_p9)
}
  0x68   :  { %146 = dma.hbm_to_vmem [thread:$0]  %s14281_s25, 16, %s144_s26, [#allocation9]  }
  0x69   :  { %s14205_s10 = smov [#allocation11]   ;;  %s14206_s15 = smov [#allocation14]  }
  0x6a   :  { %s165_s11 = sshll.u32 %s14205_s10, 4  ;;  %s184_s16 = sshll.u32 %s14206_s15, 4  ;;  %s166_s11 = int_to_ptr.vmem [resolvable:$true] %s165_s11  ;;  %s185_s16 = int_to_ptr.vmem [resolvable:$true] %s184_s16 }
  0x6b   :  { %s13454_s18 = scalar_lea.vmem %s166_s11, 16  ;;  %s13458_s0 = scalar_lea.vmem %s166_s11, 32 }
  0x6c   :  { %p13455_p10 = scmp.ne.s32.totalorder %s166_s11, %s13454_s18  ;;  %p13459_p11 = scmp.lt.s32.totalorder %s166_s11, %s166_s11 }
  0x6d   :  { %p13460_p12 = scmp.lt.s32.totalorder %s13458_s0, %s13454_s18 }
  0x6f   :  { %p13461_p13 = por %p13460_p12, %p13459_p11 }
  0x71   :  { %p13462_p0 = pnand %p13461_p13, %p13455_p10 }
  0x73   :  { %13465 = shalt.err (!%p13462_p0)
}
  0x74   :  { %168 = dma.hbm_to_vmem [thread:$0]  %s14296_s8, 16, %s166_s11, [#allocation12]  }
  0x75   :  { %s13474_s13 = scalar_lea.vmem %s185_s16, 1536  ;;  %p13479_p2 = scmp.lt.s32.totalorder %s185_s16, %s185_s16 }
  0x76   :  { %p13475_p1 = scmp.ne.s32.totalorder %s185_s16, %s13474_s13  ;;  %p13480_p3 = scmp.lt.s32.totalorder %s13474_s13, %s13474_s13 }
  0x78   :  { %p13481_p4 = por %p13480_p3, %p13479_p2 }
  0x7a   :  { %p13482_p5 = pnand %p13481_p4, %p13475_p1 }
  0x7c   :  { %13485 = shalt.err (!%p13482_p5)
}
  0x7d   :  { %s14207_s25 = smov 64   ;;  %s14208_s22 = smov 4  }
  0x7e   :  { %190 = dma.hbm_to_vmem [thread:$0]  %s14306_s19, 1536, %s185_s16, [#allocation15], %s14207_s25, %s14207_s25, %s14208_s22  }
  0x7f   :  { %s14209_s23 = smov [#allocation17]   ;;  %s14210_s28 = smov [#allocation20]  }
  0x80   :  { %s207_s26 = sshll.u32 %s14209_s23, 4  ;;  %s229_s1 = sshll.u32 %s14210_s28, 4  ;;  %s208_s26 = int_to_ptr.vmem [resolvable:$true] %s207_s26  ;;  %s230_s1 = int_to_ptr.vmem [resolvable:$true] %s229_s1 }
  0x81   :  { %s13494_s8 = scalar_lea.vmem %s208_s26, 16  ;;  %s13498_s2 = scalar_lea.vmem %s208_s26, 32 }
  0x82   :  { %p13495_p6 = scmp.ne.s32.totalorder %s208_s26, %s13494_s8  ;;  %p13499_p7 = scmp.lt.s32.totalorder %s208_s26, %s208_s26 }
  0x83   :  { %p13500_p8 = scmp.lt.s32.totalorder %s13498_s2, %s13494_s8 }
  0x85   :  { %p13501_p9 = por %p13500_p8, %p13499_p7 }
  0x87   :  { %p13502_p10 = pnand %p13501_p9, %p13495_p6 }
  0x89   :  { %13505 = shalt.err (!%p13502_p10)
}
  0x8a   :  { %210 = dma.hbm_to_vmem [thread:$0]  %s14316_s30, 16, %s208_s26, [#allocation18]  }
  0x8b   :  { %s13514_s7 = scalar_lea.vmem %s230_s1, 16  ;;  %s13518_s10 = scalar_lea.vmem %s230_s1, 32 }
  0x8c   :  { %p13515_p11 = scmp.ne.s32.totalorder %s230_s1, %s13514_s7  ;;  %p13519_p12 = scmp.lt.s32.totalorder %s230_s1, %s230_s1 }
  0x8d   :  { %p13520_p13 = scmp.lt.s32.totalorder %s13518_s10, %s13514_s7 }
  0x8f   :  { %p13521_p0 = por %p13520_p13, %p13519_p12 }
  0x91   :  { %p13522_p1 = pnand %p13521_p0, %p13515_p11 }
  0x93   :  { %13525 = shalt.err (!%p13522_p1)
}
  0x94   :  { %232 = dma.hbm_to_vmem [thread:$0]  %s14326_s12, 16, %s230_s1, [#allocation21]  }
  0x95   :  { %s14211_s19 = smov [#allocation23]   ;;  %s14212_s15 = smov [#allocation26]  }
  0x96   :  { %s248_s11 = sshll.u32 %s14211_s19, 4  ;;  %s271_s16 = sshll.u32 %s14212_s15, 4  ;;  %s249_s11 = int_to_ptr.vmem [resolvable:$true] %s248_s11  ;;  %s272_s16 = int_to_ptr.vmem [resolvable:$true] %s271_s16 }
  0x97   :  { %s13534_s18 = scalar_lea.vmem %s249_s11, 512  ;;  %p13539_p3 = scmp.lt.s32.totalorder %s249_s11, %s249_s11 }
  0x98   :  { %p13535_p2 = scmp.ne.s32.totalorder %s249_s11, %s13534_s18  ;;  %p13540_p4 = scmp.lt.s32.totalorder %s13534_s18, %s13534_s18 }
  0x9a   :  { %p13541_p5 = por %p13540_p4, %p13539_p3 }
  0x9c   :  { %p13542_p6 = pnand %p13541_p5, %p13535_p2 }
  0x9e   :  { %13545 = shalt.err (!%p13542_p6)
}
  0x9f   :  { %254 = dma.hbm_to_vmem [thread:$0]  %s14336_s27, 512, %s249_s11, [#allocation24], %s14207_s25, %s14207_s25, %s14208_s22  }
  0xa0   :  { %s13554_s30 = scalar_lea.vmem %s272_s16, 16  ;;  %s13558_s12 = scalar_lea.vmem %s272_s16, 32 }
  0xa1   :  { %p13555_p7 = scmp.ne.s32.totalorder %s272_s16, %s13554_s30  ;;  %p13559_p8 = scmp.lt.s32.totalorder %s272_s16, %s272_s16 }
  0xa2   :  { %p13560_p9 = scmp.lt.s32.totalorder %s13558_s12, %s13554_s30 }
  0xa4   :  { %p13561_p10 = por %p13560_p9, %p13559_p8 }
  0xa6   :  { %p13562_p11 = pnand %p13561_p10, %p13555_p7 }
  0xa8   :  { %13565 = shalt.err (!%p13562_p11)
}
  0xa9   :  { %274 = dma.hbm_to_vmem [thread:$0]  %s14346_s3, 16, %s272_s16, [#allocation27]  }
  0xaa   :  { %s14213_s0 = smov [#allocation29]  }
  0xab   :  { %s293_s13 = sshll.u32 %s14213_s0, 4  ;;  %s294_s13 = int_to_ptr.vmem [resolvable:$true] %s293_s13 }
  0xac   :  { %s13574_s23 = scalar_lea.vmem %s294_s13, 32  ;;  %p13579_p13 = scmp.lt.s32.totalorder %s294_s13, %s294_s13 }
  0xad   :  { %p13575_p12 = scmp.ne.s32.totalorder %s294_s13, %s13574_s23  ;;  %p13580_p0 = scmp.lt.s32.totalorder %s13574_s23, %s13574_s23 }
  0xaf   :  { %p13581_p1 = por %p13580_p0, %p13579_p13 }
  0xb1   :  { %p13582_p2 = pnand %p13581_p1, %p13575_p12 }
  0xb3   :  { %13585 = shalt.err (!%p13582_p2)
}
  0xb4   :  { %296 = dma.hbm_to_vmem [thread:$0]  %s14356_s5, 32, %s294_s13, [#allocation30]  }
  0xb5   :  { %s14214_s27 = smov [#allocation32]   ;;  %s14215_s28 = smov [#allocation35]  }
  0xb6   :  { %s312_s26 = sshll.u32 %s14214_s27, 4  ;;  %s335_s1 = sshll.u32 %s14215_s28, 4  ;;  %s313_s26 = int_to_ptr.vmem [resolvable:$true] %s312_s26  ;;  %s336_s1 = int_to_ptr.vmem [resolvable:$true] %s335_s1 }
  0xb7   :  { %s13594_s8 = scalar_lea.vmem %s313_s26, 12288  ;;  %p13599_p4 = scmp.lt.s32.totalorder %s313_s26, %s313_s26 }
  0xb8   :  { %p13595_p3 = scmp.ne.s32.totalorder %s313_s26, %s13594_s8  ;;  %p13600_p5 = scmp.lt.s32.totalorder %s13594_s8, %s13594_s8 }
  0xba   :  { %p13601_p6 = por %p13600_p5, %p13599_p4 }
  0xbc   :  { %p13602_p7 = pnand %p13601_p6, %p13595_p3 }
  0xbe   :  { %13605 = shalt.err (!%p13602_p7)
}
  0xbf   :  { %s14216_s3 = smov 128   ;;  %s14217_s2 = smov 8  }
  0xc0   :  { %318 = dma.hbm_to_vmem [thread:$0]  %s14366_s20, 12288, %s313_s26, [#allocation33], %s14216_s3, %s14216_s3, %s14217_s2  }
  0xc1   :  { %s13614_s5 = scalar_lea.vmem %s336_s1, 32  ;;  %p13619_p9 = scmp.lt.s32.totalorder %s336_s1, %s336_s1 }
  0xc2   :  { %p13615_p8 = scmp.ne.s32.totalorder %s336_s1, %s13614_s5  ;;  %p13620_p10 = scmp.lt.s32.totalorder %s13614_s5, %s13614_s5 }
  0xc4   :  { %p13621_p11 = por %p13620_p10, %p13619_p9 }
  0xc6   :  { %p13622_p12 = pnand %p13621_p11, %p13615_p8 }
  0xc8   :  { %13625 = shalt.err (!%p13622_p12)
}
  0xc9   :  { %338 = dma.hbm_to_vmem [thread:$0]  %s14376_s6, 32, %s336_s1, [#allocation36]  }
  0xca   :  { %s14218_s7 = smov [#allocation38]   ;;  %s14219_s19 = smov [#allocation41]  }
  0xcb   :  { %s357_s10 = sshll.u32 %s14218_s7, 4  ;;  %s376_s11 = sshll.u32 %s14219_s19, 4  ;;  %s358_s10 = int_to_ptr.vmem [resolvable:$true] %s357_s10  ;;  %s377_s11 = int_to_ptr.vmem [resolvable:$true] %s376_s11 }
  0xcc   :  { %s13634_s15 = scalar_lea.vmem %s358_s10, 32  ;;  %p13639_p0 = scmp.lt.s32.totalorder %s358_s10, %s358_s10 }
  0xcd   :  { %p13635_p13 = scmp.ne.s32.totalorder %s358_s10, %s13634_s15  ;;  %p13640_p1 = scmp.lt.s32.totalorder %s13634_s15, %s13634_s15 }
  0xcf   :  { %p13641_p2 = por %p13640_p1, %p13639_p0 }
  0xd1   :  { %p13642_p3 = pnand %p13641_p2, %p13635_p13 }
  0xd3   :  { %13645 = shalt.err (!%p13642_p3)
}
  0xd4   :  { %360 = dma.hbm_to_vmem [thread:$0]  %s14386_s24, 32, %s358_s10, [#allocation39]  }
  0xd5   :  { %s13654_s20 = scalar_lea.vmem %s377_s11, 24576  ;;  %p13659_p5 = scmp.lt.s32.totalorder %s377_s11, %s377_s11 }
  0xd6   :  { %p13655_p4 = scmp.ne.s32.totalorder %s377_s11, %s13654_s20  ;;  %p13660_p6 = scmp.lt.s32.totalorder %s13654_s20, %s13654_s20 }
  0xd8   :  { %p13661_p7 = por %p13660_p6, %p13659_p5 }
  0xda   :  { %p13662_p8 = pnand %p13661_p7, %p13655_p4 }
  0xdc   :  { %13665 = shalt.err (!%p13662_p8)
}
  0xdd   :  { %s14220_s6 = smov 256   ;;  %s14221_s16 = smov 16  }
  0xde   :  { %382 = dma.hbm_to_vmem [thread:$0]  %s14396_s14, 24576, %s377_s11, [#allocation42], %s14220_s6, %s14220_s6, %s14221_s16  }
  0xdf   :  { %s14222_s18 = smov [#allocation44]   ;;  %s14223_s12 = smov [#allocation47]  }
  0xe0   :  { %s399_s30 = sshll.u32 %s14222_s18, 4  ;;  %s421_s24 = sshll.u32 %s14223_s12, 4  ;;  %s400_s30 = int_to_ptr.vmem [resolvable:$true] %s399_s30  ;;  %s422_s24 = int_to_ptr.vmem [resolvable:$true] %s421_s24 }
  0xe1   :  { %s13674_s0 = scalar_lea.vmem %s400_s30, 64  ;;  %p13679_p10 = scmp.lt.s32.totalorder %s400_s30, %s400_s30 }
  0xe2   :  { %p13675_p9 = scmp.ne.s32.totalorder %s400_s30, %s13674_s0  ;;  %p13680_p11 = scmp.lt.s32.totalorder %s13674_s0, %s13674_s0 }
  0xe4   :  { %p13681_p12 = por %p13680_p11, %p13679_p10 }
  0xe6   :  { %p13682_p13 = pnand %p13681_p12, %p13675_p9 }
  0xe8   :  { %13685 = shalt.err (!%p13682_p13)
}
  0xe9   :  { %402 = dma.hbm_to_vmem [thread:$0]  %s14406_s29, 64, %s400_s30, [#allocation45]  }
  0xea   :  { %s13694_s13 = scalar_lea.vmem %s422_s24, 64  ;;  %p13699_p1 = scmp.lt.s32.totalorder %s422_s24, %s422_s24 }
  0xeb   :  { %p13695_p0 = scmp.ne.s32.totalorder %s422_s24, %s13694_s13  ;;  %p13700_p2 = scmp.lt.s32.totalorder %s13694_s13, %s13694_s13 }
  0xed   :  { %p13701_p3 = por %p13700_p2, %p13699_p1 }
  0xef   :  { %p13702_p4 = pnand %p13701_p3, %p13695_p0 }
  0xf1   :  { %13705 = shalt.err (!%p13702_p4)
}
  0xf2   :  { %s15618_s14 = sld [smem:[#allocation94_spill]]  ;;  %s14224_s23 = smov [#allocation50]  }
  0xf3   :  { %s440_s27 = sshll.u32 %s14224_s23, 4  ;;  %s14225_s26 = smov [#allocation53]   ;;  %s441_s27 = int_to_ptr.vmem [resolvable:$true] %s440_s27 }
  0xf4   :  { %s463_s28 = sshll.u32 %s14225_s26, 4  ;;  %s13714_s1 = scalar_lea.vmem %s441_s27, 8192  ;;  %s464_s28 = int_to_ptr.vmem [resolvable:$true] %s463_s28 }
  0xf5   :  { %p13715_p5 = scmp.ne.s32.totalorder %s441_s27, %s13714_s1  ;;  %p13719_p6 = scmp.lt.s32.totalorder %s441_s27, %s441_s27 }
  0xf6   :  { %p13720_p7 = scmp.lt.s32.totalorder %s13714_s1, %s13714_s1 }
  0xf8   :  { %424 = dma.hbm_to_vmem [thread:$0]  %s15618_s14, 64, %s422_s24, [#allocation48]  }
  0xf9   :  { %p13721_p8 = por %p13720_p7, %p13719_p6 }
  0xfb   :  { %p13722_p9 = pnand %p13721_p8, %p13715_p5 }
  0xfd   :  { %13725 = shalt.err (!%p13722_p9)
}
  0xfe   :  { %s15619_s29 = sld [smem:[#allocation96_spill]]  ;;  %s13734_s8 = scalar_lea.vmem %s464_s28, 64 }
  0xff   :  { %p13735_p10 = scmp.ne.s32.totalorder %s464_s28, %s13734_s8  ;;  %p13739_p11 = scmp.lt.s32.totalorder %s464_s28, %s464_s28 }
 0x100   :  { %p13740_p12 = scmp.lt.s32.totalorder %s13734_s8, %s13734_s8 }
 0x102   :  { %p13741_p13 = por %p13740_p12, %p13739_p11 }
 0x104   :  { %446 = dma.hbm_to_vmem [thread:$0]  %s15619_s29, 8192, %s441_s27, [#allocation51], %s14220_s6, %s14220_s6, %s14221_s16  }
 0x105   :  { %p13742_p0 = pnand %p13741_p13, %p13735_p10 }
 0x107   :  { %13745 = shalt.err (!%p13742_p0)
}
 0x108   :  { %466 = dma.hbm_to_vmem [thread:$0]  %s14436_s17, 64, %s464_s28, [#allocation54]  }
 0x109   :  { %s14226_s5 = smov [#allocation2]   ;;  %s14227_s10 = smov [#allocation7]  }
 0x10a   :  { %s111_s7 = sshll.u32 %s14226_s5, 4  ;;  %s131_s19 = sshll.u32 %s14227_s10, 4  ;;  %s112_s7 = int_to_ptr.vmem [resolvable:$true] %s111_s7  ;;  %s132_s19 = int_to_ptr.vmem [resolvable:$true] %s131_s19 }
 0x10b   :  { %s13754_s11 = scalar_lea.vmem %s112_s7, 64  ;;  %p13759_p2 = scmp.lt.s32.totalorder %s112_s7, %s112_s7 }
 0x10c   :  { %p13755_p1 = scmp.ne.s32.totalorder %s112_s7, %s13754_s11  ;;  %p13760_p3 = scmp.lt.s32.totalorder %s13754_s11, %s13754_s11 }
 0x10e   :  { %p13761_p4 = por %p13760_p3, %p13759_p2 }
 0x110   :  { %p13762_p5 = pnand %p13761_p4, %p13755_p1 }
 0x112   :  { %13765 = shalt.err (!%p13762_p5)
}
 0x113   :  { %s15620_s15 = sld [smem:[#allocation77_spill]]  ;;  %s13774_s20 = scalar_lea.vmem %s132_s19, 16 }
 0x114   :  { %p13775_p6 = scmp.ne.s32.totalorder %s132_s19, %s13774_s20  ;;  %s13778_s18 = scalar_lea.vmem %s132_s19, 32 }
 0x115   :  { %p13779_p7 = scmp.lt.s32.totalorder %s132_s19, %s132_s19  ;;  %p13780_p8 = scmp.lt.s32.totalorder %s13778_s18, %s13774_s20 }
 0x117   :  { %p13781_p9 = por %p13780_p8, %p13779_p7 }
 0x119   :  { %114 = dma.hbm_to_vmem [thread:$0]  %s15620_s15, 64, %s112_s7, [#allocation3]  }
 0x11a   :  { %p13782_p10 = pnand %p13781_p9, %p13775_p6 }
 0x11c   :  { %13785 = shalt.err (!%p13782_p10)
}
 0x11d   :  { %s15621_s17 = sld [smem:[#allocation78_spill]]  ;;  %s14228_s30 = smov [#allocation10]  }
 0x11e   :  { %s153_s12 = sshll.u32 %s14228_s30, 4  ;;  %s14229_s24 = smov [#allocation13]   ;;  %s154_s12 = int_to_ptr.vmem [resolvable:$true] %s153_s12 }
 0x11f   :  { %s175_s0 = sshll.u32 %s14229_s24, 4  ;;  %s13794_s13 = scalar_lea.vmem %s154_s12, 16  ;;  %s176_s0 = int_to_ptr.vmem [resolvable:$true] %s175_s0 }
 0x120   :  { %p13795_p11 = scmp.ne.s32.totalorder %s154_s12, %s13794_s13  ;;  %s13798_s14 = scalar_lea.vmem %s154_s12, 32 }
 0x121   :  { %p13799_p12 = scmp.lt.s32.totalorder %s154_s12, %s154_s12  ;;  %p13800_p13 = scmp.lt.s32.totalorder %s13798_s14, %s13794_s13 }
 0x123   :  { %134 = dma.hbm_to_vmem [thread:$0]  %s15621_s17, 16, %s132_s19, [#allocation6]  }
 0x124   :  { %p13801_p0 = por %p13800_p13, %p13799_p12 }
 0x126   :  { %p13802_p1 = pnand %p13801_p0, %p13795_p11 }
 0x128   :  { %13805 = shalt.err (!%p13802_p1)
}
 0x129   :  { %s15622_s23 = sld [smem:[#allocation80_spill]]  ;;  %s13814_s27 = scalar_lea.vmem %s176_s0, 16 }
 0x12a   :  { %p13815_p2 = scmp.ne.s32.totalorder %s176_s0, %s13814_s27  ;;  %s13818_s26 = scalar_lea.vmem %s176_s0, 32 }
 0x12b   :  { %p13819_p3 = scmp.lt.s32.totalorder %s176_s0, %s176_s0  ;;  %p13820_p4 = scmp.lt.s32.totalorder %s13818_s26, %s13814_s27 }
 0x12d   :  { %p13821_p5 = por %p13820_p4, %p13819_p3 }
 0x12f   :  { %156 = dma.hbm_to_vmem [thread:$0]  %s15622_s23, 16, %s154_s12, [#allocation9]  }
 0x130   :  { %p13822_p6 = pnand %p13821_p5, %p13815_p2 }
 0x132   :  { %13825 = shalt.err (!%p13822_p6)
}
 0x133   :  { %s15623_s28 = sld [smem:[#allocation82_spill]]  ;;  %s14230_s1 = smov [#allocation16]  }
 0x134   :  { %s197_s29 = sshll.u32 %s14230_s1, 4  ;;  %s14231_s8 = smov [#allocation19]   ;;  %s198_s29 = int_to_ptr.vmem [resolvable:$true] %s197_s29 }
 0x135   :  { %s216_s5 = sshll.u32 %s14231_s8, 4  ;;  %s13834_s7 = scalar_lea.vmem %s198_s29, 16  ;;  %s217_s5 = int_to_ptr.vmem [resolvable:$true] %s216_s5 }
 0x136   :  { %p13835_p7 = scmp.ne.s32.totalorder %s198_s29, %s13834_s7  ;;  %s13838_s10 = scalar_lea.vmem %s198_s29, 32 }
 0x137   :  { %p13839_p8 = scmp.lt.s32.totalorder %s198_s29, %s198_s29  ;;  %p13840_p9 = scmp.lt.s32.totalorder %s13838_s10, %s13834_s7 }
 0x139   :  { %178 = dma.hbm_to_vmem [thread:$0]  %s15623_s28, 16, %s176_s0, [#allocation12]  }
 0x13a   :  { %p13841_p10 = por %p13840_p9, %p13839_p8 }
 0x13c   :  { %p13842_p11 = pnand %p13841_p10, %p13835_p7 }
 0x13e   :  { %13845 = shalt.err (!%p13842_p11)
}
 0x13f   :  { %s15624_s19 = sld [smem:[#allocation83_spill]]  ;;  %s13854_s11 = scalar_lea.vmem %s217_s5, 3072 }
 0x140   :  { %p13855_p12 = scmp.ne.s32.totalorder %s217_s5, %s13854_s11  ;;  %p13859_p13 = scmp.lt.s32.totalorder %s217_s5, %s217_s5 }
 0x141   :  { %p13860_p0 = scmp.lt.s32.totalorder %s13854_s11, %s13854_s11 }
 0x143   :  { %p13861_p1 = por %p13860_p0, %p13859_p13 }
 0x145   :  { %200 = dma.hbm_to_vmem [thread:$0]  %s15624_s19, 16, %s198_s29, [#allocation15]  }
 0x146   :  { %p13862_p2 = pnand %p13861_p1, %p13855_p12 }
 0x148   :  { %13865 = shalt.err (!%p13862_p2)
}
 0x149   :  { %s15625_s15 = sld [smem:[#allocation84_spill]]  ;;  %s14232_s20 = smov [#allocation22]  }
 0x14a   :  { %s239_s18 = sshll.u32 %s14232_s20, 4  ;;  %s14233_s17 = smov [#allocation25]   ;;  %s240_s18 = int_to_ptr.vmem [resolvable:$true] %s239_s18 }
 0x14b   :  { %s261_s30 = sshll.u32 %s14233_s17, 4  ;;  %s13874_s12 = scalar_lea.vmem %s240_s18, 16  ;;  %s262_s30 = int_to_ptr.vmem [resolvable:$true] %s261_s30 }
 0x14c   :  { %p13875_p3 = scmp.ne.s32.totalorder %s240_s18, %s13874_s12  ;;  %s13878_s24 = scalar_lea.vmem %s240_s18, 32 }
 0x14d   :  { %p13879_p4 = scmp.lt.s32.totalorder %s240_s18, %s240_s18  ;;  %p13880_p5 = scmp.lt.s32.totalorder %s13878_s24, %s13874_s12 }
 0x14f   :  { %222 = dma.hbm_to_vmem [thread:$0]  %s15625_s15, 3072, %s217_s5, [#allocation18], %s14207_s25, %s14207_s25, %s14208_s22  }
 0x150   :  { %p13881_p6 = por %p13880_p5, %p13879_p4 }
 0x152   :  { %p13882_p7 = pnand %p13881_p6, %p13875_p3 }
 0x154   :  { %13885 = shalt.err (!%p13882_p7)
}
 0x155   :  { %s15626_s0 = sld [smem:[#allocation85_spill]]  ;;  %s13894_s13 = scalar_lea.vmem %s262_s30, 16 }
 0x156   :  { %p13895_p8 = scmp.ne.s32.totalorder %s262_s30, %s13894_s13  ;;  %s13898_s14 = scalar_lea.vmem %s262_s30, 32 }
 0x157   :  { %p13899_p9 = scmp.lt.s32.totalorder %s262_s30, %s262_s30  ;;  %p13900_p10 = scmp.lt.s32.totalorder %s13898_s14, %s13894_s13 }
 0x159   :  { %p13901_p11 = por %p13900_p10, %p13899_p9 }
 0x15b   :  { %242 = dma.hbm_to_vmem [thread:$0]  %s15626_s0, 16, %s240_s18, [#allocation21]  }
 0x15c   :  { %p13902_p12 = pnand %p13901_p11, %p13895_p8 }
 0x15e   :  { %13905 = shalt.err (!%p13902_p12)
}
 0x15f   :  { %s15627_s22 = sld [smem:[#allocation86_spill]]  ;;  %s14234_s23 = smov [#allocation28]  }
 0x160   :  { %s280_s27 = sshll.u32 %s14234_s23, 4  ;;  %s14235_s26 = smov [#allocation31]   ;;  %s281_s27 = int_to_ptr.vmem [resolvable:$true] %s280_s27 }
 0x161   :  { %s303_s28 = sshll.u32 %s14235_s26, 4  ;;  %s13914_s1 = scalar_lea.vmem %s281_s27, 6144  ;;  %s304_s28 = int_to_ptr.vmem [resolvable:$true] %s303_s28 }
 0x162   :  { %p13915_p13 = scmp.ne.s32.totalorder %s281_s27, %s13914_s1  ;;  %p13919_p0 = scmp.lt.s32.totalorder %s281_s27, %s281_s27 }
 0x163   :  { %p13920_p1 = scmp.lt.s32.totalorder %s13914_s1, %s13914_s1 }
 0x165   :  { %264 = dma.hbm_to_vmem [thread:$0]  %s15627_s22, 16, %s262_s30, [#allocation24]  }
 0x166   :  { %p13921_p2 = por %p13920_p1, %p13919_p0 }
 0x168   :  { %p13922_p3 = pnand %p13921_p2, %p13915_p13 }
 0x16a   :  { %13925 = shalt.err (!%p13922_p3)
}
 0x16b   :  { %s15628_s29 = sld [smem:[#allocation87_spill]]  ;;  %s13934_s8 = scalar_lea.vmem %s304_s28, 32 }
 0x16c   :  { %p13935_p4 = scmp.ne.s32.totalorder %s304_s28, %s13934_s8  ;;  %p13939_p5 = scmp.lt.s32.totalorder %s304_s28, %s304_s28 }
 0x16d   :  { %p13940_p6 = scmp.lt.s32.totalorder %s13934_s8, %s13934_s8 }
 0x16f   :  { %p13941_p7 = por %p13940_p6, %p13939_p5 }
 0x171   :  { %286 = dma.hbm_to_vmem [thread:$0]  %s15628_s29, 6144, %s281_s27, [#allocation27], %s14216_s3, %s14216_s3, %s14217_s2  }
 0x172   :  { %p13942_p8 = pnand %p13941_p7, %p13935_p4 }
 0x174   :  { %13945 = shalt.err (!%p13942_p8)
}
 0x175   :  { %s15629_s5 = sld [smem:[#allocation88_spill]]  ;;  %s14236_s7 = smov [#allocation34]  }
 0x176   :  { %s325_s10 = sshll.u32 %s14236_s7, 4  ;;  %s14237_s19 = smov [#allocation37]   ;;  %s326_s10 = int_to_ptr.vmem [resolvable:$true] %s325_s10 }
 0x177   :  { %s344_s11 = sshll.u32 %s14237_s19, 4  ;;  %s13954_s15 = scalar_lea.vmem %s326_s10, 32  ;;  %s345_s11 = int_to_ptr.vmem [resolvable:$true] %s344_s11 }
 0x178   :  { %p13955_p9 = scmp.ne.s32.totalorder %s326_s10, %s13954_s15  ;;  %p13959_p10 = scmp.lt.s32.totalorder %s326_s10, %s326_s10 }
 0x179   :  { %p13960_p11 = scmp.lt.s32.totalorder %s13954_s15, %s13954_s15 }
 0x17b   :  { %306 = dma.hbm_to_vmem [thread:$0]  %s15629_s5, 32, %s304_s28, [#allocation30]  }
 0x17c   :  { %p13961_p12 = por %p13960_p11, %p13959_p10 }
 0x17e   :  { %p13962_p13 = pnand %p13961_p12, %p13955_p9 }
 0x180   :  { %13965 = shalt.err (!%p13962_p13)
}
 0x181   :  { %s15630_s20 = sld [smem:[#allocation89_spill]]  ;;  %s13974_s18 = scalar_lea.vmem %s345_s11, 2048 }
 0x182   :  { %p13975_p0 = scmp.ne.s32.totalorder %s345_s11, %s13974_s18  ;;  %p13979_p1 = scmp.lt.s32.totalorder %s345_s11, %s345_s11 }
 0x183   :  { %p13980_p2 = scmp.lt.s32.totalorder %s13974_s18, %s13974_s18 }
 0x185   :  { %p13981_p3 = por %p13980_p2, %p13979_p1 }
 0x187   :  { %328 = dma.hbm_to_vmem [thread:$0]  %s15630_s20, 32, %s326_s10, [#allocation33]  }
 0x188   :  { %p13982_p4 = pnand %p13981_p3, %p13975_p0 }
 0x18a   :  { %13985 = shalt.err (!%p13982_p4)
}
 0x18b   :  { %s15631_s17 = sld [smem:[#allocation90_spill]]  ;;  %s14238_s30 = smov [#allocation40]  }
 0x18c   :  { %s367_s12 = sshll.u32 %s14238_s30, 4  ;;  %s14239_s24 = smov [#allocation43]   ;;  %s368_s12 = int_to_ptr.vmem [resolvable:$true] %s367_s12 }
 0x18d   :  { %s389_s0 = sshll.u32 %s14239_s24, 4  ;;  %s13994_s13 = scalar_lea.vmem %s368_s12, 32  ;;  %s390_s0 = int_to_ptr.vmem [resolvable:$true] %s389_s0 }
 0x18e   :  { %p13995_p5 = scmp.ne.s32.totalorder %s368_s12, %s13994_s13  ;;  %p13999_p6 = scmp.lt.s32.totalorder %s368_s12, %s368_s12 }
 0x18f   :  { %p14000_p7 = scmp.lt.s32.totalorder %s13994_s13, %s13994_s13 }
 0x191   :  { %350 = dma.hbm_to_vmem [thread:$0]  %s15631_s17, 2048, %s345_s11, [#allocation36], %s14216_s3, %s14216_s3, %s14217_s2  }
 0x192   :  { %p14001_p8 = por %p14000_p7, %p13999_p6 }
 0x194   :  { %p14002_p9 = pnand %p14001_p8, %p13995_p5 }
 0x196   :  { %14005 = shalt.err (!%p14002_p9)
}
 0x197   :  { %s15632_s14 = sld [smem:[#allocation91_spill]]  ;;  %s14014_s22 = scalar_lea.vmem %s390_s0, 64 }
 0x198   :  { %p14015_p10 = scmp.ne.s32.totalorder %s390_s0, %s14014_s22  ;;  %p14019_p11 = scmp.lt.s32.totalorder %s390_s0, %s390_s0 }
 0x199   :  { %p14020_p12 = scmp.lt.s32.totalorder %s14014_s22, %s14014_s22 }
 0x19b   :  { %p14021_p13 = por %p14020_p12, %p14019_p11 }
 0x19d   :  { %370 = dma.hbm_to_vmem [thread:$0]  %s15632_s14, 32, %s368_s12, [#allocation39]  }
 0x19e   :  { %p14022_p0 = pnand %p14021_p13, %p14015_p10 }
 0x1a0   :  { %14025 = shalt.err (!%p14022_p0)
}
 0x1a1   :  { %s15633_s3 = sld [smem:[#allocation92_spill]]  ;;  %s14240_s2 = smov [#allocation46]  }
 0x1a2   :  { %s408_s23 = sshll.u32 %s14240_s2, 4  ;;  %s14241_s27 = smov [#allocation49]   ;;  %s409_s23 = int_to_ptr.vmem [resolvable:$true] %s408_s23 }
 0x1a3   :  { %s431_s26 = sshll.u32 %s14241_s27, 4  ;;  %s14034_s28 = scalar_lea.vmem %s409_s23, 49152  ;;  %s432_s26 = int_to_ptr.vmem [resolvable:$true] %s431_s26 }
 0x1a4   :  { %p14035_p1 = scmp.ne.s32.totalorder %s409_s23, %s14034_s28  ;;  %p14039_p2 = scmp.lt.s32.totalorder %s409_s23, %s409_s23 }
 0x1a5   :  { %p14040_p3 = scmp.lt.s32.totalorder %s14034_s28, %s14034_s28 }
 0x1a7   :  { %392 = dma.hbm_to_vmem [thread:$0]  %s15633_s3, 64, %s390_s0, [#allocation42]  }
 0x1a8   :  { %p14041_p4 = por %p14040_p3, %p14039_p2 }
 0x1aa   :  { %p14042_p5 = pnand %p14041_p4, %p14035_p1 }
 0x1ac   :  { %14045 = shalt.err (!%p14042_p5)
}
 0x1ad   :  { %s15634_s1 = sld [smem:[#allocation93_spill]]  ;;  %s14054_s29 = scalar_lea.vmem %s432_s26, 64 }
 0x1ae   :  { %p14055_p6 = scmp.ne.s32.totalorder %s432_s26, %s14054_s29  ;;  %p14059_p7 = scmp.lt.s32.totalorder %s432_s26, %s432_s26 }
 0x1af   :  { %p14060_p8 = scmp.lt.s32.totalorder %s14054_s29, %s14054_s29 }
 0x1b1   :  { %p14061_p9 = por %p14060_p8, %p14059_p7 }
 0x1b3   :  { %414 = dma.hbm_to_vmem [thread:$0]  %s15634_s1, 49152, %s409_s23, [#allocation45], %s14220_s6, %s14220_s6, %s14221_s16  }
 0x1b4   :  { %p14062_p10 = pnand %p14061_p9, %p14055_p6 }
 0x1b6   :  { %14065 = shalt.err (!%p14062_p10)
}
 0x1b7   :  { %s15635_s8 = sld [smem:[#allocation95_spill]]  ;;  %s14242_s5 = smov [#allocation52]  }
 0x1b8   :  { %s453_s7 = sshll.u32 %s14242_s5, 4  ;;  %s14243_s10 = smov [#allocation55]   ;;  %s454_s7 = int_to_ptr.vmem [resolvable:$true] %s453_s7 }
 0x1b9   :  { %s475_s19 = sshll.u32 %s14243_s10, 4  ;;  %s14074_s11 = scalar_lea.vmem %s454_s7, 64  ;;  %s476_s19 = int_to_ptr.vmem [resolvable:$true] %s475_s19 }
 0x1ba   :  { %p14075_p11 = scmp.ne.s32.totalorder %s454_s7, %s14074_s11  ;;  %p14079_p12 = scmp.lt.s32.totalorder %s454_s7, %s454_s7 }
 0x1bb   :  { %p14080_p13 = scmp.lt.s32.totalorder %s14074_s11, %s14074_s11 }
 0x1bd   :  { %434 = dma.hbm_to_vmem [thread:$0]  %s15635_s8, 64, %s432_s26, [#allocation48]  }
 0x1be   :  { %p14081_p0 = por %p14080_p13, %p14079_p12 }
 0x1c0   :  { %p14082_p1 = pnand %p14081_p0, %p14075_p11 }
 0x1c2   :  { %14085 = shalt.err (!%p14082_p1)
}
 0x1c3   :  { %s15636_s6 = sld [smem:[#allocation97_spill]]  ;;  %s14094_s16 = scalar_lea.vmem %s476_s19, 16 }
 0x1c4   :  { %p14095_p2 = scmp.ne.s32.totalorder %s476_s19, %s14094_s16  ;;  %s14098_s15 = scalar_lea.vmem %s476_s19, 32 }
 0x1c5   :  { %p14099_p3 = scmp.lt.s32.totalorder %s476_s19, %s476_s19  ;;  %p14100_p4 = scmp.lt.s32.totalorder %s14098_s15, %s14094_s16 }
 0x1c7   :  { %p14101_p5 = por %p14100_p4, %p14099_p3 }
 0x1c9   :  { %456 = dma.hbm_to_vmem [thread:$0]  %s15636_s6, 64, %s454_s7, [#allocation51]  }
 0x1ca   :  { %p14102_p6 = pnand %p14101_p5, %p14095_p2 }
 0x1cc   :  { %14105 = shalt.err (!%p14102_p6)
}
 0x1cd   :  { %478 = dma.hbm_to_vmem [thread:$0]  %s14446_s9, 16, %s476_s19, [#allocation54]  }
 0x1ce   :  { %14126 = dma.done.wait [#allocation3], 64  }
 0x1cf   :  { %14127 = vsyncadd [#allocation3], 4294967232 }
 0x1d0   :  { %14128 = dma.done.wait [#allocation6], 32  }
 0x1d1   :  { %14129 = vsyncadd [#allocation6], 4294967264 }
 0x1d2   :  { %14130 = dma.done.wait [#allocation9], 32  }
 0x1d3   :  { %14131 = vsyncadd [#allocation9], 4294967264 }
 0x1d4   :  { %14132 = dma.done.wait [#allocation12], 32  }
 0x1d5   :  { %14133 = vsyncadd [#allocation12], 4294967264 }
 0x1d6   :  { %14134 = dma.done.wait [#allocation15], 1552  }
 0x1d7   :  { %14135 = vsyncadd [#allocation15], 4294965744 }
 0x1d8   :  { %14136 = dma.done.wait [#allocation18], 3088  }
 0x1d9   :  { %14137 = vsyncadd [#allocation18], 4294964208 }
 0x1da   :  { %14138 = dma.done.wait [#allocation21], 32  }
 0x1db   :  { %14139 = vsyncadd [#allocation21], 4294967264 }
 0x1dc   :  { %14140 = dma.done.wait [#allocation24], 528  }
 0x1dd   :  { %14141 = vsyncadd [#allocation24], 4294966768 }
 0x1de   :  { %14142 = dma.done.wait [#allocation27], 6160  }
 0x1df   :  { %14143 = vsyncadd [#allocation27], 4294961136 }
 0x1e0   :  { %14144 = dma.done.wait [#allocation30], 64  }
 0x1e1   :  { %14145 = vsyncadd [#allocation30], 4294967232 }
 0x1e2   :  { %14146 = dma.done.wait [#allocation33], 12320  }
 0x1e3   :  { %14147 = vsyncadd [#allocation33], 4294954976 }
 0x1e4   :  { %14148 = dma.done.wait [#allocation36], 2080  }
 0x1e5   :  { %14149 = vsyncadd [#allocation36], 4294965216 }
 0x1e6   :  { %14150 = dma.done.wait [#allocation39], 64  }
 0x1e7   :  { %14151 = vsyncadd [#allocation39], 4294967232 }
 0x1e8   :  { %14152 = dma.done.wait [#allocation42], 24640  }
 0x1e9   :  { %14153 = vsyncadd [#allocation42], 4294942656 }
 0x1ea   :  { %14154 = dma.done.wait [#allocation45], 49216  }
 0x1eb   :  { %14155 = vsyncadd [#allocation45], 4294918080 }
 0x1ec   :  { %14156 = dma.done.wait [#allocation48], 128  }
 0x1ed   :  { %14157 = vsyncadd [#allocation48], 4294967168 }
 0x1ee   :  { %14158 = dma.done.wait [#allocation51], 8256  }
 0x1ef   :  { %14159 = vsyncadd [#allocation51], 4294959040 }
 0x1f0   :  { %14160 = dma.done.wait [#allocation54], 80  }
 0x1f1   :  { %14161 = vsyncadd [#allocation54], 4294967216  ;;  %s15637_s9 = sld [smem:[#allocation76_spill]]  ;;  %vm15586_vm0 = vcmask 1043456   ;;  %v597_v0 = vld [vmem:[#allocation2] sm:$0xf]  ;;  %v718_v14 = vlaneseq }
 0x1f2   :  { %vm15587_vm1 = vcmask 64512   ;;  %12030 = vmatprep.subr.msk.bf16.mxu0 %vm15586_vm0, %v597_v0  ;;  %v613_v3 = vsel %vm15586_vm0, %v597_v0, 0  ;;  %v14244_v22 = vmov 0.0   ;;  %vm15593_vm10 = vcmask 523264   ;;  %v14607_v45 = vld [vmem:[#allocation5] ss:$0 sm:$0xff] }
 0x1f3   :  { %11799 = vmatpush3.bf16.msra.mxu0 %v613_v3  ;;  %v14529_v15 = vshrl.u32 %v718_v14, 7  ;;  %v14537_v19 = vand.u32 127, %v718_v14  ;;  %v14645_v56 = vld [vmem:[#allocation7] ss:$0 sm:$0xff]  ;;  %s15686_s20 = sld [smem:[#allocation79_spill]] }
 0x1f4   :  { %s15693_s18 = sld [smem:[#allocation81_spill]] }
 0x1f5   :  { %v729_v16 = vand.u32 15, %v14529_v15  ;;  %v14535_v18 = vmul.u32 2, %v14529_v15  ;;  %v14557_v25 = vadd.s32 8, %v14529_v15  ;;  %v14560_v26 = vadd.s32 16, %v14529_v15 }
 0x1f6   :  { %v14564_v28 = vadd.s32 24, %v14529_v15 }
 0x1f7   :  { %v585_v1 = vld [vmem:[%s15637_s9] sm:$0xff]  ;;  %v586_v2 = vld [vmem:[%s15637_s9 + $0x8] sm:$0xff]  ;;  %v587_v5 = vld [vmem:[%s15637_s9 + $0x10] sm:$0xff]  ;;  %v773_v17 = vmul.u32 2, %v729_v16  ;;  %v14540_v21 = vadd.s32 4294967295, %v14535_v18  ;;  %vm15589_vm4 = vcmp.eq.s32.totalorder %v14537_v19, %v14535_v18  ;;  %v736_v27 = vand.u32 15, %v14557_v25 }
 0x1f8   :  { %v593_v4 = vpack.c.bf16 %v586_v2, %v585_v1  ;;  %v588_v6 = vld [vmem:[%s15637_s9 + $0x18] sm:$0xff]  ;;  %v589_v7 = vld [vmem:[%s15637_s9 + $0x20] sm:$0xff]  ;;  %v590_v9 = vld [vmem:[%s15637_s9 + $0x28] sm:$0xff]  ;;  %v743_v29 = vand.u32 15, %v14560_v26  ;;  %v14572_v31 = vmul.u32 2, %v14557_v25  ;;  %v750_v32 = vand.u32 15, %v14564_v28 }
 0x1f9   :  { %v594_v8 = vpack.c.bf16 %v588_v6, %v587_v5  ;;  %v595_v10 = vpack.c.bf16 %v590_v9, %v589_v7  ;;  %v591_v11 = vld [vmem:[%s15637_s9 + $0x30] sm:$0xff]  ;;  %v592_v12 = vld [vmem:[%s15637_s9 + $0x38] sm:$0xff]  ;;  %v777_v20 = vadd.s32 4294967295, %v773_v17  ;;  %vm15592_vm2 = vcmp.eq.s32.totalorder %v14537_v19, %v14540_v21  ;;  %v12147_v61 = vld [vmem:[%s15686_s20] sm:$0xff]  }
 0x1fa   :  { %11800 = vmatprep.mubr.msk.bf16.mxu0 %vm15587_vm1, %v593_v4  ;;  %v596_v13 = vpack.c.bf16 %v592_v12, %v591_v11  ;;  %vm915_vm5 = vcmp.ge.s32.totalorder %v773_v17, 0  ;;  %vm923_vm8 = vcmp.lt.s32.totalorder %v773_v17, 32  ;;  %v14569_v30 = vmul.u32 2, %v736_v27 }
 0x1fb   :  { %11801 = vmatmul.mubr.msk.bf16.vlgmr.msra.gmra.mxu0 %vm15587_vm1, %v594_v8  ;;  %vm793_vm3 = vcmp.ge.s32.totalorder %v777_v20, 0  ;;  %vm801_vm7 = vcmp.lt.s32.totalorder %v777_v20, 32  ;;  %vm919_vm11 = vmand %vm15589_vm4, %vm915_vm5  ;;  %v14577_v34 = vmul.u32 2, %v743_v29  ;;  %v14580_v35 = vmul.u32 2, %v14560_v26 }
 0x1fc   :  { %11804 = vmatprep.mubr.msk.bf16.mxu0 %vm15587_vm1, %v595_v10  ;;  %vm797_vm6 = vmand %vm15592_vm2, %vm793_vm3  ;;  %v14585_v37 = vadd.s32 4294967295, %v14569_v30  ;;  %v14588_v38 = vadd.s32 4294967295, %v14572_v31  ;;  %v14592_v39 = vmul.u32 2, %v750_v32  ;;  %v14599_v43 = vmul.u32 2, %v14564_v28 }
 0x1fd   :  { %vm805_vm9 = vmand %vm797_vm6, %vm801_vm7  ;;  %v14595_v41 = vadd.s32 4294967295, %v14577_v34  ;;  %v787_v42 = vadd.s32 4294967295, %v14580_v35  ;;  %vm15588_vm15 = vcmp.eq.s32.totalorder %v14537_v19, %v14572_v31  ;;  %vm916_vm3 = vcmp.ge.s32.totalorder %v14569_v30, 0 }
 0x1fe   :  { %v809_v23 = vsel %vm805_vm9, 1.0, %v14244_v22  ;;  %vm927_vm12 = vmand %vm919_vm11, %vm923_vm8  ;;  %vm15591_vm13 = vcmp.eq.s32.totalorder %v14537_v19, %v14588_v38  ;;  %vm794_vm14 = vcmp.ge.s32.totalorder %v14585_v37, 0  ;;  %v14612_v47 = vadd.s32 4294967295, %v14592_v39 }
 0x1ff   :  { %11824 = vmatprep.mubr.msk.f32.mxu1 %vm15593_vm10, %v809_v23  ;;  %v931_v24 = vsel %vm927_vm12, 1.0, %v14244_v22  ;;  %vm791_vm5 = vcmp.eq.s32.totalorder %v14537_v19, %v787_v42  ;;  %vm795_vm6 = vcmp.ge.s32.totalorder %v14595_v41, 0  ;;  %v788_v48 = vadd.s32 4294967295, %v14599_v43  ;;  %vm14626_vm9 = vmand %vm15591_vm13, %vm794_vm14 }
 0x200   :  { %vm913_vm7 = vcmp.eq.s32.totalorder %v14537_v19, %v14580_v35  ;;  %vm917_vm8 = vcmp.ge.s32.totalorder %v14577_v34, 0  ;;  %v14618_v49 = vadd.s32 1, %v773_v17  ;;  %v14621_v50 = vadd.s32 1, %v14535_v18  ;;  %vm14633_vm11 = vmand %vm15588_vm15, %vm916_vm3 }
 0x201   :  { %vm14638_vm12 = vmand %vm791_vm5, %vm795_vm6  ;;  %vm914_vm0 = vcmp.eq.s32.totalorder %v14537_v19, %v14599_v43  ;;  %vm918_vm14 = vcmp.ge.s32.totalorder %v14592_v39, 0  ;;  %vm792_vm3 = vcmp.eq.s32.totalorder %v14537_v19, %v788_v48  ;;  %vm796_vm15 = vcmp.ge.s32.totalorder %v14612_v47, 0 }
 0x202   :  { %vm15590_vm5 = vcmp.eq.s32.totalorder %v14537_v19, %v14621_v50  ;;  %vm1048_vm6 = vcmp.ge.s32.totalorder %v14618_v49, 0  ;;  %vm14657_vm4 = vmand %vm914_vm0, %vm918_vm14  ;;  %vm802_vm0 = vcmp.lt.s32.totalorder %v14585_v37, 32  ;;  %vm803_vm14 = vcmp.lt.s32.totalorder %v14595_v41, 32 }
 0x203   :  { %11805 = vmatmul.mubr.msk.bf16.gmra.mxu0 %vm15587_vm1, %v596_v13  ;;  %vm14647_vm1 = vmand %vm913_vm7, %vm917_vm8  ;;  %v14693_v10 = vadd.s32 1, %v14569_v30  ;;  %v14696_v11 = vadd.s32 1, %v14572_v31  ;;  %v14699_v12 = vadd.s32 1, %v14577_v34  ;;  %v14886_v2 = vadd.s32 4294967295, %v14529_v15 }
 0x204   :  { %11846 = vmatprep.mubr.msk.f32.mxu0 %vm15593_vm10, %v931_v24  ;;  %vm14665_vm7 = vmand %vm792_vm3, %vm796_vm15  ;;  %vm924_vm15 = vcmp.lt.s32.totalorder %v14569_v30, 32  ;;  %vm925_vm3 = vcmp.lt.s32.totalorder %v14577_v34, 32  ;;  %v1042_v24 = vadd.s32 1, %v14580_v35  ;;  %v1043_v34 = vadd.s32 1, %v14599_v43 }
 0x205   :  { %vm14672_vm8 = vmand %vm15590_vm5, %vm1048_vm6  ;;  %vm1049_vm13 = vcmp.ge.s32.totalorder %v14693_v10, 0  ;;  %vm1050_vm2 = vcmp.ge.s32.totalorder %v14699_v12, 0  ;;  %v14932_v48 = vadd.s32 1, %v14529_v15 }
 0x206   :  { %vm14711_vm6 = vmand %vm14626_vm9, %vm802_vm0  ;;  %vm804_vm0 = vcmp.lt.s32.totalorder %v14612_v47, 32  ;;  %v1200_v47 = vadd.s32 4294967295, %v14564_v28 }
 0x207   :  { %vm14719_vm5 = vmand %vm14633_vm11, %vm924_vm15  ;;  %vm926_vm11 = vcmp.lt.s32.totalorder %v14592_v39, 32  ;;  %vm1056_vm15 = vcmp.lt.s32.totalorder %v14618_v49, 32  ;;  %v810_v53 = vsel %vm14711_vm6, 1.0, %v14244_v22  ;;  %vm1057_vm6 = vcmp.lt.s32.totalorder %v14693_v10, 32  ;;  %v12140_v10 = vld [vmem:[%s15686_s20 + $0x38] sm:$0xff]  }
 0x208   :  { %vm14730_vm9 = vmand %vm14638_vm12, %vm803_vm14  ;;  %vm1045_vm14 = vcmp.eq.s32.totalorder %v14537_v19, %v14696_v11  ;;  %v12165_v11 = vld [vmem:[#allocation23 + $0x10] sm:$0xff]  }
 0x209   :  { %vm14747_vm12 = vmand %vm14647_vm1, %vm925_vm3  ;;  %vm1046_vm3 = vcmp.eq.s32.totalorder %v14537_v19, %v1042_v24  ;;  %v811_v55 = vsel %vm14730_vm9, 1.0, %v14244_v22  ;;  %vm1058_vm9 = vcmp.lt.s32.totalorder %v14699_v12, 32  ;;  %v14245_v12 = vmov 0  }
 0x20a   :  { %vm14770_vm1 = vmand %vm14657_vm4, %vm926_vm11 }
 0x20b   :  { %vm14782_vm10 = vmand %vm14665_vm7, %vm804_vm0 }
 0x20c   :  { %vm14793_vm4 = vmand %vm14672_vm8, %vm1056_vm15  ;;  %vm1047_vm8 = vcmp.eq.s32.totalorder %v14537_v19, %v1043_v34  ;;  %v812_v58 = vsel %vm14782_vm10, 1.0, %v14244_v22  ;;  %v14910_v34 = vadd.s32 4294967295, %v14557_v25 }
 0x20d   :  { %vm14802_vm7 = vmand %vm1045_vm14, %vm1049_vm13 }
 0x20e   :  { %vm14808_vm0 = vmand %vm1046_vm3, %vm1050_vm2  ;;  %vm15672_vm2 = vcmask 523264  }
 0x20f   :  { %vm15673_vm15 = vmmov %vm15672_vm2 }
 0x210   :  { %vm15675_vm3 = vmmov %vm15672_vm2 }
 0x2bb   :  { %v11802_v33 = vpop.f32.mrf.mxu0 }
 0x2bc   :  { %v689_v7 = vmul.f32 %v11802_v33, %v14607_v45  ;;  %v1195_v33 = vadd.s32 4294967295, %v743_v29 }
 0x2bd   :  { %v14582_v36 = vpop.f32.mrf.mxu0 }
 0x2be   :  { %v704_v30 = vadd.f32 %v14645_v56, %v689_v7  ;;  %v687_v35 = vmul.f32 %v14607_v45, %v14582_v36  ;;  %v14758_v36 = vadd.s32 1, %v14592_v39 }
 0x2bf   :  { %v11803_v40 = vpop.f32.mrf.mxu0 }
 0x2c0   :  { %v690_v4 = vmul.f32 %v11803_v40, %v14607_v45  ;;  %v712_v43 = vmax.f32 %v704_v30, 0.0  ;;  %vm1051_vm11 = vcmp.ge.s32.totalorder %v14758_v36, 0  ;;  %vm1059_vm10 = vcmp.lt.s32.totalorder %v14758_v36, 32 }
 0x2c1   :  { %v652_v44 = vpop.f32.mrf.mxu0  ;;  %vm14814_vm13 = vmand %vm1047_vm8, %vm1051_vm11  ;;  %v1199_v40 = vadd.s32 4294967295, %v14560_v26 }
 0x2c2   :  { %v705_v13 = vadd.f32 %v14645_v56, %v690_v4  ;;  %v688_v14 = vmul.f32 %v14607_v45, %v652_v44  ;;  %vm14858_vm8 = vmand %vm14808_vm0, %vm1058_vm9  ;;  %vm1225_vm9 = vcmask 261120  }
 0x2c3   :  { %v11806_v46 = vpop.f32.mrf.mxu0  ;;  %vm1063_vm11 = vmand %vm14814_vm13, %vm1059_vm10  ;;  %vm1204_vm10 = vcmp.eq.s32.totalorder %v14537_v19, %v1200_v47  ;;  %v10674_v47 = vld [vmem:[#allocation10] ss:$0 sm:$0xff] }
 0x2c4   :  { %v693_v54 = vmul.f32 %v11806_v46, %v14607_v45  ;;  %v14761_v41 = vmax.f32 %v705_v13, 0.0  ;;  %v703_v42 = vadd.f32 %v14645_v56, %v688_v14  ;;  %v12141_v14 = vld [vmem:[%s15686_s20 + $0x30] sm:$0xff]  }
 0x2c5   :  { %v665_v51 = vpop.f32.mrf.mxu0 }
 0x2c6   :  { %v708_v62 = vadd.f32 %v14645_v56, %v693_v54  ;;  %v691_v63 = vmul.f32 %v14607_v45, %v665_v51  ;;  %v711_v49 = vmax.f32 %v703_v42, 0.0  ;;  %v932_v54 = vsel %vm14719_vm5, 1.0, %v14244_v22  ;;  %vm15674_vm5 = vmmov %vm15672_vm2 }
 0x2c7   :  { %v11807_v57 = vpop.f32.mrf.mxu0 }
 0x2c8   :  { %v694_v59 = vmul.f32 %v11807_v57, %v14607_v45  ;;  %v14684_v8 = vmax.f32 %v708_v62, 0.0  ;;  %v706_v9 = vadd.f32 %v14645_v56, %v691_v63  ;;  %v934_v57 = vsel %vm14770_vm1, 1.0, %v14244_v22  ;;  %vm15678_vm1 = vmmov %vm15672_vm2 }
 0x2c9   :  { %v668_v60 = vpop.f32.mrf.mxu0  ;;  %v1066_v63 = vsel %vm14858_vm8, 1.0, %v14244_v22  ;;  %vm15683_vm0 = vmmov %vm15678_vm1 }
 0x2ca   :  { %v709_v0 = vadd.f32 %v14645_v56, %v694_v59  ;;  %v692_v1 = vmul.f32 %v14607_v45, %v668_v60  ;;  %v14739_v37 = vmax.f32 %v706_v9, 0.0  ;;  %v702_v45 = vadd.f32 %v14645_v56, %v687_v35  ;;  %vm15684_vm13 = vmmov %vm15683_vm0 }
 0x2cb   :  { %v1064_v59 = vsel %vm14793_vm4, 1.0, %v14244_v22  ;;  %vm15681_vm4 = vmmov %vm15678_vm1 }
 0x2cc   :  { %v14677_v5 = vmax.f32 %v709_v0, 0.0  ;;  %v707_v6 = vadd.f32 %v14645_v56, %v692_v1  ;;  %v710_v51 = vmax.f32 %v702_v45, 0.0  ;;  %v933_v56 = vsel %vm14747_vm12, 1.0, %v14244_v22  ;;  %vm14850_vm12 = vmand %vm14802_vm7, %vm1057_vm6  ;;  %v12143_v45 = vld [vmem:[%s15686_s20 + $0x20] sm:$0xff]  }
 0x2cd   :  { %vm15682_vm7 = vmmov %vm15678_vm1  ;;  %v1065_v62 = vsel %vm14850_vm12, 1.0, %v14244_v22  ;;  %v1067_v0 = vsel %vm1063_vm11, 1.0, %v14244_v22  ;;  %v1193_v1 = vadd.s32 4294967295, %v729_v16  ;;  %vm1207_vm12 = vcmp.ge.s32.totalorder %v1195_v33, 0 }
 0x2ce   :  { %11808 = vmatprep.subr.mxu1 %v14677_v5  ;;  %11830 = vmatprep.subr.mxu0 %v14677_v5  ;;  %v14703_v17 = vmax.f32 %v707_v6, 0.0 }
 0x2cf   :  { %11809 = vmatpush3.msra.mxu1 %v14677_v5  ;;  %11831 = vmatpush3.msra.mxu0 %v14677_v5  ;;  %vm1205_vm6 = vcmp.ge.s32.totalorder %v1193_v1, 0  ;;  %v12151_v1 = vld [vmem:[%s15686_s20 + $0x40] sm:$0xff]  }
 0x2d0   :  { %11810 = vmatprep.subr.mxu1 %v14684_v8  ;;  %11832 = vmatprep.subr.mxu0 %v14684_v8 }
 0x2d1   :  { %11811 = vmatpush3.msra.mxu1 %v14684_v8  ;;  %11833 = vmatpush3.msra.mxu0 %v14684_v8 }
 0x2d2   :  { %11812 = vmatprep.subr.mxu1 %v14703_v17  ;;  %11834 = vmatprep.subr.mxu0 %v14703_v17 }
 0x2d3   :  { %11813 = vmatpush3.msra.mxu1 %v14703_v17  ;;  %11835 = vmatpush3.msra.mxu0 %v14703_v17 }
 0x2d4   :  { %11814 = vmatprep.subr.mxu1 %v14739_v37  ;;  %11836 = vmatprep.subr.mxu0 %v14739_v37 }
 0x2d5   :  { %11815 = vmatpush3.msra.mxu1 %v14739_v37  ;;  %11837 = vmatpush3.msra.mxu0 %v14739_v37 }
 0x2d6   :  { %11816 = vmatprep.subr.mxu1 %v14761_v41  ;;  %11838 = vmatprep.subr.mxu0 %v14761_v41 }
 0x2d7   :  { %11817 = vmatpush3.msra.mxu1 %v14761_v41  ;;  %11839 = vmatpush3.msra.mxu0 %v14761_v41 }
 0x2d8   :  { %11818 = vmatprep.subr.mxu1 %v712_v43  ;;  %11840 = vmatprep.subr.mxu0 %v712_v43 }
 0x2d9   :  { %11819 = vmatpush3.msra.mxu1 %v712_v43  ;;  %11841 = vmatpush3.msra.mxu0 %v712_v43 }
 0x2da   :  { %11820 = vmatprep.subr.mxu1 %v711_v49  ;;  %11842 = vmatprep.subr.mxu0 %v711_v49 }
 0x2db   :  { %11821 = vmatpush3.msra.mxu1 %v711_v49  ;;  %11843 = vmatpush3.msra.mxu0 %v711_v49 }
 0x2dc   :  { %11822 = vmatprep.subr.mxu1 %v710_v51  ;;  %11844 = vmatprep.subr.mxu0 %v710_v51 }
 0x2dd   :  { %11823 = vmatpush3.msra.mxu1 %v710_v51  ;;  %11845 = vmatpush3.msra.mxu0 %v710_v51 }
 0x2de   :  { %11825 = vmatmul.mubr.msk.f32.vlgmr.msra.gmra.mxu1 %vm15672_vm2, %v810_v53  ;;  %11847 = vmatmul.mubr.msk.f32.vlgmr.msra.gmra.mxu0 %vm15673_vm15, %v932_v54  ;;  %vm15685_vm2 = vmmov %vm15683_vm0  ;;  %vm1201_vm15 = vcmp.eq.s32.totalorder %v14537_v19, %v14886_v2  ;;  %v12144_v53 = vld [vmem:[%s15686_s20 + $0x18] sm:$0xff]   ;;  %v1329_v54 = vadd.s32 1, %v14560_v26  ;;  %v15343_v2 = vsub.s32 2, %v14529_v15 }
 0x2df   :  { %11852 = vmatprep.subr.mxu1 %v14677_v5  ;;  %11827 = vmatprep.mubr.msk.f32.mxu1 %vm15674_vm5, %v811_v55  ;;  %vm1209_vm5 = vmand %vm1201_vm15, %vm1205_vm6  ;;  %v1326_v55 = vadd.s32 1, %v750_v32 }
 0x2e0   :  { %11853 = vmatpush3.msra.mxu1 %v14677_v5  ;;  %11849 = vmatprep.mubr.msk.f32.mxu0 %vm15675_vm3, %v933_v56  ;;  %v14894_v3 = vsel %vm1209_vm5, 1.0, %v14244_v22  ;;  %vm1203_vm3 = vcmp.eq.s32.totalorder %v14537_v19, %v1199_v40  ;;  %v1330_v56 = vadd.s32 1, %v14564_v28  ;;  %v12145_v28 = vld [vmem:[%s15686_s20 + $0x10] sm:$0xff]  }
 0x2e1   :  { %11854 = vmatprep.subr.mxu1 %v14684_v8  ;;  %vm1211_vm8 = vmand %vm1203_vm3, %vm1207_vm12  ;;  %vm1346_vm6 = vcmp.lt.s32.totalorder %v1326_v55, 16  ;;  %vm15687_vm3 = vcmask 523264  }
 0x2e2   :  { %11855 = vmatpush3.msra.mxu1 %v14684_v8  ;;  %11850 = vmatmul.mubr.msk.f32.gmra.mxu0 %vm15678_vm1, %v934_v57  ;;  %vm1202_vm1 = vcmp.eq.s32.totalorder %v14537_v19, %v14910_v34  ;;  %v14952_v52 = vsel %vm1211_vm8, 1.0, %v14244_v22  ;;  %v14973_v57 = vsel %vm1204_vm10, 1.0, %v14244_v22  ;;  %vm15688_vm12 = vmmov %vm15687_vm3  ;;  %v12180_v34 = vld [vmem:[#allocation19 + $0x78] sm:$0xff]  }
 0x2e3   :  { %11856 = vmatprep.subr.mxu1 %v14703_v17  ;;  %11828 = vmatmul.mubr.msk.f32.gmra.mxu1 %vm15681_vm4, %v812_v58  ;;  %vm15595_vm4 = vcmp.eq.s32.totalorder %v14537_v19, %v14932_v48  ;;  %vm15689_vm8 = vmmov %vm15687_vm3 }
 0x2e4   :  { %11857 = vmatpush3.msra.mxu1 %v14703_v17  ;;  %11868 = vmatprep.mubr.msk.f32.mxu1 %vm15682_vm7, %v1064_v59  ;;  %v14980_v26 = vsel %vm15595_vm4, 1.0, %v14244_v22  ;;  %v12146_v59 = vld [vmem:[%s15686_s20 + $0x8] sm:$0xff]   ;;  %vm15690_vm10 = vmmov %vm15687_vm3 }
 0x2e5   :  { %11858 = vmatprep.subr.mxu1 %v14739_v37  ;;  %11882 = vmatprep.mubr.msk.f32.mxu0 %vm1225_vm9, %v14894_v3 }
 0x2e6   :  { %11859 = vmatpush3.msra.mxu1 %v14739_v37 }
 0x2e7   :  { %11860 = vmatprep.subr.mxu1 %v14761_v41 }
 0x2e8   :  { %11861 = vmatpush3.msra.mxu1 %v14761_v41  ;;  %v12142_v41 = vld [vmem:[%s15686_s20 + $0x28] sm:$0xff]  }
 0x2e9   :  { %11862 = vmatprep.subr.mxu1 %v712_v43 }
 0x2ea   :  { %11863 = vmatpush3.msra.mxu1 %v712_v43 }
 0x2eb   :  { %11864 = vmatprep.subr.mxu1 %v711_v49 }
 0x2ec   :  { %11865 = vmatpush3.msra.mxu1 %v711_v49  ;;  %v1324_v49 = vadd.s32 1, %v736_v27  ;;  %v14948_v27 = vsel %vm1202_vm1, 1.0, %v14244_v22 }
 0x2ed   :  { %11866 = vmatprep.subr.mxu1 %v710_v51 }
 0x2ee   :  { %11867 = vmatpush3.msra.mxu1 %v710_v51  ;;  %v14939_v51 = vadd.s32 1, %v14557_v25  ;;  %vm1344_vm7 = vcmp.lt.s32.totalorder %v1324_v49, 16 }
 0x2ef   :  { %11869 = vmatmul.mubr.msk.f32.vlgmr.msra.gmra.mxu1 %vm15683_vm0, %v1065_v62  ;;  %1554 = vmatprep.subr.bf16.mxu1 %v14245_v12  ;;  %v12148_v62 = vld [vmem:[%s15686_s20 + $0x58] sm:$0xff]  }
 0x2f0   :  { %11871 = vmatprep.mubr.msk.f32.mxu1 %vm15684_vm13, %v1066_v63  ;;  %1555 = vmatpush1.bf16.msra.mxu1 %v12140_v10  ;;  %vm15594_vm11 = vcmp.eq.s32.totalorder %v14537_v19, %v14939_v51  ;;  %vm1333_vm13 = vcmp.eq.s32.totalorder %v14537_v19, %v1329_v54  ;;  %v12149_v63 = vld [vmem:[%s15686_s20 + $0x50] sm:$0xff]  }
 0x2f1   :  { %1556 = vmatprep.subr.bf16.mxu1 %v14245_v12  ;;  %vm1348_vm0 = vmand %vm15594_vm11, %vm1344_vm7  ;;  %v15002_v58 = vsel %vm1333_vm13, 1.0, %v14244_v22 }
 0x2f2   :  { %v14998_v32 = vsel %vm1348_vm0, 1.0, %v14244_v22  ;;  %vm15691_vm7 = vmmov %vm15687_vm3 }
 0x2f3   :  { %11872 = vmatmul.mubr.msk.f32.gmra.mxu1 %vm15685_vm2, %v1067_v0  ;;  %vm1334_vm2 = vcmp.eq.s32.totalorder %v14537_v19, %v1330_v56  ;;  %v12150_v0 = vld [vmem:[%s15686_s20 + $0x48] sm:$0xff]   ;;  %vm15692_vm0 = vmmov %vm15687_vm3 }
 0x2f4   :  { %1557 = vmatpush1.bf16.msra.mxu1 %v12141_v14  ;;  %vm1350_vm5 = vmand %vm1334_vm2, %vm1346_vm6 }
 0x2f5   :  { %1558 = vmatprep.subr.bf16.mxu1 %v14245_v12  ;;  %v15012_v60 = vsel %vm1350_vm5, 1.0, %v14244_v22  ;;  %vm15694_vm13 = vmmov %vm15692_vm0 }
 0x2f6   :  { %vm15695_vm2 = vmmov %vm15692_vm0 }
 0x2f7   :  { %vm15696_vm6 = vmmov %vm15692_vm0 }
 0x2f8   :  { %1559 = vmatpush1.bf16.msra.mxu1 %v12142_v41  ;;  %vm15697_vm5 = vmmov %vm15692_vm0 }
 0x2f9   :  { %1560 = vmatprep.subr.bf16.mxu1 %v14245_v12 }
 0x2fc   :  { %1561 = vmatpush1.bf16.msra.mxu1 %v12143_v45 }
 0x2fd   :  { %1562 = vmatprep.subr.bf16.mxu1 %v14245_v12 }
 0x300   :  { %1563 = vmatpush1.bf16.msra.mxu1 %v12144_v53 }
 0x301   :  { %1564 = vmatprep.subr.bf16.mxu1 %v14245_v12 }
 0x304   :  { %1565 = vmatpush1.bf16.msra.mxu1 %v12145_v28 }
 0x305   :  { %1566 = vmatprep.subr.bf16.mxu1 %v14245_v12 }
 0x308   :  { %1567 = vmatpush1.bf16.msra.mxu1 %v12146_v59 }
 0x309   :  { %1568 = vmatprep.subr.bf16.mxu1 %v14245_v12 }
 0x30c   :  { %1569 = vmatpush1.bf16.msra.mxu1 %v12147_v61 }
 0x30d   :  { %1578 = vmatprep.subr.bf16.mxu1 %v14245_v12 }
 0x310   :  { %1579 = vmatpush2.bf16.msra.mxu1 %v12148_v62 }
 0x311   :  { %1580 = vmatprep.subr.bf16.mxu1 %v14245_v12 }
 0x314   :  { %1581 = vmatpush2.bf16.msra.mxu1 %v12149_v63 }
 0x315   :  { %1582 = vmatprep.subr.bf16.mxu1 %v14245_v12 }
 0x318   :  { %1583 = vmatpush2.bf16.msra.mxu1 %v12150_v0 }
 0x319   :  { %1584 = vmatprep.subr.bf16.mxu1 %v14245_v12 }
 0x31c   :  { %1585 = vmatpush2.bf16.msra.mxu1 %v12151_v1 }
 0x39e   :  { %v11826_v16 = vpop.f32.mrf.mxu1  ;;  %v11848_v4 = vpop.f32.mrf.mxu0 }
 0x39f   :  { %v1033_v17 = vmax.f32 %v11826_v16, %v11848_v4 }
 0x3a0   :  { %v892_v5 = vpop.f32.mrf.mxu1  ;;  %v1013_v7 = vpop.f32.mrf.mxu0 }
 0x3a1   :  { %v1032_v20 = vmax.f32 %v892_v5, %v1013_v7 }
 0x3a2   :  { %v11851_v8 = vpop.f32.mrf.mxu0 }
 0x3a3   :  { %v11829_v6 = vpop.f32.mrf.mxu1 }
 0x3a4   :  { %v1023_v23 = vpop.f32.mrf.mxu0  ;;  %v1035_v30 = vmax.f32 %v11829_v6, %v11851_v8 }
 0x3a5   :  { %v902_v9 = vpop.f32.mrf.mxu1 }
 0x3a6   :  { %v1034_v42 = vmax.f32 %v902_v9, %v1023_v23 }
 0x3af   :  { %v11870_v13 = vpop.f32.mrf.mxu1 }
 0x3b0   :  { %v14904_v35 = vmax.f32 %v1033_v17, %v11870_v13 }
 0x3b1   :  { %v1146_v24 = vpop.f32.mrf.mxu1 }
 0x3b2   :  { %v14906_v37 = vmax.f32 %v1032_v20, %v1146_v24 }
 0x3b3   :  { %v11873_v36 = vpop.f32.mrf.mxu1 }
 0x3b4   :  { %v14913_v44 = vmax.f32 %v1035_v30, %v11873_v36  ;;  %v12115_v29 = vpack.i.bf16 %v14904_v35, %v14906_v37 }
 0x3b5   :  { %v1156_v39 = vpop.f32.mrf.mxu1 }
 0x3b6   :  { %v14918_v43 = vmax.f32 %v1034_v42, %v1156_v39  ;;  %12116 = vrot.lane.b32.xlu0 %v12115_v29, %s14207_s25  ;;  %11874 = vmatprep.subr.mxu0 %v14913_v44  ;;  %v10673_v39 = vld [vmem:[#allocation8] ss:$0 sm:$0xff] }
 0x3b7   :  { %11875 = vmatpush3.msra.mxu0 %v14913_v44 }
 0x3b8   :  { %11876 = vmatprep.subr.mxu0 %v14918_v43  ;;  %v12120_v46 = vpack.i.bf16 %v14913_v44, %v14918_v43 }
 0x3b9   :  { %11877 = vmatpush3.msra.mxu0 %v14918_v43 }
 0x3ba   :  { %12121 = vrot.lane.b32.xlu0 %v12120_v46, %s14207_s25  ;;  %11878 = vmatprep.subr.mxu0 %v14904_v35 }
 0x3bb   :  { %11879 = vmatpush3.msra.mxu0 %v14904_v35 }
 0x3bc   :  { %11880 = vmatprep.subr.mxu0 %v14906_v37 }
 0x3bd   :  { %11881 = vmatpush3.msra.mxu0 %v14906_v37 }
 0x3be   :  { %11883 = vmatmul.mubr.msk.f32.vlgmr.msra.gmra.mxu0 %vm1225_vm9, %v14948_v27  ;;  %11888 = vmatprep.subr.mxu0 %v14913_v44 }
 0x3bf   :  { %11889 = vmatpush3.msra.mxu0 %v14913_v44  ;;  %11885 = vmatprep.mubr.msk.f32.mxu0 %vm1225_vm9, %v14952_v52 }
 0x3c0   :  { %11890 = vmatprep.subr.mxu0 %v14918_v43 }
 0x3c1   :  { %11891 = vmatpush3.msra.mxu0 %v14918_v43 }
 0x3c2   :  { %11886 = vmatmul.mubr.msk.f32.gmra.mxu0 %vm1225_vm9, %v14973_v57  ;;  %11892 = vmatprep.subr.mxu0 %v14904_v35 }
 0x3c3   :  { %11893 = vmatpush3.msra.mxu0 %v14904_v35  ;;  %11896 = vmatprep.mubr.msk.f32.mxu0 %vm1225_vm9, %v14980_v26 }
 0x3c4   :  { %11894 = vmatprep.subr.mxu0 %v14906_v37 }
 0x3c5   :  { %11895 = vmatpush3.msra.mxu0 %v14906_v37 }
 0x3c6   :  { %11897 = vmatmul.mubr.msk.f32.vlgmr.msra.gmra.mxu0 %vm1225_vm9, %v14998_v32 }
 0x3c7   :  { %11899 = vmatprep.mubr.msk.f32.mxu0 %vm1225_vm9, %v15002_v58 }
 0x3ca   :  { %11900 = vmatmul.mubr.msk.f32.gmra.mxu0 %vm1225_vm9, %v15012_v60 }
 0x3cb   :  { %11910 = vmatprep.mubr.msk.f32.mxu0 %vm1225_vm9, %v14894_v3 }
 0x428   :  { %v12117_v3 = vpop.permute.xlu0 %12116 }
 0x429   :  { %v12118_v7 = vunpack.i.l.bf16 %v12117_v3  ;;  %v12119_v9 = vunpack.i.h.bf16 %v12117_v3 }
 0x42c   :  { %v12122_v20 = vpop.permute.xlu0 %12121 }
 0x42d   :  { %v12123_v30 = vunpack.i.l.bf16 %v12122_v20  ;;  %v12124_v36 = vunpack.i.h.bf16 %v12122_v20  ;;  %v12163_v20 = vld [vmem:[%s15693_s18 + $0x40] sm:$0xff]  }
 0x47e   :  { %v11884_v16 = vpop.f32.mrf.mxu0 }
 0x47f   :  { %v1469_v14 = vsel %vm15688_vm12, %v11884_v16, %v12119_v9  ;;  %vm15699_vm12 = vmmov %vm15692_vm0 }
 0x480   :  { %v1304_v4 = vpop.f32.mrf.mxu0 }
 0x481   :  { %v1468_v10 = vsel %vm15687_vm3, %v1304_v4, %v12118_v7  ;;  %vm15698_vm3 = vmmov %vm15692_vm0 }
 0x482   :  { %v11887_v5 = vpop.f32.mrf.mxu0  ;;  %v1472_v23 = vpack.c.bf16 %v1469_v14, %v1468_v10  ;;  %v12152_v10 = vld [vmem:[%s15693_s18 + $0x38] sm:$0xff]   ;;  %v12161_v14 = vld [vmem:[%s15693_s18 + $0x50] sm:$0xff]  }
 0x483   :  { %v1471_v42 = vsel %vm15692_vm0, %v11887_v5, %v12124_v36 }
 0x484   :  { %v1314_v6 = vpop.f32.mrf.mxu0 }
 0x485   :  { %v1470_v41 = vsel %vm15690_vm10, %v1314_v6, %v12123_v30  ;;  %vm15700_vm10 = vcmp.eq.s32.totalorder %v14537_v19, %v14540_v21 }
 0x486   :  { %v11898_v8 = vpop.f32.mrf.mxu0  ;;  %v1474_v29 = vpack.c.bf16 %v1471_v42, %v1470_v41 }
 0x488   :  { %v1433_v13 = vpop.f32.mrf.mxu0 }
 0x489   :  { %v1473_v17 = vpack.c.bf16 %v11898_v8, %v1433_v13  ;;  %v12160_v13 = vld [vmem:[%s15693_s18 + $0x58] sm:$0xff]  }
 0x48a   :  { %v11901_v24 = vpop.f32.mrf.mxu0 }
 0x48b   :  { %10671 = vmatprep.mubr.msk.bf16.mxu1 %vm15689_vm8, %v1473_v17  ;;  %v12162_v17 = vld [vmem:[%s15693_s18 + $0x48] sm:$0xff]  }
 0x48c   :  { %1587 = vmatmul.mubr.bf16.vlgmr.msra.gmra.mxu1 %v1472_v23  ;;  %v1443_v33 = vpop.f32.mrf.mxu0 }
 0x48d   :  { %v1475_v40 = vpack.c.bf16 %v11901_v24, %v1443_v33 }
 0x48f   :  { %10672 = vmatprep.mubr.msk.bf16.mxu1 %vm15691_vm7, %v1475_v40 }
 0x494   :  { %1595 = vmatmul.mubr.bf16.gmra.mxu1 %v1474_v29 }
 0x54c   :  { %v1588_v45 = vpop.f32.mrf.mxu1 }
 0x54d   :  { %v1610_v46 = vmul.f32 %v10673_v39, %v1588_v45 }
 0x54e   :  { %v1590_v49 = vpop.f32.mrf.mxu1 }
 0x54f   :  { %v1621_v54 = vadd.f32 %v10674_v47, %v1610_v46 }
 0x550   :  { %v1591_v53 = vpop.f32.mrf.mxu1 }
 0x551   :  { %v1611_v55 = vmul.f32 %v10673_v39, %v1591_v53  ;;  %v1625_v61 = vmax.f32 %v1621_v54, 0.0 }
 0x552   :  { %v1593_v56 = vpop.f32.mrf.mxu1 }
 0x553   :  { %v1622_v28 = vadd.f32 %v10674_v47, %v1611_v55 }
 0x554   :  { %v1596_v59 = vpop.f32.mrf.mxu1 }
 0x555   :  { %v1626_v62 = vmax.f32 %v1622_v28, 0.0  ;;  %v1612_v63 = vmul.f32 %v10673_v39, %v1596_v59 }
 0x556   :  { %v1598_v0 = vpop.f32.mrf.mxu1 }
 0x557   :  { %v12125_v1 = vpack.i.bf16 %v1626_v62, %v1625_v61  ;;  %v1623_v4 = vadd.f32 %v10674_v47, %v1612_v63  ;;  %v15082_v63 = vand.u32 7, %v14529_v15 }
 0x558   :  { %v1599_v16 = vpop.f32.mrf.mxu1 }
 0x559   :  { %v1613_v3 = vmul.f32 %v10673_v39, %v1599_v16  ;;  %12126 = vrot.lane.b32.xlu1 %v12125_v1, %s14207_s25  ;;  %v1627_v7 = vmax.f32 %v1623_v4, 0.0  ;;  %v2052_v0 = vmul.u32 2, %v15082_v63 }
 0x55a   :  { %v1601_v5 = vpop.f32.mrf.mxu1 }
 0x55b   :  { %v1624_v6 = vadd.f32 %v10674_v47, %v1613_v3  ;;  %v2054_v1 = vadd.s32 4294967295, %v2052_v0 }
 0x55d   :  { %v1628_v8 = vmax.f32 %v1624_v6, 0.0  ;;  %vm2056_vm8 = vcmp.ge.s32.totalorder %v2054_v1, 0  ;;  %vm2060_vm0 = vcmp.lt.s32.totalorder %v2054_v1, 16  ;;  %v15091_v6 = vand.u32 7, %v14557_v25  ;;  %v12178_v1 = vld [vmem:[#allocation14 + $0x48] sm:$0xff]  }
 0x55e   :  { %vm2058_vm7 = vmand %vm15700_vm10, %vm2056_vm8  ;;  %vm15702_vm8 = vcmp.eq.s32.totalorder %v14537_v19, %v14535_v18 }
 0x55f   :  { %11902 = vmatprep.subr.mxu0 %v1628_v8  ;;  %v12130_v9 = vpack.i.bf16 %v1628_v8, %v1627_v7 }
 0x560   :  { %11903 = vmatpush3.msra.mxu0 %v1628_v8 }
 0x561   :  { %12131 = vrot.lane.b32.xlu1 %v12130_v9, %s14207_s25  ;;  %11904 = vmatprep.subr.mxu0 %v1627_v7 }
 0x562   :  { %11905 = vmatpush3.msra.mxu0 %v1627_v7 }
 0x563   :  { %11906 = vmatprep.subr.mxu0 %v1626_v62 }
 0x564   :  { %11907 = vmatpush3.msra.mxu0 %v1626_v62 }
 0x565   :  { %11908 = vmatprep.subr.mxu0 %v1625_v61 }
 0x566   :  { %11909 = vmatpush3.msra.mxu0 %v1625_v61 }
 0x567   :  { %11911 = vmatmul.mubr.msk.f32.vlgmr.msra.gmra.mxu0 %vm1225_vm9, %v14948_v27  ;;  %11916 = vmatprep.subr.mxu0 %v1628_v8  ;;  %v12153_v27 = vld [vmem:[%s15693_s18 + $0x30] sm:$0xff]  }
 0x568   :  { %11917 = vmatpush3.msra.mxu0 %v1628_v8  ;;  %11913 = vmatprep.mubr.msk.f32.mxu0 %vm1225_vm9, %v14952_v52  ;;  %v12154_v52 = vld [vmem:[%s15693_s18 + $0x28] sm:$0xff]  }
 0x569   :  { %11918 = vmatprep.subr.mxu0 %v1627_v7  ;;  %v10697_v8 = vld [vmem:[#allocation11] ss:$0 sm:$0xff] }
 0x56a   :  { %11919 = vmatpush3.msra.mxu0 %v1627_v7 }
 0x56b   :  { %11914 = vmatmul.mubr.msk.f32.gmra.mxu0 %vm1225_vm9, %v14973_v57  ;;  %11920 = vmatprep.subr.mxu0 %v1626_v62  ;;  %v12155_v57 = vld [vmem:[%s15693_s18 + $0x20] sm:$0xff]  }
 0x56c   :  { %11921 = vmatpush3.msra.mxu0 %v1626_v62  ;;  %11924 = vmatprep.mubr.msk.f32.mxu0 %vm1225_vm9, %v14980_v26  ;;  %v12156_v26 = vld [vmem:[%s15693_s18 + $0x18] sm:$0xff]  }
 0x56d   :  { %11922 = vmatprep.subr.mxu0 %v1625_v61 }
 0x56e   :  { %11923 = vmatpush3.msra.mxu0 %v1625_v61 }
 0x56f   :  { %11925 = vmatmul.mubr.msk.f32.vlgmr.msra.gmra.mxu0 %vm1225_vm9, %v14998_v32  ;;  %1925 = vmatprep.subr.bf16.mxu0 %v14245_v12  ;;  %v12157_v32 = vld [vmem:[%s15693_s18 + $0x10] sm:$0xff]  }
 0x570   :  { %11927 = vmatprep.mubr.msk.f32.mxu0 %vm1225_vm9, %v15002_v58  ;;  %1926 = vmatpush1.bf16.msra.mxu0 %v12152_v10  ;;  %v12158_v58 = vld [vmem:[%s15693_s18 + $0x8] sm:$0xff]   ;;  %v2053_v10 = vmul.u32 2, %v15091_v6 }
 0x571   :  { %1927 = vmatprep.subr.bf16.mxu0 %v14245_v12 }
 0x573   :  { %11928 = vmatmul.mubr.msk.f32.gmra.mxu0 %vm1225_vm9, %v15012_v60  ;;  %v12159_v60 = vld [vmem:[%s15693_s18] sm:$0xff]  }
 0x574   :  { %1928 = vmatpush1.bf16.msra.mxu0 %v12153_v27 }
 0x575   :  { %1929 = vmatprep.subr.bf16.mxu0 %v14245_v12 }
 0x578   :  { %1930 = vmatpush1.bf16.msra.mxu0 %v12154_v52 }
 0x579   :  { %1931 = vmatprep.subr.bf16.mxu0 %v14245_v12 }
 0x57c   :  { %1932 = vmatpush1.bf16.msra.mxu0 %v12155_v57 }
 0x57d   :  { %1933 = vmatprep.subr.bf16.mxu0 %v14245_v12 }
 0x580   :  { %1934 = vmatpush1.bf16.msra.mxu0 %v12156_v26  ;;  %v10698_v26 = vld [vmem:[#allocation13] ss:$0 sm:$0xff] }
 0x581   :  { %1935 = vmatprep.subr.bf16.mxu0 %v14245_v12 }
 0x584   :  { %1936 = vmatpush1.bf16.msra.mxu0 %v12157_v32 }
 0x585   :  { %1937 = vmatprep.subr.bf16.mxu0 %v14245_v12 }
 0x588   :  { %1938 = vmatpush1.bf16.msra.mxu0 %v12158_v58  ;;  %v2055_v58 = vadd.s32 4294967295, %v2053_v10 }
 0x589   :  { %1939 = vmatprep.subr.bf16.mxu0 %v14245_v12 }
 0x58c   :  { %1940 = vmatpush1.bf16.msra.mxu0 %v12159_v60 }
 0x58d   :  { %1949 = vmatprep.subr.bf16.mxu0 %v14245_v12 }
 0x590   :  { %1950 = vmatpush2.bf16.msra.mxu0 %v12160_v13 }
 0x591   :  { %1951 = vmatprep.subr.bf16.mxu0 %v14245_v12 }
 0x594   :  { %1952 = vmatpush2.bf16.msra.mxu0 %v12161_v14 }
 0x595   :  { %1953 = vmatprep.subr.bf16.mxu0 %v14245_v12 }
 0x598   :  { %1954 = vmatpush2.bf16.msra.mxu0 %v12162_v17 }
 0x599   :  { %1955 = vmatprep.subr.bf16.mxu0 %v14245_v12 }
 0x59c   :  { %1956 = vmatpush2.bf16.msra.mxu0 %v12163_v20 }
 0x59d   :  { %2418 = vmatprep.subr.bf16.mxu0 %v14245_v12 }
 0x5cb   :  { %v12127_v33 = vpop.permute.xlu1 %12126 }
 0x5cc   :  { %v12128_v36 = vunpack.i.l.bf16 %v12127_v33  ;;  %v12129_v42 = vunpack.i.h.bf16 %v12127_v33 }
 0x5d3   :  { %v12132_v47 = vpop.permute.xlu1 %12131 }
 0x5d4   :  { %v12133_v55 = vunpack.i.l.bf16 %v12132_v47  ;;  %v12134_v28 = vunpack.i.h.bf16 %v12132_v47  ;;  %v12167_v47 = vld [vmem:[#allocation23] sm:$0xff]  }
 0x627   :  { %v11912_v23 = vpop.f32.mrf.mxu0 }
 0x628   :  { %v1840_v45 = vsel %vm15695_vm2, %v11912_v23, %v12129_v42  ;;  %vm2057_vm2 = vcmp.ge.s32.totalorder %v2055_v58, 0  ;;  %v2239_v42 = vadd.s32 1, %v2053_v10 }
 0x629   :  { %v1719_v24 = vpop.f32.mrf.mxu0 }
 0x62a   :  { %v1839_v29 = vsel %vm15694_vm13, %v1719_v24, %v12128_v36  ;;  %vm2062_vm13 = vmand %vm2058_vm7, %vm2060_vm0  ;;  %vm2151_vm7 = vcmp.lt.s32.totalorder %v2052_v0, 16  ;;  %vm2241_vm11 = vcmp.ge.s32.totalorder %v2239_v42, 0 }
 0x62b   :  { %v11915_v30 = vpop.f32.mrf.mxu0  ;;  %v1843_v49 = vpack.c.bf16 %v1840_v45, %v1839_v29  ;;  %v2064_v16 = vsel %vm2062_vm13, 1.0, %v14244_v22  ;;  %v12164_v45 = vld [vmem:[#allocation23 + $0x18] sm:$0xff]  }
 0x62c   :  { %v1842_v61 = vsel %vm15699_vm12, %v11915_v30, %v12134_v28  ;;  %11938 = vmatprep.mubr.msk.f32.mxu1 %vm1225_vm9, %v2064_v16  ;;  %vm2061_vm12 = vcmp.lt.s32.totalorder %v2055_v58, 16  ;;  %v12173_v28 = vld [vmem:[#allocation14 + $0x10] sm:$0xff]   ;;  %v12179_v16 = vld [vmem:[#allocation14 + $0x40] sm:$0xff]  }
 0x62d   :  { %v1729_v40 = vpop.f32.mrf.mxu0 }
 0x62e   :  { %v1841_v59 = vsel %vm15697_vm5, %v1729_v40, %v12133_v55  ;;  %vm15701_vm5 = vcmp.eq.s32.totalorder %v14537_v19, %v14588_v38  ;;  %v12171_v55 = vld [vmem:[#allocation14 + $0x20] sm:$0xff]  }
 0x62f   :  { %v11926_v41 = vpop.f32.mrf.mxu0  ;;  %v1845_v62 = vpack.c.bf16 %v1842_v61, %v1841_v59  ;;  %v12174_v59 = vld [vmem:[#allocation14 + $0x8] sm:$0xff]   ;;  %v12175_v61 = vld [vmem:[#allocation14] sm:$0xff]  }
 0x631   :  { %v1804_v39 = vpop.f32.mrf.mxu0 }
 0x632   :  { %v1844_v46 = vpack.c.bf16 %v11926_v41, %v1804_v39 }
 0x633   :  { %v11929_v53 = vpop.f32.mrf.mxu0 }
 0x634   :  { %10695 = vmatprep.mubr.msk.bf16.mxu0 %vm15696_vm6, %v1844_v46  ;;  %vm2147_vm6 = vcmp.ge.s32.totalorder %v2052_v0, 0  ;;  %v12166_v46 = vld [vmem:[#allocation23 + $0x8] sm:$0xff]  }
 0x635   :  { %1958 = vmatmul.mubr.bf16.vlgmr.msra.gmra.mxu0 %v1843_v49  ;;  %v1814_v54 = vpop.f32.mrf.mxu0  ;;  %vm2149_vm10 = vmand %vm15702_vm8, %vm2147_vm6  ;;  %vm15703_vm6 = vcmp.eq.s32.totalorder %v14537_v19, %v14572_v31  ;;  %v12168_v49 = vld [vmem:[#allocation14 + $0x38] sm:$0xff]  }
 0x636   :  { %v1846_v56 = vpack.c.bf16 %v11929_v53, %v1814_v54  ;;  %vm2153_vm13 = vmand %vm2149_vm10, %vm2151_vm7  ;;  %2419 = vmatpush1.bf16.msra.mxu0 %v12168_v49  ;;  %v12169_v53 = vld [vmem:[#allocation14 + $0x30] sm:$0xff]   ;;  %v12170_v54 = vld [vmem:[#allocation14 + $0x28] sm:$0xff]  }
 0x637   :  { %2420 = vmatprep.subr.bf16.mxu0 %v14245_v12 }
 0x638   :  { %10696 = vmatprep.mubr.msk.bf16.mxu0 %vm15698_vm3, %v1846_v56  ;;  %vm2059_vm3 = vmand %vm15701_vm5, %vm2057_vm2  ;;  %vm2148_vm2 = vcmp.ge.s32.totalorder %v2053_v10, 0  ;;  %v12172_v56 = vld [vmem:[#allocation14 + $0x18] sm:$0xff]  }
 0x639   :  { %vm2063_vm0 = vmand %vm2059_vm3, %vm2061_vm12  ;;  %vm2152_vm3 = vcmp.lt.s32.totalorder %v2053_v10, 16  ;;  %vm15704_vm12 = vcmp.eq.s32.totalorder %v14537_v19, %v14621_v50 }
 0x63a   :  { %v2065_v38 = vsel %vm2063_vm0, 1.0, %v14244_v22  ;;  %vm2150_vm8 = vmand %vm15703_vm6, %vm2148_vm2  ;;  %2421 = vmatpush1.bf16.msra.mxu0 %v12169_v53 }
 0x63b   :  { %vm2154_vm0 = vmand %vm2150_vm8, %vm2152_vm3  ;;  %2422 = vmatprep.subr.bf16.mxu0 %v14245_v12 }
 0x63c   :  { %v2156_v31 = vsel %vm2154_vm0, 1.0, %v14244_v22  ;;  %vm2243_vm2 = vmand %vm1045_vm14, %vm2241_vm11  ;;  %vm14246_vm14 = vmmov 0  }
 0x63d   :  { %1966 = vmatmul.mubr.bf16.gmra.mxu0 %v1845_v62  ;;  %v12176_v62 = vld [vmem:[#allocation14 + $0x58] sm:$0xff]  }
 0x63e   :  { %2423 = vmatpush1.bf16.msra.mxu0 %v12170_v54 }
 0x63f   :  { %2424 = vmatprep.subr.bf16.mxu0 %v14245_v12 }
 0x642   :  { %2425 = vmatpush1.bf16.msra.mxu0 %v12171_v55 }
 0x643   :  { %2426 = vmatprep.subr.bf16.mxu0 %v14245_v12 }
 0x646   :  { %2427 = vmatpush1.bf16.msra.mxu0 %v12172_v56  ;;  %v12181_v56 = vld [vmem:[#allocation19 + $0x38] sm:$0xff]  }
 0x647   :  { %2428 = vmatprep.subr.bf16.mxu0 %v14245_v12 }
 0x64a   :  { %2429 = vmatpush1.bf16.msra.mxu0 %v12173_v28  ;;  %v12182_v28 = vld [vmem:[#allocation19 + $0x70] sm:$0xff]  }
 0x64b   :  { %2430 = vmatprep.subr.bf16.mxu0 %v14245_v12 }
 0x64e   :  { %2431 = vmatpush1.bf16.msra.mxu0 %v12174_v59 }
 0x64f   :  { %2432 = vmatprep.subr.bf16.mxu0 %v14245_v12 }
 0x652   :  { %2433 = vmatpush1.bf16.msra.mxu0 %v12175_v61  ;;  %v12185_v61 = vld [vmem:[#allocation19 + $0x68] sm:$0xff]  }
 0x653   :  { %2442 = vmatprep.subr.bf16.mxu0 %v14245_v12 }
 0x656   :  { %2443 = vmatpush2.bf16.msra.mxu0 %v12176_v62  ;;  %v12186_v62 = vld [vmem:[#allocation19 + $0x28] sm:$0xff]  }
 0x657   :  { %2444 = vmatprep.subr.bf16.mxu0 %v14245_v12 }
 0x6f5   :  { %v1959_v4 = vpop.f32.mrf.mxu0 }
 0x6f6   :  { %v1981_v60 = vmul.f32 %v10697_v8, %v1959_v4 }
 0x6f7   :  { %v1961_v3 = vpop.f32.mrf.mxu0 }
 0x6f8   :  { %v1992_v25 = vadd.f32 %v10698_v26, %v1981_v60 }
 0x6f9   :  { %v1962_v5 = vpop.f32.mrf.mxu0 }
 0x6fa   :  { %v1982_v57 = vmul.f32 %v10697_v8, %v1962_v5  ;;  %v1996_v36 = vadd.f32 %v1992_v25, %v14906_v37  ;;  %v2155_v37 = vsel %vm2153_vm13, 1.0, %v14244_v22 }
 0x6fb   :  { %v1964_v7 = vpop.f32.mrf.mxu0 }
 0x6fc   :  { %v1993_v20 = vadd.f32 %v10698_v26, %v1982_v57 }
 0x6fd   :  { %v1967_v9 = vpop.f32.mrf.mxu0 }
 0x6fe   :  { %v1983_v27 = vmul.f32 %v10697_v8, %v1967_v9  ;;  %v1997_v30 = vadd.f32 %v1993_v20, %v14904_v35  ;;  %v2000_v35 = vmax.f32 %v1996_v36, 0.0  ;;  %v12193_v36 = vld [vmem:[#allocation19 + $0xa0] sm:$0xff]  }
 0x6ff   :  { %v1969_v52 = vpop.f32.mrf.mxu0 }
 0x700   :  { %v1994_v13 = vadd.f32 %v10698_v26, %v1983_v27 }
 0x701   :  { %v1970_v32 = vpop.f32.mrf.mxu0 }
 0x702   :  { %v1984_v14 = vmul.f32 %v10697_v8, %v1970_v32  ;;  %v1998_v24 = vadd.f32 %v1994_v13, %v14918_v43  ;;  %v2001_v43 = vmax.f32 %v1997_v30, 0.0  ;;  %v12187_v30 = vld [vmem:[#allocation19 + $0xb0] sm:$0xff]  }
 0x703   :  { %v1972_v17 = vpop.f32.mrf.mxu0 }
 0x704   :  { %v1995_v23 = vadd.f32 %v10698_v26, %v1984_v14  ;;  %v2002_v41 = vmax.f32 %v1998_v24, 0.0  ;;  %v2622_v17 = vadd.s32 4294967295, %v15082_v63 }
 0x706   :  { %v1999_v33 = vadd.f32 %v1995_v23, %v14913_v44  ;;  %v2238_v44 = vadd.s32 1, %v2052_v0  ;;  %v12177_v0 = vld [vmem:[#allocation14 + $0x50] sm:$0xff]  }
 0x707   :  { %2445 = vmatpush2.bf16.msra.mxu0 %v12177_v0  ;;  %v12188_v0 = vld [vmem:[#allocation19 + $0x60] sm:$0xff]  }
 0x708   :  { %v2003_v40 = vmax.f32 %v1999_v33, 0.0  ;;  %vm2240_vm5 = vcmp.ge.s32.totalorder %v2238_v44, 0  ;;  %vm2244_vm7 = vcmp.lt.s32.totalorder %v2238_v44, 16  ;;  %2446 = vmatprep.subr.bf16.mxu0 %v14245_v12  ;;  %v12184_v33 = vld [vmem:[#allocation19 + $0xb8] sm:$0xff]   ;;  %v12199_v44 = vld [vmem:[#allocation19 + $0x90] sm:$0xff]  }
 0x709   :  { %vm2242_vm10 = vmand %vm15704_vm12, %vm2240_vm5  ;;  %vm2245_vm5 = vcmp.lt.s32.totalorder %v2239_v42, 16  ;;  %vm2624_vm12 = vcmp.ge.s32.totalorder %v2622_v17, 0  ;;  %v15190_v17 = vand.u32 3, %v14529_v15 }
 0x70a   :  { %11930 = vmatprep.subr.mxu1 %v2003_v40  ;;  %vm2246_vm13 = vmand %vm2242_vm10, %vm2244_vm7  ;;  %vm2634_vm7 = vcmask 130048  }
 0x70b   :  { %11931 = vmatpush3.msra.mxu1 %v2003_v40  ;;  %v2248_v29 = vsel %vm2246_vm13, 1.0, %v14244_v22  ;;  %vm2247_vm6 = vmand %vm2243_vm2, %vm2245_vm5  ;;  %2447 = vmatpush2.bf16.msra.mxu0 %v12178_v1  ;;  %v12189_v1 = vld [vmem:[#allocation19 + $0x20] sm:$0xff]  }
 0x70c   :  { %11932 = vmatprep.subr.mxu1 %v2002_v41  ;;  %v2249_v39 = vsel %vm2247_vm6, 1.0, %v14244_v22  ;;  %2448 = vmatprep.subr.bf16.mxu0 %v14245_v12  ;;  %vm2626_vm10 = vmand %vm1201_vm15, %vm2624_vm12 }
 0x70d   :  { %11933 = vmatpush3.msra.mxu1 %v2002_v41  ;;  %v2632_v25 = vsel %vm2626_vm10, 1.0, %v14244_v22 }
 0x70e   :  { %11934 = vmatprep.subr.mxu1 %v2001_v43 }
 0x70f   :  { %11935 = vmatpush3.msra.mxu1 %v2001_v43  ;;  %2449 = vmatpush2.bf16.msra.mxu0 %v12179_v16  ;;  %v12191_v16 = vld [vmem:[#allocation19 + $0x58] sm:$0xff]  }
 0x710   :  { %11936 = vmatprep.subr.mxu1 %v2000_v35  ;;  %11989 = vmatprep.subr.bf16.mxu0 %v14244_v22 }
 0x711   :  { %11937 = vmatpush3.msra.mxu1 %v2000_v35 }
 0x712   :  { %11939 = vmatmul.mubr.msk.f32.vlgmr.msra.gmra.mxu1 %vm1225_vm9, %v2065_v38  ;;  %11941 = vmatprep.subr.mxu1 %v2003_v40 }
 0x713   :  { %11942 = vmatpush3.msra.mxu1 %v2003_v40  ;;  %11949 = vmatprep.mubr.msk.f32.mxu1 %vm1225_vm9, %v2155_v37  ;;  %v2623_v37 = vadd.s32 4294967295, %v15091_v6 }
 0x714   :  { %11943 = vmatprep.subr.mxu1 %v2002_v41 }
 0x715   :  { %11944 = vmatpush3.msra.mxu1 %v2002_v41  ;;  %vm2625_vm0 = vcmp.ge.s32.totalorder %v2623_v37, 0 }
 0x716   :  { %11945 = vmatprep.subr.mxu1 %v2001_v43  ;;  %vm2627_vm2 = vmand %vm1202_vm1, %vm2625_vm0  ;;  %vm15711_vm0 = vcmp.eq.s32.totalorder %v14537_v19, %v14621_v50 }
 0x717   :  { %11946 = vmatpush3.msra.mxu1 %v2001_v43  ;;  %v2633_v54 = vsel %vm2627_vm2, 1.0, %v14244_v22 }
 0x718   :  { %11947 = vmatprep.subr.mxu1 %v2000_v35 }
 0x719   :  { %11948 = vmatpush3.msra.mxu1 %v2000_v35 }
 0x71a   :  { %11950 = vmatmul.mubr.msk.f32.vlgmr.msra.gmra.mxu1 %vm1225_vm9, %v2156_v31  ;;  %11952 = vmatprep.subr.mxu1 %v2003_v40  ;;  %v2716_v31 = vadd.s32 1, %v15082_v63 }
 0x71b   :  { %11953 = vmatpush3.msra.mxu1 %v2003_v40  ;;  %11960 = vmatprep.mubr.msk.f32.mxu1 %vm1225_vm9, %v2248_v29  ;;  %v12190_v40 = vld [vmem:[#allocation19 + $0xa8] sm:$0xff]   ;;  %v10719_v29 = vld [vmem:[#allocation17] ss:$0 sm:$0xff] }
 0x71c   :  { %11954 = vmatprep.subr.mxu1 %v2002_v41  ;;  %vm2722_vm13 = vcmp.lt.s32.totalorder %v2716_v31, 8 }
 0x71d   :  { %11955 = vmatpush3.msra.mxu1 %v2002_v41  ;;  %v12196_v41 = vld [vmem:[#allocation19 + $0x98] sm:$0xff]   ;;  %vm2724_vm5 = vmand %vm15595_vm4, %vm2722_vm13 }
 0x71e   :  { %11956 = vmatprep.subr.mxu1 %v2001_v43 }
 0x71f   :  { %11957 = vmatpush3.msra.mxu1 %v2001_v43 }
 0x720   :  { %11958 = vmatprep.subr.mxu1 %v2000_v35 }
 0x721   :  { %11959 = vmatpush3.msra.mxu1 %v2000_v35  ;;  %v10718_v35 = vld [vmem:[#allocation16] ss:$0 sm:$0xff] }
 0x722   :  { %11961 = vmatmul.mubr.msk.f32.vlgmr.msra.gmra.mxu1 %vm1225_vm9, %v2249_v39  ;;  %11963 = vmatprep.subr.bf16.mxu1 %v14244_v22  ;;  %vm15705_vm9 = vcmask 523264  }
 0x723   :  { %11964 = vmatpush3.bf16.msra.mxu1 %v12164_v45  ;;  %11971 = vmatprep.mubr.msk.bf16.mxu1 %vm14246_vm14, %v14244_v22  ;;  %vm15706_vm11 = vmmov %vm15705_vm9 }
 0x724   :  { %11965 = vmatprep.subr.bf16.mxu1 %v14244_v22  ;;  %vm15707_vm8 = vmmov %vm15705_vm9 }
 0x725   :  { %vm15708_vm3 = vmmov %vm15707_vm8 }
 0x727   :  { %11966 = vmatpush3.bf16.msra.mxu1 %v12165_v11 }
 0x728   :  { %11967 = vmatprep.subr.bf16.mxu1 %v14244_v22 }
 0x72b   :  { %11968 = vmatpush3.bf16.msra.mxu1 %v12166_v46  ;;  %v2717_v46 = vadd.s32 1, %v15091_v6  ;;  %v2726_v6 = vsel %vm2724_vm5, 1.0, %v14244_v22 }
 0x72c   :  { %11969 = vmatprep.subr.bf16.mxu1 %v14244_v22 }
 0x72d   :  { %vm2723_vm6 = vcmp.lt.s32.totalorder %v2717_v46, 8 }
 0x72f   :  { %11970 = vmatpush3.bf16.msra.mxu1 %v12167_v47 }
 0x7d2   :  { %v11940_v4 = vpop.f32.mrf.mxu1 }
 0x7d4   :  { %v2138_v3 = vpop.f32.mrf.mxu1 }
 0x7da   :  { %v11951_v5 = vpop.f32.mrf.mxu1 }
 0x7dc   :  { %v2229_v7 = vpop.f32.mrf.mxu1 }
 0x7dd   :  { %v2479_v8 = vpack.c.bf16 %v11951_v5, %v2229_v7  ;;  %v12135_v9 = vpack.i.bf16 %v11951_v5, %v2229_v7  ;;  %v12195_v5 = vld [vmem:[#allocation19 + $0x10] sm:$0xff]   ;;  %v12197_v7 = vld [vmem:[#allocation19 + $0x48] sm:$0xff]  }
 0x7df   :  { %12136 = vrot.lane.b32.xlu0 %v12135_v9, %s14207_s25  ;;  %11972 = vmatmul.mubr.msk.bf16.vlgmr.msra.gmra.mxu1 %vm15705_vm9, %v2479_v8  ;;  %vm15709_vm9 = vcmp.eq.s32.totalorder %v14537_v19, %v14939_v51  ;;  %v12183_v51 = vld [vmem:[#allocation19 + $0x30] sm:$0xff]   ;;  %v12198_v8 = vld [vmem:[#allocation19 + $0x8] sm:$0xff]   ;;  %v12200_v9 = vld [vmem:[#allocation19 + $0x40] sm:$0xff]   ;;  %s14247_s25 = smov [#allocation56]  }
 0x7e0   :  { %11979 = vmatprep.mubr.msk.f32.mxu1 %vm2634_vm7, %v2632_v25  ;;  %v3120_v25 = vmul.u32 2, %v15190_v17  ;;  %s10568_s17 = sshll.u32 %s14247_s25, 4  ;;  %s10569_s17 = int_to_ptr.vmem [resolvable:$true] %s10568_s17 }
 0x7e1   :  { %p14111_p8 = scmp.lt.s32.totalorder %s10569_s17, %s10569_s17 }
 0x7e2   :  { %v11962_v10 = vpop.f32.mrf.mxu1  ;;  %v3278_v37 = vadd.s32 1, %v3120_v25  ;;  %vm3200_vm5 = vcmp.ge.s32.totalorder %v3120_v25, 0 }
 0x7e4   :  { %v2322_v27 = vpop.f32.mrf.mxu1  ;;  %vm3281_vm2 = vcmp.lt.s32.totalorder %v3278_v37, 8 }
 0x7e5   :  { %v2342_v52 = vpack.c.bf16 %v11962_v10, %v2322_v27  ;;  %v12201_v10 = vld [vmem:[#allocation19] sm:$0xff]   ;;  %v12202_v27 = vld [vmem:[#allocation19 + $0x88] sm:$0xff]  }
 0x7e7   :  { %10717 = vmatprep.mubr.msk.bf16.mxu0 %vm15706_vm11, %v2342_v52  ;;  %vm2725_vm11 = vmand %vm15709_vm9, %vm2723_vm6  ;;  %v12203_v52 = vld [vmem:[#allocation19 + $0x80] sm:$0xff]  }
 0x7e8   :  { %v2727_v55 = vsel %vm2725_vm11, 1.0, %v14244_v22  ;;  %vm15712_vm11 = vcmp.eq.s32.totalorder %v14537_v19, %v14535_v18 }
 0x7e9   :  { %vm3201_vm4 = vmand %vm15712_vm11, %vm3200_vm5 }
 0x851   :  { %v12137_v57 = vpop.permute.xlu0 %12136 }
 0x852   :  { %v12139_v26 = vunpack.i.h.bf16 %v12137_v57  ;;  %v12138_v32 = vunpack.i.l.bf16 %v12137_v57 }
 0x854   :  { %v2340_v58 = vsel %vm15707_vm8, %v11940_v4, %v12139_v26  ;;  %v2339_v60 = vsel %vm15708_vm3, %v2138_v3, %v12138_v32  ;;  %v12192_v4 = vld [vmem:[#allocation19 + $0x18] sm:$0xff]   ;;  %v12194_v3 = vld [vmem:[#allocation19 + $0x50] sm:$0xff]   ;;  %vm3279_vm8 = vcmp.ge.s32.totalorder %v3278_v37, 0  ;;  %vm15710_vm3 = vcmp.eq.s32.totalorder %v14537_v19, %v14540_v21 }
 0x855   :  { %v2341_v13 = vpack.c.bf16 %v2340_v58, %v2339_v60  ;;  %vm3280_vm13 = vmand %vm15711_vm0, %vm3279_vm8  ;;  %v12236_v37 = vld [vmem:[#allocation28 + $0xf4] ss:$8 sps:$4 sm:$0xff]  }
 0x856   :  { %vm3282_vm9 = vmand %vm3280_vm13, %vm3281_vm2  ;;  %vm15716_vm2 = vcmp.eq.s32.totalorder %v14537_v19, %v14540_v21 }
 0x857   :  { %2451 = vmatmul.mubr.bf16.vlgmr.msra.gmra.mxu0 %v2341_v13 }
 0x858   :  { %12005 = vmatprep.mubr.msk.bf16.mxu0 %vm14246_vm14, %v14244_v22  ;;  %11990 = vmatpush3.bf16.msra.mxu0 %v12184_v33 }
 0x859   :  { %11991 = vmatprep.subr.bf16.mxu0 %v14244_v22 }
 0x85c   :  { %11992 = vmatpush3.bf16.msra.mxu0 %v12187_v30 }
 0x85d   :  { %11993 = vmatprep.subr.bf16.mxu0 %v14244_v22 }
 0x860   :  { %11994 = vmatpush3.bf16.msra.mxu0 %v12190_v40 }
 0x861   :  { %11995 = vmatprep.subr.bf16.mxu0 %v14244_v22 }
 0x864   :  { %11996 = vmatpush3.bf16.msra.mxu0 %v12193_v36  ;;  %v10755_v36 = vld [vmem:[#allocation20] ss:$0 sm:$0xff] }
 0x865   :  { %11997 = vmatprep.subr.bf16.mxu0 %v14244_v22 }
 0x868   :  { %11998 = vmatpush3.bf16.msra.mxu0 %v12196_v41 }
 0x869   :  { %11999 = vmatprep.subr.bf16.mxu0 %v14244_v22 }
 0x86c   :  { %12000 = vmatpush3.bf16.msra.mxu0 %v12199_v44  ;;  %v3121_v44 = vadd.s32 4294967295, %v3120_v25 }
 0x86d   :  { %12001 = vmatprep.subr.bf16.mxu0 %v14244_v22 }
 0x86e   :  { %vm3122_vm1 = vcmp.ge.s32.totalorder %v3121_v44, 0  ;;  %vm3124_vm10 = vcmp.lt.s32.totalorder %v3121_v44, 8  ;;  %v12230_v44 = vld [vmem:[#allocation28 + $0x4] ss:$8 sps:$4 sm:$0xff]  }
 0x86f   :  { %vm3123_vm12 = vmand %vm15710_vm3, %vm3122_vm1  ;;  %vm3202_vm1 = vcmp.lt.s32.totalorder %v3120_v25, 8  ;;  %v12257_v25 = vld [vmem:[#allocation28 + $0x124] ss:$8 sps:$4 sm:$0xff]   ;;  %vm15713_vm3 = vcmp.eq.s32.totalorder %v14537_v19, %v14932_v48 }
 0x870   :  { %12002 = vmatpush3.bf16.msra.mxu0 %v12202_v27  ;;  %vm3125_vm6 = vmand %vm3123_vm12, %vm3124_vm10  ;;  %v12215_v27 = vld [vmem:[#allocation28 + $0x44] ss:$8 sps:$4 sm:$0xff]   ;;  %vm15714_vm10 = vcmask 64512  }
 0x871   :  { %12003 = vmatprep.subr.bf16.mxu0 %v14244_v22  ;;  %vm3203_vm8 = vmand %vm3201_vm4, %vm3202_vm1  ;;  %vm15717_vm1 = vcmp.eq.s32.totalorder %v14537_v19, %v14535_v18 }
 0x872   :  { %vm15715_vm0 = vmmov %vm15714_vm10 }
 0x874   :  { %12004 = vmatpush3.bf16.msra.mxu0 %v12203_v52  ;;  %v12245_v52 = vld [vmem:[#allocation28 + $0x144] ss:$8 sps:$4 sm:$0xff]  }
 0x875   :  { %12023 = vmatprep.subr.mxu0 %v14244_v22 }
 0x89f   :  { %v15148_v14 = vpop.f32.mrf.mxu1 }
 0x8a1   :  { %v11973_v20 = vpop.f32.mrf.mxu1 }
 0x8a3   :  { %v15151_v23 = vpop.f32.mrf.mxu1 }
 0x8a5   :  { %v11974_v24 = vpop.f32.mrf.mxu1 }
 0x917   :  { %v2452_v43 = vpop.f32.mrf.mxu0 }
 0x918   :  { %v2466_v42 = vmul.f32 %v10718_v35, %v2452_v43  ;;  %v10725_v43 = vld [vmem:[#allocation25] ss:$0 sm:$0xff] }
 0x919   :  { %v2454_v38 = vpop.f32.mrf.mxu0 }
 0x91a   :  { %v2475_v47 = vadd.f32 %v10719_v29, %v2466_v42 }
 0x91b   :  { %v2455_v39 = vpop.f32.mrf.mxu0 }
 0x91c   :  { %v2467_v45 = vmul.f32 %v10718_v35, %v2455_v39  ;;  %v2477_v63 = vmax.f32 %v2475_v47, 0.0  ;;  %v10726_v47 = vld [vmem:[#allocation26] ss:$0 sm:$0xff] }
 0x91d   :  { %v2457_v11 = vpop.f32.mrf.mxu0 }
 0x91e   :  { %v2476_v49 = vadd.f32 %v10719_v29, %v2467_v45  ;;  %v10756_v29 = vld [vmem:[#allocation22] ss:$0 sm:$0xff]  ;;  %v2563_v45 = vmul.f32 %v10725_v43, %v15148_v14  ;;  %v2564_v11 = vmul.f32 %v10725_v43, %v15151_v23  ;;  %v12269_v43 = vld [vmem:[#allocation28 + $0x104] ss:$8 sps:$4 sm:$0xff]  }
 0x920   :  { %v2478_v53 = vmax.f32 %v2476_v49, 0.0 }
 0x922   :  { %11975 = vmatprep.subr.mxu1 %v2478_v53  ;;  %v2810_v59 = vpack.c.bf16 %v2478_v53, %v2477_v63 }
 0x923   :  { %11976 = vmatpush3.msra.mxu1 %v2478_v53 }
 0x924   :  { %11977 = vmatprep.subr.mxu1 %v2477_v63 }
 0x925   :  { %11978 = vmatpush3.msra.mxu1 %v2477_v63 }
 0x926   :  { %11980 = vmatmul.mubr.msk.f32.vlgmr.msra.gmra.mxu1 %vm2634_vm7, %v2633_v54  ;;  %11982 = vmatprep.subr.mxu1 %v2478_v53  ;;  %v2572_v54 = vadd.f32 %v10726_v47, %v2563_v45  ;;  %v12246_v45 = vld [vmem:[#allocation28 + $0xd0] ss:$8 sps:$4 sm:$0xff]  }
 0x927   :  { %11983 = vmatpush3.msra.mxu1 %v2478_v53  ;;  %11986 = vmatprep.mubr.msk.f32.mxu1 %vm2634_vm7, %v2726_v6  ;;  %v2573_v6 = vadd.f32 %v10726_v47, %v2564_v11  ;;  %v12254_v11 = vld [vmem:[#allocation28 + $0xc4] ss:$8 sps:$4 sm:$0xff]   ;;  %v12260_v47 = vld [vmem:[#allocation28 + $0xb4] ss:$8 sps:$4 sm:$0xff]  }
 0x928   :  { %11984 = vmatprep.subr.mxu1 %v2477_v63 }
 0x929   :  { %11985 = vmatpush3.msra.mxu1 %v2477_v63 }
 0x92a   :  { %11987 = vmatmul.mubr.msk.f32.vlgmr.msra.gmra.mxu1 %vm2634_vm7, %v2727_v55  ;;  %11688 = vmatprep.subr.bf16.mxu1 %v12180_v34 }
 0x92b   :  { %2988 = vmatprep.mubr.bf16.mxu1 %v2810_v59  ;;  %11689 = vmatpush3.bf16.msra.mxu1 %v12181_v56  ;;  %v3283_v59 = vsel %vm3282_vm9, 1.0, %v14244_v22 }
 0x92c   :  { %11690 = vmatprep.subr.bf16.mxu1 %v12182_v28  ;;  %v3126_v28 = vsel %vm3125_vm6, 1.0, %v14244_v22 }
 0x92f   :  { %11691 = vmatpush3.bf16.msra.mxu1 %v12183_v51  ;;  %v12227_v51 = vld [vmem:[#allocation28 + $0x174] ss:$8 sps:$4 sm:$0xff]  }
 0x930   :  { %11692 = vmatprep.subr.bf16.mxu1 %v12185_v61  ;;  %v12206_v61 = vld [vmem:[#allocation28 + $0x74] ss:$8 sps:$4 sm:$0xff]  }
 0x933   :  { %11693 = vmatpush3.bf16.msra.mxu1 %v12186_v62  ;;  %v3204_v62 = vsel %vm3203_vm8, 1.0, %v14244_v22 }
 0x934   :  { %11694 = vmatprep.subr.bf16.mxu1 %v12188_v0  ;;  %v12204_v0 = vld [vmem:[#allocation28 + $0x70] ss:$8 sps:$4 sm:$0xff]  }
 0x937   :  { %11695 = vmatpush3.bf16.msra.mxu1 %v12189_v1  ;;  %v12225_v1 = vld [vmem:[#allocation28 + $0x170] ss:$8 sps:$4 sm:$0xff]  }
 0x938   :  { %11696 = vmatprep.subr.bf16.mxu1 %v12191_v16  ;;  %v12209_v16 = vld [vmem:[#allocation28 + $0x64] ss:$8 sps:$4 sm:$0xff]  }
 0x93b   :  { %11697 = vmatpush3.bf16.msra.mxu1 %v12192_v4  ;;  %v12233_v4 = vld [vmem:[#allocation28 + $0x164] ss:$8 sps:$4 sm:$0xff]  }
 0x93c   :  { %11698 = vmatprep.subr.bf16.mxu1 %v12194_v3  ;;  %v12207_v3 = vld [vmem:[#allocation28 + $0x60] ss:$8 sps:$4 sm:$0xff]  }
 0x93f   :  { %11699 = vmatpush3.bf16.msra.mxu1 %v12195_v5  ;;  %v12231_v5 = vld [vmem:[#allocation28 + $0x160] ss:$8 sps:$4 sm:$0xff]  }
 0x940   :  { %11700 = vmatprep.subr.bf16.mxu1 %v12197_v7  ;;  %v12212_v7 = vld [vmem:[#allocation28 + $0x54] ss:$8 sps:$4 sm:$0xff]  }
 0x943   :  { %11701 = vmatpush3.bf16.msra.mxu1 %v12198_v8  ;;  %v12239_v8 = vld [vmem:[#allocation28 + $0x154] ss:$8 sps:$4 sm:$0xff]  }
 0x944   :  { %11702 = vmatprep.subr.bf16.mxu1 %v12200_v9  ;;  %v12210_v9 = vld [vmem:[#allocation28 + $0x50] ss:$8 sps:$4 sm:$0xff]  }
 0x947   :  { %11703 = vmatpush3.bf16.msra.mxu1 %v12201_v10  ;;  %v12237_v10 = vld [vmem:[#allocation28 + $0x150] ss:$8 sps:$4 sm:$0xff]  }
 0x948   :  { %12009 = vmatprep.subr.mxu1 %v14244_v22 }
 0x9e6   :  { %v11981_v57 = vpop.f32.mrf.mxu1 }
 0x9e8   :  { %v2707_v26 = vpop.f32.mrf.mxu1 }
 0x9e9   :  { %v2809_v32 = vpack.c.bf16 %v11981_v57, %v2707_v26  ;;  %v12213_v57 = vld [vmem:[#allocation28 + $0x40] ss:$8 sps:$4 sm:$0xff]  }
 0x9ea   :  { %v11988_v58 = vpop.f32.mrf.mxu1  ;;  %v12243_v26 = vld [vmem:[#allocation28 + $0x140] ss:$8 sps:$4 sm:$0xff]  }
 0x9eb   :  { %2989 = vmatmul.mubr.bf16.vlgmr.msra.gmra.mxu1 %v2809_v32  ;;  %v12218_v32 = vld [vmem:[#allocation28 + $0x34] ss:$8 sps:$4 sm:$0xff]  }
 0x9ec   :  { %v2800_v60 = vpop.f32.mrf.mxu1  ;;  %12013 = vmatprep.mubr.msk.f32.mxu1 %vm14246_vm14, %v14244_v22 }
 0x9ed   :  { %v2811_v13 = vpack.c.bf16 %v11988_v58, %v2800_v60  ;;  %v12251_v58 = vld [vmem:[#allocation28 + $0x134] ss:$8 sps:$4 sm:$0xff]   ;;  %v12216_v60 = vld [vmem:[#allocation28 + $0x30] ss:$8 sps:$4 sm:$0xff]  }
 0x9ef   :  { %12006 = vmatmul.mubr.bf16.vlgmr.msra.gmra.mxu0 %v2811_v13  ;;  %v12249_v13 = vld [vmem:[#allocation28 + $0x130] ss:$8 sps:$4 sm:$0xff]  }
 0x9f0   :  { %12027 = vmatprep.mubr.msk.f32.mxu0 %vm14246_vm14, %v14244_v22 }
 0xaab   :  { %v11704_v20 = vpop.f32.mrf.mxu1 }
 0xaad   :  { %v11705_v24 = vpop.f32.mrf.mxu1 }
 0xaae   :  { %v11706_v33 = vadd.f32 %v11705_v24, %v11704_v20  ;;  %v12221_v20 = vld [vmem:[#allocation28 + $0x24] ss:$8 sps:$4 sm:$0xff]   ;;  %v12219_v24 = vld [vmem:[#allocation28 + $0x20] ss:$8 sps:$4 sm:$0xff]  }
 0xaaf   :  { %v11707_v30 = vpop.f32.mrf.mxu1  ;;  %v3031_v40 = vpop.f32.mrf.mxu0 }
 0xab0   :  { %v3032_v41 = vadd.f32 %v11706_v33, %v3031_v40  ;;  %v12255_v33 = vld [vmem:[#allocation28 + $0x120] ss:$8 sps:$4 sm:$0xff]   ;;  %v12263_v40 = vld [vmem:[#allocation28 + $0x114] ss:$8 sps:$4 sm:$0xff]  }
 0xab1   :  { %v11708_v35 = vpop.f32.mrf.mxu1  ;;  %v12007_v38 = vpop.f32.mrf.mxu0 }
 0xab2   :  { %v3045_v42 = vmul.f32 %v10755_v36, %v3032_v41  ;;  %v11709_v31 = vadd.f32 %v11708_v35, %v11707_v30  ;;  %v12224_v30 = vld [vmem:[#allocation28 + $0x14] ss:$8 sps:$4 sm:$0xff]   ;;  %v12261_v41 = vld [vmem:[#allocation28 + $0x110] ss:$8 sps:$4 sm:$0xff]   ;;  %v12228_v35 = vld [vmem:[#allocation28] ss:$8 sps:$4 sm:$0xff]  }
 0xab3   :  { %v3034_v39 = vpop.f32.mrf.mxu0  ;;  %v12267_v38 = vld [vmem:[#allocation28 + $0x100] ss:$8 sps:$4 sm:$0xff]  }
 0xab4   :  { %v3035_v46 = vadd.f32 %v11709_v31, %v3034_v39  ;;  %v3054_v53 = vadd.f32 %v10756_v29, %v3045_v42  ;;  %v12234_v42 = vld [vmem:[#allocation28 + $0xf0] ss:$8 sps:$4 sm:$0xff]   ;;  %v12242_v31 = vld [vmem:[#allocation28 + $0xe4] ss:$8 sps:$4 sm:$0xff]   ;;  %v12248_v39 = vld [vmem:[#allocation28 + $0xd4] ss:$8 sps:$4 sm:$0xff]  }
 0xab5   :  { %v12008_v49 = vpop.f32.mrf.mxu0 }
 0xab6   :  { %v3046_v63 = vmul.f32 %v10755_v36, %v3035_v46  ;;  %v3056_v14 = vadd.f32 %v3054_v53, %v2572_v54  ;;  %v12222_v36 = vld [vmem:[#allocation28 + $0x10] ss:$8 sps:$4 sm:$0xff]   ;;  %v12252_v46 = vld [vmem:[#allocation28 + $0xc0] ss:$8 sps:$4 sm:$0xff]   ;;  %v12266_v53 = vld [vmem:[#allocation28 + $0xa4] ss:$8 sps:$4 sm:$0xff]  }
 0xab7   :  { %v12258_v49 = vld [vmem:[#allocation28 + $0xb0] ss:$8 sps:$4 sm:$0xff]   ;;  %v12272_v54 = vld [vmem:[#allocation28 + $0x94] ss:$8 sps:$4 sm:$0xff]  }
 0xab8   :  { %v3055_v34 = vadd.f32 %v10756_v29, %v3046_v63  ;;  %v3058_v56 = vmax.f32 %v3056_v14, 0.0  ;;  %v12240_v29 = vld [vmem:[#allocation28 + $0xe0] ss:$8 sps:$4 sm:$0xff]   ;;  %v12278_v14 = vld [vmem:[#allocation28 + $0x84] ss:$8 sps:$4 sm:$0xff]  }
 0xab9   :  { %v12264_v63 = vld [vmem:[#allocation28 + $0xa0] ss:$8 sps:$4 sm:$0xff]  }
 0xaba   :  { %v3057_v23 = vadd.f32 %v3055_v34, %v2573_v6  ;;  %v12270_v6 = vld [vmem:[#allocation28 + $0x90] ss:$8 sps:$4 sm:$0xff]   ;;  %v12275_v34 = vld [vmem:[#allocation37 + $0x74] ss:$8 sps:$4 sm:$0xff]  }
 0xabc   :  { %v3059_v55 = vmax.f32 %v3057_v23, 0.0  ;;  %v12276_v23 = vld [vmem:[#allocation28 + $0x80] ss:$8 sps:$4 sm:$0xff]  }
 0xabe   :  { %12010 = vmatpush3.msra.mxu1 %v3059_v55  ;;  %12024 = vmatpush3.msra.mxu0 %v3059_v55 }
 0xabf   :  { %12011 = vmatprep.subr.mxu1 %v14244_v22  ;;  %12025 = vmatprep.subr.mxu0 %v14244_v22 }
 0xac0   :  { %12012 = vmatpush3.msra.mxu1 %v3058_v56  ;;  %12026 = vmatpush3.msra.mxu0 %v3058_v56 }
 0xac1   :  { %12014 = vmatmul.mubr.msk.f32.vlgmr.msra.gmra.mxu1 %vm2634_vm7, %v3126_v28  ;;  %12016 = vmatprep.subr.mxu1 %v14244_v22  ;;  %v12273_v28 = vld [vmem:[#allocation37 + $0x70] ss:$8 sps:$4 sm:$0xff]  }
 0xac2   :  { %12028 = vmatmul.mubr.msk.f32.vlgmr.msra.gmra.mxu0 %vm2634_vm7, %v3283_v59  ;;  %12017 = vmatpush3.msra.mxu1 %v3059_v55 }
 0xac3   :  { %12018 = vmatprep.subr.mxu1 %v14244_v22  ;;  %12020 = vmatprep.mubr.msk.f32.mxu1 %vm14246_vm14, %v14244_v22 }
 0xac4   :  { %12019 = vmatpush3.msra.mxu1 %v3058_v56  ;;  %3641 = vmatprep.subr.bf16.mxu0 %v12227_v51 }
 0xac5   :  { %12021 = vmatmul.mubr.msk.f32.vlgmr.msra.gmra.mxu1 %vm2634_vm7, %v3204_v62  ;;  %3600 = vmatprep.subr.bf16.mxu1 %v12206_v61  ;;  %v12281_v61 = vld [vmem:[#allocation37 + $0x64] ss:$8 sps:$4 sm:$0xff]  }
 0xac6   :  { %3601 = vmatpush1.bf16.msra.mxu1 %v12204_v0  ;;  %3642 = vmatpush1.bf16.msra.mxu0 %v12225_v1 }
 0xac7   :  { %3602 = vmatprep.subr.bf16.mxu1 %v12209_v16  ;;  %3643 = vmatprep.subr.bf16.mxu0 %v12233_v4  ;;  %v12279_v16 = vld [vmem:[#allocation37 + $0x60] ss:$8 sps:$4 sm:$0xff]  }
 0xac8   :  { %3673 = vmatprep.mubr.bf16.mxu0 %v14245_v12 }
 0xaca   :  { %3603 = vmatpush1.bf16.msra.mxu1 %v12207_v3  ;;  %3644 = vmatpush1.bf16.msra.mxu0 %v12231_v5  ;;  %v12284_v5 = vld [vmem:[#allocation37 + $0x54] ss:$8 sps:$4 sm:$0xff]  }
 0xacb   :  { %3604 = vmatprep.subr.bf16.mxu1 %v12212_v7  ;;  %3645 = vmatprep.subr.bf16.mxu0 %v12239_v8  ;;  %v12282_v7 = vld [vmem:[#allocation37 + $0x50] ss:$8 sps:$4 sm:$0xff]   ;;  %v12287_v8 = vld [vmem:[#allocation37 + $0x44] ss:$8 sps:$4 sm:$0xff]  }
 0xace   :  { %3605 = vmatpush1.bf16.msra.mxu1 %v12210_v9  ;;  %3646 = vmatpush1.bf16.msra.mxu0 %v12237_v10  ;;  %v12285_v9 = vld [vmem:[#allocation37 + $0x40] ss:$8 sps:$4 sm:$0xff]   ;;  %v12290_v10 = vld [vmem:[#allocation37 + $0x34] ss:$8 sps:$4 sm:$0xff]  }
 0xacf   :  { %3606 = vmatprep.subr.bf16.mxu1 %v12215_v27  ;;  %3647 = vmatprep.subr.bf16.mxu0 %v12245_v52  ;;  %v12288_v27 = vld [vmem:[#allocation37 + $0x30] ss:$8 sps:$4 sm:$0xff]   ;;  %v12293_v52 = vld [vmem:[#allocation37 + $0x24] ss:$8 sps:$4 sm:$0xff]  }
 0xad2   :  { %3607 = vmatpush1.bf16.msra.mxu1 %v12213_v57  ;;  %3648 = vmatpush1.bf16.msra.mxu0 %v12243_v26  ;;  %v12296_v57 = vld [vmem:[#allocation37 + $0x14] ss:$8 sps:$4 sm:$0xff]   ;;  %v12294_v26 = vld [vmem:[#allocation37 + $0x10] ss:$8 sps:$4 sm:$0xff]  }
 0xad3   :  { %3608 = vmatprep.subr.bf16.mxu1 %v12218_v32  ;;  %3649 = vmatprep.subr.bf16.mxu0 %v12251_v58  ;;  %v12299_v32 = vld [vmem:[#allocation37 + $0x4] ss:$8 sps:$4 sm:$0xff]   ;;  %v12297_v58 = vld [vmem:[#allocation37] ss:$8 sps:$4 sm:$0xff]  }
 0xad6   :  { %3609 = vmatpush1.bf16.msra.mxu1 %v12216_v60  ;;  %3650 = vmatpush1.bf16.msra.mxu0 %v12249_v13  ;;  %v12348_v60 = vld [vmem:[#allocation32 + $0x70] ss:$8 sps:$4 sm:$0xff]   ;;  %v12350_v13 = vld [vmem:[#allocation32 + $0x74] ss:$8 sps:$4 sm:$0xff]  }
 0xad7   :  { %3610 = vmatprep.subr.bf16.mxu1 %v12221_v20  ;;  %3651 = vmatprep.subr.bf16.mxu0 %v12257_v25  ;;  %v12353_v20 = vld [vmem:[#allocation32 + $0x64] ss:$8 sps:$4 sm:$0xff]   ;;  %v12351_v25 = vld [vmem:[#allocation32 + $0x60] ss:$8 sps:$4 sm:$0xff]  }
 0xada   :  { %3611 = vmatpush1.bf16.msra.mxu1 %v12219_v24  ;;  %3652 = vmatpush1.bf16.msra.mxu0 %v12255_v33  ;;  %v12356_v24 = vld [vmem:[#allocation32 + $0x54] ss:$8 sps:$4 sm:$0xff]   ;;  %v12354_v33 = vld [vmem:[#allocation32 + $0x50] ss:$8 sps:$4 sm:$0xff]  }
 0xadb   :  { %3612 = vmatprep.subr.bf16.mxu1 %v12224_v30  ;;  %3653 = vmatprep.subr.bf16.mxu0 %v12263_v40  ;;  %v12359_v30 = vld [vmem:[#allocation32 + $0x44] ss:$8 sps:$4 sm:$0xff]   ;;  %v12357_v40 = vld [vmem:[#allocation32 + $0x40] ss:$8 sps:$4 sm:$0xff]  }
 0xade   :  { %3613 = vmatpush1.bf16.msra.mxu1 %v12222_v36  ;;  %3654 = vmatpush1.bf16.msra.mxu0 %v12261_v41  ;;  %v12362_v36 = vld [vmem:[#allocation32 + $0x34] ss:$8 sps:$4 sm:$0xff]   ;;  %v12360_v41 = vld [vmem:[#allocation32 + $0x30] ss:$8 sps:$4 sm:$0xff]  }
 0xadf   :  { %3614 = vmatprep.subr.bf16.mxu1 %v12230_v44  ;;  %3655 = vmatprep.subr.bf16.mxu0 %v12269_v43  ;;  %v12365_v44 = vld [vmem:[#allocation32 + $0x24] ss:$8 sps:$4 sm:$0xff]   ;;  %v12363_v43 = vld [vmem:[#allocation32 + $0x20] ss:$8 sps:$4 sm:$0xff]  }
 0xae2   :  { %3615 = vmatpush1.bf16.msra.mxu1 %v12228_v35  ;;  %3656 = vmatpush1.bf16.msra.mxu0 %v12267_v38  ;;  %v12368_v35 = vld [vmem:[#allocation32 + $0x14] ss:$8 sps:$4 sm:$0xff]   ;;  %v12366_v38 = vld [vmem:[#allocation32 + $0x10] ss:$8 sps:$4 sm:$0xff]  }
 0xae3   :  { %3616 = vmatprep.subr.bf16.mxu1 %v12236_v37  ;;  %3808 = vmatprep.subr.bf16.mxu0 %v12275_v34  ;;  %v12371_v37 = vld [vmem:[#allocation32 + $0x4] ss:$8 sps:$4 sm:$0xff]   ;;  %v12386_v34 = vld [vmem:[#allocation32 + $0xb4] ss:$8 sps:$4 sm:$0xff]  }
 0xae6   :  { %3617 = vmatpush2.bf16.msra.mxu1 %v12234_v42  ;;  %v12369_v42 = vld [vmem:[#allocation32] ss:$8 sps:$4 sm:$0xff]  }
 0xae7   :  { %3618 = vmatprep.subr.bf16.mxu1 %v12242_v31  ;;  %v12374_v31 = vld [vmem:[#allocation32 + $0xf4] ss:$8 sps:$4 sm:$0xff]  }
 0xaea   :  { %3619 = vmatpush2.bf16.msra.mxu1 %v12240_v29  ;;  %v12372_v29 = vld [vmem:[#allocation32 + $0xf0] ss:$8 sps:$4 sm:$0xff]  }
 0xaeb   :  { %3620 = vmatprep.subr.bf16.mxu1 %v12248_v39  ;;  %v12377_v39 = vld [vmem:[#allocation32 + $0xe4] ss:$8 sps:$4 sm:$0xff]  }
 0xaee   :  { %3621 = vmatpush2.bf16.msra.mxu1 %v12246_v45  ;;  %v12375_v45 = vld [vmem:[#allocation32 + $0xe0] ss:$8 sps:$4 sm:$0xff]  }
 0xaef   :  { %3622 = vmatprep.subr.bf16.mxu1 %v12254_v11  ;;  %v12380_v11 = vld [vmem:[#allocation32 + $0xd4] ss:$8 sps:$4 sm:$0xff]  }
 0xaf2   :  { %3623 = vmatpush2.bf16.msra.mxu1 %v12252_v46  ;;  %v12378_v46 = vld [vmem:[#allocation32 + $0xd0] ss:$8 sps:$4 sm:$0xff]  }
 0xaf3   :  { %3624 = vmatprep.subr.bf16.mxu1 %v12260_v47  ;;  %v12383_v47 = vld [vmem:[#allocation32 + $0xc4] ss:$8 sps:$4 sm:$0xff]  }
 0xaf6   :  { %3625 = vmatpush2.bf16.msra.mxu1 %v12258_v49  ;;  %v15220_v49 = vsub.s32 0, %v14529_v15 }
 0xaf7   :  { %3626 = vmatprep.subr.bf16.mxu1 %v12266_v53 }
 0xafa   :  { %3627 = vmatpush2.bf16.msra.mxu1 %v12264_v63  ;;  %v3682_v63 = vld [vmem:[#allocation29] sm:$0x3] }
 0xafb   :  { %3628 = vmatprep.subr.bf16.mxu1 %v12272_v54  ;;  %v12381_v54 = vld [vmem:[#allocation32 + $0xc0] ss:$8 sps:$4 sm:$0xff]  }
 0xafe   :  { %3629 = vmatpush2.bf16.msra.mxu1 %v12270_v6  ;;  %v15223_v6 = vsub.s32 1, %v14529_v15 }
 0xaff   :  { %3630 = vmatprep.subr.bf16.mxu1 %v12278_v14 }
 0xb02   :  { %3631 = vmatpush2.bf16.msra.mxu1 %v12276_v23  ;;  %v3687_v23 = vrot.slane %v3682_v63, %v15220_v49 }
 0xb03   :  { %4619 = vmatprep.subr.bf16.mxu1 %v12350_v13  ;;  %v12302_v13 = vld [vmem:[#allocation32 + $0x174] ss:$8 sps:$4 sm:$0xff]  }
 0xb81   :  { %v3196_v55 = vpop.f32.mrf.mxu1 }
 0xb82   :  { %v3353_v56 = vpop.f32.mrf.mxu0  ;;  %v3357_v4 = vpack.c.bf16 %v3196_v55, %v3196_v55  ;;  %v3696_v55 = vld [vmem:[#allocation31] sm:$0x3] }
 0xb83   :  { %v3359_v59 = vpack.c.bf16 %v3353_v56, %v3353_v56  ;;  %v12015_v51 = vpop.f32.mrf.mxu1 }
 0xb84   :  { %v12029_v62 = vpop.f32.mrf.mxu0  ;;  %v12384_v51 = vld [vmem:[#allocation32 + $0xb0] ss:$8 sps:$4 sm:$0xff]  }
 0xb85   :  { %3674 = vmatmul.mubr.bf16.vlgmr.msra.gmra.mxu0 %v3359_v59  ;;  %v3274_v0 = vpop.f32.mrf.mxu1  ;;  %v3973_v59 = vadd.s32 4294967295, %v15190_v17  ;;  %v3691_v62 = vrot.slane %v3682_v63, %v15223_v6  ;;  %v12324_v63 = vld [vmem:[#allocation32 + $0x1f0] ss:$8 sps:$4 sm:$0xff]  }
 0xb86   :  { %3809 = vmatpush1.bf16.msra.mxu0 %v12273_v28  ;;  %v3358_v1 = vpack.c.bf16 %v3274_v0, %v3274_v0  ;;  %3840 = vmatprep.mubr.bf16.mxu0 %v14245_v12  ;;  %v12291_v12 = vld [vmem:[#allocation37 + $0x20] ss:$8 sps:$4 sm:$0xff]  }
 0xb87   :  { %v12022_v3 = vpop.f32.mrf.mxu1  ;;  %3810 = vmatprep.subr.bf16.mxu0 %v12281_v61  ;;  %v12389_v0 = vld [vmem:[#allocation32 + $0xa4] ss:$8 sps:$4 sm:$0xff]   ;;  %vm3974_vm4 = vcmp.ge.s32.totalorder %v3973_v59, 0  ;;  %v12336_v59 = vld [vmem:[#allocation32 + $0x1b0] ss:$8 sps:$4 sm:$0xff]  }
 0xb88   :  { %3632 = vmatprep.mubr.bf16.mxu1 %v3358_v1  ;;  %vm3975_vm14 = vmand %vm1201_vm15, %vm3974_vm4 }
 0xb89   :  { %3633 = vmatmul.mubr.bf16.vlgmr.msra.gmra.mxu1 %v3357_v4 }
 0xb8a   :  { %3811 = vmatpush1.bf16.msra.mxu0 %v12279_v16  ;;  %4620 = vmatpush1.bf16.msra.mxu1 %v12348_v60 }
 0xb8b   :  { %3812 = vmatprep.subr.bf16.mxu0 %v12284_v5  ;;  %4621 = vmatprep.subr.bf16.mxu1 %v12353_v20  ;;  %v12300_v20 = vld [vmem:[#allocation32 + $0x170] ss:$8 sps:$4 sm:$0xff]  }
 0xb8e   :  { %3813 = vmatpush1.bf16.msra.mxu0 %v12282_v7  ;;  %4622 = vmatpush1.bf16.msra.mxu1 %v12351_v25  ;;  %v3705_v7 = vrot.slane %v3696_v55, %v15223_v6 }
 0xb8f   :  { %3814 = vmatprep.subr.bf16.mxu0 %v12287_v8  ;;  %4623 = vmatprep.subr.bf16.mxu1 %v12356_v24  ;;  %v12305_v24 = vld [vmem:[#allocation32 + $0x164] ss:$8 sps:$4 sm:$0xff]  }
 0xb92   :  { %3815 = vmatpush1.bf16.msra.mxu0 %v12285_v9  ;;  %4624 = vmatpush1.bf16.msra.mxu1 %v12354_v33  ;;  %v4053_v9 = vadd.s32 1, %v15190_v17  ;;  %v3978_v17 = vsel %vm3975_vm14, 1.0, %v14244_v22 }
 0xb93   :  { %3816 = vmatprep.subr.bf16.mxu0 %v12290_v10  ;;  %4625 = vmatprep.subr.bf16.mxu1 %v12359_v30  ;;  %v12387_v10 = vld [vmem:[#allocation32 + $0xa0] ss:$8 sps:$4 sm:$0xff]  }
 0xb94   :  { %vm4056_vm7 = vcmp.lt.s32.totalorder %v4053_v9, 4  ;;  %v12303_v30 = vld [vmem:[#allocation32 + $0x160] ss:$8 sps:$4 sm:$0xff]  }
 0xb95   :  { %vm4057_vm12 = vmand %vm15713_vm3, %vm4056_vm7  ;;  %vm15718_vm3 = vcmp.eq.s32.totalorder %v14537_v19, %v14621_v50 }
 0xb96   :  { %3817 = vmatpush1.bf16.msra.mxu0 %v12288_v27  ;;  %4626 = vmatpush1.bf16.msra.mxu1 %v12357_v40  ;;  %v4058_v25 = vsel %vm4057_vm12, 1.0, %v14244_v22  ;;  %v12308_v40 = vld [vmem:[#allocation32 + $0x154] ss:$8 sps:$4 sm:$0xff]  }
 0xb97   :  { %3818 = vmatprep.subr.bf16.mxu0 %v12293_v52  ;;  %4627 = vmatprep.subr.bf16.mxu1 %v12362_v36  ;;  %v12392_v52 = vld [vmem:[#allocation32 + $0x94] ss:$8 sps:$4 sm:$0xff]   ;;  %v12306_v36 = vld [vmem:[#allocation32 + $0x150] ss:$8 sps:$4 sm:$0xff]  }
 0xb9a   :  { %3819 = vmatpush1.bf16.msra.mxu0 %v12291_v12  ;;  %4628 = vmatpush1.bf16.msra.mxu1 %v12360_v41  ;;  %v12311_v41 = vld [vmem:[#allocation32 + $0x144] ss:$8 sps:$4 sm:$0xff]  }
 0xb9b   :  { %3820 = vmatprep.subr.bf16.mxu0 %v12296_v57  ;;  %4629 = vmatprep.subr.bf16.mxu1 %v12365_v44  ;;  %v12309_v44 = vld [vmem:[#allocation32 + $0x140] ss:$8 sps:$4 sm:$0xff]  }
 0xb9e   :  { %3821 = vmatpush1.bf16.msra.mxu0 %v12294_v26  ;;  %4630 = vmatpush1.bf16.msra.mxu1 %v12363_v43  ;;  %v12314_v43 = vld [vmem:[#allocation32 + $0x134] ss:$8 sps:$4 sm:$0xff]  }
 0xb9f   :  { %3822 = vmatprep.subr.bf16.mxu0 %v12299_v32  ;;  %4631 = vmatprep.subr.bf16.mxu1 %v12368_v35  ;;  %v12390_v32 = vld [vmem:[#allocation32 + $0x90] ss:$8 sps:$4 sm:$0xff]  }
 0xba2   :  { %3823 = vmatpush1.bf16.msra.mxu0 %v12297_v58  ;;  %4632 = vmatpush1.bf16.msra.mxu1 %v12366_v38 }
 0xba3   :  { %4633 = vmatprep.subr.bf16.mxu1 %v12371_v37  ;;  %v12312_v37 = vld [vmem:[#allocation32 + $0x130] ss:$8 sps:$4 sm:$0xff]  }
 0xba5   :  { %3841 = vmatmul.mubr.bf16.vlgmr.msra.gmra.mxu0 %v3358_v1  ;;  %v3701_v1 = vrot.slane %v3696_v55, %v15220_v49  ;;  %v12335_v55 = vld [vmem:[#allocation32 + $0x1c4] ss:$8 sps:$4 sm:$0xff]  }
 0xba6   :  { %4046 = vmatprep.mubr.f32.mxu0 %v14244_v22  ;;  %4634 = vmatpush1.bf16.msra.mxu1 %v12369_v42  ;;  %v12317_v42 = vld [vmem:[#allocation32 + $0x124] ss:$8 sps:$4 sm:$0xff]  }
 0xba7   :  { %4635 = vmatprep.subr.bf16.mxu1 %v12374_v31 }
 0xbaa   :  { %4636 = vmatpush2.bf16.msra.mxu1 %v12372_v29 }
 0xbab   :  { %4637 = vmatprep.subr.bf16.mxu1 %v12377_v39  ;;  %v12315_v39 = vld [vmem:[#allocation32 + $0x120] ss:$8 sps:$4 sm:$0xff]  }
 0xbae   :  { %4638 = vmatpush2.bf16.msra.mxu1 %v12375_v45  ;;  %v12320_v45 = vld [vmem:[#allocation32 + $0x114] ss:$8 sps:$4 sm:$0xff]  }
 0xbaf   :  { %4639 = vmatprep.subr.bf16.mxu1 %v12380_v11  ;;  %v12318_v11 = vld [vmem:[#allocation32 + $0x110] ss:$8 sps:$4 sm:$0xff]  }
 0xbb2   :  { %4640 = vmatpush2.bf16.msra.mxu1 %v12378_v46  ;;  %v12323_v46 = vld [vmem:[#allocation32 + $0x104] ss:$8 sps:$4 sm:$0xff]  }
 0xbb3   :  { %4641 = vmatprep.subr.bf16.mxu1 %v12383_v47  ;;  %v12321_v47 = vld [vmem:[#allocation32 + $0x100] ss:$8 sps:$4 sm:$0xff]  }
 0xbb6   :  { %4642 = vmatpush2.bf16.msra.mxu1 %v12381_v54  ;;  %v12329_v54 = vld [vmem:[#allocation32 + $0x1e4] ss:$8 sps:$4 sm:$0xff]  }
 0xbb7   :  { %4643 = vmatprep.subr.bf16.mxu1 %v12386_v34  ;;  %v12327_v34 = vld [vmem:[#allocation32 + $0x1e0] ss:$8 sps:$4 sm:$0xff]  }
 0xbba   :  { %4644 = vmatpush2.bf16.msra.mxu1 %v12384_v51  ;;  %v12341_v51 = vld [vmem:[#allocation32 + $0x1a4] ss:$8 sps:$4 sm:$0xff]  }
 0xbbb   :  { %4645 = vmatprep.subr.bf16.mxu1 %v12389_v0  ;;  %v12342_v0 = vld [vmem:[#allocation32 + $0x190] ss:$8 sps:$4 sm:$0xff]  }
 0xbbe   :  { %4646 = vmatpush2.bf16.msra.mxu1 %v12387_v10 }
 0xbbf   :  { %4647 = vmatprep.subr.bf16.mxu1 %v12392_v52 }
 0xbc2   :  { %4648 = vmatpush2.bf16.msra.mxu1 %v12390_v32  ;;  %v12399_v32 = vld [vmem:[#allocation32 + $0x260] ss:$8 sps:$4 sm:$0xff]  }
 0xc45   :  { %v3675_v53 = vpop.f32.mrf.mxu0 }
 0xc47   :  { %v3677_v14 = vpop.f32.mrf.mxu0 }
 0xc49   :  { %v3679_v56 = vpop.f32.mrf.mxu0  ;;  %v3634_v28 = vpop.f32.mrf.mxu1 }
 0xc4a   :  { %v3676_v61 = vadd.f32 %v3675_v53, %v3634_v28  ;;  %v12326_v53 = vld [vmem:[#allocation32 + $0x1f4] ss:$8 sps:$4 sm:$0xff]   ;;  %v12333_v56 = vld [vmem:[#allocation32 + $0x1c0] ss:$8 sps:$4 sm:$0xff]  }
 0xc4b   :  { %v3680_v16 = vpop.f32.mrf.mxu0  ;;  %v3636_v4 = vpop.f32.mrf.mxu1  ;;  %v12338_v28 = vld [vmem:[#allocation32 + $0x1b4] ss:$8 sps:$4 sm:$0xff]  }
 0xc4c   :  { %v3694_v3 = vmul.f32 %v3687_v23, %v3676_v61  ;;  %v3678_v5 = vadd.f32 %v3677_v14, %v3636_v4  ;;  %v12332_v14 = vld [vmem:[#allocation32 + $0x1d4] ss:$8 sps:$4 sm:$0xff]   ;;  %v12330_v23 = vld [vmem:[#allocation32 + $0x1d0] ss:$8 sps:$4 sm:$0xff]   ;;  %v12339_v61 = vld [vmem:[#allocation32 + $0x1a0] ss:$8 sps:$4 sm:$0xff]  }
 0xc4d   :  { %v3638_v8 = vpop.f32.mrf.mxu1  ;;  %v12345_v16 = vld [vmem:[#allocation32 + $0x180] ss:$8 sps:$4 sm:$0xff]  }
 0xc4e   :  { %v3695_v27 = vmul.f32 %v3691_v62, %v3678_v5  ;;  %v3708_v12 = vadd.f32 %v3701_v1, %v3694_v3  ;;  %v12344_v62 = vld [vmem:[#allocation32 + $0x194] ss:$8 sps:$4 sm:$0xff]   ;;  %v12347_v1 = vld [vmem:[#allocation32 + $0x184] ss:$8 sps:$4 sm:$0xff]   ;;  %v12393_v4 = vld [vmem:[#allocation32 + $0x80] ss:$8 sps:$4 sm:$0xff]  }
 0xc4f   :  { %v3639_v57 = vpop.f32.mrf.mxu1  ;;  %v12395_v3 = vld [vmem:[#allocation32 + $0x84] ss:$8 sps:$4 sm:$0xff]  }
 0xc50   :  { %v3709_v26 = vadd.f32 %v3705_v7, %v3695_v27  ;;  %v15234_v60 = vmax.f32 %v3708_v12, 0.0  ;;  %4649 = vmatprep.subr.bf16.mxu1 %v12395_v3  ;;  %v12398_v7 = vld [vmem:[#allocation32 + $0x274] ss:$8 sps:$4 sm:$0xff]   ;;  %v12396_v27 = vld [vmem:[#allocation32 + $0x270] ss:$8 sps:$4 sm:$0xff]  }
 0xc51   :  { %4650 = vmatpush2.bf16.msra.mxu1 %v12393_v4  ;;  %v12401_v12 = vld [vmem:[#allocation32 + $0x264] ss:$8 sps:$4 sm:$0xff]   ;;  %v12468_v3 = vld [vmem:[#allocation41 + $0x280] ss:$16 sps:$4 sm:$0xff]  }
 0xc52   :  { %v3711_v58 = vmax.f32 %v3709_v26, 0.0  ;;  %v4135_v5 = vpack.c.bf16 %v15234_v60, %v15234_v60  ;;  %4701 = vmatprep.subr.bf16.mxu1 %v12398_v7  ;;  %v12464_v4 = vld [vmem:[#allocation41 + $0x2a4] ss:$16 sps:$4 sm:$0xff]   ;;  %v12474_v7 = vld [vmem:[#allocation41 + $0x260] ss:$16 sps:$4 sm:$0xff]  }
 0xc54   :  { %4012 = vmatprep.subr.mxu0 %v3711_v58  ;;  %v4136_v33 = vpack.c.bf16 %v3711_v58, %v3711_v58 }
 0xc55   :  { %4013 = vmatpush1.msra.mxu0 %v15234_v60 }
 0xc56   :  { %10824 = vmatmul.mubr.msk.f32.vlgmr.msra.gmra.mxu0 %vm15714_vm10, %v3978_v17  ;;  %4092 = vmatprep.subr.mxu0 %v3711_v58  ;;  %v12402_v17 = vld [vmem:[#allocation32 + $0x250] ss:$8 sps:$4 sm:$0xff]  }
 0xc57   :  { %4093 = vmatpush1.msra.mxu0 %v15234_v60  ;;  %4126 = vmatprep.mubr.f32.mxu0 %v14244_v22  ;;  %v12404_v60 = vld [vmem:[#allocation32 + $0x254] ss:$8 sps:$4 sm:$0xff]  }
 0xc58   :  { %4660 = vmatprep.subr.bf16.mxu0 %v12302_v13  ;;  %v12407_v13 = vld [vmem:[#allocation32 + $0x244] ss:$8 sps:$4 sm:$0xff]  }
 0xc5a   :  { %10825 = vmatmul.mubr.msk.f32.vlgmr.msra.gmra.mxu0 %vm15715_vm0, %v4058_v25  ;;  %v12410_v25 = vld [vmem:[#allocation32 + $0x234] ss:$8 sps:$4 sm:$0xff]  }
 0xc5b   :  { %4661 = vmatpush1.bf16.msra.mxu0 %v12300_v20  ;;  %4692 = vmatprep.mubr.bf16.mxu0 %v4136_v33  ;;  %v12405_v20 = vld [vmem:[#allocation32 + $0x240] ss:$8 sps:$4 sm:$0xff]   ;;  %v12413_v33 = vld [vmem:[#allocation32 + $0x224] ss:$8 sps:$4 sm:$0xff]  }
 0xc5c   :  { %4662 = vmatprep.subr.bf16.mxu0 %v12305_v24  ;;  %v12408_v24 = vld [vmem:[#allocation32 + $0x230] ss:$8 sps:$4 sm:$0xff]  }
 0xc5f   :  { %4663 = vmatpush1.bf16.msra.mxu0 %v12303_v30  ;;  %v12411_v30 = vld [vmem:[#allocation32 + $0x220] ss:$8 sps:$4 sm:$0xff]  }
 0xc60   :  { %4664 = vmatprep.subr.bf16.mxu0 %v12308_v40  ;;  %v12416_v40 = vld [vmem:[#allocation32 + $0x214] ss:$8 sps:$4 sm:$0xff]  }
 0xc63   :  { %4665 = vmatpush1.bf16.msra.mxu0 %v12306_v36  ;;  %v12414_v36 = vld [vmem:[#allocation32 + $0x210] ss:$8 sps:$4 sm:$0xff]  }
 0xc64   :  { %4666 = vmatprep.subr.bf16.mxu0 %v12311_v41  ;;  %v12419_v41 = vld [vmem:[#allocation32 + $0x204] ss:$8 sps:$4 sm:$0xff]  }
 0xc65   :  { %v15246_v35 = vpop.f32.mrf.mxu0 }
 0xc67   :  { %v15248_v38 = vpop.f32.mrf.mxu0  ;;  %4667 = vmatpush1.bf16.msra.mxu0 %v12309_v44  ;;  %v12417_v44 = vld [vmem:[#allocation32 + $0x200] ss:$8 sps:$4 sm:$0xff]  }
 0xc68   :  { %4668 = vmatprep.subr.bf16.mxu0 %v12314_v43  ;;  %v12422_v43 = vld [vmem:[#allocation32 + $0x2f4] ss:$8 sps:$4 sm:$0xff]  }
 0xc69   :  { %v3846_v31 = vpop.f32.mrf.mxu0 }
 0xc6a   :  { %v12423_v31 = vld [vmem:[#allocation32 + $0x2e0] ss:$8 sps:$4 sm:$0xff]  }
 0xc6b   :  { %v3847_v29 = vpop.f32.mrf.mxu0  ;;  %4669 = vmatpush1.bf16.msra.mxu0 %v12312_v37  ;;  %v12420_v37 = vld [vmem:[#allocation32 + $0x2f0] ss:$8 sps:$4 sm:$0xff]  }
 0xc6c   :  { %4670 = vmatprep.subr.bf16.mxu0 %v12317_v42  ;;  %v12425_v42 = vld [vmem:[#allocation32 + $0x2e4] ss:$8 sps:$4 sm:$0xff]   ;;  %v12428_v29 = vld [vmem:[#allocation32 + $0x2d4] ss:$8 sps:$4 sm:$0xff]  }
 0xc6f   :  { %4671 = vmatpush1.bf16.msra.mxu0 %v12315_v39  ;;  %v12426_v39 = vld [vmem:[#allocation32 + $0x2d0] ss:$8 sps:$4 sm:$0xff]  }
 0xc70   :  { %4672 = vmatprep.subr.bf16.mxu0 %v12320_v45  ;;  %v12431_v45 = vld [vmem:[#allocation32 + $0x2c4] ss:$8 sps:$4 sm:$0xff]  }
 0xc73   :  { %4673 = vmatpush1.bf16.msra.mxu0 %v12318_v11  ;;  %v12429_v11 = vld [vmem:[#allocation32 + $0x2c0] ss:$8 sps:$4 sm:$0xff]  }
 0xc74   :  { %4674 = vmatprep.subr.bf16.mxu0 %v12323_v46  ;;  %v12434_v46 = vld [vmem:[#allocation32 + $0x2b4] ss:$8 sps:$4 sm:$0xff]  }
 0xc77   :  { %4675 = vmatpush1.bf16.msra.mxu0 %v12321_v47  ;;  %v12432_v47 = vld [vmem:[#allocation32 + $0x2b0] ss:$8 sps:$4 sm:$0xff]  }
 0xc78   :  { %4676 = vmatprep.subr.bf16.mxu0 %v12326_v53  ;;  %v12437_v53 = vld [vmem:[#allocation32 + $0x2a4] ss:$8 sps:$4 sm:$0xff]  }
 0xc7b   :  { %4677 = vmatpush2.bf16.msra.mxu0 %v12324_v63  ;;  %v12435_v63 = vld [vmem:[#allocation32 + $0x2a0] ss:$8 sps:$4 sm:$0xff]  }
 0xc7c   :  { %4678 = vmatprep.subr.bf16.mxu0 %v12329_v54  ;;  %v12440_v54 = vld [vmem:[#allocation32 + $0x294] ss:$8 sps:$4 sm:$0xff]  }
 0xc7f   :  { %4679 = vmatpush2.bf16.msra.mxu0 %v12327_v34  ;;  %v12438_v34 = vld [vmem:[#allocation32 + $0x290] ss:$8 sps:$4 sm:$0xff]  }
 0xc80   :  { %4680 = vmatprep.subr.bf16.mxu0 %v12332_v14  ;;  %v12443_v14 = vld [vmem:[#allocation32 + $0x284] ss:$8 sps:$4 sm:$0xff]  }
 0xc83   :  { %4681 = vmatpush2.bf16.msra.mxu0 %v12330_v23  ;;  %v12441_v23 = vld [vmem:[#allocation32 + $0x280] ss:$8 sps:$4 sm:$0xff]  }
 0xc84   :  { %4682 = vmatprep.subr.bf16.mxu0 %v12335_v55 }
 0xc87   :  { %4683 = vmatpush2.bf16.msra.mxu0 %v12333_v56 }
 0xc88   :  { %4684 = vmatprep.subr.bf16.mxu0 %v12338_v28 }
 0xc8b   :  { %4685 = vmatpush2.bf16.msra.mxu0 %v12336_v59 }
 0xc8c   :  { %4686 = vmatprep.subr.bf16.mxu0 %v12341_v51 }
 0xc8f   :  { %4687 = vmatpush2.bf16.msra.mxu0 %v12339_v61  ;;  %v12450_v61 = vld [vmem:[#allocation41 + $0x2e0] ss:$16 sps:$4 sm:$0xff]  }
 0xc90   :  { %4688 = vmatprep.subr.bf16.mxu0 %v12344_v62  ;;  %v12452_v62 = vld [vmem:[#allocation41 + $0x2e4] ss:$16 sps:$4 sm:$0xff]  }
 0xc93   :  { %4689 = vmatpush2.bf16.msra.mxu0 %v12342_v0  ;;  %v12456_v0 = vld [vmem:[#allocation41 + $0x2c0] ss:$16 sps:$4 sm:$0xff]  }
 0xc94   :  { %4690 = vmatprep.subr.bf16.mxu0 %v12347_v1  ;;  %v12458_v1 = vld [vmem:[#allocation41 + $0x2c4] ss:$16 sps:$4 sm:$0xff]  }
 0xc97   :  { %4691 = vmatpush2.bf16.msra.mxu0 %v12345_v16  ;;  %v12462_v16 = vld [vmem:[#allocation41 + $0x2a0] ss:$16 sps:$4 sm:$0xff]  }
 0xc9a   :  { %4693 = vmatmul.mubr.bf16.vlgmr.msra.gmra.mxu0 %v4135_v5  ;;  %v12470_v5 = vld [vmem:[#allocation41 + $0x284] ss:$16 sps:$4 sm:$0xff]  }
 0xc9b   :  { %5052 = vmatprep.mubr.f32.mxu0 %v14244_v22 }
 0xd16   :  { %v4048_v8 = vpop.f32.mrf.mxu0 }
 0xd17   :  { %v4133_v52 = vpack.c.bf16 %v4048_v8, %v4048_v8  ;;  %v12476_v8 = vld [vmem:[#allocation41 + $0x264] ss:$16 sps:$4 sm:$0xff]  }
 0xd18   :  { %v4050_v9 = vpop.f32.mrf.mxu0 }
 0xd19   :  { %v4134_v10 = vpack.c.bf16 %v4050_v9, %v4050_v9  ;;  %v12480_v9 = vld [vmem:[#allocation41 + $0x240] ss:$16 sps:$4 sm:$0xff]  }
 0xd1a   :  { %v15253_v57 = vpop.f32.mrf.mxu0 }
 0xd1b   :  { %4651 = vmatprep.mubr.bf16.mxu1 %v4134_v10  ;;  %v4137_v55 = vpack.c.bf16 %v15253_v57, %v15253_v57  ;;  %v12482_v10 = vld [vmem:[#allocation41 + $0x244] ss:$16 sps:$4 sm:$0xff]  }
 0xd1c   :  { %4652 = vmatmul.mubr.bf16.vlgmr.msra.gmra.mxu1 %v4133_v52  ;;  %v4130_v26 = vpop.f32.mrf.mxu0  ;;  %v12488_v52 = vld [vmem:[#allocation41 + $0x224] ss:$16 sps:$4 sm:$0xff]  }
 0xd1d   :  { %4702 = vmatpush1.bf16.msra.mxu1 %v12396_v27  ;;  %v4138_v58 = vpack.c.bf16 %v4130_v26, %v4130_v26  ;;  %v12486_v27 = vld [vmem:[#allocation41 + $0x220] ss:$16 sps:$4 sm:$0xff]   ;;  %v12494_v57 = vld [vmem:[#allocation41 + $0x204] ss:$16 sps:$4 sm:$0xff]  }
 0xd1e   :  { %4703 = vmatprep.subr.bf16.mxu1 %v12401_v12  ;;  %v12492_v12 = vld [vmem:[#allocation41 + $0x200] ss:$16 sps:$4 sm:$0xff]  }
 0xd1f   :  { %4733 = vmatprep.mubr.bf16.mxu1 %v4138_v58  ;;  %v12498_v26 = vld [vmem:[#allocation41 + $0x3e0] ss:$16 sps:$4 sm:$0xff]  }
 0xd20   :  { %v12504_v58 = vld [vmem:[#allocation41 + $0x3c0] ss:$16 sps:$4 sm:$0xff]  }
 0xd21   :  { %4704 = vmatpush1.bf16.msra.mxu1 %v12399_v32  ;;  %v12500_v32 = vld [vmem:[#allocation41 + $0x3e4] ss:$16 sps:$4 sm:$0xff]  }
 0xd22   :  { %4705 = vmatprep.subr.bf16.mxu1 %v12404_v60  ;;  %v12506_v60 = vld [vmem:[#allocation41 + $0x3c4] ss:$16 sps:$4 sm:$0xff]  }
 0xd25   :  { %4706 = vmatpush1.bf16.msra.mxu1 %v12402_v17 }
 0xd26   :  { %4707 = vmatprep.subr.bf16.mxu1 %v12407_v13  ;;  %v12510_v13 = vld [vmem:[#allocation41 + $0x3a0] ss:$16 sps:$4 sm:$0xff]  }
 0xd29   :  { %4708 = vmatpush1.bf16.msra.mxu1 %v12405_v20  ;;  %v12512_v20 = vld [vmem:[#allocation41 + $0x3a4] ss:$16 sps:$4 sm:$0xff]  }
 0xd2a   :  { %4709 = vmatprep.subr.bf16.mxu1 %v12410_v25 }
 0xd2d   :  { %4710 = vmatpush1.bf16.msra.mxu1 %v12408_v24 }
 0xd2e   :  { %4711 = vmatprep.subr.bf16.mxu1 %v12413_v33  ;;  %v12516_v33 = vld [vmem:[#allocation41 + $0x380] ss:$16 sps:$4 sm:$0xff]  }
 0xd31   :  { %4712 = vmatpush1.bf16.msra.mxu1 %v12411_v30  ;;  %v12518_v30 = vld [vmem:[#allocation41 + $0x384] ss:$16 sps:$4 sm:$0xff]  }
 0xd32   :  { %4713 = vmatprep.subr.bf16.mxu1 %v12416_v40 }
 0xd35   :  { %4714 = vmatpush1.bf16.msra.mxu1 %v12414_v36  ;;  %v12522_v36 = vld [vmem:[#allocation41 + $0x360] ss:$16 sps:$4 sm:$0xff]  }
 0xd36   :  { %4715 = vmatprep.subr.bf16.mxu1 %v12419_v41  ;;  %v12524_v41 = vld [vmem:[#allocation41 + $0x364] ss:$16 sps:$4 sm:$0xff]  }
 0xd39   :  { %4716 = vmatpush1.bf16.msra.mxu1 %v12417_v44  ;;  %v12528_v44 = vld [vmem:[#allocation41 + $0x340] ss:$16 sps:$4 sm:$0xff]  }
 0xd3a   :  { %4717 = vmatprep.subr.bf16.mxu1 %v12422_v43  ;;  %v12530_v43 = vld [vmem:[#allocation41 + $0x344] ss:$16 sps:$4 sm:$0xff]  }
 0xd3d   :  { %4718 = vmatpush2.bf16.msra.mxu1 %v12420_v37  ;;  %v15262_v37 = vand.u32 1, %v14529_v15 }
 0xd3e   :  { %4719 = vmatprep.subr.bf16.mxu1 %v12425_v42  ;;  %v3849_v42 = vld [vmem:[#allocation38] sm:$0x3] }
 0xd41   :  { %4720 = vmatpush2.bf16.msra.mxu1 %v12423_v31  ;;  %v4978_v31 = vmul.u32 2, %v15262_v37 }
 0xd42   :  { %4721 = vmatprep.subr.bf16.mxu1 %v12428_v29  ;;  %v3854_v29 = vrot.slane %v3849_v42, %v15220_v49 }
 0xd43   :  { %vm5059_vm9 = vcmp.ge.s32.totalorder %v4978_v31, 0  ;;  %vm5061_vm4 = vcmp.lt.s32.totalorder %v4978_v31, 4 }
 0xd44   :  { %vm5060_vm8 = vmand %vm15717_vm1, %vm5059_vm9  ;;  %vm15721_vm1 = vcmask 1043456  }
 0xd45   :  { %4722 = vmatpush2.bf16.msra.mxu1 %v12426_v39  ;;  %v4742_v39 = vld [vmem:[#allocation34] sm:$0x3]  ;;  %vm5062_vm7 = vmand %vm5060_vm8, %vm5061_vm4 }
 0xd46   :  { %4723 = vmatprep.subr.bf16.mxu1 %v12431_v45  ;;  %v3863_v45 = vld [vmem:[#allocation40] sm:$0x3]  ;;  %v5063_v21 = vsel %vm5062_vm7, 1.0, %v14244_v22  ;;  %vm15722_vm8 = vmmov %vm15721_vm1 }
 0xd47   :  { %vm15723_vm4 = vmmov %vm15721_vm1 }
 0xd49   :  { %4724 = vmatpush2.bf16.msra.mxu1 %v12429_v11  ;;  %v3858_v11 = vrot.slane %v3849_v42, %v15223_v6  ;;  %v12489_v42 = vld [vmem:[#allocation41 + $0x1e0] ss:$16 sps:$4 sm:$0xff]  }
 0xd4a   :  { %4725 = vmatprep.subr.bf16.mxu1 %v12434_v46  ;;  %v4756_v46 = vld [vmem:[#allocation35] sm:$0x3] }
 0xd4d   :  { %4726 = vmatpush2.bf16.msra.mxu1 %v12432_v47 }
 0xd4e   :  { %4727 = vmatprep.subr.bf16.mxu1 %v12437_v53  ;;  %v4747_v53 = vrot.slane %v4742_v39, %v15220_v49 }
 0xd51   :  { %4728 = vmatpush2.bf16.msra.mxu1 %v12435_v63  ;;  %v4979_v63 = vadd.s32 4294967295, %v4978_v31 }
 0xd52   :  { %4729 = vmatprep.subr.bf16.mxu1 %v12440_v54  ;;  %v3861_v54 = vmul.f32 %v3854_v29, %v15246_v35  ;;  %v12495_v29 = vld [vmem:[#allocation41 + $0x1c0] ss:$16 sps:$4 sm:$0xff]  }
 0xd53   :  { %vm4980_vm13 = vcmp.ge.s32.totalorder %v4979_v63, 0  ;;  %vm4982_vm6 = vcmp.lt.s32.totalorder %v4979_v63, 4  ;;  %v12521_v63 = vld [vmem:[#allocation41 + $0x144] ss:$16 sps:$4 sm:$0xff]  }
 0xd54   :  { %vm4981_vm5 = vmand %vm15716_vm2, %vm4980_vm13 }
 0xd55   :  { %4730 = vmatpush2.bf16.msra.mxu1 %v12438_v34  ;;  %v3868_v34 = vrot.slane %v3863_v45, %v15220_v49  ;;  %vm4983_vm11 = vmand %vm4981_vm5, %vm4982_vm6 }
 0xd56   :  { %4731 = vmatprep.subr.bf16.mxu1 %v12443_v14  ;;  %vm15719_vm2 = vmmov %vm15715_vm0 }
 0xd57   :  { %vm15720_vm5 = vmmov %vm15715_vm0 }
 0xd59   :  { %4732 = vmatpush2.bf16.msra.mxu1 %v12441_v23 }
 0xd5a   :  { %v15257_v56 = vpop.f32.mrf.mxu0  ;;  %6225 = vmatprep.subr.bf16.mxu1 %v12452_v62  ;;  %v3872_v62 = vrot.slane %v3863_v45, %v15223_v6  ;;  %v12501_v45 = vld [vmem:[#allocation41 + $0x1a0] ss:$16 sps:$4 sm:$0xff]  }
 0xd5c   :  { %v15259_v28 = vpop.f32.mrf.mxu0  ;;  %4734 = vmatmul.mubr.bf16.vlgmr.msra.gmra.mxu1 %v4137_v55 }
 0xd5d   :  { %6226 = vmatpush1.bf16.msra.mxu1 %v12450_v61  ;;  %v3862_v61 = vmul.f32 %v3858_v11, %v15248_v38  ;;  %v12509_v11 = vld [vmem:[#allocation41 + $0x184] ss:$16 sps:$4 sm:$0xff]  }
 0xd5e   :  { %v4698_v59 = vpop.f32.mrf.mxu0  ;;  %6227 = vmatprep.subr.bf16.mxu1 %v12458_v1 }
 0xd5f   :  { %v4761_v59 = vrot.slane %v4756_v46, %v15220_v49 }
 0xd60   :  { %v4699_v51 = vpop.f32.mrf.mxu0 }
 0xd61   :  { %6228 = vmatpush1.bf16.msra.mxu1 %v12456_v0  ;;  %v4751_v51 = vrot.slane %v4742_v39, %v15223_v6  ;;  %v12503_v39 = vld [vmem:[#allocation41 + $0x1a4] ss:$16 sps:$4 sm:$0xff]  }
 0xd62   :  { %6229 = vmatprep.subr.bf16.mxu1 %v12464_v4  ;;  %v3875_v4 = vadd.f32 %v3868_v34, %v3861_v54  ;;  %v12519_v54 = vld [vmem:[#allocation41 + $0x140] ss:$16 sps:$4 sm:$0xff]   ;;  %v12527_v34 = vld [vmem:[#allocation41 + $0x124] ss:$16 sps:$4 sm:$0xff]  }
 0xd65   :  { %6230 = vmatpush1.bf16.msra.mxu1 %v12462_v16  ;;  %v4765_v16 = vrot.slane %v4756_v46, %v15223_v6  ;;  %v12507_v46 = vld [vmem:[#allocation41 + $0x180] ss:$16 sps:$4 sm:$0xff]  }
 0xd66   :  { %6231 = vmatprep.subr.bf16.mxu1 %v12470_v5 }
 0xd69   :  { %6232 = vmatpush1.bf16.msra.mxu1 %v12468_v3 }
 0xd6a   :  { %6233 = vmatprep.subr.bf16.mxu1 %v12476_v8 }
 0xd6d   :  { %6234 = vmatpush1.bf16.msra.mxu1 %v12474_v7 }
 0xd6e   :  { %6235 = vmatprep.subr.bf16.mxu1 %v12482_v10 }
 0xd71   :  { %6236 = vmatpush1.bf16.msra.mxu1 %v12480_v9  ;;  %v5138_v9 = vadd.s32 1, %v4978_v31  ;;  %v12497_v31 = vld [vmem:[#allocation41 + $0x1c4] ss:$16 sps:$4 sm:$0xff]  }
 0xd72   :  { %6237 = vmatprep.subr.bf16.mxu1 %v12488_v52 }
 0xd73   :  { %vm5139_vm14 = vcmp.ge.s32.totalorder %v5138_v9, 0  ;;  %vm5141_vm10 = vcmp.lt.s32.totalorder %v5138_v9, 4  ;;  %v12546_v9 = vld [vmem:[#allocation41 + $0xe8] ss:$16 sps:$4 sm:$0xff]  }
 0xd74   :  { %vm5140_vm12 = vmand %vm15718_vm3, %vm5139_vm14  ;;  %vm15724_vm14 = vcmp.eq.s32.totalorder %v14537_v19, %v14932_v48 }
 0xd75   :  { %6238 = vmatpush1.bf16.msra.mxu1 %v12486_v27  ;;  %vm5142_vm13 = vmand %vm5140_vm12, %vm5141_vm10 }
 0xd76   :  { %6239 = vmatprep.subr.bf16.mxu1 %v12494_v57  ;;  %v12446_v57 = vld [vmem:[#allocation41 + $0xe4] ss:$16 sps:$4 sm:$0xff]   ;;  %v5143_v50 = vsel %vm5142_vm13, 1.0, %v14244_v22  ;;  %vm15725_vm3 = vmmov %vm15721_vm1 }
 0xd77   :  { %vm15726_vm12 = vmmov %vm15721_vm1 }
 0xd78   :  { %vm15727_vm10 = vmmov %vm15721_vm1 }
 0xd79   :  { %6240 = vmatpush1.bf16.msra.mxu1 %v12492_v12  ;;  %v4984_v12 = vsel %vm4983_vm11, 1.0, %v14244_v22  ;;  %vm7394_vm11 = vcmask 31744  }
 0xd7a   :  { %6241 = vmatprep.subr.bf16.mxu1 %v12500_v32  ;;  %v12449_v32 = vld [vmem:[#allocation41 + $0xc4] ss:$16 sps:$4 sm:$0xff]  }
 0xd7d   :  { %6242 = vmatpush2.bf16.msra.mxu1 %v12498_v26  ;;  %v12444_v26 = vld [vmem:[#allocation41 + $0xe0] ss:$16 sps:$4 sm:$0xff]  }
 0xd7e   :  { %6243 = vmatprep.subr.bf16.mxu1 %v12506_v60  ;;  %v12455_v60 = vld [vmem:[#allocation41 + $0xa4] ss:$16 sps:$4 sm:$0xff]  }
 0xd81   :  { %6244 = vmatpush2.bf16.msra.mxu1 %v12504_v58  ;;  %v12447_v58 = vld [vmem:[#allocation41 + $0xc0] ss:$16 sps:$4 sm:$0xff]  }
 0xd82   :  { %6245 = vmatprep.subr.bf16.mxu1 %v12512_v20  ;;  %v12459_v20 = vld [vmem:[#allocation41 + $0x80] ss:$16 sps:$4 sm:$0xff]  }
 0xd85   :  { %6246 = vmatpush2.bf16.msra.mxu1 %v12510_v13  ;;  %v12461_v13 = vld [vmem:[#allocation41 + $0x84] ss:$16 sps:$4 sm:$0xff]  }
 0xd86   :  { %6247 = vmatprep.subr.bf16.mxu1 %v12518_v30  ;;  %v12471_v30 = vld [vmem:[#allocation41 + $0x40] ss:$16 sps:$4 sm:$0xff]  }
 0xd89   :  { %6248 = vmatpush2.bf16.msra.mxu1 %v12516_v33  ;;  %v12473_v33 = vld [vmem:[#allocation41 + $0x44] ss:$16 sps:$4 sm:$0xff]  }
 0xd8a   :  { %6249 = vmatprep.subr.bf16.mxu1 %v12524_v41  ;;  %v12485_v41 = vld [vmem:[#allocation41 + $0x4] ss:$16 sps:$4 sm:$0xff]  }
 0xd8d   :  { %6250 = vmatpush2.bf16.msra.mxu1 %v12522_v36  ;;  %v12477_v36 = vld [vmem:[#allocation41 + $0x20] ss:$16 sps:$4 sm:$0xff]  }
 0xd8e   :  { %6251 = vmatprep.subr.bf16.mxu1 %v12530_v43  ;;  %v12491_v43 = vld [vmem:[#allocation41 + $0x1e4] ss:$16 sps:$4 sm:$0xff]  }
 0xd91   :  { %6252 = vmatpush2.bf16.msra.mxu1 %v12528_v44  ;;  %v12483_v44 = vld [vmem:[#allocation41] ss:$16 sps:$4 sm:$0xff]  }
 0xddc   :  { %v4653_v17 = vpop.f32.mrf.mxu1 }
 0xddd   :  { %v4695_v47 = vadd.f32 %v15257_v56, %v4653_v17  ;;  %v12453_v17 = vld [vmem:[#allocation41 + $0xa0] ss:$16 sps:$4 sm:$0xff]  }
 0xdde   :  { %v4655_v25 = vpop.f32.mrf.mxu1 }
 0xddf   :  { %v4697_v23 = vadd.f32 %v15259_v28, %v4655_v25  ;;  %v3876_v28 = vadd.f32 %v3872_v62, %v3862_v61  ;;  %v12467_v25 = vld [vmem:[#allocation41 + $0x64] ss:$16 sps:$4 sm:$0xff]  }
 0xde0   :  { %v4657_v24 = vpop.f32.mrf.mxu1  ;;  %v12539_v61 = vld [vmem:[#allocation41 + $0x304] ss:$16 sps:$4 sm:$0xff]  }
 0xde1   :  { %v12465_v24 = vld [vmem:[#allocation41 + $0x60] ss:$16 sps:$4 sm:$0xff]   ;;  %v12542_v62 = vld [vmem:[#allocation41 + $0x4e4] ss:$16 sps:$4 sm:$0xff]  }
 0xde2   :  { %v4658_v40 = vpop.f32.mrf.mxu1 }
 0xde3   :  { %v12479_v40 = vld [vmem:[#allocation41 + $0x24] ss:$16 sps:$4 sm:$0xff]  }
 0xe1c   :  { %v4735_v14 = vpop.f32.mrf.mxu1 }
 0xe1d   :  { %v4736_v55 = vadd.f32 %v4735_v14, %v4695_v47  ;;  %v12515_v47 = vld [vmem:[#allocation41 + $0x164] ss:$16 sps:$4 sm:$0xff]   ;;  %v12525_v14 = vld [vmem:[#allocation41 + $0x120] ss:$16 sps:$4 sm:$0xff]  }
 0xe1e   :  { %v4737_v56 = vpop.f32.mrf.mxu1 }
 0xe1f   :  { %v4754_v0 = vmul.f32 %v4747_v53, %v4736_v55  ;;  %v4738_v1 = vadd.f32 %v4737_v56, %v4697_v23  ;;  %v12513_v53 = vld [vmem:[#allocation41 + $0x160] ss:$16 sps:$4 sm:$0xff]   ;;  %v12533_v23 = vld [vmem:[#allocation41 + $0x104] ss:$16 sps:$4 sm:$0xff]  }
 0xe20   :  { %v4739_v35 = vpop.f32.mrf.mxu1  ;;  %v12536_v55 = vld [vmem:[#allocation41 + $0x324] ss:$16 sps:$4 sm:$0xff]   ;;  %v12537_v56 = vld [vmem:[#allocation41 + $0x300] ss:$16 sps:$4 sm:$0xff]  }
 0xe21   :  { %v4768_v3 = vadd.f32 %v4761_v59, %v4754_v0  ;;  %v4755_v5 = vmul.f32 %v4751_v51, %v4738_v1  ;;  %v12531_v59 = vld [vmem:[#allocation41 + $0x100] ss:$16 sps:$4 sm:$0xff]   ;;  %6253 = vmatprep.subr.bf16.mxu1 %v12536_v55  ;;  %v12548_v0 = vld [vmem:[#allocation41 + $0xec] ss:$16 sps:$4 sm:$0xff]  }
 0xe22   :  { %v4740_v7 = vpop.f32.mrf.mxu1  ;;  %v12534_v51 = vld [vmem:[#allocation41 + $0x320] ss:$16 sps:$4 sm:$0xff]   ;;  %v12602_v55 = vld [vmem:[#allocation41 + $0x1cc] ss:$16 sps:$4 sm:$0xff]  }
 0xe23   :  { %v4770_v38 = vadd.f32 %v4768_v3, %v3875_v4  ;;  %v4769_v8 = vadd.f32 %v4765_v16, %v4755_v5  ;;  %6254 = vmatpush2.bf16.msra.mxu1 %v12534_v51  ;;  %v12540_v4 = vld [vmem:[#allocation41 + $0x4e0] ss:$16 sps:$4 sm:$0xff]   ;;  %v12600_v51 = vld [vmem:[#allocation41 + $0x1c8] ss:$16 sps:$4 sm:$0xff]  }
 0xe24   :  { %6255 = vmatprep.subr.bf16.mxu1 %v12539_v61  ;;  %v12605_v61 = vld [vmem:[#allocation41 + $0x584] ss:$16 sps:$4 sm:$0xff]  }
 0xe25   :  { %v4771_v10 = vadd.f32 %v4769_v8, %v3876_v28  ;;  %v4772_v52 = vmax.f32 %v4770_v38, 0.0  ;;  %v12545_v28 = vld [vmem:[#allocation41 + $0x4c4] ss:$16 sps:$4 sm:$0xff]   ;;  %v12543_v8 = vld [vmem:[#allocation41 + $0x4c0] ss:$16 sps:$4 sm:$0xff]  }
 0xe27   :  { %v4773_v27 = vmax.f32 %v4771_v10, 0.0  ;;  %6256 = vmatpush2.bf16.msra.mxu1 %v12537_v56  ;;  %v12603_v56 = vld [vmem:[#allocation41 + $0x580] ss:$16 sps:$4 sm:$0xff]  }
 0xe28   :  { %6307 = vmatprep.subr.bf16.mxu1 %v12548_v0  ;;  %v12606_v0 = vld [vmem:[#allocation41 + $0x1a8] ss:$16 sps:$4 sm:$0xff]  }
 0xe29   :  { %5018 = vmatprep.subr.mxu0 %v4773_v27 }
 0xe2a   :  { %5019 = vmatpush1.msra.mxu0 %v4772_v52 }
 0xe2b   :  { %10922 = vmatmul.mubr.msk.f32.vlgmr.msra.gmra.mxu0 %vm15715_vm0, %v4984_v12  ;;  %5097 = vmatprep.subr.mxu0 %v4773_v27  ;;  %v12554_v12 = vld [vmem:[#allocation41 + $0xcc] ss:$16 sps:$4 sm:$0xff]   ;;  %vm15728_vm0 = vmmov %vm15721_vm1 }
 0xe2c   :  { %5098 = vmatpush1.msra.mxu0 %v4772_v52  ;;  %5131 = vmatprep.mubr.f32.mxu0 %v14244_v22  ;;  %vm15729_vm13 = vmmov %vm15728_vm0 }
 0xe2d   :  { %5177 = vmatprep.subr.mxu0 %v4773_v27  ;;  %v12551_v27 = vld [vmem:[#allocation41 + $0x4a4] ss:$16 sps:$4 sm:$0xff]  }
 0xe2f   :  { %10923 = vmatmul.mubr.msk.f32.vlgmr.msra.gmra.mxu0 %vm15719_vm2, %v5063_v21  ;;  %vm15730_vm2 = vmmov %vm15728_vm0 }
 0xe30   :  { %5178 = vmatpush1.msra.mxu0 %v4772_v52  ;;  %5211 = vmatprep.mubr.f32.mxu0 %v14244_v22 }
 0xe31   :  { %6184 = vmatprep.subr.bf16.mxu0 %v12446_v57  ;;  %v12549_v57 = vld [vmem:[#allocation41 + $0x4a0] ss:$16 sps:$4 sm:$0xff]  }
 0xe33   :  { %10924 = vmatmul.mubr.msk.f32.vlgmr.msra.gmra.mxu0 %vm15720_vm5, %v5143_v50  ;;  %v12552_v50 = vld [vmem:[#allocation41 + $0xc8] ss:$16 sps:$4 sm:$0xff]   ;;  %vm15731_vm5 = vmmov %vm15728_vm0 }
 0xe34   :  { %6185 = vmatpush1.bf16.msra.mxu0 %v12444_v26 }
 0xe35   :  { %6186 = vmatprep.subr.bf16.mxu0 %v12449_v32  ;;  %v12557_v32 = vld [vmem:[#allocation41 + $0x484] ss:$16 sps:$4 sm:$0xff]  }
 0xe38   :  { %6187 = vmatpush1.bf16.msra.mxu0 %v12447_v58  ;;  %v12560_v58 = vld [vmem:[#allocation41 + $0xac] ss:$16 sps:$4 sm:$0xff]  }
 0xe39   :  { %6188 = vmatprep.subr.bf16.mxu0 %v12455_v60  ;;  %v12555_v60 = vld [vmem:[#allocation41 + $0x480] ss:$16 sps:$4 sm:$0xff]  }
 0xe3c   :  { %6189 = vmatpush1.bf16.msra.mxu0 %v12453_v17  ;;  %v12558_v17 = vld [vmem:[#allocation41 + $0xa8] ss:$16 sps:$4 sm:$0xff]  }
 0xe3d   :  { %6190 = vmatprep.subr.bf16.mxu0 %v12461_v13  ;;  %v12563_v13 = vld [vmem:[#allocation41 + $0x464] ss:$16 sps:$4 sm:$0xff]  }
 0xe40   :  { %6191 = vmatpush1.bf16.msra.mxu0 %v12459_v20  ;;  %v12566_v20 = vld [vmem:[#allocation41 + $0x8c] ss:$16 sps:$4 sm:$0xff]  }
 0xe41   :  { %6192 = vmatprep.subr.bf16.mxu0 %v12467_v25  ;;  %v12561_v25 = vld [vmem:[#allocation41 + $0x460] ss:$16 sps:$4 sm:$0xff]  }
 0xe44   :  { %6193 = vmatpush1.bf16.msra.mxu0 %v12465_v24  ;;  %v12564_v24 = vld [vmem:[#allocation41 + $0x88] ss:$16 sps:$4 sm:$0xff]  }
 0xe45   :  { %6194 = vmatprep.subr.bf16.mxu0 %v12473_v33  ;;  %v12569_v33 = vld [vmem:[#allocation41 + $0x444] ss:$16 sps:$4 sm:$0xff]  }
 0xe48   :  { %6195 = vmatpush1.bf16.msra.mxu0 %v12471_v30  ;;  %v12572_v30 = vld [vmem:[#allocation41 + $0x6c] ss:$16 sps:$4 sm:$0xff]  }
 0xe49   :  { %6196 = vmatprep.subr.bf16.mxu0 %v12479_v40  ;;  %v12567_v40 = vld [vmem:[#allocation41 + $0x440] ss:$16 sps:$4 sm:$0xff]  }
 0xe4c   :  { %6197 = vmatpush1.bf16.msra.mxu0 %v12477_v36  ;;  %v12570_v36 = vld [vmem:[#allocation41 + $0x68] ss:$16 sps:$4 sm:$0xff]  }
 0xe4d   :  { %6198 = vmatprep.subr.bf16.mxu0 %v12485_v41  ;;  %v12575_v41 = vld [vmem:[#allocation41 + $0x424] ss:$16 sps:$4 sm:$0xff]  }
 0xe50   :  { %6199 = vmatpush1.bf16.msra.mxu0 %v12483_v44  ;;  %v12578_v44 = vld [vmem:[#allocation41 + $0x4c] ss:$16 sps:$4 sm:$0xff]  }
 0xe51   :  { %6200 = vmatprep.subr.bf16.mxu0 %v12491_v43  ;;  %v12573_v43 = vld [vmem:[#allocation41 + $0x420] ss:$16 sps:$4 sm:$0xff]  }
 0xe54   :  { %6201 = vmatpush2.bf16.msra.mxu0 %v12489_v42  ;;  %v12576_v42 = vld [vmem:[#allocation41 + $0x48] ss:$16 sps:$4 sm:$0xff]  }
 0xe55   :  { %6202 = vmatprep.subr.bf16.mxu0 %v12497_v31  ;;  %v12581_v31 = vld [vmem:[#allocation41 + $0x404] ss:$16 sps:$4 sm:$0xff]  }
 0xe58   :  { %6203 = vmatpush2.bf16.msra.mxu0 %v12495_v29  ;;  %v12584_v29 = vld [vmem:[#allocation41 + $0x2c] ss:$16 sps:$4 sm:$0xff]  }
 0xe59   :  { %6204 = vmatprep.subr.bf16.mxu0 %v12503_v39  ;;  %v12579_v39 = vld [vmem:[#allocation41 + $0x400] ss:$16 sps:$4 sm:$0xff]  }
 0xe5c   :  { %6205 = vmatpush2.bf16.msra.mxu0 %v12501_v45  ;;  %v12582_v45 = vld [vmem:[#allocation41 + $0x28] ss:$16 sps:$4 sm:$0xff]  }
 0xe5d   :  { %6206 = vmatprep.subr.bf16.mxu0 %v12509_v11  ;;  %v12587_v11 = vld [vmem:[#allocation41 + $0x5e4] ss:$16 sps:$4 sm:$0xff]  }
 0xe60   :  { %6207 = vmatpush2.bf16.msra.mxu0 %v12507_v46  ;;  %v12590_v46 = vld [vmem:[#allocation41 + $0xc] ss:$16 sps:$4 sm:$0xff]  }
 0xe61   :  { %6208 = vmatprep.subr.bf16.mxu0 %v12515_v47  ;;  %v12585_v47 = vld [vmem:[#allocation41 + $0x5e0] ss:$16 sps:$4 sm:$0xff]  }
 0xe64   :  { %6209 = vmatpush2.bf16.msra.mxu0 %v12513_v53  ;;  %v12588_v53 = vld [vmem:[#allocation41 + $0x8] ss:$16 sps:$4 sm:$0xff]  }
 0xe65   :  { %6210 = vmatprep.subr.bf16.mxu0 %v12521_v63  ;;  %v12593_v63 = vld [vmem:[#allocation41 + $0x5c4] ss:$16 sps:$4 sm:$0xff]  }
 0xe68   :  { %6211 = vmatpush2.bf16.msra.mxu0 %v12519_v54  ;;  %v12596_v54 = vld [vmem:[#allocation41 + $0x1ec] ss:$16 sps:$4 sm:$0xff]  }
 0xe69   :  { %6212 = vmatprep.subr.bf16.mxu0 %v12527_v34  ;;  %v12591_v34 = vld [vmem:[#allocation41 + $0x5c0] ss:$16 sps:$4 sm:$0xff]  }
 0xe6c   :  { %6213 = vmatpush2.bf16.msra.mxu0 %v12525_v14  ;;  %v12594_v14 = vld [vmem:[#allocation41 + $0x1e8] ss:$16 sps:$4 sm:$0xff]  }
 0xe6d   :  { %6214 = vmatprep.subr.bf16.mxu0 %v12533_v23  ;;  %v12599_v23 = vld [vmem:[#allocation41 + $0x5a4] ss:$16 sps:$4 sm:$0xff]  }
 0xe70   :  { %6215 = vmatpush2.bf16.msra.mxu0 %v12531_v59  ;;  %v12597_v59 = vld [vmem:[#allocation41 + $0x5a0] ss:$16 sps:$4 sm:$0xff]  }
 0xe71   :  { %6266 = vmatprep.subr.bf16.mxu0 %v12542_v62  ;;  %v12608_v62 = vld [vmem:[#allocation41 + $0x1ac] ss:$16 sps:$4 sm:$0xff]  }
 0xeeb   :  { %v5054_v1 = vpop.f32.mrf.mxu0 }
 0xeec   :  { %v15294_v3 = vpack.c.bf16 %v5054_v1, %v5054_v1  ;;  %v12611_v1 = vld [vmem:[#allocation41 + $0x564] ss:$16 sps:$4 sm:$0xff]  }
 0xeed   :  { %v5056_v16 = vpop.f32.mrf.mxu0 }
 0xeee   :  { %v5219_v35 = vpack.c.bf16 %v5056_v16, %v5056_v16  ;;  %v12614_v16 = vld [vmem:[#allocation41 + $0x18c] ss:$16 sps:$4 sm:$0xff]  }
 0xeef   :  { %v5133_v5 = vpop.f32.mrf.mxu0 }
 0xef0   :  { %6216 = vmatprep.mubr.bf16.mxu0 %v5219_v35  ;;  %v15299_v10 = vpack.c.bf16 %v5133_v5, %v5133_v5  ;;  %v12617_v5 = vld [vmem:[#allocation41 + $0x544] ss:$16 sps:$4 sm:$0xff]  }
 0xef1   :  { %v5135_v7 = vpop.f32.mrf.mxu0  ;;  %6217 = vmatmul.mubr.bf16.vlgmr.msra.gmra.mxu0 %v15294_v3 }
 0xef2   :  { %v15297_v38 = vpack.c.bf16 %v5135_v7, %v5135_v7  ;;  %6267 = vmatpush1.bf16.msra.mxu0 %v12540_v4  ;;  %v12612_v4 = vld [vmem:[#allocation41 + $0x188] ss:$16 sps:$4 sm:$0xff]   ;;  %v12615_v7 = vld [vmem:[#allocation41 + $0x540] ss:$16 sps:$4 sm:$0xff]  }
 0xef3   :  { %6268 = vmatprep.subr.bf16.mxu0 %v12545_v28  ;;  %v15301_v52 = vpop.f32.mrf.mxu0  ;;  %v12620_v28 = vld [vmem:[#allocation41 + $0x16c] ss:$16 sps:$4 sm:$0xff]  }
 0xef4   :  { %6257 = vmatprep.mubr.bf16.mxu1 %v15297_v38 }
 0xef5   :  { %6258 = vmatmul.mubr.bf16.vlgmr.msra.gmra.mxu1 %v15299_v10  ;;  %v5215_v21 = vpop.f32.mrf.mxu0 }
 0xef6   :  { %6269 = vmatpush1.bf16.msra.mxu0 %v12543_v8  ;;  %6308 = vmatpush1.bf16.msra.mxu1 %v12546_v9  ;;  %v15305_v26 = vpack.c.bf16 %v5215_v21, %v5215_v21  ;;  %v12618_v8 = vld [vmem:[#allocation41 + $0x168] ss:$16 sps:$4 sm:$0xff]   ;;  %v12623_v9 = vld [vmem:[#allocation41 + $0x524] ss:$16 sps:$4 sm:$0xff]  }
 0xef7   :  { %6339 = vmatprep.mubr.bf16.mxu1 %v5219_v35  ;;  %6270 = vmatprep.subr.bf16.mxu0 %v12551_v27  ;;  %v12609_v35 = vld [vmem:[#allocation41 + $0x560] ss:$16 sps:$4 sm:$0xff]   ;;  %v12626_v27 = vld [vmem:[#allocation41 + $0x14c] ss:$16 sps:$4 sm:$0xff]   ;;  %v12624_v21 = vld [vmem:[#allocation41 + $0x148] ss:$16 sps:$4 sm:$0xff]  }
 0xef8   :  { %6309 = vmatprep.subr.bf16.mxu1 %v12554_v12  ;;  %6298 = vmatprep.mubr.bf16.mxu0 %v15305_v26  ;;  %v12621_v12 = vld [vmem:[#allocation41 + $0x520] ss:$16 sps:$4 sm:$0xff]  }
 0xefa   :  { %6271 = vmatpush1.bf16.msra.mxu0 %v12549_v57  ;;  %6310 = vmatpush1.bf16.msra.mxu1 %v12552_v50  ;;  %v12629_v57 = vld [vmem:[#allocation41 + $0x504] ss:$16 sps:$4 sm:$0xff]   ;;  %v12632_v50 = vld [vmem:[#allocation41 + $0x12c] ss:$16 sps:$4 sm:$0xff]  }
 0xefb   :  { %6272 = vmatprep.subr.bf16.mxu0 %v12557_v32  ;;  %6311 = vmatprep.subr.bf16.mxu1 %v12560_v58  ;;  %v12627_v32 = vld [vmem:[#allocation41 + $0x500] ss:$16 sps:$4 sm:$0xff]   ;;  %v12630_v58 = vld [vmem:[#allocation41 + $0x128] ss:$16 sps:$4 sm:$0xff]  }
 0xefe   :  { %6273 = vmatpush1.bf16.msra.mxu0 %v12555_v60  ;;  %6312 = vmatpush1.bf16.msra.mxu1 %v12558_v17  ;;  %v12635_v60 = vld [vmem:[#allocation41 + $0x10c] ss:$16 sps:$4 sm:$0xff]  }
 0xeff   :  { %6274 = vmatprep.subr.bf16.mxu0 %v12563_v13  ;;  %6313 = vmatprep.subr.bf16.mxu1 %v12566_v20  ;;  %v12638_v17 = vld [vmem:[#allocation41 + $0x2ec] ss:$16 sps:$4 sm:$0xff]   ;;  %v15310_v13 = vpack.c.bf16 %v15301_v52, %v15301_v52  ;;  %v12633_v20 = vld [vmem:[#allocation41 + $0x108] ss:$16 sps:$4 sm:$0xff]  }
 0xf00   :  { %v12650_v52 = vld [vmem:[#allocation41 + $0x4cc] ss:$16 sps:$4 sm:$0xff]  }
 0xf02   :  { %6275 = vmatpush1.bf16.msra.mxu0 %v12561_v25  ;;  %6314 = vmatpush1.bf16.msra.mxu1 %v12564_v24  ;;  %v12636_v25 = vld [vmem:[#allocation41 + $0x2e8] ss:$16 sps:$4 sm:$0xff]   ;;  %v12641_v24 = vld [vmem:[#allocation41 + $0x2cc] ss:$16 sps:$4 sm:$0xff]  }
 0xf03   :  { %6276 = vmatprep.subr.bf16.mxu0 %v12569_v33  ;;  %6315 = vmatprep.subr.bf16.mxu1 %v12572_v30  ;;  %v12644_v33 = vld [vmem:[#allocation41 + $0x4ec] ss:$16 sps:$4 sm:$0xff]   ;;  %v12639_v30 = vld [vmem:[#allocation41 + $0x2c8] ss:$16 sps:$4 sm:$0xff]  }
 0xf06   :  { %6277 = vmatpush1.bf16.msra.mxu0 %v12567_v40  ;;  %6316 = vmatpush1.bf16.msra.mxu1 %v12570_v36  ;;  %v12642_v40 = vld [vmem:[#allocation41 + $0x4e8] ss:$16 sps:$4 sm:$0xff]   ;;  %v12647_v36 = vld [vmem:[#allocation41 + $0x2ac] ss:$16 sps:$4 sm:$0xff]  }
 0xf07   :  { %6278 = vmatprep.subr.bf16.mxu0 %v12575_v41  ;;  %6317 = vmatprep.subr.bf16.mxu1 %v12578_v44  ;;  %v12645_v41 = vld [vmem:[#allocation41 + $0x2a8] ss:$16 sps:$4 sm:$0xff]  }
 0xf08   :  { %v12648_v44 = vld [vmem:[#allocation41 + $0x4c8] ss:$16 sps:$4 sm:$0xff]  }
 0xf0a   :  { %6279 = vmatpush1.bf16.msra.mxu0 %v12573_v43  ;;  %6318 = vmatpush1.bf16.msra.mxu1 %v12576_v42  ;;  %v12653_v43 = vld [vmem:[#allocation41 + $0x28c] ss:$16 sps:$4 sm:$0xff]  }
 0xf0b   :  { %6280 = vmatprep.subr.bf16.mxu0 %v12581_v31  ;;  %6319 = vmatprep.subr.bf16.mxu1 %v12584_v29  ;;  %v12656_v42 = vld [vmem:[#allocation41 + $0x4ac] ss:$16 sps:$4 sm:$0xff]   ;;  %v12651_v31 = vld [vmem:[#allocation41 + $0x288] ss:$16 sps:$4 sm:$0xff]  }
 0xf0c   :  { %v12654_v29 = vld [vmem:[#allocation41 + $0x4a8] ss:$16 sps:$4 sm:$0xff]  }
 0xf0e   :  { %6281 = vmatpush1.bf16.msra.mxu0 %v12579_v39  ;;  %6320 = vmatpush1.bf16.msra.mxu1 %v12582_v45  ;;  %v12659_v39 = vld [vmem:[#allocation41 + $0x26c] ss:$16 sps:$4 sm:$0xff]  }
 0xf0f   :  { %6282 = vmatprep.subr.bf16.mxu0 %v12587_v11  ;;  %6321 = vmatprep.subr.bf16.mxu1 %v12590_v46  ;;  %v12662_v45 = vld [vmem:[#allocation41 + $0x48c] ss:$16 sps:$4 sm:$0xff]   ;;  %v12660_v11 = vld [vmem:[#allocation41 + $0x488] ss:$16 sps:$4 sm:$0xff]  }
 0xf10   :  { %v12665_v46 = vld [vmem:[#allocation41 + $0x24c] ss:$16 sps:$4 sm:$0xff]  }
 0xf12   :  { %6283 = vmatpush2.bf16.msra.mxu0 %v12585_v47  ;;  %6322 = vmatpush1.bf16.msra.mxu1 %v12588_v53  ;;  %v12663_v47 = vld [vmem:[#allocation41 + $0x248] ss:$16 sps:$4 sm:$0xff]  }
 0xf13   :  { %6284 = vmatprep.subr.bf16.mxu0 %v12593_v63  ;;  %6323 = vmatprep.subr.bf16.mxu1 %v12596_v54  ;;  %v12666_v53 = vld [vmem:[#allocation41 + $0x468] ss:$16 sps:$4 sm:$0xff]   ;;  %v12671_v63 = vld [vmem:[#allocation41 + $0x22c] ss:$16 sps:$4 sm:$0xff]  }
 0xf14   :  { %v12674_v54 = vld [vmem:[#allocation41 + $0x44c] ss:$16 sps:$4 sm:$0xff]  }
 0xf16   :  { %6285 = vmatpush2.bf16.msra.mxu0 %v12591_v34  ;;  %6324 = vmatpush2.bf16.msra.mxu1 %v12594_v14  ;;  %v12669_v34 = vld [vmem:[#allocation41 + $0x228] ss:$16 sps:$4 sm:$0xff]  }
 0xf17   :  { %6286 = vmatprep.subr.bf16.mxu0 %v12599_v23  ;;  %6325 = vmatprep.subr.bf16.mxu1 %v12602_v55  ;;  %v12672_v14 = vld [vmem:[#allocation41 + $0x448] ss:$16 sps:$4 sm:$0xff]   ;;  %v12677_v23 = vld [vmem:[#allocation41 + $0x20c] ss:$16 sps:$4 sm:$0xff]  }
 0xf18   :  { %v12680_v55 = vld [vmem:[#allocation41 + $0x42c] ss:$16 sps:$4 sm:$0xff]  }
 0xf1a   :  { %6287 = vmatpush2.bf16.msra.mxu0 %v12597_v59  ;;  %6326 = vmatpush2.bf16.msra.mxu1 %v12600_v51  ;;  %v12675_v59 = vld [vmem:[#allocation41 + $0x208] ss:$16 sps:$4 sm:$0xff]  }
 0xf1b   :  { %6288 = vmatprep.subr.bf16.mxu0 %v12605_v61  ;;  %6327 = vmatprep.subr.bf16.mxu1 %v12608_v62  ;;  %v12678_v51 = vld [vmem:[#allocation41 + $0x428] ss:$16 sps:$4 sm:$0xff]   ;;  %v12683_v61 = vld [vmem:[#allocation41 + $0x3ec] ss:$16 sps:$4 sm:$0xff]  }
 0xf1c   :  { %v12686_v62 = vld [vmem:[#allocation41 + $0x40c] ss:$16 sps:$4 sm:$0xff]  }
 0xf1e   :  { %6289 = vmatpush2.bf16.msra.mxu0 %v12603_v56  ;;  %6328 = vmatpush2.bf16.msra.mxu1 %v12606_v0  ;;  %v12681_v56 = vld [vmem:[#allocation41 + $0x3e8] ss:$16 sps:$4 sm:$0xff]  }
 0xf1f   :  { %6290 = vmatprep.subr.bf16.mxu0 %v12611_v1  ;;  %6329 = vmatprep.subr.bf16.mxu1 %v12614_v16  ;;  %v12684_v0 = vld [vmem:[#allocation41 + $0x408] ss:$16 sps:$4 sm:$0xff]   ;;  %v12689_v1 = vld [vmem:[#allocation41 + $0x3cc] ss:$16 sps:$4 sm:$0xff]  }
 0xf20   :  { %v12692_v16 = vld [vmem:[#allocation41 + $0x5ec] ss:$16 sps:$4 sm:$0xff]  }
 0xf22   :  { %6291 = vmatpush2.bf16.msra.mxu0 %v12609_v35  ;;  %6330 = vmatpush2.bf16.msra.mxu1 %v12612_v4  ;;  %v12687_v35 = vld [vmem:[#allocation41 + $0x3c8] ss:$16 sps:$4 sm:$0xff]  }
 0xf23   :  { %6292 = vmatprep.subr.bf16.mxu0 %v12617_v5  ;;  %6331 = vmatprep.subr.bf16.mxu1 %v12620_v28  ;;  %v12690_v4 = vld [vmem:[#allocation41 + $0x5e8] ss:$16 sps:$4 sm:$0xff]   ;;  %v12695_v5 = vld [vmem:[#allocation41 + $0x3ac] ss:$16 sps:$4 sm:$0xff]  }
 0xf24   :  { %v12698_v28 = vld [vmem:[#allocation41 + $0x5cc] ss:$16 sps:$4 sm:$0xff]  }
 0xf26   :  { %6293 = vmatpush2.bf16.msra.mxu0 %v12615_v7  ;;  %6332 = vmatpush2.bf16.msra.mxu1 %v12618_v8  ;;  %v12693_v7 = vld [vmem:[#allocation41 + $0x3a8] ss:$16 sps:$4 sm:$0xff]  }
 0xf27   :  { %6294 = vmatprep.subr.bf16.mxu0 %v12623_v9  ;;  %6333 = vmatprep.subr.bf16.mxu1 %v12626_v27  ;;  %v12696_v8 = vld [vmem:[#allocation41 + $0x5c8] ss:$16 sps:$4 sm:$0xff]   ;;  %v12701_v9 = vld [vmem:[#allocation41 + $0x38c] ss:$16 sps:$4 sm:$0xff]  }
 0xf28   :  { %v12704_v27 = vld [vmem:[#allocation41 + $0x5ac] ss:$16 sps:$4 sm:$0xff]  }
 0xf2a   :  { %6295 = vmatpush2.bf16.msra.mxu0 %v12621_v12  ;;  %6334 = vmatpush2.bf16.msra.mxu1 %v12624_v21  ;;  %v12699_v12 = vld [vmem:[#allocation41 + $0x388] ss:$16 sps:$4 sm:$0xff]  }
 0xf2b   :  { %6296 = vmatprep.subr.bf16.mxu0 %v12629_v57  ;;  %6335 = vmatprep.subr.bf16.mxu1 %v12632_v50  ;;  %v12702_v21 = vld [vmem:[#allocation41 + $0x5a8] ss:$16 sps:$4 sm:$0xff]   ;;  %v12707_v57 = vld [vmem:[#allocation41 + $0x36c] ss:$16 sps:$4 sm:$0xff]  }
 0xf2c   :  { %v12710_v50 = vld [vmem:[#allocation41 + $0x58c] ss:$16 sps:$4 sm:$0xff]  }
 0xf2e   :  { %6297 = vmatpush2.bf16.msra.mxu0 %v12627_v32  ;;  %6336 = vmatpush2.bf16.msra.mxu1 %v12630_v58  ;;  %v12705_v32 = vld [vmem:[#allocation41 + $0x368] ss:$16 sps:$4 sm:$0xff]  }
 0xf2f   :  { %6337 = vmatprep.subr.bf16.mxu1 %v12635_v60  ;;  %6348 = vmatprep.subr.bf16.mxu0 %v12638_v17  ;;  %v12708_v58 = vld [vmem:[#allocation41 + $0x588] ss:$16 sps:$4 sm:$0xff]   ;;  %v12713_v60 = vld [vmem:[#allocation41 + $0x34c] ss:$16 sps:$4 sm:$0xff]  }
 0xf30   :  { %v12716_v17 = vld [vmem:[#allocation41 + $0x56c] ss:$16 sps:$4 sm:$0xff]  }
 0xf31   :  { %6299 = vmatmul.mubr.bf16.vlgmr.msra.gmra.mxu0 %v15310_v13 }
 0xf32   :  { %6338 = vmatpush2.bf16.msra.mxu1 %v12633_v20  ;;  %6349 = vmatpush1.bf16.msra.mxu0 %v12636_v25  ;;  %v12711_v20 = vld [vmem:[#allocation41 + $0x348] ss:$16 sps:$4 sm:$0xff]  }
 0xf33   :  { %6380 = vmatprep.mubr.bf16.mxu0 %v15297_v38  ;;  %6350 = vmatprep.subr.bf16.mxu0 %v12641_v24  ;;  %v12714_v25 = vld [vmem:[#allocation41 + $0x568] ss:$16 sps:$4 sm:$0xff]   ;;  %v12719_v24 = vld [vmem:[#allocation41 + $0x32c] ss:$16 sps:$4 sm:$0xff]  }
 0xf34   :  { %6389 = vmatprep.subr.bf16.mxu1 %v12644_v33  ;;  %v12722_v33 = vld [vmem:[#allocation41 + $0x54c] ss:$16 sps:$4 sm:$0xff]  }
 0xf35   :  { %6340 = vmatmul.mubr.bf16.vlgmr.msra.gmra.mxu1 %v15294_v3  ;;  %v12657_v3 = vld [vmem:[#allocation41 + $0x268] ss:$16 sps:$4 sm:$0xff]  }
 0xf36   :  { %6351 = vmatpush1.bf16.msra.mxu0 %v12639_v30  ;;  %6390 = vmatpush1.bf16.msra.mxu1 %v12642_v40  ;;  %v12717_v30 = vld [vmem:[#allocation41 + $0x328] ss:$16 sps:$4 sm:$0xff]  }
 0xf37   :  { %6421 = vmatprep.mubr.bf16.mxu1 %v15305_v26  ;;  %6352 = vmatprep.subr.bf16.mxu0 %v12647_v36  ;;  %v12668_v26 = vld [vmem:[#allocation41 + $0x46c] ss:$16 sps:$4 sm:$0xff]   ;;  %v12720_v40 = vld [vmem:[#allocation41 + $0x548] ss:$16 sps:$4 sm:$0xff]  }
 0xf38   :  { %6391 = vmatprep.subr.bf16.mxu1 %v12650_v52  ;;  %v12725_v36 = vld [vmem:[#allocation41 + $0x30c] ss:$16 sps:$4 sm:$0xff]  }
 0xf39   :  { %v12728_v52 = vld [vmem:[#allocation41 + $0x52c] ss:$16 sps:$4 sm:$0xff]  }
 0xf3a   :  { %6353 = vmatpush1.bf16.msra.mxu0 %v12645_v41  ;;  %6392 = vmatpush1.bf16.msra.mxu1 %v12648_v44  ;;  %v12723_v41 = vld [vmem:[#allocation41 + $0x308] ss:$16 sps:$4 sm:$0xff]  }
 0xf3b   :  { %6354 = vmatprep.subr.bf16.mxu0 %v12653_v43  ;;  %6393 = vmatprep.subr.bf16.mxu1 %v12656_v42  ;;  %v12726_v44 = vld [vmem:[#allocation41 + $0x528] ss:$16 sps:$4 sm:$0xff]   ;;  %v12731_v43 = vld [vmem:[#allocation41 + $0x50c] ss:$16 sps:$4 sm:$0xff]   ;;  %v12734_v42 = vld [vmem:[#allocation50 + $0xe4] ss:$16 sps:$4 sm:$0xff]  }
 0xf3e   :  { %6355 = vmatpush1.bf16.msra.mxu0 %v12651_v31  ;;  %6394 = vmatpush1.bf16.msra.mxu1 %v12654_v29  ;;  %v12729_v31 = vld [vmem:[#allocation41 + $0x508] ss:$16 sps:$4 sm:$0xff]   ;;  %v12732_v29 = vld [vmem:[#allocation50 + $0xe0] ss:$16 sps:$4 sm:$0xff]  }
 0xf3f   :  { %6356 = vmatprep.subr.bf16.mxu0 %v12659_v39  ;;  %6395 = vmatprep.subr.bf16.mxu1 %v12662_v45  ;;  %v12737_v39 = vld [vmem:[#allocation50 + $0xc4] ss:$16 sps:$4 sm:$0xff]   ;;  %v12740_v45 = vld [vmem:[#allocation50 + $0xec] ss:$16 sps:$4 sm:$0xff]  }
 0xf42   :  { %6357 = vmatpush1.bf16.msra.mxu0 %v12657_v3  ;;  %6396 = vmatpush1.bf16.msra.mxu1 %v12660_v11  ;;  %v12735_v3 = vld [vmem:[#allocation50 + $0xc0] ss:$16 sps:$4 sm:$0xff]   ;;  %v12738_v11 = vld [vmem:[#allocation50 + $0xe8] ss:$16 sps:$4 sm:$0xff]  }
 0xf43   :  { %6358 = vmatprep.subr.bf16.mxu0 %v12665_v46  ;;  %6397 = vmatprep.subr.bf16.mxu1 %v12668_v26  ;;  %v12743_v46 = vld [vmem:[#allocation50 + $0xa4] ss:$16 sps:$4 sm:$0xff]   ;;  %v12746_v26 = vld [vmem:[#allocation50 + $0xcc] ss:$16 sps:$4 sm:$0xff]  }
 0xf46   :  { %6359 = vmatpush1.bf16.msra.mxu0 %v12663_v47  ;;  %6398 = vmatpush1.bf16.msra.mxu1 %v12666_v53  ;;  %v12741_v47 = vld [vmem:[#allocation50 + $0xa0] ss:$16 sps:$4 sm:$0xff]   ;;  %v12744_v53 = vld [vmem:[#allocation50 + $0xc8] ss:$16 sps:$4 sm:$0xff]  }
 0xf47   :  { %6360 = vmatprep.subr.bf16.mxu0 %v12671_v63  ;;  %6399 = vmatprep.subr.bf16.mxu1 %v12674_v54  ;;  %v12749_v63 = vld [vmem:[#allocation50 + $0x84] ss:$16 sps:$4 sm:$0xff]   ;;  %v12752_v54 = vld [vmem:[#allocation50 + $0xac] ss:$16 sps:$4 sm:$0xff]  }
 0xf4a   :  { %6361 = vmatpush1.bf16.msra.mxu0 %v12669_v34  ;;  %6400 = vmatpush1.bf16.msra.mxu1 %v12672_v14  ;;  %v12747_v34 = vld [vmem:[#allocation50 + $0x80] ss:$16 sps:$4 sm:$0xff]   ;;  %v12750_v14 = vld [vmem:[#allocation50 + $0xa8] ss:$16 sps:$4 sm:$0xff]  }
 0xf4b   :  { %6362 = vmatprep.subr.bf16.mxu0 %v12677_v23  ;;  %6401 = vmatprep.subr.bf16.mxu1 %v12680_v55  ;;  %v12755_v23 = vld [vmem:[#allocation50 + $0x64] ss:$16 sps:$4 sm:$0xff]   ;;  %v12758_v55 = vld [vmem:[#allocation50 + $0x8c] ss:$16 sps:$4 sm:$0xff]  }
 0xf4e   :  { %6363 = vmatpush1.bf16.msra.mxu0 %v12675_v59  ;;  %6402 = vmatpush1.bf16.msra.mxu1 %v12678_v51  ;;  %v12756_v59 = vld [vmem:[#allocation50 + $0x88] ss:$16 sps:$4 sm:$0xff]   ;;  %v12761_v51 = vld [vmem:[#allocation50 + $0x44] ss:$16 sps:$4 sm:$0xff]  }
 0xf4f   :  { %6364 = vmatprep.subr.bf16.mxu0 %v12683_v61  ;;  %6403 = vmatprep.subr.bf16.mxu1 %v12686_v62  ;;  %v12759_v61 = vld [vmem:[#allocation50 + $0x40] ss:$16 sps:$4 sm:$0xff]   ;;  %v12762_v62 = vld [vmem:[#allocation50 + $0x68] ss:$16 sps:$4 sm:$0xff]  }
 0xf52   :  { %6365 = vmatpush2.bf16.msra.mxu0 %v12681_v56  ;;  %6404 = vmatpush1.bf16.msra.mxu1 %v12684_v0  ;;  %v12767_v56 = vld [vmem:[#allocation50 + $0x24] ss:$16 sps:$4 sm:$0xff]   ;;  %v12770_v0 = vld [vmem:[#allocation50 + $0x4c] ss:$16 sps:$4 sm:$0xff]  }
 0xf53   :  { %6366 = vmatprep.subr.bf16.mxu0 %v12689_v1  ;;  %6405 = vmatprep.subr.bf16.mxu1 %v12692_v16  ;;  %v12765_v1 = vld [vmem:[#allocation50 + $0x20] ss:$16 sps:$4 sm:$0xff]   ;;  %v12768_v16 = vld [vmem:[#allocation50 + $0x48] ss:$16 sps:$4 sm:$0xff]  }
 0xf56   :  { %6367 = vmatpush2.bf16.msra.mxu0 %v12687_v35  ;;  %6406 = vmatpush2.bf16.msra.mxu1 %v12690_v4  ;;  %v12773_v35 = vld [vmem:[#allocation50 + $0x4] ss:$16 sps:$4 sm:$0xff]   ;;  %v12776_v4 = vld [vmem:[#allocation50 + $0x2c] ss:$16 sps:$4 sm:$0xff]  }
 0xf57   :  { %6368 = vmatprep.subr.bf16.mxu0 %v12695_v5  ;;  %6407 = vmatprep.subr.bf16.mxu1 %v12698_v28  ;;  %v12771_v5 = vld [vmem:[#allocation50] ss:$16 sps:$4 sm:$0xff]   ;;  %v12774_v28 = vld [vmem:[#allocation50 + $0x28] ss:$16 sps:$4 sm:$0xff]  }
 0xf5a   :  { %6369 = vmatpush2.bf16.msra.mxu0 %v12693_v7  ;;  %6408 = vmatpush2.bf16.msra.mxu1 %v12696_v8  ;;  %v12779_v7 = vld [vmem:[#allocation50 + $0x1e4] ss:$16 sps:$4 sm:$0xff]   ;;  %v12782_v8 = vld [vmem:[#allocation50 + $0xc] ss:$16 sps:$4 sm:$0xff]  }
 0xf5b   :  { %6370 = vmatprep.subr.bf16.mxu0 %v12701_v9  ;;  %6409 = vmatprep.subr.bf16.mxu1 %v12704_v27  ;;  %v12777_v9 = vld [vmem:[#allocation50 + $0x1e0] ss:$16 sps:$4 sm:$0xff]   ;;  %v12780_v27 = vld [vmem:[#allocation50 + $0x8] ss:$16 sps:$4 sm:$0xff]  }
 0xf5e   :  { %6371 = vmatpush2.bf16.msra.mxu0 %v12699_v12  ;;  %6410 = vmatpush2.bf16.msra.mxu1 %v12702_v21  ;;  %v12785_v12 = vld [vmem:[#allocation50 + $0x1c4] ss:$16 sps:$4 sm:$0xff]   ;;  %v12788_v21 = vld [vmem:[#allocation50 + $0x1ec] ss:$16 sps:$4 sm:$0xff]  }
 0xf5f   :  { %6372 = vmatprep.subr.bf16.mxu0 %v12707_v57  ;;  %6411 = vmatprep.subr.bf16.mxu1 %v12710_v50  ;;  %v12783_v57 = vld [vmem:[#allocation50 + $0x1c0] ss:$16 sps:$4 sm:$0xff]   ;;  %v12786_v50 = vld [vmem:[#allocation50 + $0x1e8] ss:$16 sps:$4 sm:$0xff]  }
 0xf62   :  { %6373 = vmatpush2.bf16.msra.mxu0 %v12705_v32  ;;  %6412 = vmatpush2.bf16.msra.mxu1 %v12708_v58  ;;  %v12791_v32 = vld [vmem:[#allocation50 + $0x1a4] ss:$16 sps:$4 sm:$0xff]   ;;  %v12794_v58 = vld [vmem:[#allocation50 + $0x1cc] ss:$16 sps:$4 sm:$0xff]  }
 0xf63   :  { %6374 = vmatprep.subr.bf16.mxu0 %v12713_v60  ;;  %6413 = vmatprep.subr.bf16.mxu1 %v12716_v17  ;;  %v12789_v60 = vld [vmem:[#allocation50 + $0x1a0] ss:$16 sps:$4 sm:$0xff]   ;;  %v12792_v17 = vld [vmem:[#allocation50 + $0x1c8] ss:$16 sps:$4 sm:$0xff]  }
 0xf66   :  { %6375 = vmatpush2.bf16.msra.mxu0 %v12711_v20  ;;  %6414 = vmatpush2.bf16.msra.mxu1 %v12714_v25  ;;  %v12797_v20 = vld [vmem:[#allocation50 + $0x184] ss:$16 sps:$4 sm:$0xff]   ;;  %v12800_v25 = vld [vmem:[#allocation50 + $0x1ac] ss:$16 sps:$4 sm:$0xff]  }
 0xf67   :  { %6376 = vmatprep.subr.bf16.mxu0 %v12719_v24  ;;  %6415 = vmatprep.subr.bf16.mxu1 %v12722_v33  ;;  %v12795_v24 = vld [vmem:[#allocation50 + $0x180] ss:$16 sps:$4 sm:$0xff]   ;;  %v12798_v33 = vld [vmem:[#allocation50 + $0x1a8] ss:$16 sps:$4 sm:$0xff]  }
 0xf6a   :  { %6377 = vmatpush2.bf16.msra.mxu0 %v12717_v30  ;;  %6416 = vmatpush2.bf16.msra.mxu1 %v12720_v40  ;;  %v12803_v30 = vld [vmem:[#allocation50 + $0x164] ss:$16 sps:$4 sm:$0xff]   ;;  %v12806_v40 = vld [vmem:[#allocation50 + $0x18c] ss:$16 sps:$4 sm:$0xff]  }
 0xf6b   :  { %6378 = vmatprep.subr.bf16.mxu0 %v12725_v36  ;;  %6417 = vmatprep.subr.bf16.mxu1 %v12728_v52  ;;  %v12801_v36 = vld [vmem:[#allocation50 + $0x160] ss:$16 sps:$4 sm:$0xff]   ;;  %v12804_v52 = vld [vmem:[#allocation50 + $0x188] ss:$16 sps:$4 sm:$0xff]  }
 0xf6e   :  { %6379 = vmatpush2.bf16.msra.mxu0 %v12723_v41  ;;  %6418 = vmatpush2.bf16.msra.mxu1 %v12726_v44  ;;  %v12809_v41 = vld [vmem:[#allocation50 + $0x144] ss:$16 sps:$4 sm:$0xff]   ;;  %v12812_v44 = vld [vmem:[#allocation50 + $0x16c] ss:$16 sps:$4 sm:$0xff]  }
 0xf6f   :  { %6419 = vmatprep.subr.bf16.mxu1 %v12731_v43  ;;  %6870 = vmatprep.subr.bf16.mxu0 %v12734_v42  ;;  %v12807_v43 = vld [vmem:[#allocation50 + $0x140] ss:$16 sps:$4 sm:$0xff]   ;;  %v12810_v42 = vld [vmem:[#allocation50 + $0x168] ss:$16 sps:$4 sm:$0xff]  }
 0xf71   :  { %6381 = vmatmul.mubr.bf16.vlgmr.msra.gmra.mxu0 %v15299_v10 }
 0xf72   :  { %6420 = vmatpush2.bf16.msra.mxu1 %v12729_v31  ;;  %6871 = vmatpush1.bf16.msra.mxu0 %v12732_v29  ;;  %v12815_v31 = vld [vmem:[#allocation50 + $0x124] ss:$16 sps:$4 sm:$0xff]   ;;  %v12818_v29 = vld [vmem:[#allocation50 + $0x14c] ss:$16 sps:$4 sm:$0xff]  }
 0xf73   :  { %6902 = vmatprep.mubr.bf16.mxu0 %v15297_v38  ;;  %6872 = vmatprep.subr.bf16.mxu0 %v12737_v39  ;;  %v12813_v39 = vld [vmem:[#allocation50 + $0x120] ss:$16 sps:$4 sm:$0xff]  }
 0xf74   :  { %6911 = vmatprep.subr.bf16.mxu1 %v12740_v45  ;;  %v12816_v45 = vld [vmem:[#allocation50 + $0x148] ss:$16 sps:$4 sm:$0xff]  }
 0xf75   :  { %6422 = vmatmul.mubr.bf16.vlgmr.msra.gmra.mxu1 %v15310_v13  ;;  %v12753_v13 = vld [vmem:[#allocation50 + $0x60] ss:$16 sps:$4 sm:$0xff]  }
 0xf76   :  { %6873 = vmatpush1.bf16.msra.mxu0 %v12735_v3  ;;  %6912 = vmatpush1.bf16.msra.mxu1 %v12738_v11  ;;  %v12821_v3 = vld [vmem:[#allocation50 + $0x104] ss:$16 sps:$4 sm:$0xff]   ;;  %v12824_v11 = vld [vmem:[#allocation50 + $0x12c] ss:$16 sps:$4 sm:$0xff]  }
 0xf77   :  { %6943 = vmatprep.mubr.bf16.mxu1 %v15297_v38  ;;  %6874 = vmatprep.subr.bf16.mxu0 %v12743_v46  ;;  %v12764_v38 = vld [vmem:[#allocation50 + $0x6c] ss:$16 sps:$4 sm:$0xff]   ;;  %v12819_v46 = vld [vmem:[#allocation50 + $0x100] ss:$16 sps:$4 sm:$0xff]  }
 0xf78   :  { %6913 = vmatprep.subr.bf16.mxu1 %v12746_v26  ;;  %v12822_v26 = vld [vmem:[#allocation50 + $0x128] ss:$16 sps:$4 sm:$0xff]  }
 0xf7a   :  { %6875 = vmatpush1.bf16.msra.mxu0 %v12741_v47  ;;  %6914 = vmatpush1.bf16.msra.mxu1 %v12744_v53  ;;  %v12827_v47 = vld [vmem:[#allocation50 + $0x10c] ss:$16 sps:$4 sm:$0xff]   ;;  %v12825_v53 = vld [vmem:[#allocation50 + $0x108] ss:$16 sps:$4 sm:$0xff]  }
 0xf7b   :  { %6876 = vmatprep.subr.bf16.mxu0 %v12749_v63  ;;  %6915 = vmatprep.subr.bf16.mxu1 %v12752_v54 }
 0xf7e   :  { %6877 = vmatpush1.bf16.msra.mxu0 %v12747_v34  ;;  %6916 = vmatpush1.bf16.msra.mxu1 %v12750_v14 }
 0xf7f   :  { %6878 = vmatprep.subr.bf16.mxu0 %v12755_v23  ;;  %6917 = vmatprep.subr.bf16.mxu1 %v12758_v55 }
 0xf82   :  { %6879 = vmatpush1.bf16.msra.mxu0 %v12753_v13  ;;  %6918 = vmatpush1.bf16.msra.mxu1 %v12756_v59 }
 0xf83   :  { %6880 = vmatprep.subr.bf16.mxu0 %v12761_v51  ;;  %6919 = vmatprep.subr.bf16.mxu1 %v12764_v38  ;;  %v6430_v51 = vld [vmem:[#allocation43] sm:$0xf] }
 0xf86   :  { %6881 = vmatpush1.bf16.msra.mxu0 %v12759_v61  ;;  %6920 = vmatpush1.bf16.msra.mxu1 %v12762_v62  ;;  %v6435_v61 = vrot.slane %v6430_v51, %v15220_v49  ;;  %v6456_v62 = vld [vmem:[#allocation44] sm:$0xf] }
 0xf87   :  { %6882 = vmatprep.subr.bf16.mxu0 %v12767_v56  ;;  %6921 = vmatprep.subr.bf16.mxu1 %v12770_v0  ;;  %v7388_v0 = vadd.s32 4294967295, %v15262_v37 }
 0xf89   :  { %vm7389_vm6 = vcmp.ge.s32.totalorder %v7388_v0, 0  ;;  %v12834_v0 = vld [vmem:[#allocation46 + $0xa0] ss:$16 sps:$4 sm:$0xff]  }
 0xf8a   :  { %6883 = vmatpush1.bf16.msra.mxu0 %v12765_v1  ;;  %6922 = vmatpush1.bf16.msra.mxu1 %v12768_v16  ;;  %vm7390_vm9 = vmand %vm1201_vm15, %vm7389_vm6  ;;  %vm10187_vm6 = vcmp.ge.s32.totalorder %v14537_v19, %v14535_v18  ;;  %v10396_v18 = vld [vmem:[%s14441_s4 + $0x178] sm:$0xff] }
 0xf8b   :  { %6884 = vmatprep.subr.bf16.mxu0 %v12773_v35  ;;  %6923 = vmatprep.subr.bf16.mxu1 %v12776_v4  ;;  %v6439_v35 = vrot.slane %v6430_v51, %v15223_v6 }
 0xf8e   :  { %6885 = vmatpush1.bf16.msra.mxu0 %v12771_v5  ;;  %6924 = vmatpush1.bf16.msra.mxu1 %v12774_v28 }
 0xf8f   :  { %6886 = vmatprep.subr.bf16.mxu0 %v12779_v7  ;;  %6925 = vmatprep.subr.bf16.mxu1 %v12782_v8  ;;  %v6465_v7 = vrot.slane %v6456_v62, %v15223_v6 }
 0xf92   :  { %6887 = vmatpush2.bf16.msra.mxu0 %v12777_v9  ;;  %6926 = vmatpush1.bf16.msra.mxu1 %v12780_v27 }
 0xf93   :  { %6888 = vmatprep.subr.bf16.mxu0 %v12785_v12  ;;  %6927 = vmatprep.subr.bf16.mxu1 %v12788_v21 }
 0xf96   :  { %6889 = vmatpush2.bf16.msra.mxu0 %v12783_v57  ;;  %6928 = vmatpush2.bf16.msra.mxu1 %v12786_v50 }
 0xf97   :  { %6890 = vmatprep.subr.bf16.mxu0 %v12791_v32  ;;  %6929 = vmatprep.subr.bf16.mxu1 %v12794_v58 }
 0xf9a   :  { %6891 = vmatpush2.bf16.msra.mxu0 %v12789_v60  ;;  %6930 = vmatpush2.bf16.msra.mxu1 %v12792_v17 }
 0xf9b   :  { %6892 = vmatprep.subr.bf16.mxu0 %v12797_v20  ;;  %6931 = vmatprep.subr.bf16.mxu1 %v12800_v25  ;;  %v7393_v20 = vsel %vm7390_vm9, 1.0, %v14244_v22 }
 0xf9e   :  { %6893 = vmatpush2.bf16.msra.mxu0 %v12795_v24  ;;  %6932 = vmatpush2.bf16.msra.mxu1 %v12798_v33  ;;  %v15346_v24 = vsub.s32 3, %v14529_v15 }
 0xf9f   :  { %6894 = vmatprep.subr.bf16.mxu0 %v12803_v30  ;;  %6933 = vmatprep.subr.bf16.mxu1 %v12806_v40  ;;  %v6443_v40 = vrot.slane %v6430_v51, %v15343_v2 }
 0xfa2   :  { %6895 = vmatpush2.bf16.msra.mxu0 %v12801_v36  ;;  %6934 = vmatpush2.bf16.msra.mxu1 %v12804_v52 }
 0xfa3   :  { %6896 = vmatprep.subr.bf16.mxu0 %v12809_v41  ;;  %6935 = vmatprep.subr.bf16.mxu1 %v12812_v44 }
 0xfa6   :  { %6897 = vmatpush2.bf16.msra.mxu0 %v12807_v43  ;;  %6936 = vmatpush2.bf16.msra.mxu1 %v12810_v42  ;;  %v6447_v43 = vrot.slane %v6430_v51, %v15346_v24  ;;  %v6469_v42 = vrot.slane %v6456_v62, %v15343_v2  ;;  %v12887_v51 = vld [vmem:[#allocation46 + $0x2c4] ss:$16 sps:$4 sm:$0xff]  }
 0xfa7   :  { %6898 = vmatprep.subr.bf16.mxu0 %v12815_v31  ;;  %6937 = vmatprep.subr.bf16.mxu1 %v12818_v29 }
 0xfaa   :  { %6899 = vmatpush2.bf16.msra.mxu0 %v12813_v39  ;;  %6938 = vmatpush2.bf16.msra.mxu1 %v12816_v45 }
 0xfab   :  { %6900 = vmatprep.subr.bf16.mxu0 %v12821_v3  ;;  %6939 = vmatprep.subr.bf16.mxu1 %v12824_v11  ;;  %v6473_v3 = vrot.slane %v6456_v62, %v15346_v24  ;;  %v7552_v11 = vadd.s32 1, %v15262_v37 }
 0xfad   :  { %vm7555_vm15 = vcmp.lt.s32.totalorder %v7552_v11, 2  ;;  %v6952_v11 = vld [vmem:[#allocation52] sm:$0xf] }
 0xfae   :  { %6901 = vmatpush2.bf16.msra.mxu0 %v12819_v46  ;;  %6940 = vmatpush2.bf16.msra.mxu1 %v12822_v26  ;;  %vm7556_vm7 = vmand %vm15724_vm14, %vm7555_vm15 }
 0xfaf   :  { %6941 = vmatprep.subr.bf16.mxu1 %v12827_v47  ;;  %v7557_v37 = vsel %vm7556_vm7, 1.0, %v14244_v22  ;;  %vm15733_vm15 = vmmov %vm15728_vm0 }
 0xfb1   :  { %6903 = vmatmul.mubr.bf16.vlgmr.msra.gmra.mxu0 %v15299_v10  ;;  %v6218_v63 = vpop.f32.mrf.mxu0 }
 0xfb2   :  { %6942 = vmatpush2.bf16.msra.mxu1 %v12825_v53  ;;  %7474 = vmatprep.mubr.f32.mxu0 %v14244_v22 }
 0xfb3   :  { %v6220_v54 = vpop.f32.mrf.mxu0 }
 0xfb5   :  { %6944 = vmatmul.mubr.bf16.vlgmr.msra.gmra.mxu1 %v15299_v10  ;;  %v6222_v34 = vpop.f32.mrf.mxu0  ;;  %v6259_v14 = vpop.f32.mrf.mxu1  ;;  %v6461_v10 = vrot.slane %v6456_v62, %v15220_v49  ;;  %v12891_v62 = vld [vmem:[#allocation46 + $0x2a0] ss:$16 sps:$4 sm:$0xff]  }
 0xfb6   :  { %v6260_v38 = vadd.f32 %v6259_v14, %v6218_v63  ;;  %v12830_v34 = vld [vmem:[#allocation46 + $0xe4] ss:$16 sps:$4 sm:$0xff]   ;;  %v12879_v14 = vld [vmem:[#allocation46 + $0x2e0] ss:$16 sps:$4 sm:$0xff]  }
 0xfb7   :  { %v6223_v23 = vpop.f32.mrf.mxu0  ;;  %v6261_v55 = vpop.f32.mrf.mxu1 }
 0xfb8   :  { %v6262_v1 = vadd.f32 %v6261_v55, %v6220_v54  ;;  %v12881_v23 = vld [vmem:[#allocation46 + $0x2e4] ss:$16 sps:$4 sm:$0xff]   ;;  %v12828_v55 = vld [vmem:[#allocation46 + $0xe0] ss:$16 sps:$4 sm:$0xff]  }
 0xfb9   :  { %v6263_v13 = vpop.f32.mrf.mxu1  ;;  %9676 = vmatprep.subr.bf16.mxu1 %v12881_v23  ;;  %v6969_v23 = vrot.slane %v6952_v11, %v15346_v24 }
 0xfba   :  { %v12833_v13 = vld [vmem:[#allocation46 + $0xc4] ss:$16 sps:$4 sm:$0xff]   ;;  %9677 = vmatpush1.bf16.msra.mxu1 %v12879_v14 }
 0xfbb   :  { %v6264_v59 = vpop.f32.mrf.mxu1  ;;  %9678 = vmatprep.subr.bf16.mxu1 %v12887_v51  ;;  %v12951_v51 = vld [vmem:[#allocation46 + $0x360] ss:$16 sps:$4 sm:$0xff]  }
 0xfbc   :  { %v12885_v59 = vld [vmem:[#allocation46 + $0x2c0] ss:$16 sps:$4 sm:$0xff]  }
 0xfbe   :  { %9679 = vmatpush1.bf16.msra.mxu1 %v12885_v59 }
 0xff1   :  { %v6300_v56 = vpop.f32.mrf.mxu0 }
 0xff2   :  { %v6301_v16 = vadd.f32 %v6300_v56, %v6260_v38  ;;  %v12831_v38 = vld [vmem:[#allocation46 + $0xc0] ss:$16 sps:$4 sm:$0xff]   ;;  %v12893_v56 = vld [vmem:[#allocation46 + $0x2a4] ss:$16 sps:$4 sm:$0xff]  }
 0xff3   :  { %v6302_v4 = vpop.f32.mrf.mxu0  ;;  %9680 = vmatprep.subr.bf16.mxu1 %v12893_v56 }
 0xff4   :  { %v6452_v5 = vmul.f32 %v6435_v61, %v6301_v16  ;;  %v6303_v28 = vadd.f32 %v6302_v4, %v6262_v1  ;;  %v12836_v61 = vld [vmem:[#allocation46 + $0xa4] ss:$16 sps:$4 sm:$0xff]   ;;  %9681 = vmatpush1.bf16.msra.mxu1 %v12891_v62  ;;  %v12897_v16 = vld [vmem:[#allocation46 + $0x280] ss:$16 sps:$4 sm:$0xff]  }
 0xff5   :  { %v6304_v8 = vpop.f32.mrf.mxu0  ;;  %v6341_v9 = vpop.f32.mrf.mxu1  ;;  %v12839_v1 = vld [vmem:[#allocation46 + $0x84] ss:$16 sps:$4 sm:$0xff]  }
 0xff6   :  { %v6453_v27 = vmul.f32 %v6439_v35, %v6303_v28  ;;  %v6478_v12 = vadd.f32 %v6461_v10, %v6452_v5  ;;  %v12899_v35 = vld [vmem:[#allocation46 + $0x284] ss:$16 sps:$4 sm:$0xff]   ;;  %v12837_v10 = vld [vmem:[#allocation46 + $0x80] ss:$16 sps:$4 sm:$0xff]  }
 0xff7   :  { %v6305_v21 = vpop.f32.mrf.mxu0  ;;  %v6343_v57 = vpop.f32.mrf.mxu1  ;;  %9682 = vmatprep.subr.bf16.mxu1 %v12899_v35  ;;  %v12842_v4 = vld [vmem:[#allocation46 + $0x64] ss:$16 sps:$4 sm:$0xff]   ;;  %v12903_v5 = vld [vmem:[#allocation46 + $0x260] ss:$16 sps:$4 sm:$0xff]  }
 0xff8   :  { %v6479_v50 = vadd.f32 %v6465_v7, %v6453_v27  ;;  %v15333_v60 = vmax.f32 %v6478_v12, 0.0  ;;  %9683 = vmatpush1.bf16.msra.mxu1 %v12897_v16  ;;  %v12905_v28 = vld [vmem:[#allocation46 + $0x264] ss:$16 sps:$4 sm:$0xff]   ;;  %v12840_v7 = vld [vmem:[#allocation46 + $0x60] ss:$16 sps:$4 sm:$0xff]  }
 0xff9   :  { %v6345_v32 = vpop.f32.mrf.mxu1  ;;  %9684 = vmatprep.subr.bf16.mxu1 %v12905_v28  ;;  %v12845_v8 = vld [vmem:[#allocation46 + $0x44] ss:$16 sps:$4 sm:$0xff]   ;;  %v12843_v12 = vld [vmem:[#allocation46 + $0x40] ss:$16 sps:$4 sm:$0xff]  }
 0xffa   :  { %v15331_v58 = vmax.f32 %v6479_v50, 0.0  ;;  %v12911_v27 = vld [vmem:[#allocation46 + $0x244] ss:$16 sps:$4 sm:$0xff]   ;;  %v12846_v32 = vld [vmem:[#allocation46 + $0x20] ss:$16 sps:$4 sm:$0xff]  }
 0xffb   :  { %v6346_v17 = vpop.f32.mrf.mxu1  ;;  %v12848_v21 = vld [vmem:[#allocation46 + $0x24] ss:$16 sps:$4 sm:$0xff]  }
 0xffc   :  { %11181 = vmatprep.subr.msk.mxu0 %vm15721_vm1, %v15331_v58  ;;  %9685 = vmatpush1.bf16.msra.mxu1 %v12903_v5  ;;  %v12917_v50 = vld [vmem:[#allocation46 + $0x224] ss:$16 sps:$4 sm:$0xff]   ;;  %v12957_v5 = vld [vmem:[#allocation46 + $0x340] ss:$16 sps:$4 sm:$0xff]  }
 0xffd   :  { %11182 = vmatpush1.msk.msra.mxu0 %vm15722_vm8, %v15333_v60  ;;  %9686 = vmatprep.subr.bf16.mxu1 %v12911_v27  ;;  %v12851_v17 = vld [vmem:[#allocation46 + $0x4] ss:$16 sps:$4 sm:$0xff]   ;;  %vm15732_vm8 = vmmov %vm15728_vm0 }
 0xffe   :  { %11183 = vmatmul.mubr.msk.f32.vlgmr.msra.gmra.mxu0 %vm7394_vm11, %v7393_v20  ;;  %v12959_v28 = vld [vmem:[#allocation46 + $0x344] ss:$16 sps:$4 sm:$0xff]  }
 0xfff   :  { %7545 = vmatprep.mubr.f32.mxu0 %v14244_v22  ;;  %v12872_v27 = vld [vmem:[#allocation46 + $0x124] ss:$16 sps:$4 sm:$0xff]  }
0x1031   :  { %v6382_v25 = vpop.f32.mrf.mxu0 }
0x1032   :  { %v6383_v30 = vadd.f32 %v6382_v25, %v6341_v9  ;;  %v12909_v9 = vld [vmem:[#allocation46 + $0x240] ss:$16 sps:$4 sm:$0xff]   ;;  %v12923_v25 = vld [vmem:[#allocation46 + $0x204] ss:$16 sps:$4 sm:$0xff]  }
0x1033   :  { %v6384_v33 = vpop.f32.mrf.mxu0  ;;  %9687 = vmatpush1.bf16.msra.mxu1 %v12909_v9  ;;  %v12867_v9 = vld [vmem:[#allocation46 + $0x140] ss:$16 sps:$4 sm:$0xff]  }
0x1034   :  { %v6385_v41 = vadd.f32 %v6384_v33, %v6343_v57  ;;  %v12915_v57 = vld [vmem:[#allocation46 + $0x220] ss:$16 sps:$4 sm:$0xff]   ;;  %9688 = vmatprep.subr.bf16.mxu1 %v12917_v50  ;;  %v12875_v50 = vld [vmem:[#allocation46 + $0x104] ss:$16 sps:$4 sm:$0xff]  }
0x1035   :  { %v6386_v36 = vpop.f32.mrf.mxu0  ;;  %v6423_v52 = vpop.f32.mrf.mxu1  ;;  %v12849_v33 = vld [vmem:[#allocation46] ss:$16 sps:$4 sm:$0xff]  }
0x1036   :  { %v6424_v44 = vadd.f32 %v6423_v52, %v6383_v30  ;;  %v12854_v30 = vld [vmem:[#allocation46 + $0x1e4] ss:$16 sps:$4 sm:$0xff]   ;;  %v12852_v52 = vld [vmem:[#allocation46 + $0x1e0] ss:$16 sps:$4 sm:$0xff]  }
0x1037   :  { %v6387_v31 = vpop.f32.mrf.mxu0  ;;  %v6425_v29 = vpop.f32.mrf.mxu1  ;;  %9689 = vmatpush1.bf16.msra.mxu1 %v12915_v57  ;;  %v12929_v36 = vld [vmem:[#allocation46 + $0x3e4] ss:$16 sps:$4 sm:$0xff]   ;;  %v12870_v57 = vld [vmem:[#allocation46 + $0x120] ss:$16 sps:$4 sm:$0xff]  }
0x1038   :  { %v6454_v39 = vmul.f32 %v6443_v40, %v6424_v44  ;;  %v6426_v45 = vadd.f32 %v6425_v29, %v6385_v41  ;;  %9690 = vmatprep.subr.bf16.mxu1 %v12923_v25  ;;  %v12927_v40 = vld [vmem:[#allocation46 + $0x3e0] ss:$16 sps:$4 sm:$0xff]   ;;  %v12857_v41 = vld [vmem:[#allocation46 + $0x1c4] ss:$16 sps:$4 sm:$0xff]  }
0x1039   :  { %v6427_v15 = vpop.f32.mrf.mxu1  ;;  %v12933_v44 = vld [vmem:[#allocation46 + $0x3c0] ss:$16 sps:$4 sm:$0xff]   ;;  %v12860_v31 = vld [vmem:[#allocation46 + $0x1a4] ss:$16 sps:$4 sm:$0xff]  }
0x103a   :  { %v6455_v46 = vmul.f32 %v6447_v43, %v6426_v45  ;;  %v6480_v26 = vadd.f32 %v6469_v42, %v6454_v39  ;;  %v12935_v43 = vld [vmem:[#allocation46 + $0x3c4] ss:$16 sps:$4 sm:$0xff]   ;;  %v12855_v42 = vld [vmem:[#allocation46 + $0x1c0] ss:$16 sps:$4 sm:$0xff]  }
0x103b   :  { %v6428_v47 = vpop.f32.mrf.mxu1  ;;  %v12939_v29 = vld [vmem:[#allocation46 + $0x3a0] ss:$16 sps:$4 sm:$0xff]   ;;  %v12941_v39 = vld [vmem:[#allocation46 + $0x3a4] ss:$16 sps:$4 sm:$0xff]  }
0x103c   :  { %v6481_v53 = vadd.f32 %v6473_v3, %v6455_v46  ;;  %v15355_v54 = vmax.f32 %v6480_v26, 0.0  ;;  %v12858_v45 = vld [vmem:[#allocation46 + $0x1a0] ss:$16 sps:$4 sm:$0xff]   ;;  %v12863_v3 = vld [vmem:[#allocation46 + $0x184] ss:$16 sps:$4 sm:$0xff]   ;;  %v6965_v47 = vrot.slane %v6952_v11, %v15343_v2 }
0x103d   :  { %v12945_v46 = vld [vmem:[#allocation46 + $0x380] ss:$16 sps:$4 sm:$0xff]   ;;  %v12947_v26 = vld [vmem:[#allocation46 + $0x384] ss:$16 sps:$4 sm:$0xff]  }
0x103e   :  { %v15353_v63 = vmax.f32 %v6481_v53, 0.0  ;;  %v6978_v53 = vld [vmem:[#allocation53] sm:$0xf]  ;;  %v12878_v25 = vld [vmem:[#allocation46 + $0x4e4] ss:$16 sps:$4 sm:$0xff]  }
0x103f   :  { %v6991_v14 = vrot.slane %v6978_v53, %v15343_v2  ;;  %v6995_v62 = vrot.slane %v6978_v53, %v15346_v24  ;;  %v12900_v11 = vld [vmem:[#allocation46 + $0x460] ss:$16 sps:$4 sm:$0xff]   ;;  %v12920_v53 = vld [vmem:[#allocation46 + $0x404] ss:$16 sps:$4 sm:$0xff]  }
0x1040   :  { %11184 = vmatprep.subr.msk.mxu0 %vm15723_vm4, %v15353_v63 }
0x1041   :  { %11185 = vmatpush1.msk.msra.mxu0 %vm15725_vm3, %v15355_v54 }
0x1042   :  { %11186 = vmatmul.mubr.msk.f32.vlgmr.msra.gmra.mxu0 %vm7394_vm11, %v7393_v20  ;;  %11187 = vmatprep.subr.msk.mxu0 %vm15726_vm12, %v15331_v58  ;;  %v12921_v20 = vld [vmem:[#allocation46 + $0x200] ss:$16 sps:$4 sm:$0xff]  }
0x1043   :  { %11188 = vmatpush1.msk.msra.mxu0 %vm15727_vm10, %v15333_v60  ;;  %7625 = vmatprep.mubr.f32.mxu0 %v14244_v22 }
0x1044   :  { %11190 = vmatprep.subr.msk.mxu0 %vm15728_vm0, %v15353_v63  ;;  %9691 = vmatpush1.bf16.msra.mxu1 %v12921_v20  ;;  %v12969_v20 = vld [vmem:[#allocation46 + $0x300] ss:$16 sps:$4 sm:$0xff]  }
0x1045   :  { %9692 = vmatprep.subr.bf16.mxu1 %v12929_v36 }
0x1046   :  { %11189 = vmatmul.mubr.msk.f32.vlgmr.msra.gmra.mxu0 %vm7394_vm11, %v7557_v37 }
0x1047   :  { %11191 = vmatpush1.msk.msra.mxu0 %vm15729_vm13, %v15355_v54  ;;  %7696 = vmatprep.mubr.f32.mxu0 %v14244_v22 }
0x1048   :  { %9635 = vmatprep.subr.bf16.mxu0 %v12830_v34  ;;  %9693 = vmatpush2.bf16.msra.mxu1 %v12927_v40  ;;  %v12861_v34 = vld [vmem:[#allocation46 + $0x180] ss:$16 sps:$4 sm:$0xff]  }
0x1049   :  { %9694 = vmatprep.subr.bf16.mxu1 %v12935_v43  ;;  %v15397_v43 = vpack.c.bf16 %v15331_v58, %v15331_v58  ;;  %v12908_v58 = vld [vmem:[#allocation46 + $0x444] ss:$16 sps:$4 sm:$0xff]  }
0x104a   :  { %11192 = vmatmul.mubr.msk.f32.vlgmr.msra.gmra.mxu0 %vm7394_vm11, %v7557_v37 }
0x104b   :  { %9636 = vmatpush1.bf16.msra.mxu0 %v12828_v55  ;;  %v12866_v55 = vld [vmem:[#allocation46 + $0x164] ss:$16 sps:$4 sm:$0xff]  }
0x104c   :  { %9637 = vmatprep.subr.bf16.mxu0 %v12833_v13  ;;  %9695 = vmatpush2.bf16.msra.mxu1 %v12933_v44  ;;  %v12884_v44 = vld [vmem:[#allocation46 + $0x4c4] ss:$16 sps:$4 sm:$0xff]  }
0x104d   :  { %9696 = vmatprep.subr.bf16.mxu1 %v12941_v39  ;;  %v12896_v39 = vld [vmem:[#allocation46 + $0x484] ss:$16 sps:$4 sm:$0xff]  }
0x104f   :  { %9638 = vmatpush1.bf16.msra.mxu0 %v12831_v38  ;;  %v12953_v38 = vld [vmem:[#allocation46 + $0x364] ss:$16 sps:$4 sm:$0xff]  }
0x1050   :  { %9639 = vmatprep.subr.bf16.mxu0 %v12836_v61  ;;  %9697 = vmatpush2.bf16.msra.mxu1 %v12939_v29  ;;  %v12888_v29 = vld [vmem:[#allocation46 + $0x4a0] ss:$16 sps:$4 sm:$0xff]  }
0x1051   :  { %9698 = vmatprep.subr.bf16.mxu1 %v12947_v26  ;;  %v12914_v26 = vld [vmem:[#allocation46 + $0x424] ss:$16 sps:$4 sm:$0xff]  }
0x1053   :  { %9640 = vmatpush1.bf16.msra.mxu0 %v12834_v0 }
0x1054   :  { %9641 = vmatprep.subr.bf16.mxu0 %v12839_v1  ;;  %9699 = vmatpush2.bf16.msra.mxu1 %v12945_v46  ;;  %v12864_v1 = vld [vmem:[#allocation46 + $0x160] ss:$16 sps:$4 sm:$0xff]  }
0x1055   :  { %9700 = vmatprep.subr.bf16.mxu1 %v12953_v38  ;;  %v12906_v46 = vld [vmem:[#allocation46 + $0x440] ss:$16 sps:$4 sm:$0xff]   ;;  %v12944_v38 = vld [vmem:[#allocation46 + $0x584] ss:$16 sps:$4 sm:$0xff]  }
0x1057   :  { %9642 = vmatpush1.bf16.msra.mxu0 %v12837_v10  ;;  %v12869_v10 = vld [vmem:[#allocation46 + $0x144] ss:$16 sps:$4 sm:$0xff]  }
0x1058   :  { %9643 = vmatprep.subr.bf16.mxu0 %v12842_v4  ;;  %9701 = vmatpush2.bf16.msra.mxu1 %v12951_v51  ;;  %v12936_v51 = vld [vmem:[#allocation46 + $0x5a0] ss:$16 sps:$4 sm:$0xff]  }
0x1059   :  { %9702 = vmatprep.subr.bf16.mxu1 %v12959_v28  ;;  %v12974_v28 = vld [vmem:[#allocation46 + $0x8e4] ss:$16 sps:$4 sm:$0xff]  }
0x105b   :  { %9644 = vmatpush1.bf16.msra.mxu0 %v12840_v7 }
0x105c   :  { %9645 = vmatprep.subr.bf16.mxu0 %v12845_v8  ;;  %9703 = vmatpush2.bf16.msra.mxu1 %v12957_v5  ;;  %v12966_v5 = vld [vmem:[#allocation46 + $0x500] ss:$16 sps:$4 sm:$0xff]  }
0x105f   :  { %9646 = vmatpush1.bf16.msra.mxu0 %v12843_v12  ;;  %v12963_v12 = vld [vmem:[#allocation46 + $0x320] ss:$16 sps:$4 sm:$0xff]  }
0x1060   :  { %9647 = vmatprep.subr.bf16.mxu0 %v12848_v21  ;;  %v12965_v21 = vld [vmem:[#allocation46 + $0x324] ss:$16 sps:$4 sm:$0xff]  }
0x1061   :  { %9704 = vmatprep.subr.bf16.mxu1 %v12965_v21 }
0x1062   :  { %9705 = vmatpush2.bf16.msra.mxu1 %v12963_v12  ;;  %v12980_v12 = vld [vmem:[#allocation46 + $0x8c4] ss:$16 sps:$4 sm:$0xff]  }
0x1063   :  { %9648 = vmatpush1.bf16.msra.mxu0 %v12846_v32  ;;  %v12971_v32 = vld [vmem:[#allocation46 + $0x304] ss:$16 sps:$4 sm:$0xff]  }
0x1064   :  { %9649 = vmatprep.subr.bf16.mxu0 %v12851_v17  ;;  %v12873_v17 = vld [vmem:[#allocation46 + $0x100] ss:$16 sps:$4 sm:$0xff]   ;;  %9706 = vmatprep.subr.bf16.mxu1 %v12971_v32 }
0x1065   :  { %v12978_v32 = vld [vmem:[#allocation46 + $0x8c0] ss:$16 sps:$4 sm:$0xff]  }
0x1066   :  { %9707 = vmatpush2.bf16.msra.mxu1 %v12969_v20  ;;  %v12983_v20 = vld [vmem:[#allocation46 + $0x6c4] ss:$16 sps:$4 sm:$0xff]  }
0x1067   :  { %9650 = vmatpush1.bf16.msra.mxu0 %v12849_v33  ;;  %v12977_v33 = vld [vmem:[#allocation46 + $0x6e4] ss:$16 sps:$4 sm:$0xff]  }
0x1068   :  { %9651 = vmatprep.subr.bf16.mxu0 %v12854_v30  ;;  %9758 = vmatprep.subr.bf16.mxu1 %v12977_v33  ;;  %v15416_v33 = vpack.c.bf16 %v15353_v63, %v15353_v63  ;;  %v12990_v63 = vld [vmem:[#allocation46 + $0x880] ss:$16 sps:$4 sm:$0xff]  }
0x106b   :  { %9652 = vmatpush2.bf16.msra.mxu0 %v12852_v52 }
0x106c   :  { %9653 = vmatprep.subr.bf16.mxu0 %v12857_v41  ;;  %v12876_v41 = vld [vmem:[#allocation46 + $0x4e0] ss:$16 sps:$4 sm:$0xff]  }
0x106f   :  { %9654 = vmatpush2.bf16.msra.mxu0 %v12855_v42  ;;  %v12882_v42 = vld [vmem:[#allocation46 + $0x4c0] ss:$16 sps:$4 sm:$0xff]  }
0x1070   :  { %9655 = vmatprep.subr.bf16.mxu0 %v12860_v31  ;;  %v12890_v31 = vld [vmem:[#allocation46 + $0x4a4] ss:$16 sps:$4 sm:$0xff]  }
0x1071   :  { %v15378_v15 = vpop.f32.mrf.mxu0 }
0x1073   :  { %v15381_v37 = vpop.f32.mrf.mxu0  ;;  %9656 = vmatpush2.bf16.msra.mxu0 %v12858_v45  ;;  %v12894_v45 = vld [vmem:[#allocation46 + $0x480] ss:$16 sps:$4 sm:$0xff]  }
0x1074   :  { %9657 = vmatprep.subr.bf16.mxu0 %v12863_v3  ;;  %v12902_v3 = vld [vmem:[#allocation46 + $0x464] ss:$16 sps:$4 sm:$0xff]  }
0x1075   :  { %v6908_v13 = vpop.f32.mrf.mxu0  ;;  %v6945_v59 = vpop.f32.mrf.mxu1 }
0x1076   :  { %v6976_v61 = vmul.f32 %v6965_v47, %v6945_v59  ;;  %v12912_v47 = vld [vmem:[#allocation46 + $0x420] ss:$16 sps:$4 sm:$0xff]   ;;  %v12938_v59 = vld [vmem:[#allocation46 + $0x5a4] ss:$16 sps:$4 sm:$0xff]  }
0x1077   :  { %v6909_v56 = vpop.f32.mrf.mxu0  ;;  %v6947_v0 = vpop.f32.mrf.mxu1  ;;  %9658 = vmatpush2.bf16.msra.mxu0 %v12861_v34  ;;  %v12918_v34 = vld [vmem:[#allocation46 + $0x400] ss:$16 sps:$4 sm:$0xff]  }
0x1078   :  { %v15386_v16 = vadd.f32 %v6991_v14, %v6976_v61  ;;  %v6977_v35 = vmul.f32 %v6969_v23, %v6947_v0  ;;  %9659 = vmatprep.subr.bf16.mxu0 %v12866_v55  ;;  %v12926_v14 = vld [vmem:[#allocation46 + $0x5e4] ss:$16 sps:$4 sm:$0xff]   ;;  %v12924_v23 = vld [vmem:[#allocation46 + $0x5e0] ss:$16 sps:$4 sm:$0xff]  }
0x1079   :  { %v6949_v4 = vpop.f32.mrf.mxu1  ;;  %v12932_v55 = vld [vmem:[#allocation46 + $0x5c4] ss:$16 sps:$4 sm:$0xff]   ;;  %v12930_v13 = vld [vmem:[#allocation46 + $0x5c0] ss:$16 sps:$4 sm:$0xff]  }
0x107a   :  { %v15388_v7 = vadd.f32 %v6995_v62, %v6977_v35  ;;  %v12942_v61 = vld [vmem:[#allocation46 + $0x580] ss:$16 sps:$4 sm:$0xff]   ;;  %v12950_v62 = vld [vmem:[#allocation46 + $0x564] ss:$16 sps:$4 sm:$0xff]  }
0x107b   :  { %v6950_v8 = vpop.f32.mrf.mxu1  ;;  %9660 = vmatpush2.bf16.msra.mxu0 %v12864_v1  ;;  %v12948_v56 = vld [vmem:[#allocation46 + $0x560] ss:$16 sps:$4 sm:$0xff]   ;;  %v12956_v0 = vld [vmem:[#allocation46 + $0x544] ss:$16 sps:$4 sm:$0xff]  }
0x107c   :  { %9661 = vmatprep.subr.bf16.mxu0 %v12869_v10  ;;  %v12954_v1 = vld [vmem:[#allocation46 + $0x540] ss:$16 sps:$4 sm:$0xff]   ;;  %v12962_v35 = vld [vmem:[#allocation46 + $0x524] ss:$16 sps:$4 sm:$0xff]  }
0x107d   :  { %v12960_v10 = vld [vmem:[#allocation46 + $0x520] ss:$16 sps:$4 sm:$0xff]   ;;  %v12968_v4 = vld [vmem:[#allocation46 + $0x504] ss:$16 sps:$4 sm:$0xff]  }
0x107e   :  { %v12972_v8 = vld [vmem:[#allocation46 + $0x8e0] ss:$16 sps:$4 sm:$0xff]  }
0x107f   :  { %9662 = vmatpush2.bf16.msra.mxu0 %v12867_v9 }
0x1080   :  { %9663 = vmatprep.subr.bf16.mxu0 %v12872_v27  ;;  %v15403_v27 = vpack.c.bf16 %v15333_v60, %v15333_v60  ;;  %v12986_v60 = vld [vmem:[#allocation46 + $0x8a4] ss:$16 sps:$4 sm:$0xff]  }
0x1083   :  { %9664 = vmatpush2.bf16.msra.mxu0 %v12870_v57 }
0x1084   :  { %9665 = vmatprep.subr.bf16.mxu0 %v12875_v50  ;;  %v12975_v50 = vld [vmem:[#allocation46 + $0x6e0] ss:$16 sps:$4 sm:$0xff]  }
0x1087   :  { %9666 = vmatpush2.bf16.msra.mxu0 %v12873_v17 }
0x1088   :  { %9717 = vmatprep.subr.bf16.mxu0 %v12878_v25 }
0x10be   :  { %v7476_v30 = vpop.f32.mrf.mxu0 }
0x10bf   :  { %v15390_v40 = vpack.c.bf16 %v7476_v30, %v7476_v30 }
0x10c0   :  { %v7478_v36 = vpop.f32.mrf.mxu0 }
0x10c1   :  { %v15392_v52 = vpack.c.bf16 %v7478_v36, %v7478_v36  ;;  %v12981_v36 = vld [vmem:[#allocation46 + $0x6c0] ss:$16 sps:$4 sm:$0xff]  }
0x10c3   :  { %9667 = vmatprep.mubr.bf16.mxu0 %v15392_v52 }
0x10c4   :  { %9668 = vmatmul.mubr.bf16.vlgmr.msra.gmra.mxu0 %v15390_v40 }
0x10c5   :  { %9718 = vmatpush1.bf16.msra.mxu0 %v12876_v41  ;;  %9749 = vmatprep.mubr.bf16.mxu0 %v15397_v43  ;;  %v12984_v41 = vld [vmem:[#allocation46 + $0x8a0] ss:$16 sps:$4 sm:$0xff]  }
0x10c6   :  { %9719 = vmatprep.subr.bf16.mxu0 %v12884_v44 }
0x10c9   :  { %9720 = vmatpush1.bf16.msra.mxu0 %v12882_v42  ;;  %v12989_v42 = vld [vmem:[#allocation46 + $0x6a4] ss:$16 sps:$4 sm:$0xff]  }
0x10ca   :  { %9721 = vmatprep.subr.bf16.mxu0 %v12890_v31  ;;  %v12992_v31 = vld [vmem:[#allocation46 + $0x884] ss:$16 sps:$4 sm:$0xff]  }
0x10cd   :  { %9722 = vmatpush1.bf16.msra.mxu0 %v12888_v29  ;;  %v12987_v29 = vld [vmem:[#allocation46 + $0x6a0] ss:$16 sps:$4 sm:$0xff]  }
0x10ce   :  { %9723 = vmatprep.subr.bf16.mxu0 %v12896_v39  ;;  %v12995_v39 = vld [vmem:[#allocation46 + $0x684] ss:$16 sps:$4 sm:$0xff]  }
0x10d1   :  { %9724 = vmatpush1.bf16.msra.mxu0 %v12894_v45  ;;  %v12998_v45 = vld [vmem:[#allocation46 + $0x864] ss:$16 sps:$4 sm:$0xff]  }
0x10d2   :  { %9725 = vmatprep.subr.bf16.mxu0 %v12902_v3  ;;  %v12993_v3 = vld [vmem:[#allocation46 + $0x680] ss:$16 sps:$4 sm:$0xff]  }
0x10d5   :  { %9726 = vmatpush1.bf16.msra.mxu0 %v12900_v11  ;;  %v12996_v11 = vld [vmem:[#allocation46 + $0x860] ss:$16 sps:$4 sm:$0xff]  }
0x10d6   :  { %9727 = vmatprep.subr.bf16.mxu0 %v12908_v58  ;;  %v13001_v58 = vld [vmem:[#allocation46 + $0x664] ss:$16 sps:$4 sm:$0xff]  }
0x10d9   :  { %9728 = vmatpush1.bf16.msra.mxu0 %v12906_v46  ;;  %v13004_v46 = vld [vmem:[#allocation46 + $0x844] ss:$16 sps:$4 sm:$0xff]  }
0x10da   :  { %9729 = vmatprep.subr.bf16.mxu0 %v12914_v26  ;;  %v12999_v26 = vld [vmem:[#allocation46 + $0x660] ss:$16 sps:$4 sm:$0xff]  }
0x10dd   :  { %9730 = vmatpush1.bf16.msra.mxu0 %v12912_v47  ;;  %v13002_v47 = vld [vmem:[#allocation46 + $0x840] ss:$16 sps:$4 sm:$0xff]  }
0x10de   :  { %9731 = vmatprep.subr.bf16.mxu0 %v12920_v53  ;;  %v13007_v53 = vld [vmem:[#allocation46 + $0x644] ss:$16 sps:$4 sm:$0xff]  }
0x10e1   :  { %9732 = vmatpush1.bf16.msra.mxu0 %v12918_v34  ;;  %v13010_v34 = vld [vmem:[#allocation46 + $0x824] ss:$16 sps:$4 sm:$0xff]  }
0x10e2   :  { %9733 = vmatprep.subr.bf16.mxu0 %v12926_v14  ;;  %v13005_v14 = vld [vmem:[#allocation46 + $0x640] ss:$16 sps:$4 sm:$0xff]  }
0x10e5   :  { %9734 = vmatpush2.bf16.msra.mxu0 %v12924_v23  ;;  %v13008_v23 = vld [vmem:[#allocation46 + $0x820] ss:$16 sps:$4 sm:$0xff]  }
0x10e6   :  { %9735 = vmatprep.subr.bf16.mxu0 %v12932_v55  ;;  %v13013_v55 = vld [vmem:[#allocation46 + $0x624] ss:$16 sps:$4 sm:$0xff]  }
0x10e9   :  { %9736 = vmatpush2.bf16.msra.mxu0 %v12930_v13  ;;  %v13016_v13 = vld [vmem:[#allocation46 + $0x804] ss:$16 sps:$4 sm:$0xff]  }
0x10ea   :  { %9737 = vmatprep.subr.bf16.mxu0 %v12938_v59  ;;  %v13011_v59 = vld [vmem:[#allocation46 + $0x620] ss:$16 sps:$4 sm:$0xff]  }
0x10ed   :  { %9738 = vmatpush2.bf16.msra.mxu0 %v12936_v51  ;;  %v13014_v51 = vld [vmem:[#allocation46 + $0x800] ss:$16 sps:$4 sm:$0xff]  }
0x10ee   :  { %9739 = vmatprep.subr.bf16.mxu0 %v12944_v38  ;;  %v13019_v38 = vld [vmem:[#allocation46 + $0x604] ss:$16 sps:$4 sm:$0xff]  }
0x10f1   :  { %9740 = vmatpush2.bf16.msra.mxu0 %v12942_v61  ;;  %v13022_v61 = vld [vmem:[#allocation46 + $0x9e4] ss:$16 sps:$4 sm:$0xff]  }
0x10f2   :  { %9741 = vmatprep.subr.bf16.mxu0 %v12950_v62  ;;  %v13017_v62 = vld [vmem:[#allocation46 + $0x600] ss:$16 sps:$4 sm:$0xff]  }
0x10f5   :  { %9742 = vmatpush2.bf16.msra.mxu0 %v12948_v56  ;;  %v13020_v56 = vld [vmem:[#allocation46 + $0x9e0] ss:$16 sps:$4 sm:$0xff]  }
0x10f6   :  { %9743 = vmatprep.subr.bf16.mxu0 %v12956_v0  ;;  %v13025_v0 = vld [vmem:[#allocation46 + $0x7e4] ss:$16 sps:$4 sm:$0xff]  }
0x10f9   :  { %9744 = vmatpush2.bf16.msra.mxu0 %v12954_v1  ;;  %v13028_v1 = vld [vmem:[#allocation46 + $0x9c4] ss:$16 sps:$4 sm:$0xff]  }
0x10fa   :  { %9745 = vmatprep.subr.bf16.mxu0 %v12962_v35  ;;  %v13023_v35 = vld [vmem:[#allocation46 + $0x7e0] ss:$16 sps:$4 sm:$0xff]  }
0x10fd   :  { %9746 = vmatpush2.bf16.msra.mxu0 %v12960_v10  ;;  %v13026_v10 = vld [vmem:[#allocation46 + $0x9c0] ss:$16 sps:$4 sm:$0xff]  }
0x10fe   :  { %9747 = vmatprep.subr.bf16.mxu0 %v12968_v4  ;;  %v13031_v4 = vld [vmem:[#allocation46 + $0x7c4] ss:$16 sps:$4 sm:$0xff]  }
0x1101   :  { %9748 = vmatpush2.bf16.msra.mxu0 %v12966_v5  ;;  %v13034_v5 = vld [vmem:[#allocation46 + $0x9a4] ss:$16 sps:$4 sm:$0xff]  }
0x1102   :  { %v7547_v9 = vpop.f32.mrf.mxu0  ;;  %9799 = vmatprep.subr.bf16.mxu0 %v12974_v28  ;;  %v13029_v28 = vld [vmem:[#allocation46 + $0x7c0] ss:$16 sps:$4 sm:$0xff]  }
0x1103   :  { %v15408_v17 = vpack.c.bf16 %v7547_v9, %v7547_v9  ;;  %v13037_v9 = vld [vmem:[#allocation46 + $0x7a4] ss:$16 sps:$4 sm:$0xff]  }
0x1104   :  { %9750 = vmatmul.mubr.bf16.vlgmr.msra.gmra.mxu0 %v15403_v27  ;;  %v7549_v21 = vpop.f32.mrf.mxu0 }
0x1105   :  { %v15406_v57 = vpack.c.bf16 %v7549_v21, %v7549_v21  ;;  %9800 = vmatpush1.bf16.msra.mxu0 %v12972_v8  ;;  %v13032_v8 = vld [vmem:[#allocation46 + $0x9a0] ss:$16 sps:$4 sm:$0xff]  }
0x1106   :  { %9801 = vmatprep.subr.bf16.mxu0 %v12980_v12  ;;  %v15410_v25 = vpop.f32.mrf.mxu0  ;;  %v13040_v12 = vld [vmem:[#allocation46 + $0x984] ss:$16 sps:$4 sm:$0xff]   ;;  %v13035_v21 = vld [vmem:[#allocation46 + $0x7a0] ss:$16 sps:$4 sm:$0xff]  }
0x1107   :  { %9708 = vmatprep.mubr.bf16.mxu1 %v15406_v57 }
0x1108   :  { %9709 = vmatmul.mubr.bf16.vlgmr.msra.gmra.mxu1 %v15408_v17  ;;  %v7629_v30 = vpop.f32.mrf.mxu0 }
0x1109   :  { %9759 = vmatpush1.bf16.msra.mxu1 %v12975_v50  ;;  %9802 = vmatpush1.bf16.msra.mxu0 %v12978_v32  ;;  %v15418_v44 = vpack.c.bf16 %v7629_v30, %v7629_v30  ;;  %v13038_v50 = vld [vmem:[#allocation46 + $0x980] ss:$16 sps:$4 sm:$0xff]   ;;  %v13043_v32 = vld [vmem:[#allocation46 + $0x784] ss:$16 sps:$4 sm:$0xff]  }
0x110a   :  { %9790 = vmatprep.mubr.bf16.mxu1 %v15416_v33  ;;  %9760 = vmatprep.subr.bf16.mxu1 %v12983_v20  ;;  %v13046_v20 = vld [vmem:[#allocation46 + $0x964] ss:$16 sps:$4 sm:$0xff]   ;;  %v13044_v30 = vld [vmem:[#allocation46 + $0x960] ss:$16 sps:$4 sm:$0xff]  }
0x110b   :  { %9803 = vmatprep.subr.bf16.mxu0 %v12986_v60  ;;  %9831 = vmatprep.mubr.bf16.mxu0 %v15418_v44  ;;  %v13041_v60 = vld [vmem:[#allocation46 + $0x780] ss:$16 sps:$4 sm:$0xff]  }
0x110d   :  { %9761 = vmatpush1.bf16.msra.mxu1 %v12981_v36  ;;  %9804 = vmatpush1.bf16.msra.mxu0 %v12984_v41  ;;  %v13049_v36 = vld [vmem:[#allocation46 + $0x764] ss:$16 sps:$4 sm:$0xff]  }
0x110e   :  { %9762 = vmatprep.subr.bf16.mxu1 %v12989_v42  ;;  %9805 = vmatprep.subr.bf16.mxu0 %v12992_v31  ;;  %v13052_v41 = vld [vmem:[#allocation46 + $0x944] ss:$16 sps:$4 sm:$0xff]   ;;  %v13047_v42 = vld [vmem:[#allocation46 + $0x760] ss:$16 sps:$4 sm:$0xff]  }
0x110f   :  { %v13050_v31 = vld [vmem:[#allocation46 + $0x940] ss:$16 sps:$4 sm:$0xff]  }
0x1111   :  { %9763 = vmatpush1.bf16.msra.mxu1 %v12987_v29  ;;  %9806 = vmatpush1.bf16.msra.mxu0 %v12990_v63  ;;  %v13055_v29 = vld [vmem:[#allocation46 + $0x744] ss:$16 sps:$4 sm:$0xff]  }
0x1112   :  { %9764 = vmatprep.subr.bf16.mxu1 %v12995_v39  ;;  %9807 = vmatprep.subr.bf16.mxu0 %v12998_v45  ;;  %v13058_v63 = vld [vmem:[#allocation46 + $0x924] ss:$16 sps:$4 sm:$0xff]   ;;  %v13053_v39 = vld [vmem:[#allocation46 + $0x740] ss:$16 sps:$4 sm:$0xff]  }
0x1113   :  { %v13056_v45 = vld [vmem:[#allocation46 + $0x920] ss:$16 sps:$4 sm:$0xff]  }
0x1115   :  { %9765 = vmatpush1.bf16.msra.mxu1 %v12993_v3  ;;  %9808 = vmatpush1.bf16.msra.mxu0 %v12996_v11  ;;  %v13061_v3 = vld [vmem:[#allocation46 + $0x724] ss:$16 sps:$4 sm:$0xff]  }
0x1116   :  { %9766 = vmatprep.subr.bf16.mxu1 %v13001_v58  ;;  %9809 = vmatprep.subr.bf16.mxu0 %v13004_v46  ;;  %v13064_v11 = vld [vmem:[#allocation46 + $0x904] ss:$16 sps:$4 sm:$0xff]   ;;  %v13059_v58 = vld [vmem:[#allocation46 + $0x720] ss:$16 sps:$4 sm:$0xff]  }
0x1117   :  { %v13062_v46 = vld [vmem:[#allocation46 + $0x900] ss:$16 sps:$4 sm:$0xff]  }
0x1119   :  { %9767 = vmatpush1.bf16.msra.mxu1 %v12999_v26  ;;  %9810 = vmatpush1.bf16.msra.mxu0 %v13002_v47  ;;  %v13067_v26 = vld [vmem:[#allocation46 + $0x704] ss:$16 sps:$4 sm:$0xff]   ;;  %v13070_v47 = vld [vmem:[#allocation46 + $0xec] ss:$16 sps:$4 sm:$0xff]  }
0x111a   :  { %9768 = vmatprep.subr.bf16.mxu1 %v13007_v53  ;;  %9811 = vmatprep.subr.bf16.mxu0 %v13010_v34  ;;  %v15424_v53 = vpack.c.bf16 %v15410_v25, %v15410_v25  ;;  %v15426_v34 = vpop.f32.mrf.mxu0  ;;  %v15432_v25 = vpack.c.bf16 %v15355_v54, %v15355_v54  ;;  %v13083_v54 = vld [vmem:[#allocation46 + $0xaa0] ss:$16 sps:$4 sm:$0xff]  }
0x111d   :  { %9769 = vmatpush1.bf16.msra.mxu1 %v13005_v14  ;;  %9812 = vmatpush1.bf16.msra.mxu0 %v13008_v23  ;;  %v13065_v14 = vld [vmem:[#allocation46 + $0x700] ss:$16 sps:$4 sm:$0xff]   ;;  %v13068_v23 = vld [vmem:[#allocation46 + $0xe8] ss:$16 sps:$4 sm:$0xff]  }
0x111e   :  { %9770 = vmatprep.subr.bf16.mxu1 %v13013_v55  ;;  %9813 = vmatprep.subr.bf16.mxu0 %v13016_v13  ;;  %v13073_v55 = vld [vmem:[#allocation46 + $0xae4] ss:$16 sps:$4 sm:$0xff]   ;;  %v13076_v13 = vld [vmem:[#allocation46 + $0xcc] ss:$16 sps:$4 sm:$0xff]  }
0x1121   :  { %9771 = vmatpush1.bf16.msra.mxu1 %v13011_v59  ;;  %9814 = vmatpush1.bf16.msra.mxu0 %v13014_v51  ;;  %v7700_v59 = vpop.f32.mrf.mxu0  ;;  %v13071_v51 = vld [vmem:[#allocation46 + $0xae0] ss:$16 sps:$4 sm:$0xff]  }
0x1122   :  { %9772 = vmatprep.subr.bf16.mxu1 %v13019_v38  ;;  %9815 = vmatprep.subr.bf16.mxu0 %v13022_v61  ;;  %v13074_v38 = vld [vmem:[#allocation46 + $0xc8] ss:$16 sps:$4 sm:$0xff]   ;;  %v13079_v61 = vld [vmem:[#allocation46 + $0xac4] ss:$16 sps:$4 sm:$0xff]  }
0x1125   :  { %9773 = vmatpush1.bf16.msra.mxu1 %v13017_v62  ;;  %9816 = vmatpush2.bf16.msra.mxu0 %v13020_v56  ;;  %v13082_v62 = vld [vmem:[#allocation46 + $0xac] ss:$16 sps:$4 sm:$0xff]   ;;  %v15434_v56 = vpack.c.bf16 %v7700_v59, %v7700_v59  ;;  %v13131_v59 = vld [vmem:[#allocation46 + $0xba0] ss:$16 sps:$4 sm:$0xff]  }
0x1126   :  { %9774 = vmatprep.subr.bf16.mxu1 %v13025_v0  ;;  %9817 = vmatprep.subr.bf16.mxu0 %v13028_v1  ;;  %v13077_v0 = vld [vmem:[#allocation46 + $0xac0] ss:$16 sps:$4 sm:$0xff]   ;;  %v13080_v1 = vld [vmem:[#allocation46 + $0xa8] ss:$16 sps:$4 sm:$0xff]  }
0x1129   :  { %9775 = vmatpush2.bf16.msra.mxu1 %v13023_v35  ;;  %9818 = vmatpush2.bf16.msra.mxu0 %v13026_v10  ;;  %v13085_v35 = vld [vmem:[#allocation46 + $0xaa4] ss:$16 sps:$4 sm:$0xff]   ;;  %v13086_v10 = vld [vmem:[#allocation46 + $0x88] ss:$16 sps:$4 sm:$0xff]  }
0x112a   :  { %9776 = vmatprep.subr.bf16.mxu1 %v13031_v4  ;;  %9819 = vmatprep.subr.bf16.mxu0 %v13034_v5  ;;  %v13091_v4 = vld [vmem:[#allocation46 + $0xa84] ss:$16 sps:$4 sm:$0xff]   ;;  %v13094_v5 = vld [vmem:[#allocation46 + $0x6c] ss:$16 sps:$4 sm:$0xff]  }
0x112d   :  { %9777 = vmatpush2.bf16.msra.mxu1 %v13029_v28  ;;  %9820 = vmatpush2.bf16.msra.mxu0 %v13032_v8  ;;  %v13089_v28 = vld [vmem:[#allocation46 + $0xa80] ss:$16 sps:$4 sm:$0xff]   ;;  %v13092_v8 = vld [vmem:[#allocation46 + $0x68] ss:$16 sps:$4 sm:$0xff]  }
0x112e   :  { %9778 = vmatprep.subr.bf16.mxu1 %v13037_v9  ;;  %9821 = vmatprep.subr.bf16.mxu0 %v13040_v12  ;;  %v13097_v9 = vld [vmem:[#allocation46 + $0xa64] ss:$16 sps:$4 sm:$0xff]   ;;  %v13100_v12 = vld [vmem:[#allocation46 + $0x4c] ss:$16 sps:$4 sm:$0xff]  }
0x1131   :  { %9779 = vmatpush2.bf16.msra.mxu1 %v13035_v21  ;;  %9822 = vmatpush2.bf16.msra.mxu0 %v13038_v50  ;;  %v13095_v21 = vld [vmem:[#allocation46 + $0xa60] ss:$16 sps:$4 sm:$0xff]   ;;  %v13098_v50 = vld [vmem:[#allocation46 + $0x48] ss:$16 sps:$4 sm:$0xff]  }
0x1132   :  { %9780 = vmatprep.subr.bf16.mxu1 %v13043_v32  ;;  %9823 = vmatprep.subr.bf16.mxu0 %v13046_v20  ;;  %v13103_v32 = vld [vmem:[#allocation46 + $0xa44] ss:$16 sps:$4 sm:$0xff]   ;;  %v13106_v20 = vld [vmem:[#allocation46 + $0x2c] ss:$16 sps:$4 sm:$0xff]  }
0x1135   :  { %9781 = vmatpush2.bf16.msra.mxu1 %v13041_v60  ;;  %9824 = vmatpush2.bf16.msra.mxu0 %v13044_v30  ;;  %v13101_v60 = vld [vmem:[#allocation46 + $0xa40] ss:$16 sps:$4 sm:$0xff]   ;;  %v13104_v30 = vld [vmem:[#allocation46 + $0x28] ss:$16 sps:$4 sm:$0xff]  }
0x1136   :  { %9782 = vmatprep.subr.bf16.mxu1 %v13049_v36  ;;  %9825 = vmatprep.subr.bf16.mxu0 %v13052_v41  ;;  %v13109_v36 = vld [vmem:[#allocation46 + $0xa24] ss:$16 sps:$4 sm:$0xff]   ;;  %v13112_v41 = vld [vmem:[#allocation46 + $0xc] ss:$16 sps:$4 sm:$0xff]  }
0x1139   :  { %9783 = vmatpush2.bf16.msra.mxu1 %v13047_v42  ;;  %9826 = vmatpush2.bf16.msra.mxu0 %v13050_v31  ;;  %v13107_v42 = vld [vmem:[#allocation46 + $0xa20] ss:$16 sps:$4 sm:$0xff]   ;;  %v13110_v31 = vld [vmem:[#allocation46 + $0x8] ss:$16 sps:$4 sm:$0xff]  }
0x113a   :  { %9784 = vmatprep.subr.bf16.mxu1 %v13055_v29  ;;  %9827 = vmatprep.subr.bf16.mxu0 %v13058_v63  ;;  %v13115_v29 = vld [vmem:[#allocation46 + $0xa04] ss:$16 sps:$4 sm:$0xff]   ;;  %v13118_v63 = vld [vmem:[#allocation46 + $0x1ec] ss:$16 sps:$4 sm:$0xff]  }
0x113d   :  { %9785 = vmatpush2.bf16.msra.mxu1 %v13053_v39  ;;  %9828 = vmatpush2.bf16.msra.mxu0 %v13056_v45  ;;  %v13113_v39 = vld [vmem:[#allocation46 + $0xa00] ss:$16 sps:$4 sm:$0xff]   ;;  %v13116_v45 = vld [vmem:[#allocation46 + $0x1e8] ss:$16 sps:$4 sm:$0xff]  }
0x113e   :  { %9786 = vmatprep.subr.bf16.mxu1 %v13061_v3  ;;  %9829 = vmatprep.subr.bf16.mxu0 %v13064_v11  ;;  %v13121_v3 = vld [vmem:[#allocation46 + $0xbe4] ss:$16 sps:$4 sm:$0xff]   ;;  %v13124_v11 = vld [vmem:[#allocation46 + $0x1cc] ss:$16 sps:$4 sm:$0xff]  }
0x1141   :  { %9787 = vmatpush2.bf16.msra.mxu1 %v13059_v58  ;;  %9830 = vmatpush2.bf16.msra.mxu0 %v13062_v46  ;;  %v13119_v58 = vld [vmem:[#allocation46 + $0xbe0] ss:$16 sps:$4 sm:$0xff]   ;;  %v13122_v46 = vld [vmem:[#allocation46 + $0x1c8] ss:$16 sps:$4 sm:$0xff]  }
0x1142   :  { %9788 = vmatprep.subr.bf16.mxu1 %v13067_v26  ;;  %9881 = vmatprep.subr.bf16.mxu0 %v13070_v47  ;;  %v13127_v26 = vld [vmem:[#allocation46 + $0xbc4] ss:$16 sps:$4 sm:$0xff]   ;;  %v13130_v47 = vld [vmem:[#allocation46 + $0x1ac] ss:$16 sps:$4 sm:$0xff]  }
0x1144   :  { %9832 = vmatmul.mubr.bf16.vlgmr.msra.gmra.mxu0 %v15424_v53 }
0x1145   :  { %9789 = vmatpush2.bf16.msra.mxu1 %v13065_v14  ;;  %9882 = vmatpush1.bf16.msra.mxu0 %v13068_v23  ;;  %v13125_v14 = vld [vmem:[#allocation46 + $0xbc0] ss:$16 sps:$4 sm:$0xff]   ;;  %v13128_v23 = vld [vmem:[#allocation46 + $0x1a8] ss:$16 sps:$4 sm:$0xff]  }
0x1146   :  { %9913 = vmatprep.mubr.bf16.mxu0 %v15392_v52  ;;  %9840 = vmatprep.subr.bf16.mxu1 %v13073_v55  ;;  %v13088_v52 = vld [vmem:[#allocation46 + $0x8c] ss:$16 sps:$4 sm:$0xff]   ;;  %v13133_v55 = vld [vmem:[#allocation46 + $0xba4] ss:$16 sps:$4 sm:$0xff]  }
0x1147   :  { %9883 = vmatprep.subr.bf16.mxu0 %v13076_v13  ;;  %v13136_v13 = vld [vmem:[#allocation46 + $0x18c] ss:$16 sps:$4 sm:$0xff]  }
0x1148   :  { %9791 = vmatmul.mubr.bf16.vlgmr.msra.gmra.mxu1 %v15432_v25 }
0x1149   :  { %9841 = vmatpush1.bf16.msra.mxu1 %v13071_v51  ;;  %9884 = vmatpush1.bf16.msra.mxu0 %v13074_v38  ;;  %v13134_v51 = vld [vmem:[#allocation46 + $0x188] ss:$16 sps:$4 sm:$0xff]   ;;  %v13139_v38 = vld [vmem:[#allocation46 + $0xb84] ss:$16 sps:$4 sm:$0xff]  }
0x114a   :  { %9842 = vmatprep.subr.bf16.mxu1 %v13079_v61  ;;  %9885 = vmatprep.subr.bf16.mxu0 %v13082_v62  ;;  %v13142_v61 = vld [vmem:[#allocation46 + $0x16c] ss:$16 sps:$4 sm:$0xff]   ;;  %v13137_v62 = vld [vmem:[#allocation46 + $0xb80] ss:$16 sps:$4 sm:$0xff]  }
0x114b   :  { %9872 = vmatprep.mubr.bf16.mxu1 %v15434_v56 }
0x114d   :  { %9843 = vmatpush1.bf16.msra.mxu1 %v13077_v0  ;;  %9886 = vmatpush1.bf16.msra.mxu0 %v13080_v1  ;;  %v13140_v0 = vld [vmem:[#allocation46 + $0x168] ss:$16 sps:$4 sm:$0xff]   ;;  %v13145_v1 = vld [vmem:[#allocation46 + $0xb64] ss:$16 sps:$4 sm:$0xff]  }
0x114e   :  { %9844 = vmatprep.subr.bf16.mxu1 %v13085_v35  ;;  %9887 = vmatprep.subr.bf16.mxu0 %v13088_v52  ;;  %v13148_v35 = vld [vmem:[#allocation46 + $0x14c] ss:$16 sps:$4 sm:$0xff]   ;;  %v13143_v52 = vld [vmem:[#allocation46 + $0xb60] ss:$16 sps:$4 sm:$0xff]  }
0x1151   :  { %9845 = vmatpush1.bf16.msra.mxu1 %v13083_v54  ;;  %9888 = vmatpush1.bf16.msra.mxu0 %v13086_v10  ;;  %v13146_v54 = vld [vmem:[#allocation46 + $0x148] ss:$16 sps:$4 sm:$0xff]   ;;  %v13151_v10 = vld [vmem:[#allocation46 + $0xb44] ss:$16 sps:$4 sm:$0xff]  }
0x1152   :  { %9846 = vmatprep.subr.bf16.mxu1 %v13091_v4  ;;  %9889 = vmatprep.subr.bf16.mxu0 %v13094_v5  ;;  %v13154_v4 = vld [vmem:[#allocation46 + $0x12c] ss:$16 sps:$4 sm:$0xff]   ;;  %v13149_v5 = vld [vmem:[#allocation46 + $0xb40] ss:$16 sps:$4 sm:$0xff]  }
0x1155   :  { %9847 = vmatpush1.bf16.msra.mxu1 %v13089_v28  ;;  %9890 = vmatpush1.bf16.msra.mxu0 %v13092_v8  ;;  %v13152_v28 = vld [vmem:[#allocation46 + $0x128] ss:$16 sps:$4 sm:$0xff]   ;;  %v13157_v8 = vld [vmem:[#allocation46 + $0xb24] ss:$16 sps:$4 sm:$0xff]  }
0x1156   :  { %9848 = vmatprep.subr.bf16.mxu1 %v13097_v9  ;;  %9891 = vmatprep.subr.bf16.mxu0 %v13100_v12  ;;  %v13160_v9 = vld [vmem:[#allocation46 + $0x10c] ss:$16 sps:$4 sm:$0xff]   ;;  %v13155_v12 = vld [vmem:[#allocation46 + $0xb20] ss:$16 sps:$4 sm:$0xff]  }
0x1159   :  { %9849 = vmatpush1.bf16.msra.mxu1 %v13095_v21  ;;  %9892 = vmatpush1.bf16.msra.mxu0 %v13098_v50  ;;  %v13158_v21 = vld [vmem:[#allocation46 + $0x108] ss:$16 sps:$4 sm:$0xff]   ;;  %v13163_v50 = vld [vmem:[#allocation46 + $0xb04] ss:$16 sps:$4 sm:$0xff]  }
0x115a   :  { %9850 = vmatprep.subr.bf16.mxu1 %v13103_v32  ;;  %9893 = vmatprep.subr.bf16.mxu0 %v13106_v20  ;;  %v13166_v32 = vld [vmem:[#allocation46 + $0x4ec] ss:$16 sps:$4 sm:$0xff]   ;;  %v13161_v20 = vld [vmem:[#allocation46 + $0xb00] ss:$16 sps:$4 sm:$0xff]  }
0x115d   :  { %9851 = vmatpush1.bf16.msra.mxu1 %v13101_v60  ;;  %9894 = vmatpush1.bf16.msra.mxu0 %v13104_v30  ;;  %v13164_v60 = vld [vmem:[#allocation46 + $0x4e8] ss:$16 sps:$4 sm:$0xff]   ;;  %v13169_v30 = vld [vmem:[#allocation46 + $0x2ec] ss:$16 sps:$4 sm:$0xff]  }
0x115e   :  { %9852 = vmatprep.subr.bf16.mxu1 %v13109_v36  ;;  %9895 = vmatprep.subr.bf16.mxu0 %v13112_v41  ;;  %v13172_v36 = vld [vmem:[#allocation46 + $0x4cc] ss:$16 sps:$4 sm:$0xff]  }
0x1161   :  { %9853 = vmatpush1.bf16.msra.mxu1 %v13107_v42  ;;  %9896 = vmatpush1.bf16.msra.mxu0 %v13110_v31  ;;  %v13167_v42 = vld [vmem:[#allocation46 + $0x2e8] ss:$16 sps:$4 sm:$0xff]   ;;  %v15443_v31 = vpack.c.bf16 %v15426_v34, %v15426_v34 }
0x1162   :  { %9854 = vmatprep.subr.bf16.mxu1 %v13115_v29  ;;  %9897 = vmatprep.subr.bf16.mxu0 %v13118_v63  ;;  %v13170_v29 = vld [vmem:[#allocation46 + $0x4c8] ss:$16 sps:$4 sm:$0xff]   ;;  %v13175_v63 = vld [vmem:[#allocation46 + $0x2cc] ss:$16 sps:$4 sm:$0xff]  }
0x1163   :  { %v13176_v34 = vld [vmem:[#allocation46 + $0x4a8] ss:$16 sps:$4 sm:$0xff]  }
0x1165   :  { %9855 = vmatpush1.bf16.msra.mxu1 %v13113_v39  ;;  %9898 = vmatpush2.bf16.msra.mxu0 %v13116_v45  ;;  %v13178_v45 = vld [vmem:[#allocation46 + $0x4ac] ss:$16 sps:$4 sm:$0xff]  }
0x1166   :  { %9856 = vmatprep.subr.bf16.mxu1 %v13121_v3  ;;  %9899 = vmatprep.subr.bf16.mxu0 %v13124_v11  ;;  %v13173_v3 = vld [vmem:[#allocation46 + $0x2c8] ss:$16 sps:$4 sm:$0xff]   ;;  %v13181_v11 = vld [vmem:[#allocation46 + $0x2ac] ss:$16 sps:$4 sm:$0xff]  }
0x1169   :  { %9857 = vmatpush2.bf16.msra.mxu1 %v13119_v58  ;;  %9900 = vmatpush2.bf16.msra.mxu0 %v13122_v46  ;;  %v13179_v46 = vld [vmem:[#allocation46 + $0x2a8] ss:$16 sps:$4 sm:$0xff]  }
0x116a   :  { %9858 = vmatprep.subr.bf16.mxu1 %v13127_v26  ;;  %9901 = vmatprep.subr.bf16.mxu0 %v13130_v47  ;;  %v13182_v26 = vld [vmem:[#allocation46 + $0x488] ss:$16 sps:$4 sm:$0xff]   ;;  %v13187_v47 = vld [vmem:[#allocation46 + $0x28c] ss:$16 sps:$4 sm:$0xff]  }
0x116d   :  { %9859 = vmatpush2.bf16.msra.mxu1 %v13125_v14  ;;  %9902 = vmatpush2.bf16.msra.mxu0 %v13128_v23  ;;  %v13190_v14 = vld [vmem:[#allocation46 + $0x46c] ss:$16 sps:$4 sm:$0xff]   ;;  %v13185_v23 = vld [vmem:[#allocation46 + $0x288] ss:$16 sps:$4 sm:$0xff]  }
0x116e   :  { %9860 = vmatprep.subr.bf16.mxu1 %v13133_v55  ;;  %9903 = vmatprep.subr.bf16.mxu0 %v13136_v13  ;;  %v13193_v55 = vld [vmem:[#allocation46 + $0x26c] ss:$16 sps:$4 sm:$0xff]  }
0x116f   :  { %v13196_v13 = vld [vmem:[#allocation46 + $0x44c] ss:$16 sps:$4 sm:$0xff]  }
0x1171   :  { %9861 = vmatpush2.bf16.msra.mxu1 %v13131_v59  ;;  %9904 = vmatpush2.bf16.msra.mxu0 %v13134_v51  ;;  %v13191_v59 = vld [vmem:[#allocation46 + $0x268] ss:$16 sps:$4 sm:$0xff]  }
0x1172   :  { %9862 = vmatprep.subr.bf16.mxu1 %v13139_v38  ;;  %9905 = vmatprep.subr.bf16.mxu0 %v13142_v61  ;;  %v13194_v51 = vld [vmem:[#allocation46 + $0x448] ss:$16 sps:$4 sm:$0xff]   ;;  %v13199_v38 = vld [vmem:[#allocation46 + $0x24c] ss:$16 sps:$4 sm:$0xff]  }
0x1173   :  { %v13202_v61 = vld [vmem:[#allocation46 + $0x42c] ss:$16 sps:$4 sm:$0xff]  }
0x1175   :  { %9863 = vmatpush2.bf16.msra.mxu1 %v13137_v62  ;;  %9906 = vmatpush2.bf16.msra.mxu0 %v13140_v0  ;;  %v13197_v62 = vld [vmem:[#allocation46 + $0x248] ss:$16 sps:$4 sm:$0xff]  }
0x1176   :  { %9864 = vmatprep.subr.bf16.mxu1 %v13145_v1  ;;  %9907 = vmatprep.subr.bf16.mxu0 %v13148_v35  ;;  %v13200_v0 = vld [vmem:[#allocation46 + $0x428] ss:$16 sps:$4 sm:$0xff]   ;;  %v13205_v1 = vld [vmem:[#allocation46 + $0x22c] ss:$16 sps:$4 sm:$0xff]  }
0x1177   :  { %v13208_v35 = vld [vmem:[#allocation46 + $0x40c] ss:$16 sps:$4 sm:$0xff]  }
0x1179   :  { %9865 = vmatpush2.bf16.msra.mxu1 %v13143_v52  ;;  %9908 = vmatpush2.bf16.msra.mxu0 %v13146_v54  ;;  %v13203_v52 = vld [vmem:[#allocation46 + $0x228] ss:$16 sps:$4 sm:$0xff]  }
0x117a   :  { %9866 = vmatprep.subr.bf16.mxu1 %v13151_v10  ;;  %9909 = vmatprep.subr.bf16.mxu0 %v13154_v4  ;;  %v13206_v54 = vld [vmem:[#allocation46 + $0x408] ss:$16 sps:$4 sm:$0xff]   ;;  %v13211_v10 = vld [vmem:[#allocation46 + $0x20c] ss:$16 sps:$4 sm:$0xff]  }
0x117b   :  { %v13214_v4 = vld [vmem:[#allocation46 + $0x5ec] ss:$16 sps:$4 sm:$0xff]  }
0x117d   :  { %9867 = vmatpush2.bf16.msra.mxu1 %v13149_v5  ;;  %9910 = vmatpush2.bf16.msra.mxu0 %v13152_v28  ;;  %v13209_v5 = vld [vmem:[#allocation46 + $0x208] ss:$16 sps:$4 sm:$0xff]  }
0x117e   :  { %9868 = vmatprep.subr.bf16.mxu1 %v13157_v8  ;;  %9911 = vmatprep.subr.bf16.mxu0 %v13160_v9  ;;  %v13212_v28 = vld [vmem:[#allocation46 + $0x5e8] ss:$16 sps:$4 sm:$0xff]   ;;  %v13217_v8 = vld [vmem:[#allocation46 + $0x3ec] ss:$16 sps:$4 sm:$0xff]  }
0x117f   :  { %v13220_v9 = vld [vmem:[#allocation46 + $0x5cc] ss:$16 sps:$4 sm:$0xff]  }
0x1181   :  { %9869 = vmatpush2.bf16.msra.mxu1 %v13155_v12  ;;  %9912 = vmatpush2.bf16.msra.mxu0 %v13158_v21  ;;  %v13215_v12 = vld [vmem:[#allocation46 + $0x3e8] ss:$16 sps:$4 sm:$0xff]  }
0x1182   :  { %9870 = vmatprep.subr.bf16.mxu1 %v13163_v50  ;;  %9963 = vmatprep.subr.bf16.mxu0 %v13166_v32  ;;  %v13218_v21 = vld [vmem:[#allocation46 + $0x5c8] ss:$16 sps:$4 sm:$0xff]   ;;  %v13223_v50 = vld [vmem:[#allocation46 + $0x3cc] ss:$16 sps:$4 sm:$0xff]  }
0x1183   :  { %v13226_v32 = vld [vmem:[#allocation46 + $0x5ac] ss:$16 sps:$4 sm:$0xff]  }
0x1184   :  { %9914 = vmatmul.mubr.bf16.vlgmr.msra.gmra.mxu0 %v15390_v40  ;;  %v15439_v41 = vpop.f32.mrf.mxu0 }
0x1185   :  { %9871 = vmatpush2.bf16.msra.mxu1 %v13161_v20  ;;  %9964 = vmatpush1.bf16.msra.mxu0 %v13164_v60  ;;  %v13221_v20 = vld [vmem:[#allocation46 + $0x3c8] ss:$16 sps:$4 sm:$0xff]  }
0x1186   :  { %9995 = vmatprep.mubr.bf16.mxu0 %v15397_v43  ;;  %9922 = vmatprep.subr.bf16.mxu1 %v13169_v30  ;;  %v15446_v39 = vpop.f32.mrf.mxu0  ;;  %v13184_v43 = vld [vmem:[#allocation46 + $0x48c] ss:$16 sps:$4 sm:$0xff]   ;;  %v13224_v60 = vld [vmem:[#allocation46 + $0x5a8] ss:$16 sps:$4 sm:$0xff]  }
0x1187   :  { %9965 = vmatprep.subr.bf16.mxu0 %v13172_v36  ;;  %v13229_v30 = vld [vmem:[#allocation46 + $0x3ac] ss:$16 sps:$4 sm:$0xff]  }
0x1188   :  { %9873 = vmatmul.mubr.bf16.vlgmr.msra.gmra.mxu1 %v15443_v31  ;;  %v9673_v40 = vpop.f32.mrf.mxu0  ;;  %v13232_v36 = vld [vmem:[#allocation46 + $0x58c] ss:$16 sps:$4 sm:$0xff]  }
0x1189   :  { %9923 = vmatpush1.bf16.msra.mxu1 %v13167_v42  ;;  %9954 = vmatprep.mubr.bf16.mxu1 %v15406_v57  ;;  %v13188_v57 = vld [vmem:[#allocation46 + $0x468] ss:$16 sps:$4 sm:$0xff]  }
0x118a   :  { %9966 = vmatpush1.bf16.msra.mxu0 %v13170_v29  ;;  %9924 = vmatprep.subr.bf16.mxu1 %v13175_v63  ;;  %v9674_v58 = vpop.f32.mrf.mxu0  ;;  %v13227_v42 = vld [vmem:[#allocation46 + $0x3a8] ss:$16 sps:$4 sm:$0xff]   ;;  %v13235_v63 = vld [vmem:[#allocation46 + $0x38c] ss:$16 sps:$4 sm:$0xff]  }
0x118b   :  { %9967 = vmatprep.subr.bf16.mxu0 %v13178_v45  ;;  %v13230_v29 = vld [vmem:[#allocation46 + $0x588] ss:$16 sps:$4 sm:$0xff]   ;;  %v13238_v45 = vld [vmem:[#allocation46 + $0x56c] ss:$16 sps:$4 sm:$0xff]  }
0x118c   :  { %v13233_v40 = vld [vmem:[#allocation46 + $0x388] ss:$16 sps:$4 sm:$0xff]  }
0x118d   :  { %9925 = vmatpush1.bf16.msra.mxu1 %v13173_v3  ;;  %v13236_v3 = vld [vmem:[#allocation46 + $0x568] ss:$16 sps:$4 sm:$0xff]  }
0x118e   :  { %9968 = vmatpush1.bf16.msra.mxu0 %v13176_v34  ;;  %9926 = vmatprep.subr.bf16.mxu1 %v13181_v11  ;;  %v13241_v34 = vld [vmem:[#allocation46 + $0x36c] ss:$16 sps:$4 sm:$0xff]   ;;  %v13239_v58 = vld [vmem:[#allocation46 + $0x368] ss:$16 sps:$4 sm:$0xff]  }
0x118f   :  { %9969 = vmatprep.subr.bf16.mxu0 %v13184_v43  ;;  %v13244_v11 = vld [vmem:[#allocation46 + $0x54c] ss:$16 sps:$4 sm:$0xff]   ;;  %v13242_v43 = vld [vmem:[#allocation46 + $0x548] ss:$16 sps:$4 sm:$0xff]  }
0x1191   :  { %9927 = vmatpush1.bf16.msra.mxu1 %v13179_v46  ;;  %v13247_v46 = vld [vmem:[#allocation46 + $0x34c] ss:$16 sps:$4 sm:$0xff]  }
0x1192   :  { %9970 = vmatpush1.bf16.msra.mxu0 %v13182_v26  ;;  %9928 = vmatprep.subr.bf16.mxu1 %v13187_v47  ;;  %v13250_v26 = vld [vmem:[#allocation46 + $0x52c] ss:$16 sps:$4 sm:$0xff]   ;;  %v13245_v47 = vld [vmem:[#allocation46 + $0x348] ss:$16 sps:$4 sm:$0xff]  }
0x1193   :  { %9971 = vmatprep.subr.bf16.mxu0 %v13190_v14  ;;  %v13248_v14 = vld [vmem:[#allocation46 + $0x528] ss:$16 sps:$4 sm:$0xff]  }
0x1195   :  { %9929 = vmatpush1.bf16.msra.mxu1 %v13185_v23  ;;  %v13253_v23 = vld [vmem:[#allocation46 + $0x32c] ss:$16 sps:$4 sm:$0xff]  }
0x1196   :  { %9972 = vmatpush1.bf16.msra.mxu0 %v13188_v57  ;;  %9930 = vmatprep.subr.bf16.mxu1 %v13193_v55  ;;  %v13256_v57 = vld [vmem:[#allocation46 + $0x50c] ss:$16 sps:$4 sm:$0xff]   ;;  %v13251_v55 = vld [vmem:[#allocation46 + $0x328] ss:$16 sps:$4 sm:$0xff]  }
0x1197   :  { %9973 = vmatprep.subr.bf16.mxu0 %v13196_v13  ;;  %v13254_v13 = vld [vmem:[#allocation46 + $0x508] ss:$16 sps:$4 sm:$0xff]  }
0x1199   :  { %9931 = vmatpush1.bf16.msra.mxu1 %v13191_v59  ;;  %v13259_v59 = vld [vmem:[#allocation46 + $0x30c] ss:$16 sps:$4 sm:$0xff]  }
0x119a   :  { %9974 = vmatpush1.bf16.msra.mxu0 %v13194_v51  ;;  %9932 = vmatprep.subr.bf16.mxu1 %v13199_v38  ;;  %v13262_v51 = vld [vmem:[#allocation46 + $0x8ec] ss:$16 sps:$4 sm:$0xff]   ;;  %v13257_v38 = vld [vmem:[#allocation46 + $0x308] ss:$16 sps:$4 sm:$0xff]  }
0x119b   :  { %9975 = vmatprep.subr.bf16.mxu0 %v13202_v61  ;;  %v13260_v61 = vld [vmem:[#allocation46 + $0x8e8] ss:$16 sps:$4 sm:$0xff]  }
0x119d   :  { %9933 = vmatpush1.bf16.msra.mxu1 %v13197_v62  ;;  %v13265_v62 = vld [vmem:[#allocation46 + $0x6ec] ss:$16 sps:$4 sm:$0xff]  }
0x119e   :  { %9976 = vmatpush1.bf16.msra.mxu0 %v13200_v0  ;;  %9934 = vmatprep.subr.bf16.mxu1 %v13205_v1  ;;  %v13268_v0 = vld [vmem:[#allocation46 + $0x8cc] ss:$16 sps:$4 sm:$0xff]  }
0x119f   :  { %9977 = vmatprep.subr.bf16.mxu0 %v13208_v35  ;;  %v13263_v35 = vld [vmem:[#allocation46 + $0x6e8] ss:$16 sps:$4 sm:$0xff]  }
0x11a1   :  { %9935 = vmatpush1.bf16.msra.mxu1 %v13203_v52 }
0x11a2   :  { %9978 = vmatpush1.bf16.msra.mxu0 %v13206_v54  ;;  %9936 = vmatprep.subr.bf16.mxu1 %v13211_v10  ;;  %v13266_v54 = vld [vmem:[#allocation46 + $0x8c8] ss:$16 sps:$4 sm:$0xff]   ;;  %v13271_v10 = vld [vmem:[#allocation46 + $0x6cc] ss:$16 sps:$4 sm:$0xff]  }
0x11a3   :  { %9979 = vmatprep.subr.bf16.mxu0 %v13214_v4  ;;  %v13274_v4 = vld [vmem:[#allocation46 + $0x8ac] ss:$16 sps:$4 sm:$0xff]  }
0x11a5   :  { %9937 = vmatpush1.bf16.msra.mxu1 %v13209_v5 }
0x11a6   :  { %9980 = vmatpush2.bf16.msra.mxu0 %v13212_v28  ;;  %9938 = vmatprep.subr.bf16.mxu1 %v13217_v8 }
0x11a7   :  { %9981 = vmatprep.subr.bf16.mxu0 %v13220_v9 }
0x11a9   :  { %9939 = vmatpush2.bf16.msra.mxu1 %v13215_v12 }
0x11aa   :  { %9982 = vmatpush2.bf16.msra.mxu0 %v13218_v21  ;;  %9940 = vmatprep.subr.bf16.mxu1 %v13223_v50  ;;  %v13277_v21 = vld [vmem:[#allocation46 + $0x6ac] ss:$16 sps:$4 sm:$0xff]  }
0x11ab   :  { %9983 = vmatprep.subr.bf16.mxu0 %v13226_v32  ;;  %v13280_v32 = vld [vmem:[#allocation46 + $0x88c] ss:$16 sps:$4 sm:$0xff]  }
0x11ad   :  { %9941 = vmatpush2.bf16.msra.mxu1 %v13221_v20 }
0x11ae   :  { %9984 = vmatpush2.bf16.msra.mxu0 %v13224_v60  ;;  %9942 = vmatprep.subr.bf16.mxu1 %v13229_v30  ;;  %v13275_v60 = vld [vmem:[#allocation46 + $0x6a8] ss:$16 sps:$4 sm:$0xff]  }
0x11af   :  { %9985 = vmatprep.subr.bf16.mxu0 %v13232_v36  ;;  %v13278_v30 = vld [vmem:[#allocation46 + $0x888] ss:$16 sps:$4 sm:$0xff]   ;;  %v13283_v36 = vld [vmem:[#allocation46 + $0x68c] ss:$16 sps:$4 sm:$0xff]  }
0x11b1   :  { %9943 = vmatpush2.bf16.msra.mxu1 %v13227_v42  ;;  %v13286_v42 = vld [vmem:[#allocation46 + $0x86c] ss:$16 sps:$4 sm:$0xff]  }
0x11b2   :  { %9986 = vmatpush2.bf16.msra.mxu0 %v13230_v29  ;;  %9944 = vmatprep.subr.bf16.mxu1 %v13235_v63  ;;  %v13281_v29 = vld [vmem:[#allocation46 + $0x688] ss:$16 sps:$4 sm:$0xff]   ;;  %v13289_v63 = vld [vmem:[#allocation46 + $0x66c] ss:$16 sps:$4 sm:$0xff]  }
0x11b3   :  { %9987 = vmatprep.subr.bf16.mxu0 %v13238_v45  ;;  %v13292_v45 = vld [vmem:[#allocation46 + $0x84c] ss:$16 sps:$4 sm:$0xff]  }
0x11b5   :  { %9945 = vmatpush2.bf16.msra.mxu1 %v13233_v40  ;;  %v13287_v40 = vld [vmem:[#allocation46 + $0x668] ss:$16 sps:$4 sm:$0xff]  }
0x11b6   :  { %9988 = vmatpush2.bf16.msra.mxu0 %v13236_v3  ;;  %9946 = vmatprep.subr.bf16.mxu1 %v13241_v34  ;;  %v13290_v3 = vld [vmem:[#allocation46 + $0x848] ss:$16 sps:$4 sm:$0xff]   ;;  %v13295_v34 = vld [vmem:[#allocation46 + $0x64c] ss:$16 sps:$4 sm:$0xff]  }
0x11b7   :  { %9989 = vmatprep.subr.bf16.mxu0 %v13244_v11  ;;  %v13298_v11 = vld [vmem:[#allocation46 + $0x82c] ss:$16 sps:$4 sm:$0xff]  }
0x11b9   :  { %9947 = vmatpush2.bf16.msra.mxu1 %v13239_v58  ;;  %v13293_v58 = vld [vmem:[#allocation46 + $0x648] ss:$16 sps:$4 sm:$0xff]  }
0x11ba   :  { %9990 = vmatpush2.bf16.msra.mxu0 %v13242_v43  ;;  %9948 = vmatprep.subr.bf16.mxu1 %v13247_v46  ;;  %v13296_v43 = vld [vmem:[#allocation46 + $0x828] ss:$16 sps:$4 sm:$0xff]   ;;  %v13301_v46 = vld [vmem:[#allocation46 + $0x62c] ss:$16 sps:$4 sm:$0xff]  }
0x11bb   :  { %9991 = vmatprep.subr.bf16.mxu0 %v13250_v26  ;;  %v13304_v26 = vld [vmem:[#allocation46 + $0x80c] ss:$16 sps:$4 sm:$0xff]  }
0x11bd   :  { %9949 = vmatpush2.bf16.msra.mxu1 %v13245_v47  ;;  %v13299_v47 = vld [vmem:[#allocation46 + $0x628] ss:$16 sps:$4 sm:$0xff]  }
0x11be   :  { %9992 = vmatpush2.bf16.msra.mxu0 %v13248_v14  ;;  %9950 = vmatprep.subr.bf16.mxu1 %v13253_v23  ;;  %v13302_v14 = vld [vmem:[#allocation46 + $0x808] ss:$16 sps:$4 sm:$0xff]   ;;  %v13307_v23 = vld [vmem:[#allocation46 + $0x60c] ss:$16 sps:$4 sm:$0xff]  }
0x11bf   :  { %9993 = vmatprep.subr.bf16.mxu0 %v13256_v57  ;;  %v13310_v57 = vld [vmem:[#allocation46 + $0x9ec] ss:$16 sps:$4 sm:$0xff]  }
0x11c1   :  { %9951 = vmatpush2.bf16.msra.mxu1 %v13251_v55  ;;  %v13305_v55 = vld [vmem:[#allocation46 + $0x608] ss:$16 sps:$4 sm:$0xff]  }
0x11c2   :  { %9994 = vmatpush2.bf16.msra.mxu0 %v13254_v13  ;;  %9952 = vmatprep.subr.bf16.mxu1 %v13259_v59  ;;  %v13308_v13 = vld [vmem:[#allocation46 + $0x9e8] ss:$16 sps:$4 sm:$0xff]   ;;  %v13313_v59 = vld [vmem:[#allocation46 + $0x7ec] ss:$16 sps:$4 sm:$0xff]  }
0x11c3   :  { %10045 = vmatprep.subr.bf16.mxu0 %v13262_v51  ;;  %v13316_v51 = vld [vmem:[#allocation46 + $0x9cc] ss:$16 sps:$4 sm:$0xff]  }
0x11c4   :  { %v9751_v1 = vpop.f32.mrf.mxu0 }
0x11c5   :  { %9996 = vmatmul.mubr.bf16.vlgmr.msra.gmra.mxu0 %v15403_v27  ;;  %9953 = vmatpush2.bf16.msra.mxu1 %v13257_v38  ;;  %v13269_v27 = vld [vmem:[#allocation46 + $0x6c8] ss:$16 sps:$4 sm:$0xff]  }
0x11c6   :  { %10046 = vmatpush1.bf16.msra.mxu0 %v13260_v61  ;;  %10077 = vmatprep.mubr.bf16.mxu0 %v15418_v44  ;;  %v9753_v52 = vpop.f32.mrf.mxu0  ;;  %v13272_v44 = vld [vmem:[#allocation46 + $0x8a8] ss:$16 sps:$4 sm:$0xff]  }
0x11c7   :  { %10004 = vmatprep.subr.bf16.mxu1 %v13265_v62  ;;  %10047 = vmatprep.subr.bf16.mxu0 %v13268_v0  ;;  %v13311_v38 = vld [vmem:[#allocation46 + $0x7e8] ss:$16 sps:$4 sm:$0xff]   ;;  %v13319_v62 = vld [vmem:[#allocation46 + $0x7cc] ss:$16 sps:$4 sm:$0xff]  }
0x11c8   :  { %v9755_v5 = vpop.f32.mrf.mxu0  ;;  %9955 = vmatmul.mubr.bf16.vlgmr.msra.gmra.mxu1 %v15408_v17  ;;  %v9710_v28 = vpop.f32.mrf.mxu1  ;;  %v13314_v61 = vld [vmem:[#allocation46 + $0x9c8] ss:$16 sps:$4 sm:$0xff]   ;;  %v13322_v0 = vld [vmem:[#allocation46 + $0x9ac] ss:$16 sps:$4 sm:$0xff]  }
0x11c9   :  { %v9711_v8 = vadd.f32 %v9710_v28, %v15439_v41  ;;  %10005 = vmatpush1.bf16.msra.mxu1 %v13263_v35  ;;  %10036 = vmatprep.mubr.bf16.mxu1 %v15416_v33  ;;  %v13320_v35 = vld [vmem:[#allocation46 + $0x9a8] ss:$16 sps:$4 sm:$0xff]   ;;  %v13331_v5 = vld [vmem:[#allocation46 + $0x78c] ss:$16 sps:$4 sm:$0xff]  }
0x11ca   :  { %10048 = vmatpush1.bf16.msra.mxu0 %v13266_v54  ;;  %v9756_v9 = vpop.f32.mrf.mxu0  ;;  %v9712_v12 = vpop.f32.mrf.mxu1  ;;  %10006 = vmatprep.subr.bf16.mxu1 %v13271_v10  ;;  %v13328_v54 = vld [vmem:[#allocation46 + $0x98c] ss:$16 sps:$4 sm:$0xff]   ;;  %v13323_v10 = vld [vmem:[#allocation46 + $0x7a8] ss:$16 sps:$4 sm:$0xff]  }
0x11cb   :  { %v9713_v50 = vadd.f32 %v9712_v12, %v15446_v39  ;;  %10049 = vmatprep.subr.bf16.mxu0 %v13274_v4  ;;  %v15456_v20 = vadd.f32 %v9751_v1, %v9711_v8  ;;  %v13284_v39 = vld [vmem:[#allocation46 + $0x868] ss:$16 sps:$4 sm:$0xff]   ;;  %v13334_v28 = vld [vmem:[#allocation46 + $0x96c] ss:$16 sps:$4 sm:$0xff]  }
0x11cc   :  { %v9714_v17 = vpop.f32.mrf.mxu1  ;;  %v13317_v1 = vld [vmem:[#allocation46 + $0x7c8] ss:$16 sps:$4 sm:$0xff]   ;;  %v13337_v9 = vld [vmem:[#allocation46 + $0x76c] ss:$16 sps:$4 sm:$0xff]  }
0x11cd   :  { %10007 = vmatpush1.bf16.msra.mxu1 %v13269_v27  ;;  %v15458_v41 = vadd.f32 %v9753_v52, %v9713_v50  ;;  %v13325_v52 = vld [vmem:[#allocation46 + $0x7ac] ss:$16 sps:$4 sm:$0xff]   ;;  %v13326_v4 = vld [vmem:[#allocation46 + $0x988] ss:$16 sps:$4 sm:$0xff]  }
0x11ce   :  { %10050 = vmatpush1.bf16.msra.mxu0 %v13272_v44  ;;  %v9715_v33 = vpop.f32.mrf.mxu1  ;;  %10008 = vmatprep.subr.bf16.mxu1 %v13277_v21  ;;  %v13329_v8 = vld [vmem:[#allocation46 + $0x788] ss:$16 sps:$4 sm:$0xff]   ;;  %v13340_v12 = vld [vmem:[#allocation46 + $0x94c] ss:$16 sps:$4 sm:$0xff]  }
0x11cf   :  { %10051 = vmatprep.subr.bf16.mxu0 %v13280_v32  ;;  %v13332_v27 = vld [vmem:[#allocation46 + $0x968] ss:$16 sps:$4 sm:$0xff]   ;;  %v13343_v50 = vld [vmem:[#allocation46 + $0x74c] ss:$16 sps:$4 sm:$0xff]  }
0x11d0   :  { %v13335_v44 = vld [vmem:[#allocation46 + $0x768] ss:$16 sps:$4 sm:$0xff]   ;;  %v13346_v32 = vld [vmem:[#allocation46 + $0x92c] ss:$16 sps:$4 sm:$0xff]  }
0x11d1   :  { %10009 = vmatpush1.bf16.msra.mxu1 %v13275_v60  ;;  %v13338_v21 = vld [vmem:[#allocation46 + $0x948] ss:$16 sps:$4 sm:$0xff]   ;;  %v13349_v33 = vld [vmem:[#allocation46 + $0x72c] ss:$16 sps:$4 sm:$0xff]  }
0x11d2   :  { %10052 = vmatpush1.bf16.msra.mxu0 %v13278_v30  ;;  %10010 = vmatprep.subr.bf16.mxu1 %v13283_v36  ;;  %v13341_v17 = vld [vmem:[#allocation46 + $0x748] ss:$16 sps:$4 sm:$0xff]   ;;  %v13352_v30 = vld [vmem:[#allocation46 + $0x90c] ss:$16 sps:$4 sm:$0xff]  }
0x11d3   :  { %10053 = vmatprep.subr.bf16.mxu0 %v13286_v42  ;;  %v13344_v60 = vld [vmem:[#allocation46 + $0x928] ss:$16 sps:$4 sm:$0xff]  }
0x11d4   :  { %v13347_v36 = vld [vmem:[#allocation46 + $0x728] ss:$16 sps:$4 sm:$0xff]  }
0x11d5   :  { %10011 = vmatpush1.bf16.msra.mxu1 %v13281_v29  ;;  %v13350_v42 = vld [vmem:[#allocation46 + $0x908] ss:$16 sps:$4 sm:$0xff]   ;;  %v13355_v29 = vld [vmem:[#allocation46 + $0x70c] ss:$16 sps:$4 sm:$0xff]  }
0x11d6   :  { %10054 = vmatpush1.bf16.msra.mxu0 %v13284_v39  ;;  %10012 = vmatprep.subr.bf16.mxu1 %v13289_v63  ;;  %v13353_v39 = vld [vmem:[#allocation46 + $0x708] ss:$16 sps:$4 sm:$0xff]   ;;  %v13358_v63 = vld [vmem:[#allocation46 + $0xaec] ss:$16 sps:$4 sm:$0xff]  }
0x11d7   :  { %10055 = vmatprep.subr.bf16.mxu0 %v13292_v45 }
0x11d9   :  { %10013 = vmatpush1.bf16.msra.mxu1 %v13287_v40  ;;  %v13356_v40 = vld [vmem:[#allocation46 + $0xae8] ss:$16 sps:$4 sm:$0xff]  }
0x11da   :  { %10056 = vmatpush1.bf16.msra.mxu0 %v13290_v3  ;;  %10014 = vmatprep.subr.bf16.mxu1 %v13295_v34  ;;  %v13361_v34 = vld [vmem:[#allocation46 + $0xacc] ss:$16 sps:$4 sm:$0xff]  }
0x11db   :  { %10057 = vmatprep.subr.bf16.mxu0 %v13298_v11 }
0x11dd   :  { %10015 = vmatpush1.bf16.msra.mxu1 %v13293_v58 }
0x11de   :  { %10058 = vmatpush1.bf16.msra.mxu0 %v13296_v43  ;;  %10016 = vmatprep.subr.bf16.mxu1 %v13301_v46  ;;  %v13359_v46 = vld [vmem:[#allocation46 + $0xac8] ss:$16 sps:$4 sm:$0xff]  }
0x11df   :  { %10059 = vmatprep.subr.bf16.mxu0 %v13304_v26 }
0x11e1   :  { %10017 = vmatpush1.bf16.msra.mxu1 %v13299_v47 }
0x11e2   :  { %10060 = vmatpush1.bf16.msra.mxu0 %v13302_v14  ;;  %10018 = vmatprep.subr.bf16.mxu1 %v13307_v23 }
0x11e3   :  { %10061 = vmatprep.subr.bf16.mxu0 %v13310_v57 }
0x11e5   :  { %10019 = vmatpush1.bf16.msra.mxu1 %v13305_v55 }
0x11e6   :  { %10062 = vmatpush2.bf16.msra.mxu0 %v13308_v13  ;;  %10020 = vmatprep.subr.bf16.mxu1 %v13313_v59  ;;  %v13365_v59 = vld [vmem:[#allocation46 + $0xa88] ss:$16 sps:$4 sm:$0xff]  }
0x11e7   :  { %10063 = vmatprep.subr.bf16.mxu0 %v13316_v51  ;;  %v13368_v51 = vld [vmem:[#allocation46 + $0xa68] ss:$16 sps:$4 sm:$0xff]  }
0x11e9   :  { %10021 = vmatpush2.bf16.msra.mxu1 %v13311_v38  ;;  %v13373_v38 = vld [vmem:[#allocation46 + $0xa4c] ss:$16 sps:$4 sm:$0xff]  }
0x11ea   :  { %10064 = vmatpush2.bf16.msra.mxu0 %v13314_v61  ;;  %10022 = vmatprep.subr.bf16.mxu1 %v13319_v62  ;;  %v13376_v61 = vld [vmem:[#allocation46 + $0xa2c] ss:$16 sps:$4 sm:$0xff]   ;;  %v13374_v62 = vld [vmem:[#allocation46 + $0xa28] ss:$16 sps:$4 sm:$0xff]  }
0x11eb   :  { %10065 = vmatprep.subr.bf16.mxu0 %v13322_v0  ;;  %v13379_v0 = vld [vmem:[#allocation46 + $0xa0c] ss:$16 sps:$4 sm:$0xff]  }
0x11ed   :  { %10023 = vmatpush2.bf16.msra.mxu1 %v13317_v1  ;;  %v13377_v1 = vld [vmem:[#allocation46 + $0xa08] ss:$16 sps:$4 sm:$0xff]  }
0x11ee   :  { %10066 = vmatpush2.bf16.msra.mxu0 %v13320_v35  ;;  %10024 = vmatprep.subr.bf16.mxu1 %v13325_v52  ;;  %v13382_v35 = vld [vmem:[#allocation46 + $0xbec] ss:$16 sps:$4 sm:$0xff]   ;;  %v13380_v52 = vld [vmem:[#allocation46 + $0xbe8] ss:$16 sps:$4 sm:$0xff]  }
0x11ef   :  { %10067 = vmatprep.subr.bf16.mxu0 %v13328_v54  ;;  %v13385_v54 = vld [vmem:[#allocation46 + $0xbcc] ss:$16 sps:$4 sm:$0xff]  }
0x11f1   :  { %10025 = vmatpush2.bf16.msra.mxu1 %v13323_v10  ;;  %v13383_v10 = vld [vmem:[#allocation46 + $0xbc8] ss:$16 sps:$4 sm:$0xff]  }
0x11f2   :  { %10068 = vmatpush2.bf16.msra.mxu0 %v13326_v4  ;;  %10026 = vmatprep.subr.bf16.mxu1 %v13331_v5  ;;  %v13388_v4 = vld [vmem:[#allocation46 + $0xbac] ss:$16 sps:$4 sm:$0xff]   ;;  %v13386_v5 = vld [vmem:[#allocation46 + $0xba8] ss:$16 sps:$4 sm:$0xff]  }
0x11f3   :  { %10069 = vmatprep.subr.bf16.mxu0 %v13334_v28  ;;  %v13391_v28 = vld [vmem:[#allocation46 + $0xb8c] ss:$16 sps:$4 sm:$0xff]  }
0x11f5   :  { %10027 = vmatpush2.bf16.msra.mxu1 %v13329_v8  ;;  %v13389_v8 = vld [vmem:[#allocation46 + $0xb88] ss:$16 sps:$4 sm:$0xff]  }
0x11f6   :  { %10070 = vmatpush2.bf16.msra.mxu0 %v13332_v27  ;;  %10028 = vmatprep.subr.bf16.mxu1 %v13337_v9  ;;  %v13394_v27 = vld [vmem:[#allocation46 + $0xb6c] ss:$16 sps:$4 sm:$0xff]   ;;  %v13392_v9 = vld [vmem:[#allocation46 + $0xb68] ss:$16 sps:$4 sm:$0xff]  }
0x11f7   :  { %10071 = vmatprep.subr.bf16.mxu0 %v13340_v12  ;;  %v13397_v12 = vld [vmem:[#allocation46 + $0xb4c] ss:$16 sps:$4 sm:$0xff]  }
0x11f9   :  { %10029 = vmatpush2.bf16.msra.mxu1 %v13335_v44  ;;  %v13395_v44 = vld [vmem:[#allocation46 + $0xb48] ss:$16 sps:$4 sm:$0xff]  }
0x11fa   :  { %10072 = vmatpush2.bf16.msra.mxu0 %v13338_v21  ;;  %10030 = vmatprep.subr.bf16.mxu1 %v13343_v50  ;;  %v13400_v21 = vld [vmem:[#allocation46 + $0xb2c] ss:$16 sps:$4 sm:$0xff]   ;;  %v13398_v50 = vld [vmem:[#allocation46 + $0xb28] ss:$16 sps:$4 sm:$0xff]  }
0x11fb   :  { %10073 = vmatprep.subr.bf16.mxu0 %v13346_v32  ;;  %v13403_v32 = vld [vmem:[#allocation46 + $0xb0c] ss:$16 sps:$4 sm:$0xff]  }
0x11fd   :  { %10031 = vmatpush2.bf16.msra.mxu1 %v13341_v17  ;;  %v13401_v17 = vld [vmem:[#allocation46 + $0xb08] ss:$16 sps:$4 sm:$0xff]  }
0x11fe   :  { %10074 = vmatpush2.bf16.msra.mxu0 %v13344_v60  ;;  %10032 = vmatprep.subr.bf16.mxu1 %v13349_v33  ;;  %v15470_v33 = vld [vmem:[#allocation47] sm:$0xf] }
0x11ff   :  { %10075 = vmatprep.subr.bf16.mxu0 %v13352_v30  ;;  %v13404_v30 = vld [vmem:[#allocation52] sm:$0xf] }
0x1201   :  { %10033 = vmatpush2.bf16.msra.mxu1 %v13347_v36  ;;  %v6957_v36 = vrot.slane %v13404_v30, %v15220_v49 }
0x1202   :  { %10076 = vmatpush2.bf16.msra.mxu0 %v13350_v42  ;;  %10034 = vmatprep.subr.bf16.mxu1 %v13355_v29  ;;  %v15473_v29 = vld [vmem:[#allocation49] sm:$0xf] }
0x1204   :  { %v9833_v45 = vpop.f32.mrf.mxu0 }
0x1205   :  { %10078 = vmatmul.mubr.bf16.vlgmr.msra.gmra.mxu0 %v15424_v53  ;;  %10035 = vmatpush2.bf16.msra.mxu1 %v13353_v39  ;;  %v13364_v53 = vld [vmem:[#allocation46 + $0xaac] ss:$16 sps:$4 sm:$0xff]   ;;  %v6961_v39 = vrot.slane %v13404_v30, %v15223_v6 }
0x1206   :  { %10086 = vmatprep.subr.bf16.mxu1 %v13358_v63  ;;  %v9835_v3 = vpop.f32.mrf.mxu0  ;;  %10271 = vmatprep.mubr.f32.mxu0 %v14244_v22  ;;  %v10132_v63 = vrot.slane %v15470_v33, %v15220_v49  ;;  %v10390_v30 = vld [vmem:[%s14441_s4 + $0x148] sm:$0xff] }
0x1208   :  { %v9792_v11 = vpop.f32.mrf.mxu1  ;;  %10037 = vmatmul.mubr.bf16.vlgmr.msra.gmra.mxu1 %v15432_v25  ;;  %v9837_v58 = vpop.f32.mrf.mxu0  ;;  %v13362_v25 = vld [vmem:[#allocation46 + $0xaa8] ss:$16 sps:$4 sm:$0xff]  }
0x1209   :  { %v9793_v43 = vadd.f32 %v9792_v11, %v15456_v20  ;;  %10087 = vmatpush1.bf16.msra.mxu1 %v13356_v40  ;;  %10118 = vmatprep.mubr.bf16.mxu1 %v15434_v56  ;;  %v13367_v20 = vld [vmem:[#allocation46 + $0xa8c] ss:$16 sps:$4 sm:$0xff]   ;;  %v6974_v11 = vmul.f32 %v6957_v36, %v15378_v15  ;;  %v10162_v15 = vrot.slane %v15473_v29, %v15223_v6  ;;  %v10405_v36 = vld [vmem:[%s14441_s4 + $0x1c0] sm:$0xff] }
0x120a   :  { %v9794_v26 = vpop.f32.mrf.mxu1  ;;  %10088 = vmatprep.subr.bf16.mxu1 %v13361_v34  ;;  %v9838_v47 = vpop.f32.mrf.mxu0  ;;  %v13370_v56 = vld [vmem:[#allocation46 + $0xa6c] ss:$16 sps:$4 sm:$0xff]  }
0x120b   :  { %v9795_v14 = vadd.f32 %v9794_v26, %v15458_v41  ;;  %v15466_v23 = vadd.f32 %v9833_v45, %v9793_v43  ;;  %v13371_v41 = vld [vmem:[#allocation46 + $0xa48] ss:$16 sps:$4 sm:$0xff]   ;;  %v13405_v45 = vld [vmem:[#allocation53] sm:$0xf]  ;;  %v10158_v43 = vrot.slane %v15473_v29, %v15220_v49 }
0x120c   :  { %v9796_v57 = vpop.f32.mrf.mxu1  ;;  %v6983_v40 = vrot.slane %v13405_v45, %v15220_v49  ;;  %v6987_v26 = vrot.slane %v13405_v45, %v15223_v6  ;;  %v10403_v45 = vld [vmem:[%s14441_s4 + $0x1b0] sm:$0xff] }
0x120d   :  { %v15468_v55 = vadd.f32 %v9835_v3, %v9795_v14  ;;  %10089 = vmatpush1.bf16.msra.mxu1 %v13359_v46  ;;  %v10136_v46 = vrot.slane %v15470_v33, %v15223_v6  ;;  %v6975_v14 = vmul.f32 %v6961_v39, %v15381_v37  ;;  %v10404_v39 = vld [vmem:[%s14441_s4 + $0x1b8] sm:$0xff] }
0x120e   :  { %v9797_v13 = vpop.f32.mrf.mxu1  ;;  %10090 = vmatprep.subr.bf16.mxu1 %v13364_v53 }
0x1211   :  { %10091 = vmatpush1.bf16.msra.mxu1 %v13362_v25 }
0x1212   :  { %10092 = vmatprep.subr.bf16.mxu1 %v13367_v20 }
0x1215   :  { %10093 = vmatpush1.bf16.msra.mxu1 %v13365_v59  ;;  %v7001_v59 = vadd.f32 %v6987_v26, %v6975_v14 }
0x1216   :  { %10094 = vmatprep.subr.bf16.mxu1 %v13370_v56 }
0x1219   :  { %10095 = vmatpush1.bf16.msra.mxu1 %v13368_v51 }
0x121a   :  { %10096 = vmatprep.subr.bf16.mxu1 %v13373_v38 }
0x121d   :  { %10097 = vmatpush1.bf16.msra.mxu1 %v13371_v41 }
0x121e   :  { %10098 = vmatprep.subr.bf16.mxu1 %v13376_v61 }
0x1221   :  { %10099 = vmatpush1.bf16.msra.mxu1 %v13374_v62  ;;  %v10188_v62 = vmul.u32 2, %v14932_v48 }
0x1222   :  { %10100 = vmatprep.subr.bf16.mxu1 %v13379_v0 }
0x1223   :  { %vm10189_vm9 = vcmp.lt.s32.totalorder %v14537_v19, %v10188_v62  ;;  %v10411_v19 = vld [vmem:[%s14441_s4 + $0x1f0] sm:$0xff] }
0x1224   :  { %vm10190_vm1 = vmand %vm10187_vm6, %vm10189_vm9 }
0x1225   :  { %10101 = vmatpush1.bf16.msra.mxu1 %v13377_v1 }
0x1226   :  { %10102 = vmatprep.subr.bf16.mxu1 %v13382_v35 }
0x1229   :  { %10103 = vmatpush2.bf16.msra.mxu1 %v13380_v52 }
0x122a   :  { %10104 = vmatprep.subr.bf16.mxu1 %v13385_v54 }
0x122d   :  { %10105 = vmatpush2.bf16.msra.mxu1 %v13383_v10 }
0x122e   :  { %10106 = vmatprep.subr.bf16.mxu1 %v13388_v4 }
0x1231   :  { %10107 = vmatpush2.bf16.msra.mxu1 %v13386_v5 }
0x1232   :  { %10108 = vmatprep.subr.bf16.mxu1 %v13391_v28  ;;  %v15498_v28 = vsel %vm10190_vm1, 0.5, %v14244_v22 }
0x1235   :  { %10109 = vmatpush2.bf16.msra.mxu1 %v13389_v8  ;;  %v10412_v8 = vld [vmem:[%s14441_s4 + $0x1f8] sm:$0xff] }
0x1236   :  { %10110 = vmatprep.subr.bf16.mxu1 %v13394_v27  ;;  %v10395_v27 = vld [vmem:[%s14441_s4 + $0x170] sm:$0xff] }
0x1239   :  { %10111 = vmatpush2.bf16.msra.mxu1 %v13392_v9  ;;  %v10410_v9 = vld [vmem:[%s14441_s4 + $0x1e8] sm:$0xff] }
0x123a   :  { %10112 = vmatprep.subr.bf16.mxu1 %v13397_v12  ;;  %v10394_v12 = vld [vmem:[%s14441_s4 + $0x168] sm:$0xff] }
0x123d   :  { %10113 = vmatpush2.bf16.msra.mxu1 %v13395_v44  ;;  %v10409_v44 = vld [vmem:[%s14441_s4 + $0x1e0] sm:$0xff] }
0x123e   :  { %10114 = vmatprep.subr.bf16.mxu1 %v13400_v21  ;;  %v10408_v21 = vld [vmem:[%s14441_s4 + $0x1d8] sm:$0xff] }
0x1241   :  { %10115 = vmatpush2.bf16.msra.mxu1 %v13398_v50  ;;  %v10392_v50 = vld [vmem:[%s14441_s4 + $0x158] sm:$0xff] }
0x1242   :  { %10116 = vmatprep.subr.bf16.mxu1 %v13403_v32  ;;  %v10407_v32 = vld [vmem:[%s14441_s4 + $0x1d0] sm:$0xff] }
0x1244   :  { %v9915_v60 = vpop.f32.mrf.mxu0 }
0x1245   :  { %10117 = vmatpush2.bf16.msra.mxu1 %v13401_v17  ;;  %v10391_v17 = vld [vmem:[%s14441_s4 + $0x150] sm:$0xff] }
0x1246   :  { %v9917_v42 = vpop.f32.mrf.mxu0  ;;  %11763 = vmatprep.subr.mxu1 %v10412_v8  ;;  %v10362_v8 = vld [vmem:[%s14441_s4 + $0x68] sm:$0xff] }
0x1248   :  { %v9874_v3 = vpop.f32.mrf.mxu1  ;;  %v9919_v34 = vpop.f32.mrf.mxu0  ;;  %10119 = vmatmul.mubr.bf16.vlgmr.msra.gmra.mxu1 %v15443_v31 }
0x1249   :  { %v9875_v58 = vadd.f32 %v9874_v3, %v15466_v23  ;;  %v7000_v23 = vadd.f32 %v6983_v40, %v6974_v11  ;;  %11764 = vmatpush3.msra.mxu1 %v10396_v18  ;;  %v10387_v40 = vld [vmem:[%s14441_s4 + $0x130] sm:$0xff]  ;;  %v10402_v3 = vld [vmem:[%s14441_s4 + $0x1a8] sm:$0xff]  ;;  %v10401_v11 = vld [vmem:[%s14441_s4 + $0x1a0] sm:$0xff] }
0x124a   :  { %v9876_v53 = vpop.f32.mrf.mxu1  ;;  %v9920_v47 = vpop.f32.mrf.mxu0  ;;  %11765 = vmatprep.subr.mxu1 %v10411_v19  ;;  %v10386_v34 = vld [vmem:[%s14441_s4 + $0x128] sm:$0xff]  ;;  %v10377_v18 = vld [vmem:[%s14441_s4 + $0xe0] sm:$0xff] }
0x124b   :  { %v10149_v57 = vmul.f32 %v10132_v63, %v9875_v58  ;;  %v9877_v25 = vadd.f32 %v9876_v53, %v15468_v55  ;;  %11766 = vmatpush3.msra.mxu1 %v10395_v27  ;;  %v10388_v63 = vld [vmem:[%s14441_s4 + $0x138] sm:$0xff]  ;;  %v10385_v58 = vld [vmem:[%s14441_s4 + $0x120] sm:$0xff] }
0x124c   :  { %v9878_v31 = vpop.f32.mrf.mxu1  ;;  %11767 = vmatprep.subr.mxu1 %v10410_v9  ;;  %v10361_v19 = vld [vmem:[%s14441_s4 + $0x60] sm:$0xff]  ;;  %v10376_v27 = vld [vmem:[%s14441_s4 + $0xd8] sm:$0xff]  ;;  %v10375_v9 = vld [vmem:[%s14441_s4 + $0xd0] sm:$0xff] }
0x124d   :  { %v10175_v13 = vadd.f32 %v10158_v43, %v10149_v57  ;;  %v10150_v20 = vmul.f32 %v10136_v46, %v9877_v25  ;;  %11768 = vmatpush3.msra.mxu1 %v10394_v12  ;;  %v10359_v12 = vld [vmem:[%s14441_s4 + $0x50] sm:$0xff] }
0x124e   :  { %v9879_v49 = vpop.f32.mrf.mxu1  ;;  %11769 = vmatprep.subr.mxu1 %v10409_v44  ;;  %v10374_v44 = vld [vmem:[%s14441_s4 + $0xc8] sm:$0xff] }
0x124f   :  { %v10179_v56 = vadd.f32 %v10175_v13, %v7000_v23  ;;  %v10176_v51 = vadd.f32 %v10162_v15, %v10150_v20  ;;  %v10400_v20 = vld [vmem:[%s14441_s4 + $0x198] sm:$0xff] }
0x1250   :  { %v10384_v49 = vld [vmem:[%s14441_s4 + $0x118] sm:$0xff] }
0x1251   :  { %v10180_v38 = vadd.f32 %v10176_v51, %v7001_v59  ;;  %v10183_v61 = vmax.f32 %v10179_v56, 0.0  ;;  %v10399_v59 = vld [vmem:[%s14441_s4 + $0x190] sm:$0xff]  ;;  %v10140_v51 = vrot.slane %v15470_v33, %v15343_v2 }
0x1252   :  { %v10383_v56 = vld [vmem:[%s14441_s4 + $0x110] sm:$0xff] }
0x1253   :  { %v10184_v41 = vmax.f32 %v10180_v38, 0.0 }
0x1255   :  { %11577 = vmatprep.subr.msk.mxu0 %vm15730_vm2, %v10184_v41 }
0x1256   :  { %11578 = vmatpush1.msk.msra.mxu0 %vm15731_vm5, %v10183_v61  ;;  %v10166_v61 = vrot.slane %v15473_v29, %v15343_v2 }
0x1257   :  { %11579 = vmatmul.mubr.msk.f32.vlgmr.msra.gmra.mxu0 %vm7394_vm11, %v15498_v28 }
0x1258   :  { %10342 = vmatprep.mubr.f32.mxu0 %v14244_v22  ;;  %v10393_v22 = vld [vmem:[%s14441_s4 + $0x160] sm:$0xff] }
0x1259   :  { %11770 = vmatpush3.msra.mxu1 %v10393_v22  ;;  %v10358_v22 = vld [vmem:[%s14441_s4 + $0x48] sm:$0xff] }
0x125a   :  { %11771 = vmatprep.subr.mxu1 %v10408_v21  ;;  %v10373_v21 = vld [vmem:[%s14441_s4 + $0xc0] sm:$0xff] }
0x125b   :  { %11772 = vmatpush3.msra.mxu1 %v10392_v50  ;;  %v10357_v50 = vld [vmem:[%s14441_s4 + $0x40] sm:$0xff] }
0x125c   :  { %11773 = vmatprep.subr.mxu1 %v10407_v32  ;;  %v10372_v32 = vld [vmem:[%s14441_s4 + $0xb8] sm:$0xff] }
0x125d   :  { %11774 = vmatpush3.msra.mxu1 %v10391_v17  ;;  %v10356_v17 = vld [vmem:[%s14441_s4 + $0x38] sm:$0xff] }
0x1285   :  { %v9997_v37 = vpop.f32.mrf.mxu0 }
0x1287   :  { %v9999_v55 = vpop.f32.mrf.mxu0 }
0x1288   :  { %v9956_v6 = vpop.f32.mrf.mxu1 }
0x1289   :  { %v9957_v0 = vadd.f32 %v9956_v6, %v9915_v60  ;;  %v10001_v1 = vpop.f32.mrf.mxu0  ;;  %v10406_v60 = vld [vmem:[%s14441_s4 + $0x1c8] sm:$0xff] }
0x128a   :  { %v9958_v35 = vpop.f32.mrf.mxu1  ;;  %11775 = vmatprep.subr.mxu1 %v10406_v60  ;;  %v10371_v60 = vld [vmem:[%s14441_s4 + $0xb0] sm:$0xff] }
0x128b   :  { %v9959_v52 = vadd.f32 %v9958_v35, %v9917_v42  ;;  %v10002_v54 = vpop.f32.mrf.mxu0  ;;  %v9998_v10 = vadd.f32 %v9997_v37, %v9957_v0  ;;  %11776 = vmatpush3.msra.mxu1 %v10390_v30  ;;  %v10389_v42 = vld [vmem:[%s14441_s4 + $0x140] sm:$0xff]  ;;  %v10144_v37 = vrot.slane %v15470_v33, %v15346_v24  ;;  %v10170_v0 = vrot.slane %v15473_v29, %v15346_v24  ;;  %v10364_v24 = vld [vmem:[%s14441_s4 + $0x78] sm:$0xff]  ;;  %v10379_v29 = vld [vmem:[%s14441_s4 + $0xf0] sm:$0xff] }
0x128c   :  { %v9960_v4 = vpop.f32.mrf.mxu1  ;;  %11777 = vmatprep.subr.mxu1 %v10405_v36  ;;  %v10355_v30 = vld [vmem:[%s14441_s4 + $0x30] sm:$0xff]  ;;  %v10370_v36 = vld [vmem:[%s14441_s4 + $0xa8] sm:$0xff] }
0x128d   :  { %v10000_v5 = vadd.f32 %v9999_v55, %v9959_v52  ;;  %11778 = vmatpush3.msra.mxu1 %v10389_v42  ;;  %v10354_v42 = vld [vmem:[%s14441_s4 + $0x28] sm:$0xff] }
0x128e   :  { %v9961_v48 = vpop.f32.mrf.mxu1  ;;  %11779 = vmatprep.subr.mxu1 %v10404_v39  ;;  %v10369_v39 = vld [vmem:[%s14441_s4 + $0xa0] sm:$0xff] }
0x128f   :  { %11780 = vmatpush3.msra.mxu1 %v10388_v63  ;;  %v10380_v48 = vld [vmem:[%s14441_s4 + $0xf8] sm:$0xff]  ;;  %v10353_v63 = vld [vmem:[%s14441_s4 + $0x20] sm:$0xff] }
0x1290   :  { %11781 = vmatprep.subr.mxu1 %v10403_v45  ;;  %v10368_v45 = vld [vmem:[%s14441_s4 + $0x98] sm:$0xff] }
0x1291   :  { %11782 = vmatpush3.msra.mxu1 %v10387_v40  ;;  %v10352_v40 = vld [vmem:[%s14441_s4 + $0x18] sm:$0xff] }
0x1292   :  { %11783 = vmatprep.subr.mxu1 %v10402_v3  ;;  %v10367_v3 = vld [vmem:[%s14441_s4 + $0x90] sm:$0xff] }
0x1293   :  { %11784 = vmatpush3.msra.mxu1 %v10386_v34  ;;  %v10351_v34 = vld [vmem:[%s14441_s4 + $0x10] sm:$0xff] }
0x1294   :  { %11785 = vmatprep.subr.mxu1 %v10401_v11  ;;  %v10366_v11 = vld [vmem:[%s14441_s4 + $0x88] sm:$0xff] }
0x1295   :  { %11786 = vmatpush3.msra.mxu1 %v10385_v58  ;;  %v10350_v58 = vld [vmem:[%s14441_s4 + $0x8] sm:$0xff] }
0x1296   :  { %11787 = vmatprep.subr.mxu1 %v10400_v20 }
0x1297   :  { %11788 = vmatpush3.msra.mxu1 %v10384_v49  ;;  %v11583_v49 = vld [vmem:[#allocation55] ss:$0 sm:$0xff] }
0x1298   :  { %11789 = vmatprep.subr.mxu1 %v10399_v59 }
0x1299   :  { %11790 = vmatpush3.msra.mxu1 %v10383_v56 }
0x12c5   :  { %v10079_v43 = vpop.f32.mrf.mxu0 }
0x12c7   :  { %v10081_v46 = vpop.f32.mrf.mxu0 }
0x12c8   :  { %v10038_v26 = vpop.f32.mrf.mxu1 }
0x12c9   :  { %v10039_v53 = vadd.f32 %v10038_v26, %v9998_v10  ;;  %v10083_v47 = vpop.f32.mrf.mxu0 }
0x12ca   :  { %v10040_v14 = vpop.f32.mrf.mxu1  ;;  %v10398_v47 = vld [vmem:[%s14441_s4 + $0x188] sm:$0xff] }
0x12cb   :  { %v10041_v57 = vadd.f32 %v10040_v14, %v10000_v5  ;;  %v10084_v25 = vpop.f32.mrf.mxu0  ;;  %v10080_v15 = vadd.f32 %v10079_v43, %v10039_v53  ;;  %v10349_v53 = vld [vmem:[%s14441_s4] sm:$0xff]  ;;  %v10382_v14 = vld [vmem:[%s14441_s4 + $0x108] sm:$0xff]  ;;  %11791 = vmatprep.subr.mxu1 %v10398_v47 }
0x12cc   :  { %v10042_v31 = vpop.f32.mrf.mxu1  ;;  %11792 = vmatpush3.msra.mxu1 %v10382_v14  ;;  %v10381_v25 = vld [vmem:[%s14441_s4 + $0x100] sm:$0xff] }
0x12cd   :  { %v10082_v23 = vadd.f32 %v10081_v46, %v10041_v57  ;;  %v10365_v46 = vld [vmem:[%s14441_s4 + $0x80] sm:$0xff] }
0x12ce   :  { %v10043_v13 = vpop.f32.mrf.mxu1  ;;  %v10397_v57 = vld [vmem:[%s14441_s4 + $0x180] sm:$0xff] }
0x12cf   :  { %11793 = vmatprep.subr.mxu1 %v10397_v57 }
0x12d0   :  { %11794 = vmatpush3.msra.mxu1 %v10381_v25 }
0x1308   :  { %v10120_v38 = vpop.f32.mrf.mxu1 }
0x1309   :  { %v10121_v41 = vadd.f32 %v10120_v38, %v10080_v15 }
0x130a   :  { %v10122_v55 = vpop.f32.mrf.mxu1 }
0x130b   :  { %v10151_v62 = vmul.f32 %v10140_v51, %v10121_v41  ;;  %v10123_v6 = vadd.f32 %v10122_v55, %v10082_v23 }
0x130c   :  { %v10124_v1 = vpop.f32.mrf.mxu1 }
0x130d   :  { %v10177_v35 = vadd.f32 %v10166_v61, %v10151_v62  ;;  %v10152_v52 = vmul.f32 %v10144_v37, %v10123_v6 }
0x130e   :  { %v10125_v54 = vpop.f32.mrf.mxu1 }
0x130f   :  { %v10181_v10 = vadd.f32 %v10177_v35, %v15386_v16  ;;  %v10178_v2 = vadd.f32 %v10170_v0, %v10152_v52  ;;  %v10363_v16 = vld [vmem:[%s14441_s4 + $0x70] sm:$0xff] }
0x1311   :  { %v10182_v33 = vadd.f32 %v10178_v2, %v15388_v7  ;;  %v10185_v5 = vmax.f32 %v10181_v10, 0.0  ;;  %v10378_v7 = vld [vmem:[%s14441_s4 + $0xe8] sm:$0xff] }
0x1313   :  { %v10186_v4 = vmax.f32 %v10182_v33, 0.0 }
0x1315   :  { %11580 = vmatprep.subr.msk.mxu0 %vm15732_vm8, %v10186_v4 }
0x1316   :  { %11581 = vmatpush1.msk.msra.mxu0 %vm15733_vm15, %v10185_v5 }
0x1317   :  { %11582 = vmatmul.mubr.msk.f32.vlgmr.msra.gmra.mxu0 %vm7394_vm11, %v15498_v28  ;;  %11728 = vmatprep.subr.mxu0 %v10380_v48  ;;  %v10360_v28 = vld [vmem:[%s14441_s4 + $0x58] sm:$0xff]  ;;  %v10273_v43 = vpop.f32.mrf.mxu0  ;;  %vm10560_vm11 = vcmask 25600   ;;  %s14106_s4 = scalar_lea.vmem %s10569_s17, 32 }
0x1318   :  { %11729 = vmatpush3.msra.mxu0 %v10364_v24  ;;  %p14107_p7 = scmp.ne.s32.totalorder %s10569_s17, %s14106_s4  ;;  %p14112_p9 = scmp.lt.s32.totalorder %s14106_s4, %s14106_s4 }
0x1319   :  { %11730 = vmatprep.subr.mxu0 %v10379_v29  ;;  %v10275_v26 = vpop.f32.mrf.mxu0 }
0x131a   :  { %11731 = vmatpush3.msra.mxu0 %v10363_v16  ;;  %10484 = vmatprep.mubr.f32.mxu0 %v10275_v26  ;;  %p14113_p10 = por %p14112_p9, %p14111_p8 }
0x131b   :  { %11732 = vmatprep.subr.mxu0 %v10378_v7 }
0x131c   :  { %11733 = vmatpush3.msra.mxu0 %v10362_v8  ;;  %p14114_p11 = pnand %p14113_p10, %p14107_p7 }
0x131d   :  { %11734 = vmatprep.subr.mxu0 %v10377_v18 }
0x131e   :  { %11735 = vmatpush3.msra.mxu0 %v10361_v19 }
0x131f   :  { %11736 = vmatprep.subr.mxu0 %v10376_v27 }
0x1320   :  { %11737 = vmatpush3.msra.mxu0 %v10360_v28 }
0x1321   :  { %11738 = vmatprep.subr.mxu0 %v10375_v9 }
0x1322   :  { %11739 = vmatpush3.msra.mxu0 %v10359_v12 }
0x1323   :  { %11740 = vmatprep.subr.mxu0 %v10374_v44 }
0x1324   :  { %11741 = vmatpush3.msra.mxu0 %v10358_v22 }
0x1325   :  { %11742 = vmatprep.subr.mxu0 %v10373_v21 }
0x1326   :  { %11743 = vmatpush3.msra.mxu0 %v10357_v50 }
0x1327   :  { %11744 = vmatprep.subr.mxu0 %v10372_v32 }
0x1328   :  { %11745 = vmatpush3.msra.mxu0 %v10356_v17 }
0x1329   :  { %11746 = vmatprep.subr.mxu0 %v10371_v60 }
0x132a   :  { %11747 = vmatpush3.msra.mxu0 %v10355_v30 }
0x132b   :  { %11748 = vmatprep.subr.mxu0 %v10370_v36 }
0x132c   :  { %11749 = vmatpush3.msra.mxu0 %v10354_v42 }
0x132d   :  { %11750 = vmatprep.subr.mxu0 %v10369_v39 }
0x132e   :  { %11751 = vmatpush3.msra.mxu0 %v10353_v63 }
0x132f   :  { %11752 = vmatprep.subr.mxu0 %v10368_v45 }
0x1330   :  { %11753 = vmatpush3.msra.mxu0 %v10352_v40 }
0x1331   :  { %11754 = vmatprep.subr.mxu0 %v10367_v3 }
0x1332   :  { %11755 = vmatpush3.msra.mxu0 %v10351_v34 }
0x1333   :  { %11756 = vmatprep.subr.mxu0 %v10366_v11 }
0x1334   :  { %11757 = vmatpush3.msra.mxu0 %v10350_v58 }
0x1335   :  { %11758 = vmatprep.subr.mxu0 %v10365_v46 }
0x1336   :  { %11759 = vmatpush3.msra.mxu0 %v10349_v53 }
0x1337   :  { %10485 = vmatmul.mubr.f32.vlgmr.msra.gmra.mxu0 %v10273_v43 }
0x13d7   :  { %v10344_v15 = vpop.f32.mrf.mxu0 }
0x13d9   :  { %v10346_v31 = vpop.f32.mrf.mxu0 }
0x13da   :  { %10554 = vmatprep.mubr.f32.mxu1 %v10346_v31 }
0x13db   :  { %10555 = vmatmul.mubr.f32.vlgmr.msra.gmra.mxu1 %v10344_v15 }
0x13f7   :  { %v11760_v23 = vpop.f32.mrf.mxu0 }
0x13f9   :  { %v11761_v13 = vpop.f32.mrf.mxu0 }
0x13fa   :  { %v11762_v20 = vadd.f32 %v11761_v13, %v11760_v23 }
0x13fc   :  { %v10487_v51 = vadd.f32 %v11762_v20, %v11583_v49 }
0x149b   :  { %v11795_v59 = vpop.f32.mrf.mxu1 }
0x149d   :  { %v11796_v56 = vpop.f32.mrf.mxu1 }
0x149e   :  { %v11797_v38 = vadd.f32 %v11796_v56, %v11795_v59 }
0x14a0   :  { %v10557_v41 = vadd.f32 %v11797_v38, %v10487_v51 }
0x14a2   :  { %10561 = vst.msk [vmem:[#allocation56] sm:$0x3] %vm10560_vm11, %v10557_v41 }
0x14a3   :  { %14117 = shalt.err (!%p14114_p11)
}
0x14a4   :  { %10571 = dma.vmem_to_hbm [thread:$0]  %s10569_s17, 32, %s14451_s21, [#allocation4]  }
0x14a5   :  { %14162 = dma.done.wait [#allocation4], 32  }
0x14a6   :  { %14163 = vsyncadd [#allocation4], 4294967264 }
0x14a7   :  { %10575 = vsyncpa [#allocation3], 1 }
0x14a8   :  { %10576 = vsyncpa [#allocation6], 1 }
0x14a9   :  { %10577 = vsyncpa [#allocation9], 1 }
0x14aa   :  { %10578 = vsyncpa [#allocation12], 1 }
0x14ab   :  { %10579 = vsyncpa [#allocation15], 1 }
0x14ac   :  { %10580 = vsyncpa [#allocation18], 1 }
0x14ad   :  { %10581 = vsyncpa [#allocation21], 1 }
0x14ae   :  { %10582 = vsyncpa [#allocation24], 1 }
0x14af   :  { %10583 = vsyncpa [#allocation27], 1 }
0x14b0   :  { %10584 = vsyncpa [#allocation30], 1 }
0x14b1   :  { %10585 = vsyncpa [#allocation33], 1 }
0x14b2   :  { %10586 = vsyncpa [#allocation36], 1 }
0x14b3   :  { %10587 = vsyncpa [#allocation39], 1 }
0x14b4   :  { %10588 = vsyncpa [#allocation42], 1 }
0x14b5   :  { %10589 = vsyncpa [#allocation45], 1 }
0x14b6   :  { %10590 = vsyncpa [#allocation48], 1 }
0x14b7   :  { %10591 = vsyncpa [#allocation51], 1 }
0x14b8   :  { %10592 = vsyncpa [#allocation54], 1 }
0x14b9   :  { %10593 = vsyncpa [#allocation4], 1 }

</bundles_post_ra>
